<compile_context>
chip_gen: v5e
topology: v5e:2x2
jax: 0.10.0
libtpu: 0.0.40
codegen_flags: <defaults>
</compile_context>

<pallas_src>
import functools

import numpy as np
import jax
import jax.numpy as jnp
from jax import lax
from jax.experimental import pallas as pl
from jax.experimental.pallas import tpu as pltpu


def _round_up(x, m):
    return ((x + m - 1) // m) * m


def _dblock_kernel(CIN, COUT, W, Wp, Lc, Hq, Wq, OFS, M1h, MAGIC, SHIFT,
                   xpf_ref, w1_ref, b1_ref, w2_ref, wsc_ref, bsum_ref,
                   out_ref, h1p_ref, acc_ref):
    """Fused DBlockOptimized forward for one image.

    xpf_ref : (M1, CIN)     bf16  zero-padded input, flattened padded-row layout (+ tail)
    w1_ref  : (9*CIN, COUT) bf16  conv1 weights, tap-flattened
    b1_ref  : (1, COUT)     f32   conv1 bias
    w2_ref  : (9*COUT,COUT) bf16  conv2 weights, tap-flattened, pre-scaled by 0.25
    wsc_ref : (CIN, COUT)   bf16  1x1 shortcut weights, pre-scaled by 0.25
    bsum_ref: (1, COUT)     f32   b2 + bsc (avg-pool commutes with a constant bias)
    out_ref : (Hq*Wq, COUT) f32   pooled output, flattened spatial
    h1p_ref : (M1h, COUT)   bf16  relu(conv1) as a zero-bordered padded image
    acc_ref : (Lc, COUT)    f32   shared pre-pool accumulator (conv1, then conv2+shortcut)
    """
    f32 = jnp.float32

    # ---- conv1: 9 shifted-window accumulating MXU matmuls (no im2col scratch) -------
    for t in range(9):
        off = (t // 3) * Wp + (t % 3)
        part = jnp.dot(xpf_ref[pl.ds(off, Lc), :],
                       w1_ref[pl.ds(t * CIN, CIN), :],
                       preferred_element_type=f32)
        if t == 0:
            acc_ref[...] = part
        else:
            acc_ref[...] += part

    # ---- bias + ReLU + junk-column mask (in-kernel iota, exact magic division) ------
    lidx = lax.broadcasted_iota(jnp.int32, (Lc, 1), 0)
    row = jnp.right_shift(lidx * MAGIC, SHIFT)        # == lidx // Wp (verified host-side)
    keep = (lidx - row * Wp) < W                      # 1 on real pixels, 0 on pad columns
    h1 = jnp.where(keep, jnp.maximum(acc_ref[...] + b1_ref[...], 0.0), 0.0)

    # ---- relu(conv1) as a bf16 zero-bordered padded image; borders-only memset ------
    h1p_ref[pl.ds(0, OFS), :] = jnp.zeros((OFS, COUT), jnp.bfloat16)
    h1p_ref[pl.ds(OFS, Lc), :] = h1.astype(jnp.bfloat16)           # OFS is 8-aligned
    h1p_ref[pl.ds(OFS + Lc, M1h - OFS - Lc), :] = jnp.zeros(
        (M1h - OFS - Lc, COUT), jnp.bfloat16)

    # ---- conv2 + fused 1x1 shortcut: 10 shifted-window accumulating matmuls ---------
    # avg_pool commutes with the 1x1 conv, so x-window @ (0.25*wsc) is simply one more
    # shifted-window accumulation into the same pre-pool accumulator as conv2.
    acc_ref[...] = jnp.dot(xpf_ref[pl.ds(Wp + 1, Lc), :], wsc_ref[...],
                           preferred_element_type=f32)
    D0 = OFS - Wp - 1
    for t in range(9):
        off = D0 + (t // 3) * Wp + (t % 3)
        acc_ref[...] += jnp.dot(h1p_ref[pl.ds(off, Lc), :],
                                w2_ref[pl.ds(t * COUT, COUT), :],
                                preferred_element_type=f32)

    # ---- 2x2 average pooling: VPU adds over stride-2 reads, ONE output store --------
    # (the 0.25 factor is already folded into w2/wsc, biases are added once at the end)
    # TODO(synk): for realistic H (>=32) switch this unrolled loop to lax.fori_loop
    # with a pooled VMEM scratch (and/or add a spatial grid axis for the v7x VMEM budget).
    rows = []
    for pi in range(Hq):
        rb = 2 * pi * Wp
        rows.append(acc_ref[pl.ds(rb, Wq, 2), :] +
                    acc_ref[pl.ds(rb + 1, Wq, 2), :] +
                    acc_ref[pl.ds(rb + Wp, Wq, 2), :] +
                    acc_ref[pl.ds(rb + Wp + 1, Wq, 2), :])
    out_ref[...] = jnp.concatenate(rows, axis=0) + bsum_ref[...]


def dblock_optimized_forward(x_nchw, params):
    w1, b1 = params["w1"], params["b1"]
    w2, b2 = params["w2"], params["b2"]
    wsc, bsc = params["wsc"], params["bsc"]

    N, CIN, H, W = x_nchw.shape
    COUT = w1.shape[-1]
    assert H % 2 == 0 and W % 2 == 0
    Hp, Wp = H + 2, W + 2
    Lc = H * Wp                                   # conv-output rows, padded-row layout
    Hq, Wq = H // 2, W // 2

    # padded-input rows: conv1 taps read up to offset 2*Wp+2 past the last output row
    M1 = _round_up(Hp * Wp + 2, 8)
    assert M1 >= Lc + 2 * Wp + 2
    # aligned interior start for the re-padded relu(conv1) scratch (8-aligned store)
    OFS = _round_up(Wp + 1, 8)
    M1h = _round_up(OFS + Lc + Wp + 1, 8)
    assert M1h >= OFS + Lc + Wp + 1 and OFS >= Wp + 1
    assert (H - 1) * Wp + W - 1 < Lc              # pooling gathers stay in bounds

    # exact integer division by Wp via multiply + shift (brute-force verified)
    SHIFT = 20
    MAGIC = ((1 << SHIFT) + Wp - 1) // Wp
    ls = np.arange(Lc, dtype=np.int64)
    assert (Lc - 1) * MAGIC < 2 ** 31
    assert np.all((ls * MAGIC) >> SHIFT == ls // Wp)

    # ---- glue: NCHW -> flattened padded-row NHWC, cast to bf16 ONCE ------------------
    x = jnp.transpose(x_nchw, (0, 2, 3, 1))
    x_pad = jnp.pad(x, ((0, 0), (1, 1), (1, 1), (0, 0)))
    xpf = x_pad.reshape(N, Hp * Wp, CIN)
    xpf = jnp.pad(xpf, ((0, 0), (0, M1 - Hp * Wp), (0, 0))).astype(jnp.bfloat16)

    # ---- parameters: tap-flattened bf16 weights; 0.25 avg-pool folded into w2 / wsc --
    w1_k = w1.reshape(9 * CIN, COUT).astype(jnp.bfloat16)
    w2_k = (0.25 * w2).reshape(9 * COUT, COUT).astype(jnp.bfloat16)
    wsc_k = (0.25 * wsc).reshape(CIN, COUT).astype(jnp.bfloat16)
    b1_k = b1.reshape(1, COUT).astype(jnp.float32)
    bsum_k = (b2 + bsc).reshape(1, COUT).astype(jnp.float32)

    kernel = functools.partial(_dblock_kernel, CIN, COUT, W, Wp, Lc, Hq, Wq,
                               OFS, M1h, MAGIC, SHIFT)

    out_flat = pl.pallas_call(
        kernel,
        out_shape=jax.ShapeDtypeStruct((N, Hq * Wq, COUT), jnp.float32),
        grid=(N,),
        in_specs=[
            pl.BlockSpec((None, M1, CIN), lambda n: (n, 0, 0)),     # x, padded-row, bf16
            pl.BlockSpec((9 * CIN, COUT), lambda n: (0, 0)),        # w1
            pl.BlockSpec((1, COUT), lambda n: (0, 0)),              # b1
            pl.BlockSpec((9 * COUT, COUT), lambda n: (0, 0)),       # 0.25 * w2
            pl.BlockSpec((CIN, COUT), lambda n: (0, 0)),            # 0.25 * wsc
            pl.BlockSpec((1, COUT), lambda n: (0, 0)),              # b2 + bsc
        ],
        out_specs=pl.BlockSpec((None, Hq * Wq, COUT), lambda n: (n, 0, 0)),
        scratch_shapes=[
            pltpu.VMEM((M1h, COUT), jnp.bfloat16),   # relu(conv1), re-padded, bf16
            pltpu.VMEM((Lc, COUT), jnp.float32),     # shared pre-pool f32 accumulator
        ],
        compiler_params=pltpu.CompilerParams(
            dimension_semantics=("parallel",),
            vmem_limit_bytes=32 * 1024 * 1024,
        ),
    )(xpf, w1_k, b1_k, w2_k, wsc_k, bsum_k)

    out = out_flat.reshape(N, Hq, Wq, COUT)
    return jnp.transpose(out, (0, 3, 1, 2))          # back to NCHW


# ----------------------------- reference (pure JAX, f32) -----------------------------
def reference_forward(x_nchw, params):
    w1, b1 = params["w1"], params["b1"]
    w2, b2 = params["w2"], params["b2"]
    wsc, bsc = params["wsc"], params["bsc"]
    dn = ("NHWC", "HWIO", "NHWC")

    def avgpool2(v):
        return lax.reduce_window(v, 0.0, lax.add, (1, 2, 2, 1), (1, 2, 2, 1), "VALID") * 0.25

    x = jnp.transpose(x_nchw, (0, 2, 3, 1))
    h = lax.conv_general_dilated(x, w1, (1, 1), ((1, 1), (1, 1)), dimension_numbers=dn) + b1
    h = jax.nn.relu(h)
    h = lax.conv_general_dilated(h, w2, (1, 1), ((1, 1), (1, 1)), dimension_numbers=dn) + b2
    res = avgpool2(h)
    sc = avgpool2(x)
    sc = lax.conv_general_dilated(sc, wsc, (1, 1), ((0, 0), (0, 0)), dimension_numbers=dn) + bsc
    return jnp.transpose(res + sc, (0, 3, 1, 2))


def _xavier_uniform(key, shape):
    # shape is HWIO; matches torch.nn.init.xavier_uniform_ fan computation for conv weights
    kh, kw, cin, cout = shape
    fan_in, fan_out = cin * kh * kw, cout * kh * kw
    limit = float(np.sqrt(6.0 / (fan_in + fan_out)))
    return jax.random.uniform(key, shape, jnp.float32, -limit, limit)


if __name__ == "__main__":
    N, CIN, COUT, H, W = 2, 4, 8, 16, 16

    key = jax.random.PRNGKey(0)
    k_x, k1, k2, k3, kb1, kb2, kb3 = jax.random.split(key, 7)
    x = jax.random.normal(k_x, (N, CIN, H, W), jnp.float32)

    params = dict(
        w1=_xavier_uniform(k1, (3, 3, CIN, COUT)),
        b1=0.1 * jax.random.normal(kb1, (COUT,), jnp.float32),
        w2=_xavier_uniform(k2, (3, 3, COUT, COUT)),
        b2=0.1 * jax.random.normal(kb2, (COUT,), jnp.float32),
        wsc=_xavier_uniform(k3, (1, 1, CIN, COUT)),
        bsc=0.1 * jax.random.normal(kb3, (COUT,), jnp.float32),
    )

    out = jax.jit(dblock_optimized_forward)(x, params)
    out = jax.block_until_ready(out)

    ref = reference_forward(x, params)
    # bf16 MXU operands / bf16 intermediate with f32 accumulation -> relaxed tolerance.
    np.testing.assert_allclose(np.asarray(out), np.asarray(ref), atol=5e-2, rtol=5e-2)

    print("KERNEL_OK")
</pallas_src>

<mosaic_0001>
module attributes {stable_mosaic.version = 11 : i64} {
  func.func @_dblock_kernel(%arg0: i32, %arg1: memref<1x328x4xbf16, #tpu.memory_space<vmem>>, %arg2: memref<36x8xbf16, #tpu.memory_space<vmem>>, %arg3: memref<1x8xf32, #tpu.memory_space<vmem>>, %arg4: memref<72x8xbf16, #tpu.memory_space<vmem>>, %arg5: memref<4x8xbf16, #tpu.memory_space<vmem>>, %arg6: memref<1x8xf32, #tpu.memory_space<vmem>>, %arg7: memref<1x64x8xf32, #tpu.memory_space<vmem>>, %arg8: memref<336x8xbf16, #tpu.memory_space<vmem>>, %arg9: memref<288x8xf32, #tpu.memory_space<vmem>>) attributes {dimension_semantics = [#tpu.dimension_semantics<parallel>], iteration_bounds = array<i64: 2>, scalar_prefetch = 0 : i64, scratch_operands = 2 : i64, tpu.core_type = #tpu.core_type<tc>, window_params = [{transform_indices = @transform_0, window_bounds = array<i64: 1, 328, 4>}, {pipeline_mode = #tpu.pipeline_mode<synchronous>, transform_indices = @transform_1, window_bounds = array<i64: 36, 8>}, {pipeline_mode = #tpu.pipeline_mode<synchronous>, transform_indices = @transform_2, window_bounds = array<i64: 1, 8>}, {pipeline_mode = #tpu.pipeline_mode<synchronous>, transform_indices = @transform_3, window_bounds = array<i64: 72, 8>}, {pipeline_mode = #tpu.pipeline_mode<synchronous>, transform_indices = @transform_4, window_bounds = array<i64: 4, 8>}, {pipeline_mode = #tpu.pipeline_mode<synchronous>, transform_indices = @transform_5, window_bounds = array<i64: 1, 8>}, {transform_indices = @transform_6, window_bounds = array<i64: 1, 64, 8>}]} {
    %c0 = arith.constant 0 : index
    %c0_0 = arith.constant 0 : index
    %c0_1 = arith.constant 0 : index
    %0 = vector.load %arg1[%c0, %c0_0, %c0_1] : memref<1x328x4xbf16, #tpu.memory_space<vmem>>, vector<1x288x4xbf16>
    %1 = vector.shape_cast %0 : vector<1x288x4xbf16> to vector<288x4xbf16>
    %c0_2 = arith.constant 0 : index
    %c0_3 = arith.constant 0 : index
    %2 = vector.load %arg2[%c0_2, %c0_3] : memref<36x8xbf16, #tpu.memory_space<vmem>>, vector<4x8xbf16>
    %cst = arith.constant dense<0.000000e+00> : vector<288x8xf32>
    %3 = tpu.matmul %1, %2, %cst {dimension_numbers = #tpu.dot_dimension_numbers<[1], [0], [0], [1], [0, 0, 1, 1], [], []>} : vector<288x4xbf16>, vector<4x8xbf16>, vector<288x8xf32> -> vector<288x8xf32>
    %c0_4 = arith.constant 0 : index
    %c0_5 = arith.constant 0 : index
    %4 = vector.load %arg9[%c0_4, %c0_5] : memref<288x8xf32, #tpu.memory_space<vmem>>, vector<288x8xf32>
    tpu.vector_store %arg9[%c0_4, %c0_5], %3 {strides = array<i32>} : memref<288x8xf32, #tpu.memory_space<vmem>>, vector<288x8xf32>,
    %c0_6 = arith.constant 0 : index
    %c1 = arith.constant 1 : index
    %c0_7 = arith.constant 0 : index
    %5 = vector.load %arg1[%c0_6, %c1, %c0_7] : memref<1x328x4xbf16, #tpu.memory_space<vmem>>, vector<1x288x4xbf16>
    %6 = vector.shape_cast %5 : vector<1x288x4xbf16> to vector<288x4xbf16>
    %c4 = arith.constant 4 : index
    %c0_8 = arith.constant 0 : index
    %7 = vector.load %arg2[%c4, %c0_8] : memref<36x8xbf16, #tpu.memory_space<vmem>>, vector<4x8xbf16>
    %cst_9 = arith.constant dense<0.000000e+00> : vector<288x8xf32>
    %8 = tpu.matmul %6, %7, %cst_9 {dimension_numbers = #tpu.dot_dimension_numbers<[1], [0], [0], [1], [0, 0, 1, 1], [], []>} : vector<288x4xbf16>, vector<4x8xbf16>, vector<288x8xf32> -> vector<288x8xf32>
    %c0_10 = arith.constant 0 : index
    %c0_11 = arith.constant 0 : index
    %9 = vector.load %arg9[%c0_10, %c0_11] : memref<288x8xf32, #tpu.memory_space<vmem>>, vector<288x8xf32>
    %10 = arith.addf %9, %8 : vector<288x8xf32>
    %c0_12 = arith.constant 0 : index
    %c0_13 = arith.constant 0 : index
    %11 = vector.load %arg9[%c0_12, %c0_13] : memref<288x8xf32, #tpu.memory_space<vmem>>, vector<288x8xf32>
    tpu.vector_store %arg9[%c0_12, %c0_13], %10 {strides = array<i32>} : memref<288x8xf32, #tpu.memory_space<vmem>>, vector<288x8xf32>,
    %c0_14 = arith.constant 0 : index
    %c2 = arith.constant 2 : index
    %c0_15 = arith.constant 0 : index
    %12 = vector.load %arg1[%c0_14, %c2, %c0_15] : memref<1x328x4xbf16, #tpu.memory_space<vmem>>, vector<1x288x4xbf16>
    %13 = vector.shape_cast %12 : vector<1x288x4xbf16> to vector<288x4xbf16>
    %c8 = arith.constant 8 : index
    %c0_16 = arith.constant 0 : index
    %14 = vector.load %arg2[%c8, %c0_16] : memref<36x8xbf16, #tpu.memory_space<vmem>>, vector<4x8xbf16>
    %cst_17 = arith.constant dense<0.000000e+00> : vector<288x8xf32>
    %15 = tpu.matmul %13, %14, %cst_17 {dimension_numbers = #tpu.dot_dimension_numbers<[1], [0], [0], [1], [0, 0, 1, 1], [], []>} : vector<288x4xbf16>, vector<4x8xbf16>, vector<288x8xf32> -> vector<288x8xf32>
    %c0_18 = arith.constant 0 : index
    %c0_19 = arith.constant 0 : index
    %16 = vector.load %arg9[%c0_18, %c0_19] : memref<288x8xf32, #tpu.memory_space<vmem>>, vector<288x8xf32>
    %17 = arith.addf %16, %15 : vector<288x8xf32>
    %c0_20 = arith.constant 0 : index
    %c0_21 = arith.constant 0 : index
    %18 = vector.load %arg9[%c0_20, %c0_21] : memref<288x8xf32, #tpu.memory_space<vmem>>, vector<288x8xf32>
    tpu.vector_store %arg9[%c0_20, %c0_21], %17 {strides = array<i32>} : memref<288x8xf32, #tpu.memory_space<vmem>>, vector<288x8xf32>,
    %c0_22 = arith.constant 0 : index
    %c18 = arith.constant 18 : index
    %c0_23 = arith.constant 0 : index
    %19 = vector.load %arg1[%c0_22, %c18, %c0_23] : memref<1x328x4xbf16, #tpu.memory_space<vmem>>, vector<1x288x4xbf16>
    %20 = vector.shape_cast %19 : vector<1x288x4xbf16> to vector<288x4xbf16>
    %c12 = arith.constant 12 : index
    %c0_24 = arith.constant 0 : index
    %21 = vector.load %arg2[%c12, %c0_24] : memref<36x8xbf16, #tpu.memory_space<vmem>>, vector<4x8xbf16>
    %cst_25 = arith.constant dense<0.000000e+00> : vector<288x8xf32>
    %22 = tpu.matmul %20, %21, %cst_25 {dimension_numbers = #tpu.dot_dimension_numbers<[1], [0], [0], [1], [0, 0, 1, 1], [], []>} : vector<288x4xbf16>, vector<4x8xbf16>, vector<288x8xf32> -> vector<288x8xf32>
    %c0_26 = arith.constant 0 : index
    %c0_27 = arith.constant 0 : index
    %23 = vector.load %arg9[%c0_26, %c0_27] : memref<288x8xf32, #tpu.memory_space<vmem>>, vector<288x8xf32>
    %24 = arith.addf %23, %22 : vector<288x8xf32>
    %c0_28 = arith.constant 0 : index
    %c0_29 = arith.constant 0 : index
    %25 = vector.load %arg9[%c0_28, %c0_29] : memref<288x8xf32, #tpu.memory_space<vmem>>, vector<288x8xf32>
    tpu.vector_store %arg9[%c0_28, %c0_29], %24 {strides = array<i32>} : memref<288x8xf32, #tpu.memory_space<vmem>>, vector<288x8xf32>,
    %c0_30 = arith.constant 0 : index
    %c19 = arith.constant 19 : index
    %c0_31 = arith.constant 0 : index
    %26 = vector.load %arg1[%c0_30, %c19, %c0_31] : memref<1x328x4xbf16, #tpu.memory_space<vmem>>, vector<1x288x4xbf16>
    %27 = vector.shape_cast %26 : vector<1x288x4xbf16> to vector<288x4xbf16>
    %c16 = arith.constant 16 : index
    %c0_32 = arith.constant 0 : index
    %28 = vector.load %arg2[%c16, %c0_32] : memref<36x8xbf16, #tpu.memory_space<vmem>>, vector<4x8xbf16>
    %cst_33 = arith.constant dense<0.000000e+00> : vector<288x8xf32>
    %29 = tpu.matmul %27, %28, %cst_33 {dimension_numbers = #tpu.dot_dimension_numbers<[1], [0], [0], [1], [0, 0, 1, 1], [], []>} : vector<288x4xbf16>, vector<4x8xbf16>, vector<288x8xf32> -> vector<288x8xf32>
    %c0_34 = arith.constant 0 : index
    %c0_35 = arith.constant 0 : index
    %30 = vector.load %arg9[%c0_34, %c0_35] : memref<288x8xf32, #tpu.memory_space<vmem>>, vector<288x8xf32>
    %31 = arith.addf %30, %29 : vector<288x8xf32>
    %c0_36 = arith.constant 0 : index
    %c0_37 = arith.constant 0 : index
    %32 = vector.load %arg9[%c0_36, %c0_37] : memref<288x8xf32, #tpu.memory_space<vmem>>, vector<288x8xf32>
    tpu.vector_store %arg9[%c0_36, %c0_37], %31 {strides = array<i32>} : memref<288x8xf32, #tpu.memory_space<vmem>>, vector<288x8xf32>,
    %c0_38 = arith.constant 0 : index
    %c20 = arith.constant 20 : index
    %c0_39 = arith.constant 0 : index
    %33 = vector.load %arg1[%c0_38, %c20, %c0_39] : memref<1x328x4xbf16, #tpu.memory_space<vmem>>, vector<1x288x4xbf16>
    %34 = vector.shape_cast %33 : vector<1x288x4xbf16> to vector<288x4xbf16>
    %c20_40 = arith.constant 20 : index
    %c0_41 = arith.constant 0 : index
    %35 = vector.load %arg2[%c20_40, %c0_41] : memref<36x8xbf16, #tpu.memory_space<vmem>>, vector<4x8xbf16>
    %cst_42 = arith.constant dense<0.000000e+00> : vector<288x8xf32>
    %36 = tpu.matmul %34, %35, %cst_42 {dimension_numbers = #tpu.dot_dimension_numbers<[1], [0], [0], [1], [0, 0, 1, 1], [], []>} : vector<288x4xbf16>, vector<4x8xbf16>, vector<288x8xf32> -> vector<288x8xf32>
    %c0_43 = arith.constant 0 : index
    %c0_44 = arith.constant 0 : index
    %37 = vector.load %arg9[%c0_43, %c0_44] : memref<288x8xf32, #tpu.memory_space<vmem>>, vector<288x8xf32>
    %38 = arith.addf %37, %36 : vector<288x8xf32>
    %c0_45 = arith.constant 0 : index
    %c0_46 = arith.constant 0 : index
    %39 = vector.load %arg9[%c0_45, %c0_46] : memref<288x8xf32, #tpu.memory_space<vmem>>, vector<288x8xf32>
    tpu.vector_store %arg9[%c0_45, %c0_46], %38 {strides = array<i32>} : memref<288x8xf32, #tpu.memory_space<vmem>>, vector<288x8xf32>,
    %c0_47 = arith.constant 0 : index
    %c36 = arith.constant 36 : index
    %c0_48 = arith.constant 0 : index
    %40 = vector.load %arg1[%c0_47, %c36, %c0_48] : memref<1x328x4xbf16, #tpu.memory_space<vmem>>, vector<1x288x4xbf16>
    %41 = vector.shape_cast %40 : vector<1x288x4xbf16> to vector<288x4xbf16>
    %c24 = arith.constant 24 : index
    %c0_49 = arith.constant 0 : index
    %42 = vector.load %arg2[%c24, %c0_49] : memref<36x8xbf16, #tpu.memory_space<vmem>>, vector<4x8xbf16>
    %cst_50 = arith.constant dense<0.000000e+00> : vector<288x8xf32>
    %43 = tpu.matmul %41, %42, %cst_50 {dimension_numbers = #tpu.dot_dimension_numbers<[1], [0], [0], [1], [0, 0, 1, 1], [], []>} : vector<288x4xbf16>, vector<4x8xbf16>, vector<288x8xf32> -> vector<288x8xf32>
    %c0_51 = arith.constant 0 : index
    %c0_52 = arith.constant 0 : index
    %44 = vector.load %arg9[%c0_51, %c0_52] : memref<288x8xf32, #tpu.memory_space<vmem>>, vector<288x8xf32>
    %45 = arith.addf %44, %43 : vector<288x8xf32>
    %c0_53 = arith.constant 0 : index
    %c0_54 = arith.constant 0 : index
    %46 = vector.load %arg9[%c0_53, %c0_54] : memref<288x8xf32, #tpu.memory_space<vmem>>, vector<288x8xf32>
    tpu.vector_store %arg9[%c0_53, %c0_54], %45 {strides = array<i32>} : memref<288x8xf32, #tpu.memory_space<vmem>>, vector<288x8xf32>,
    %c0_55 = arith.constant 0 : index
    %c37 = arith.constant 37 : index
    %c0_56 = arith.constant 0 : index
    %47 = vector.load %arg1[%c0_55, %c37, %c0_56] : memref<1x328x4xbf16, #tpu.memory_space<vmem>>, vector<1x288x4xbf16>
    %48 = vector.shape_cast %47 : vector<1x288x4xbf16> to vector<288x4xbf16>
    %c28 = arith.constant 28 : index
    %c0_57 = arith.constant 0 : index
    %49 = vector.load %arg2[%c28, %c0_57] : memref<36x8xbf16, #tpu.memory_space<vmem>>, vector<4x8xbf16>
    %cst_58 = arith.constant dense<0.000000e+00> : vector<288x8xf32>
    %50 = tpu.matmul %48, %49, %cst_58 {dimension_numbers = #tpu.dot_dimension_numbers<[1], [0], [0], [1], [0, 0, 1, 1], [], []>} : vector<288x4xbf16>, vector<4x8xbf16>, vector<288x8xf32> -> vector<288x8xf32>
    %c0_59 = arith.constant 0 : index
    %c0_60 = arith.constant 0 : index
    %51 = vector.load %arg9[%c0_59, %c0_60] : memref<288x8xf32, #tpu.memory_space<vmem>>, vector<288x8xf32>
    %52 = arith.addf %51, %50 : vector<288x8xf32>
    %c0_61 = arith.constant 0 : index
    %c0_62 = arith.constant 0 : index
    %53 = vector.load %arg9[%c0_61, %c0_62] : memref<288x8xf32, #tpu.memory_space<vmem>>, vector<288x8xf32>
    tpu.vector_store %arg9[%c0_61, %c0_62], %52 {strides = array<i32>} : memref<288x8xf32, #tpu.memory_space<vmem>>, vector<288x8xf32>,
    %c0_63 = arith.constant 0 : index
    %c38 = arith.constant 38 : index
    %c0_64 = arith.constant 0 : index
    %54 = vector.load %arg1[%c0_63, %c38, %c0_64] : memref<1x328x4xbf16, #tpu.memory_space<vmem>>, vector<1x288x4xbf16>
    %55 = vector.shape_cast %54 : vector<1x288x4xbf16> to vector<288x4xbf16>
    %c32 = arith.constant 32 : index
    %c0_65 = arith.constant 0 : index
    %56 = vector.load %arg2[%c32, %c0_65] : memref<36x8xbf16, #tpu.memory_space<vmem>>, vector<4x8xbf16>
    %cst_66 = arith.constant dense<0.000000e+00> : vector<288x8xf32>
    %57 = tpu.matmul %55, %56, %cst_66 {dimension_numbers = #tpu.dot_dimension_numbers<[1], [0], [0], [1], [0, 0, 1, 1], [], []>} : vector<288x4xbf16>, vector<4x8xbf16>, vector<288x8xf32> -> vector<288x8xf32>
    %c0_67 = arith.constant 0 : index
    %c0_68 = arith.constant 0 : index
    %58 = vector.load %arg9[%c0_67, %c0_68] : memref<288x8xf32, #tpu.memory_space<vmem>>, vector<288x8xf32>
    %59 = arith.addf %58, %57 : vector<288x8xf32>
    %c0_69 = arith.constant 0 : index
    %c0_70 = arith.constant 0 : index
    %60 = vector.load %arg9[%c0_69, %c0_70] : memref<288x8xf32, #tpu.memory_space<vmem>>, vector<288x8xf32>
    tpu.vector_store %arg9[%c0_69, %c0_70], %59 {strides = array<i32>} : memref<288x8xf32, #tpu.memory_space<vmem>>, vector<288x8xf32>,
    %61 = tpu.iota {dimensions = array<i32: 0>} : vector<288x1xi32>
    %c58255_i32 = arith.constant 58255 : i32
    %62 = vector.broadcast %c58255_i32 : i32 to vector<288x1xi32>
    %63 = arith.muli %61, %62 : vector<288x1xi32>
    %c20_i32 = arith.constant 20 : i32
    %64 = vector.broadcast %c20_i32 : i32 to vector<288x1xi32>
    %65 = arith.shrsi %63, %64 : vector<288x1xi32>
    %c18_i32 = arith.constant 18 : i32
    %66 = vector.broadcast %c18_i32 : i32 to vector<288x1xi32>
    %67 = arith.muli %65, %66 : vector<288x1xi32>
    %68 = arith.subi %61, %67 : vector<288x1xi32>
    %c16_i32 = arith.constant 16 : i32
    %69 = vector.broadcast %c16_i32 : i32 to vector<288x1xi32>
    %70 = arith.cmpi slt, %68, %69 : vector<288x1xi32>
    %c0_71 = arith.constant 0 : index
    %c0_72 = arith.constant 0 : index
    %71 = vector.load %arg9[%c0_71, %c0_72] : memref<288x8xf32, #tpu.memory_space<vmem>>, vector<288x8xf32>
    %c0_73 = arith.constant 0 : index
    %c0_74 = arith.constant 0 : index
    %72 = vector.load %arg3[%c0_73, %c0_74] : memref<1x8xf32, #tpu.memory_space<vmem>>, vector<1x8xf32>
    %73 = vector.broadcast %72 : vector<1x8xf32> to vector<288x8xf32>
    %74 = arith.addf %71, %73 : vector<288x8xf32>
    %cst_75 = arith.constant 0.000000e+00 : f32
    %75 = vector.broadcast %cst_75 : f32 to vector<288x8xf32>
    %76 = arith.maximumf %74, %75 : vector<288x8xf32>
    %cst_76 = arith.constant 0.000000e+00 : f32
    %77 = vector.shape_cast %70 : vector<288x1xi1> to vector<288x1xi1>
    %78 = vector.broadcast %77 : vector<288x1xi1> to vector<288x8xi1>
    %79 = vector.broadcast %cst_76 : f32 to vector<288x8xf32>
    %80 = arith.select %78, %76, %79 : vector<288x8xi1>, vector<288x8xf32>
    %cst_77 = arith.constant 0.000000e+00 : bf16
    %81 = vector.broadcast %cst_77 : bf16 to vector<24x8xbf16>
    %c0_78 = arith.constant 0 : index
    %c0_79 = arith.constant 0 : index
    %82 = vector.load %arg8[%c0_78, %c0_79] : memref<336x8xbf16, #tpu.memory_space<vmem>>, vector<24x8xbf16>
    tpu.vector_store %arg8[%c0_78, %c0_79], %81 {strides = array<i32>} : memref<336x8xbf16, #tpu.memory_space<vmem>>, vector<24x8xbf16>,
    %83 = arith.truncf %80 : vector<288x8xf32> to vector<288x8xbf16>
    %c24_80 = arith.constant 24 : index
    %c0_81 = arith.constant 0 : index
    %84 = vector.load %arg8[%c24_80, %c0_81] : memref<336x8xbf16, #tpu.memory_space<vmem>>, vector<288x8xbf16>
    tpu.vector_store %arg8[%c24_80, %c0_81], %83 {strides = array<i32>} : memref<336x8xbf16, #tpu.memory_space<vmem>>, vector<288x8xbf16>,
    %cst_82 = arith.constant 0.000000e+00 : bf16
    %85 = vector.broadcast %cst_82 : bf16 to vector<24x8xbf16>
    %c312 = arith.constant 312 : index
    %c0_83 = arith.constant 0 : index
    %86 = vector.load %arg8[%c312, %c0_83] : memref<336x8xbf16, #tpu.memory_space<vmem>>, vector<24x8xbf16>
    tpu.vector_store %arg8[%c312, %c0_83], %85 {strides = array<i32>} : memref<336x8xbf16, #tpu.memory_space<vmem>>, vector<24x8xbf16>,
    %c0_84 = arith.constant 0 : index
    %c19_85 = arith.constant 19 : index
    %c0_86 = arith.constant 0 : index
    %87 = vector.load %arg1[%c0_84, %c19_85, %c0_86] : memref<1x328x4xbf16, #tpu.memory_space<vmem>>, vector<1x288x4xbf16>
    %88 = vector.shape_cast %87 : vector<1x288x4xbf16> to vector<288x4xbf16>
    %c0_87 = arith.constant 0 : index
    %c0_88 = arith.constant 0 : index
    %89 = vector.load %arg5[%c0_87, %c0_88] : memref<4x8xbf16, #tpu.memory_space<vmem>>, vector<4x8xbf16>
    %cst_89 = arith.constant dense<0.000000e+00> : vector<288x8xf32>
    %90 = tpu.matmul %88, %89, %cst_89 {dimension_numbers = #tpu.dot_dimension_numbers<[1], [0], [0], [1], [0, 0, 1, 1], [], []>} : vector<288x4xbf16>, vector<4x8xbf16>, vector<288x8xf32> -> vector<288x8xf32>
    %c0_90 = arith.constant 0 : index
    %c0_91 = arith.constant 0 : index
    %91 = vector.load %arg9[%c0_90, %c0_91] : memref<288x8xf32, #tpu.memory_space<vmem>>, vector<288x8xf32>
    tpu.vector_store %arg9[%c0_90, %c0_91], %90 {strides = array<i32>} : memref<288x8xf32, #tpu.memory_space<vmem>>, vector<288x8xf32>,
    %c0_92 = arith.constant 0 : index
    %c0_93 = arith.constant 0 : index
    %92 = vector.load %arg9[%c0_92, %c0_93] : memref<288x8xf32, #tpu.memory_space<vmem>>, vector<288x8xf32>
    %c5 = arith.constant 5 : index
    %c0_94 = arith.constant 0 : index
    %93 = vector.load %arg8[%c5, %c0_94] : memref<336x8xbf16, #tpu.memory_space<vmem>>, vector<288x8xbf16>
    %c0_95 = arith.constant 0 : index
    %c0_96 = arith.constant 0 : index
    %94 = vector.load %arg4[%c0_95, %c0_96] : memref<72x8xbf16, #tpu.memory_space<vmem>>, vector<8x8xbf16>
    %cst_97 = arith.constant dense<0.000000e+00> : vector<288x8xf32>
    %95 = tpu.matmul %93, %94, %cst_97 {dimension_numbers = #tpu.dot_dimension_numbers<[1], [0], [0], [1], [0, 0, 1, 1], [], []>} : vector<288x8xbf16>, vector<8x8xbf16>, vector<288x8xf32> -> vector<288x8xf32>
    %96 = arith.addf %92, %95 : vector<288x8xf32>
    %c0_98 = arith.constant 0 : index
    %c0_99 = arith.constant 0 : index
    %97 = vector.load %arg9[%c0_98, %c0_99] : memref<288x8xf32, #tpu.memory_space<vmem>>, vector<288x8xf32>
    tpu.vector_store %arg9[%c0_98, %c0_99], %96 {strides = array<i32>} : memref<288x8xf32, #tpu.memory_space<vmem>>, vector<288x8xf32>,
    %c0_100 = arith.constant 0 : index
    %c0_101 = arith.constant 0 : index
    %98 = vector.load %arg9[%c0_100, %c0_101] : memref<288x8xf32, #tpu.memory_space<vmem>>, vector<288x8xf32>
    %c6 = arith.constant 6 : index
    %c0_102 = arith.constant 0 : index
    %99 = vector.load %arg8[%c6, %c0_102] : memref<336x8xbf16, #tpu.memory_space<vmem>>, vector<288x8xbf16>
    %c8_103 = arith.constant 8 : index
    %c0_104 = arith.constant 0 : index
    %100 = vector.load %arg4[%c8_103, %c0_104] : memref<72x8xbf16, #tpu.memory_space<vmem>>, vector<8x8xbf16>
    %cst_105 = arith.constant dense<0.000000e+00> : vector<288x8xf32>
    %101 = tpu.matmul %99, %100, %cst_105 {dimension_numbers = #tpu.dot_dimension_numbers<[1], [0], [0], [1], [0, 0, 1, 1], [], []>} : vector<288x8xbf16>, vector<8x8xbf16>, vector<288x8xf32> -> vector<288x8xf32>
    %102 = arith.addf %98, %101 : vector<288x8xf32>
    %c0_106 = arith.constant 0 : index
    %c0_107 = arith.constant 0 : index
    %103 = vector.load %arg9[%c0_106, %c0_107] : memref<288x8xf32, #tpu.memory_space<vmem>>, vector<288x8xf32>
    tpu.vector_store %arg9[%c0_106, %c0_107], %102 {strides = array<i32>} : memref<288x8xf32, #tpu.memory_space<vmem>>, vector<288x8xf32>,
    %c0_108 = arith.constant 0 : index
    %c0_109 = arith.constant 0 : index
    %104 = vector.load %arg9[%c0_108, %c0_109] : memref<288x8xf32, #tpu.memory_space<vmem>>, vector<288x8xf32>
    %c7 = arith.constant 7 : index
    %c0_110 = arith.constant 0 : index
    %105 = vector.load %arg8[%c7, %c0_110] : memref<336x8xbf16, #tpu.memory_space<vmem>>, vector<288x8xbf16>
    %c16_111 = arith.constant 16 : index
    %c0_112 = arith.constant 0 : index
    %106 = vector.load %arg4[%c16_111, %c0_112] : memref<72x8xbf16, #tpu.memory_space<vmem>>, vector<8x8xbf16>
    %cst_113 = arith.constant dense<0.000000e+00> : vector<288x8xf32>
    %107 = tpu.matmul %105, %106, %cst_113 {dimension_numbers = #tpu.dot_dimension_numbers<[1], [0], [0], [1], [0, 0, 1, 1], [], []>} : vector<288x8xbf16>, vector<8x8xbf16>, vector<288x8xf32> -> vector<288x8xf32>
    %108 = arith.addf %104, %107 : vector<288x8xf32>
    %c0_114 = arith.constant 0 : index
    %c0_115 = arith.constant 0 : index
    %109 = vector.load %arg9[%c0_114, %c0_115] : memref<288x8xf32, #tpu.memory_space<vmem>>, vector<288x8xf32>
    tpu.vector_store %arg9[%c0_114, %c0_115], %108 {strides = array<i32>} : memref<288x8xf32, #tpu.memory_space<vmem>>, vector<288x8xf32>,
    %c0_116 = arith.constant 0 : index
    %c0_117 = arith.constant 0 : index
    %110 = vector.load %arg9[%c0_116, %c0_117] : memref<288x8xf32, #tpu.memory_space<vmem>>, vector<288x8xf32>
    %c23 = arith.constant 23 : index
    %c0_118 = arith.constant 0 : index
    %111 = vector.load %arg8[%c23, %c0_118] : memref<336x8xbf16, #tpu.memory_space<vmem>>, vector<288x8xbf16>
    %c24_119 = arith.constant 24 : index
    %c0_120 = arith.constant 0 : index
    %112 = vector.load %arg4[%c24_119, %c0_120] : memref<72x8xbf16, #tpu.memory_space<vmem>>, vector<8x8xbf16>
    %cst_121 = arith.constant dense<0.000000e+00> : vector<288x8xf32>
    %113 = tpu.matmul %111, %112, %cst_121 {dimension_numbers = #tpu.dot_dimension_numbers<[1], [0], [0], [1], [0, 0, 1, 1], [], []>} : vector<288x8xbf16>, vector<8x8xbf16>, vector<288x8xf32> -> vector<288x8xf32>
    %114 = arith.addf %110, %113 : vector<288x8xf32>
    %c0_122 = arith.constant 0 : index
    %c0_123 = arith.constant 0 : index
    %115 = vector.load %arg9[%c0_122, %c0_123] : memref<288x8xf32, #tpu.memory_space<vmem>>, vector<288x8xf32>
    tpu.vector_store %arg9[%c0_122, %c0_123], %114 {strides = array<i32>} : memref<288x8xf32, #tpu.memory_space<vmem>>, vector<288x8xf32>,
    %c0_124 = arith.constant 0 : index
    %c0_125 = arith.constant 0 : index
    %116 = vector.load %arg9[%c0_124, %c0_125] : memref<288x8xf32, #tpu.memory_space<vmem>>, vector<288x8xf32>
    %c24_126 = arith.constant 24 : index
    %c0_127 = arith.constant 0 : index
    %117 = vector.load %arg8[%c24_126, %c0_127] : memref<336x8xbf16, #tpu.memory_space<vmem>>, vector<288x8xbf16>
    %c32_128 = arith.constant 32 : index
    %c0_129 = arith.constant 0 : index
    %118 = vector.load %arg4[%c32_128, %c0_129] : memref<72x8xbf16, #tpu.memory_space<vmem>>, vector<8x8xbf16>
    %cst_130 = arith.constant dense<0.000000e+00> : vector<288x8xf32>
    %119 = tpu.matmul %117, %118, %cst_130 {dimension_numbers = #tpu.dot_dimension_numbers<[1], [0], [0], [1], [0, 0, 1, 1], [], []>} : vector<288x8xbf16>, vector<8x8xbf16>, vector<288x8xf32> -> vector<288x8xf32>
    %120 = arith.addf %116, %119 : vector<288x8xf32>
    %c0_131 = arith.constant 0 : index
    %c0_132 = arith.constant 0 : index
    %121 = vector.load %arg9[%c0_131, %c0_132] : memref<288x8xf32, #tpu.memory_space<vmem>>, vector<288x8xf32>
    tpu.vector_store %arg9[%c0_131, %c0_132], %120 {strides = array<i32>} : memref<288x8xf32, #tpu.memory_space<vmem>>, vector<288x8xf32>,
    %c0_133 = arith.constant 0 : index
    %c0_134 = arith.constant 0 : index
    %122 = vector.load %arg9[%c0_133, %c0_134] : memref<288x8xf32, #tpu.memory_space<vmem>>, vector<288x8xf32>
    %c25 = arith.constant 25 : index
    %c0_135 = arith.constant 0 : index
    %123 = vector.load %arg8[%c25, %c0_135] : memref<336x8xbf16, #tpu.memory_space<vmem>>, vector<288x8xbf16>
    %c40 = arith.constant 40 : index
    %c0_136 = arith.constant 0 : index
    %124 = vector.load %arg4[%c40, %c0_136] : memref<72x8xbf16, #tpu.memory_space<vmem>>, vector<8x8xbf16>
    %cst_137 = arith.constant dense<0.000000e+00> : vector<288x8xf32>
    %125 = tpu.matmul %123, %124, %cst_137 {dimension_numbers = #tpu.dot_dimension_numbers<[1], [0], [0], [1], [0, 0, 1, 1], [], []>} : vector<288x8xbf16>, vector<8x8xbf16>, vector<288x8xf32> -> vector<288x8xf32>
    %126 = arith.addf %122, %125 : vector<288x8xf32>
    %c0_138 = arith.constant 0 : index
    %c0_139 = arith.constant 0 : index
    %127 = vector.load %arg9[%c0_138, %c0_139] : memref<288x8xf32, #tpu.memory_space<vmem>>, vector<288x8xf32>
    tpu.vector_store %arg9[%c0_138, %c0_139], %126 {strides = array<i32>} : memref<288x8xf32, #tpu.memory_space<vmem>>, vector<288x8xf32>,
    %c0_140 = arith.constant 0 : index
    %c0_141 = arith.constant 0 : index
    %128 = vector.load %arg9[%c0_140, %c0_141] : memref<288x8xf32, #tpu.memory_space<vmem>>, vector<288x8xf32>
    %c41 = arith.constant 41 : index
    %c0_142 = arith.constant 0 : index
    %129 = vector.load %arg8[%c41, %c0_142] : memref<336x8xbf16, #tpu.memory_space<vmem>>, vector<288x8xbf16>
    %c48 = arith.constant 48 : index
    %c0_143 = arith.constant 0 : index
    %130 = vector.load %arg4[%c48, %c0_143] : memref<72x8xbf16, #tpu.memory_space<vmem>>, vector<8x8xbf16>
    %cst_144 = arith.constant dense<0.000000e+00> : vector<288x8xf32>
    %131 = tpu.matmul %129, %130, %cst_144 {dimension_numbers = #tpu.dot_dimension_numbers<[1], [0], [0], [1], [0, 0, 1, 1], [], []>} : vector<288x8xbf16>, vector<8x8xbf16>, vector<288x8xf32> -> vector<288x8xf32>
    %132 = arith.addf %128, %131 : vector<288x8xf32>
    %c0_145 = arith.constant 0 : index
    %c0_146 = arith.constant 0 : index
    %133 = vector.load %arg9[%c0_145, %c0_146] : memref<288x8xf32, #tpu.memory_space<vmem>>, vector<288x8xf32>
    tpu.vector_store %arg9[%c0_145, %c0_146], %132 {strides = array<i32>} : memref<288x8xf32, #tpu.memory_space<vmem>>, vector<288x8xf32>,
    %c0_147 = arith.constant 0 : index
    %c0_148 = arith.constant 0 : index
    %134 = vector.load %arg9[%c0_147, %c0_148] : memref<288x8xf32, #tpu.memory_space<vmem>>, vector<288x8xf32>
    %c42 = arith.constant 42 : index
    %c0_149 = arith.constant 0 : index
    %135 = vector.load %arg8[%c42, %c0_149] : memref<336x8xbf16, #tpu.memory_space<vmem>>, vector<288x8xbf16>
    %c56 = arith.constant 56 : index
    %c0_150 = arith.constant 0 : index
    %136 = vector.load %arg4[%c56, %c0_150] : memref<72x8xbf16, #tpu.memory_space<vmem>>, vector<8x8xbf16>
    %cst_151 = arith.constant dense<0.000000e+00> : vector<288x8xf32>
    %137 = tpu.matmul %135, %136, %cst_151 {dimension_numbers = #tpu.dot_dimension_numbers<[1], [0], [0], [1], [0, 0, 1, 1], [], []>} : vector<288x8xbf16>, vector<8x8xbf16>, vector<288x8xf32> -> vector<288x8xf32>
    %138 = arith.addf %134, %137 : vector<288x8xf32>
    %c0_152 = arith.constant 0 : index
    %c0_153 = arith.constant 0 : index
    %139 = vector.load %arg9[%c0_152, %c0_153] : memref<288x8xf32, #tpu.memory_space<vmem>>, vector<288x8xf32>
    tpu.vector_store %arg9[%c0_152, %c0_153], %138 {strides = array<i32>} : memref<288x8xf32, #tpu.memory_space<vmem>>, vector<288x8xf32>,
    %c0_154 = arith.constant 0 : index
    %c0_155 = arith.constant 0 : index
    %140 = vector.load %arg9[%c0_154, %c0_155] : memref<288x8xf32, #tpu.memory_space<vmem>>, vector<288x8xf32>
    %c43 = arith.constant 43 : index
    %c0_156 = arith.constant 0 : index
    %141 = vector.load %arg8[%c43, %c0_156] : memref<336x8xbf16, #tpu.memory_space<vmem>>, vector<288x8xbf16>
    %c64 = arith.constant 64 : index
    %c0_157 = arith.constant 0 : index
    %142 = vector.load %arg4[%c64, %c0_157] : memref<72x8xbf16, #tpu.memory_space<vmem>>, vector<8x8xbf16>
    %cst_158 = arith.constant dense<0.000000e+00> : vector<288x8xf32>
    %143 = tpu.matmul %141, %142, %cst_158 {dimension_numbers = #tpu.dot_dimension_numbers<[1], [0], [0], [1], [0, 0, 1, 1], [], []>} : vector<288x8xbf16>, vector<8x8xbf16>, vector<288x8xf32> -> vector<288x8xf32>
    %144 = arith.addf %140, %143 : vector<288x8xf32>
    %c0_159 = arith.constant 0 : index
    %c0_160 = arith.constant 0 : index
    %145 = vector.load %arg9[%c0_159, %c0_160] : memref<288x8xf32, #tpu.memory_space<vmem>>, vector<288x8xf32>
    tpu.vector_store %arg9[%c0_159, %c0_160], %144 {strides = array<i32>} : memref<288x8xf32, #tpu.memory_space<vmem>>, vector<288x8xf32>,
    %c0_161 = arith.constant 0 : index
    %c0_162 = arith.constant 0 : index
    %146 = tpu.strided_load %arg9[%c0_161, %c0_162] {strides = array<i32: 2, 1>} : memref<288x8xf32, #tpu.memory_space<vmem>>, vector<8x8xf32>
    %c1_163 = arith.constant 1 : index
    %c0_164 = arith.constant 0 : index
    %147 = tpu.strided_load %arg9[%c1_163, %c0_164] {strides = array<i32: 2, 1>} : memref<288x8xf32, #tpu.memory_space<vmem>>, vector<8x8xf32>
    %148 = arith.addf %146, %147 : vector<8x8xf32>
    %c18_165 = arith.constant 18 : index
    %c0_166 = arith.constant 0 : index
    %149 = tpu.strided_load %arg9[%c18_165, %c0_166] {strides = array<i32: 2, 1>} : memref<288x8xf32, #tpu.memory_space<vmem>>, vector<8x8xf32>
    %150 = arith.addf %148, %149 : vector<8x8xf32>
    %c19_167 = arith.constant 19 : index
    %c0_168 = arith.constant 0 : index
    %151 = tpu.strided_load %arg9[%c19_167, %c0_168] {strides = array<i32: 2, 1>} : memref<288x8xf32, #tpu.memory_space<vmem>>, vector<8x8xf32>
    %152 = arith.addf %150, %151 : vector<8x8xf32>
    %c36_169 = arith.constant 36 : index
    %c0_170 = arith.constant 0 : index
    %153 = tpu.strided_load %arg9[%c36_169, %c0_170] {strides = array<i32: 2, 1>} : memref<288x8xf32, #tpu.memory_space<vmem>>, vector<8x8xf32>
    %c37_171 = arith.constant 37 : index
    %c0_172 = arith.constant 0 : index
    %154 = tpu.strided_load %arg9[%c37_171, %c0_172] {strides = array<i32: 2, 1>} : memref<288x8xf32, #tpu.memory_space<vmem>>, vector<8x8xf32>
    %155 = arith.addf %153, %154 : vector<8x8xf32>
    %c54 = arith.constant 54 : index
    %c0_173 = arith.constant 0 : index
    %156 = tpu.strided_load %arg9[%c54, %c0_173] {strides = array<i32: 2, 1>} : memref<288x8xf32, #tpu.memory_space<vmem>>, vector<8x8xf32>
    %157 = arith.addf %155, %156 : vector<8x8xf32>
    %c55 = arith.constant 55 : index
    %c0_174 = arith.constant 0 : index
    %158 = tpu.strided_load %arg9[%c55, %c0_174] {strides = array<i32: 2, 1>} : memref<288x8xf32, #tpu.memory_space<vmem>>, vector<8x8xf32>
    %159 = arith.addf %157, %158 : vector<8x8xf32>
    %c72 = arith.constant 72 : index
    %c0_175 = arith.constant 0 : index
    %160 = tpu.strided_load %arg9[%c72, %c0_175] {strides = array<i32: 2, 1>} : memref<288x8xf32, #tpu.memory_space<vmem>>, vector<8x8xf32>
    %c73 = arith.constant 73 : index
    %c0_176 = arith.constant 0 : index
    %161 = tpu.strided_load %arg9[%c73, %c0_176] {strides = array<i32: 2, 1>} : memref<288x8xf32, #tpu.memory_space<vmem>>, vector<8x8xf32>
    %162 = arith.addf %160, %161 : vector<8x8xf32>
    %c90 = arith.constant 90 : index
    %c0_177 = arith.constant 0 : index
    %163 = tpu.strided_load %arg9[%c90, %c0_177] {strides = array<i32: 2, 1>} : memref<288x8xf32, #tpu.memory_space<vmem>>, vector<8x8xf32>
    %164 = arith.addf %162, %163 : vector<8x8xf32>
    %c91 = arith.constant 91 : index
    %c0_178 = arith.constant 0 : index
    %165 = tpu.strided_load %arg9[%c91, %c0_178] {strides = array<i32: 2, 1>} : memref<288x8xf32, #tpu.memory_space<vmem>>, vector<8x8xf32>
    %166 = arith.addf %164, %165 : vector<8x8xf32>
    %c108 = arith.constant 108 : index
    %c0_179 = arith.constant 0 : index
    %167 = tpu.strided_load %arg9[%c108, %c0_179] {strides = array<i32: 2, 1>} : memref<288x8xf32, #tpu.memory_space<vmem>>, vector<8x8xf32>
    %c109 = arith.constant 109 : index
    %c0_180 = arith.constant 0 : index
    %168 = tpu.strided_load %arg9[%c109, %c0_180] {strides = array<i32: 2, 1>} : memref<288x8xf32, #tpu.memory_space<vmem>>, vector<8x8xf32>
    %169 = arith.addf %167, %168 : vector<8x8xf32>
    %c126 = arith.constant 126 : index
    %c0_181 = arith.constant 0 : index
    %170 = tpu.strided_load %arg9[%c126, %c0_181] {strides = array<i32: 2, 1>} : memref<288x8xf32, #tpu.memory_space<vmem>>, vector<8x8xf32>
    %171 = arith.addf %169, %170 : vector<8x8xf32>
    %c127 = arith.constant 127 : index
    %c0_182 = arith.constant 0 : index
    %172 = tpu.strided_load %arg9[%c127, %c0_182] {strides = array<i32: 2, 1>} : memref<288x8xf32, #tpu.memory_space<vmem>>, vector<8x8xf32>
    %173 = arith.addf %171, %172 : vector<8x8xf32>
    %c144 = arith.constant 144 : index
    %c0_183 = arith.constant 0 : index
    %174 = tpu.strided_load %arg9[%c144, %c0_183] {strides = array<i32: 2, 1>} : memref<288x8xf32, #tpu.memory_space<vmem>>, vector<8x8xf32>
    %c145 = arith.constant 145 : index
    %c0_184 = arith.constant 0 : index
    %175 = tpu.strided_load %arg9[%c145, %c0_184] {strides = array<i32: 2, 1>} : memref<288x8xf32, #tpu.memory_space<vmem>>, vector<8x8xf32>
    %176 = arith.addf %174, %175 : vector<8x8xf32>
    %c162 = arith.constant 162 : index
    %c0_185 = arith.constant 0 : index
    %177 = tpu.strided_load %arg9[%c162, %c0_185] {strides = array<i32: 2, 1>} : memref<288x8xf32, #tpu.memory_space<vmem>>, vector<8x8xf32>
    %178 = arith.addf %176, %177 : vector<8x8xf32>
    %c163 = arith.constant 163 : index
    %c0_186 = arith.constant 0 : index
    %179 = tpu.strided_load %arg9[%c163, %c0_186] {strides = array<i32: 2, 1>} : memref<288x8xf32, #tpu.memory_space<vmem>>, vector<8x8xf32>
    %180 = arith.addf %178, %179 : vector<8x8xf32>
    %c180 = arith.constant 180 : index
    %c0_187 = arith.constant 0 : index
    %181 = tpu.strided_load %arg9[%c180, %c0_187] {strides = array<i32: 2, 1>} : memref<288x8xf32, #tpu.memory_space<vmem>>, vector<8x8xf32>
    %c181 = arith.constant 181 : index
    %c0_188 = arith.constant 0 : index
    %182 = tpu.strided_load %arg9[%c181, %c0_188] {strides = array<i32: 2, 1>} : memref<288x8xf32, #tpu.memory_space<vmem>>, vector<8x8xf32>
    %183 = arith.addf %181, %182 : vector<8x8xf32>
    %c198 = arith.constant 198 : index
    %c0_189 = arith.constant 0 : index
    %184 = tpu.strided_load %arg9[%c198, %c0_189] {strides = array<i32: 2, 1>} : memref<288x8xf32, #tpu.memory_space<vmem>>, vector<8x8xf32>
    %185 = arith.addf %183, %184 : vector<8x8xf32>
    %c199 = arith.constant 199 : index
    %c0_190 = arith.constant 0 : index
    %186 = tpu.strided_load %arg9[%c199, %c0_190] {strides = array<i32: 2, 1>} : memref<288x8xf32, #tpu.memory_space<vmem>>, vector<8x8xf32>
    %187 = arith.addf %185, %186 : vector<8x8xf32>
    %c216 = arith.constant 216 : index
    %c0_191 = arith.constant 0 : index
    %188 = tpu.strided_load %arg9[%c216, %c0_191] {strides = array<i32: 2, 1>} : memref<288x8xf32, #tpu.memory_space<vmem>>, vector<8x8xf32>
    %c217 = arith.constant 217 : index
    %c0_192 = arith.constant 0 : index
    %189 = tpu.strided_load %arg9[%c217, %c0_192] {strides = array<i32: 2, 1>} : memref<288x8xf32, #tpu.memory_space<vmem>>, vector<8x8xf32>
    %190 = arith.addf %188, %189 : vector<8x8xf32>
    %c234 = arith.constant 234 : index
    %c0_193 = arith.constant 0 : index
    %191 = tpu.strided_load %arg9[%c234, %c0_193] {strides = array<i32: 2, 1>} : memref<288x8xf32, #tpu.memory_space<vmem>>, vector<8x8xf32>
    %192 = arith.addf %190, %191 : vector<8x8xf32>
    %c235 = arith.constant 235 : index
    %c0_194 = arith.constant 0 : index
    %193 = tpu.strided_load %arg9[%c235, %c0_194] {strides = array<i32: 2, 1>} : memref<288x8xf32, #tpu.memory_space<vmem>>, vector<8x8xf32>
    %194 = arith.addf %192, %193 : vector<8x8xf32>
    %c252 = arith.constant 252 : index
    %c0_195 = arith.constant 0 : index
    %195 = tpu.strided_load %arg9[%c252, %c0_195] {strides = array<i32: 2, 1>} : memref<288x8xf32, #tpu.memory_space<vmem>>, vector<8x8xf32>
    %c253 = arith.constant 253 : index
    %c0_196 = arith.constant 0 : index
    %196 = tpu.strided_load %arg9[%c253, %c0_196] {strides = array<i32: 2, 1>} : memref<288x8xf32, #tpu.memory_space<vmem>>, vector<8x8xf32>
    %197 = arith.addf %195, %196 : vector<8x8xf32>
    %c270 = arith.constant 270 : index
    %c0_197 = arith.constant 0 : index
    %198 = tpu.strided_load %arg9[%c270, %c0_197] {strides = array<i32: 2, 1>} : memref<288x8xf32, #tpu.memory_space<vmem>>, vector<8x8xf32>
    %199 = arith.addf %197, %198 : vector<8x8xf32>
    %c271 = arith.constant 271 : index
    %c0_198 = arith.constant 0 : index
    %200 = tpu.strided_load %arg9[%c271, %c0_198] {strides = array<i32: 2, 1>} : memref<288x8xf32, #tpu.memory_space<vmem>>, vector<8x8xf32>
    %201 = arith.addf %199, %200 : vector<8x8xf32>
    %202 = tpu.concatenate %152, %159, %166, %173, %180, %187, %194, %201 in 0 : vector<8x8xf32>, vector<8x8xf32>, vector<8x8xf32>, vector<8x8xf32>, vector<8x8xf32>, vector<8x8xf32>, vector<8x8xf32>, vector<8x8xf32> -> vector<64x8xf32>
    %c0_199 = arith.constant 0 : index
    %c0_200 = arith.constant 0 : index
    %203 = vector.load %arg6[%c0_199, %c0_200] : memref<1x8xf32, #tpu.memory_space<vmem>>, vector<1x8xf32>
    %204 = vector.broadcast %203 : vector<1x8xf32> to vector<64x8xf32>
    %205 = arith.addf %202, %204 : vector<64x8xf32>
    %c0_201 = arith.constant 0 : index
    %c0_202 = arith.constant 0 : index
    %c0_203 = arith.constant 0 : index
    %206 = vector.load %arg7[%c0_201, %c0_202, %c0_203] : memref<1x64x8xf32, #tpu.memory_space<vmem>>, vector<1x64x8xf32>
    %207 = vector.shape_cast %206 : vector<1x64x8xf32> to vector<64x8xf32>
    %208 = vector.shape_cast %205 : vector<64x8xf32> to vector<1x64x8xf32>
    tpu.vector_store %arg7[%c0_201, %c0_202, %c0_203], %208 {strides = array<i32>} : memref<1x64x8xf32, #tpu.memory_space<vmem>>, vector<1x64x8xf32>,
    return
  }
  func.func @transform_0(%arg0: i32) -> (i32, i32, i32) {
    %c0_i32 = arith.constant 0 : i32
    %c0_i32_0 = arith.constant 0 : i32
    %c0_i32_1 = arith.constant 0 : i32
    return %arg0, %c0_i32, %c0_i32_0 : i32, i32, i32
  }
  func.func @transform_1(%arg0: i32) -> (i32, i32) {
    %c0_i32 = arith.constant 0 : i32
    %c0_i32_0 = arith.constant 0 : i32
    %c0_i32_1 = arith.constant 0 : i32
    return %c0_i32, %c0_i32_0 : i32, i32
  }
  func.func @transform_2(%arg0: i32) -> (i32, i32) {
    %c0_i32 = arith.constant 0 : i32
    %c0_i32_0 = arith.constant 0 : i32
    %c0_i32_1 = arith.constant 0 : i32
    return %c0_i32, %c0_i32_0 : i32, i32
  }
  func.func @transform_3(%arg0: i32) -> (i32, i32) {
    %c0_i32 = arith.constant 0 : i32
    %c0_i32_0 = arith.constant 0 : i32
    %c0_i32_1 = arith.constant 0 : i32
    return %c0_i32, %c0_i32_0 : i32, i32
  }
  func.func @transform_4(%arg0: i32) -> (i32, i32) {
    %c0_i32 = arith.constant 0 : i32
    %c0_i32_0 = arith.constant 0 : i32
    %c0_i32_1 = arith.constant 0 : i32
    return %c0_i32, %c0_i32_0 : i32, i32
  }
  func.func @transform_5(%arg0: i32) -> (i32, i32) {
    %c0_i32 = arith.constant 0 : i32
    %c0_i32_0 = arith.constant 0 : i32
    %c0_i32_1 = arith.constant 0 : i32
    return %c0_i32, %c0_i32_0 : i32, i32
  }
  func.func @transform_6(%arg0: i32) -> (i32, i32, i32) {
    %c0_i32 = arith.constant 0 : i32
    %c0_i32_0 = arith.constant 0 : i32
    %c0_i32_1 = arith.constant 0 : i32
    return %arg0, %c0_i32, %c0_i32_0 : i32, i32, i32
  }
}

</mosaic_0001>

<bundles_post_ra>
// kernel: dblock_optimized_forward.1
= control target key start
LH: loop header
LB: loop body
LE: loop exit
PB: predicated region body
PF: predicated region fallthrough
CT: control target
= control target key end

     0   :  { %s12328_s21 = smov 0   ;;  %s15551_s0 = inlined_call_operand.vmem [shape: bf16[2,328,4], index: 0, kind: input, shape index: {}]   ;;  %s15552_s1 = inlined_call_operand.vmem [shape: bf16[36,8], index: 1, kind: input, shape index: {}]   ;;  %s15553_s2 = inlined_call_operand.vmem [shape: f32[1,8], index: 2, kind: input, shape index: {}]   ;;  %s15554_s3 = inlined_call_operand.vmem [shape: bf16[72,8], index: 3, kind: input, shape index: {}]   ;;  %s15555_s4 = inlined_call_operand.vmem [shape: bf16[4,8], index: 4, kind: input, shape index: {}]   ;;  %s15556_s5 = inlined_call_operand.vmem [shape: f32[1,8], index: 5, kind: input, shape index: {}]   ;;  %s15557_s6 = inlined_call_operand.vmem [shape: f32[2,64,8], index: 6, kind: output, shape index: {}]  }
   0x1 LB: > { %s10204_s22 = sadd.s32 4294967295, %s12290_s21   ;;  %p10208_p0 = scmp.ge.s32.totalorder %s12290_s21, 1  ;;  %s12290_s21 = sphi %s12328_s21, %s16_s21  }
   0x2   : > { %p212_p1 = scmp.lt.s32.totalorder %s12290_s21, 3 }
   0x4   : > { %p213_p2 = pnand %p10208_p0, %p212_p1 }
   0x5   : > { %p242_p3 = scmp.lt.s32.totalorder (!%p213_p2), %s10204_s22, 1 }
   0x6   : > { %216 = sbr.rel (%p213_p2) target bundleno = 1693 (0x69d), region = 44 }
   0xb   : > { %v289_v0 = vld [vmem:[%s15552_s1] sm:$0x3]  ;;  %vm435_vm0 = vcmask 1041408   ;;  %v2029_v2 = vld [vmem:[%s15552_s1 + $0x8] sm:$0x3]  ;;  %s15559_s22 = smov (!%p242_p3, %s10204_s22), 1 }
   0xc   : > { %v437_v1 = vsel %vm435_vm0, %v289_v0, 0  ;;  %v612_v3 = vld [vmem:[%s15552_s1] sm:$0xc]  ;;  %v2349_v4 = vsel %vm435_vm0, %v2029_v2, 0  ;;  %v1160_v6 = vld [vmem:[%s15552_s1 + $0x4] sm:$0x3] }
   0xd   : > { %446 = vmatpush.bf16.msra.mxu0 %v437_v1  ;;  %12267 = vmatpush.bf16.msra.mxu3 %v437_v1  ;;  %v856_v5 = vunpack.c.l.b16 %v612_v3  ;;  %v1347_v7 = vsel %vm435_vm0, %v1160_v6, 0  ;;  %s12270_s7 = smul.u32 164, %s15559_s22  ;;  %vm380_vm1 = vcmask 31744   ;;  %vm1254_vm2 = vcmask 1046528   ;;  %s11924_s27 = sshll.u32 %s15559_s22, 6 }
   0xe   : > { %1356 = vmatpush.bf16.msra.mxu2 %v1347_v7  ;;  %vm706_vm3 = vsmask.f32 7424  ;;  %vm538_vm4 = vcmask 64512   ;;  %vm2123_vm5 = vsmask.f32 6400  ;;  %vm2689_vm6 = vcmask 1045504  }
   0xf   : > { %v857_v8 = vpack.c.b16 %v856_v5, %v856_v5  ;;  %s12357_s10 = scalar_lea.vmem %s15551_s0, %s12270_s7  ;;  %vm5830_vm7 = vcmask 1043456   ;;  %vm3558_vm8 = vsmask.f32 5376  ;;  %vm4128_vm9 = vcmask 1044480   ;;  %s15453_s7 = scalar_lea.vmem %s15557_s6, %s11924_s27 }
  0x10   : > { %v11925_v10 = vld [vmem:[%s12357_s10] sm:$0xff]  ;;  %v11939_v11 = vld [vmem:[%s12357_s10 + $0x70] sm:$0xff]  ;;  %v11944_v14 = vld [vmem:[%s12357_s10 + $0x8] sm:$0xff]  ;;  %vm4867_vm10 = vcmask 60416  }
  0x11   : > { %2358 = vmatpush.bf16.msrb.mxu0 %v2349_v4  ;;  %v858_v9 = vrot.slane %v857_v8, 2  ;;  %v11943_v12 = vld [vmem:[%s12357_s10] sm:$0xff]  ;;  %10298 = vmatmul.msk.bf16.vlgmr.msra.gmra.mxu3 %vm380_vm1, %v11939_v11  ;;  %v11962_v19 = vld [vmem:[%s12357_s10 + $0x8] sm:$0xff]  ;;  %v715_v21 = vshll.u32 %v11944_v14, 16  ;;  %v11945_v29 = vld [vmem:[%s12357_s10 + $0x10] sm:$0xff]  ;;  %v719_v33 = vshrl.u32 %v11944_v14, 16 }
  0x12   : > { %v10394_v15 = vld [vmem:[%s12357_s10] sm:$0xe]  ;;  %v11961_v16 = vld [vmem:[%s12357_s10] sm:$0xf0]  ;;  %10284 = vmatmul.msk.bf16.vlgmr.msra.gmra.mxu0 %vm380_vm1, %v11925_v10  ;;  %v708_v17 = vshrl.u32 %v11943_v12, 16  ;;  %v710_v18 = vshll.u32 %v11943_v12, 16 }
  0x13   : > { %v914_v13 = vsel %vm435_vm0, %v858_v9, 0  ;;  %v10395_v20 = vor.u32 %v11961_v16, %v10394_v15  ;;  %v1256_v24 = vrot.slane %v11962_v19, 1  ;;  %v717_v25 = vrot.slane %v715_v21, 1  ;;  %v11963_v30 = vld [vmem:[%s12357_s10 + $0x10] sm:$0xff]  ;;  %v11926_v31 = vld [vmem:[%s12357_s10 + $0x8] sm:$0xff]  ;;  %v11940_v32 = vld [vmem:[%s12357_s10 + $0x78] sm:$0xff] }
  0x14   : > { %923 = vmatpush.bf16.msra.mxu1 %v914_v13  ;;  %12268 = vmatpush.bf16.msrb.mxu3 %v914_v13  ;;  %v712_v22 = vrot.slane %v710_v18, 1  ;;  %v723_v34 = vshll.u32 %v11945_v29, 16  ;;  %v1258_v35 = vrot.slane %v11963_v30, 1  ;;  %v11946_v40 = vld [vmem:[%s12357_s10 + $0x18] sm:$0xff]  ;;  %v11927_v42 = vld [vmem:[%s12357_s10 + $0x10] sm:$0xff]  ;;  %v11941_v43 = vld [vmem:[%s12357_s10 + $0x80] sm:$0xff] }
  0x15   : > { %v1255_v23 = vrot.slane %v10395_v20, 1  ;;  %v721_v36 = vor.u32 %v719_v33, %v717_v25  ;;  %v11964_v41 = vld [vmem:[%s12357_s10 + $0x18] sm:$0xff]  ;;  %v727_v44 = vshrl.u32 %v11945_v29, 16  ;;  %v731_v45 = vshll.u32 %v11946_v40, 16  ;;  %v11947_v51 = vld [vmem:[%s12357_s10 + $0x20] sm:$0xff]  ;;  %v11942_v54 = vld [vmem:[%s12357_s10 + $0x88] sm:$0xff] }
  0x16   : > { %v713_v26 = vor.u32 %v712_v22, %v708_v17  ;;  %v725_v37 = vrot.slane %v723_v34, 1  ;;  %v1259_v38 = vsel %vm1254_vm2, %v1256_v24, %v1258_v35  ;;  %v1260_v46 = vrot.slane %v11964_v41, 1  ;;  %v11965_v52 = vld [vmem:[%s12357_s10 + $0x20] sm:$0xff]  ;;  %v11928_v53 = vld [vmem:[%s12357_s10 + $0x18] sm:$0xff]  ;;  %v11957_v57 = vld [vmem:[%s12357_s10 + $0x70] sm:$0xff] }
  0x17   : > { %v1257_v27 = vsel %vm1254_vm2, %v1255_v23, %v1256_v24  ;;  %v733_v48 = vrot.slane %v731_v45, 1  ;;  %v735_v55 = vshrl.u32 %v11946_v40, 16  ;;  %v739_v56 = vshll.u32 %v11947_v51, 16  ;;  %v11958_v61 = vld [vmem:[%s12357_s10 + $0x78] sm:$0xff]  ;;  %v11948_v4 = vld [vmem:[%s12357_s10 + $0x28] sm:$0xff]  ;;  %v11929_v8 = vld [vmem:[%s12357_s10 + $0x20] sm:$0xff] }
  0x18   : > { %12269 = vmatpush.bf16.msra.mxu3 %v1347_v7  ;;  %10464 = vmatmul.msk.bf16.vlgmr.msra.gmra.mxu2 %vm380_vm1, %v1257_v27  ;;  %v718_v28 = vsel %vm706_vm3, %v713_v26, %v717_v25  ;;  %v726_v39 = vsel %vm706_vm3, %v721_v36, %v725_v37  ;;  %v729_v47 = vor.u32 %v727_v44, %v725_v37  ;;  %v1262_v58 = vrot.slane %v11965_v52, 1  ;;  %v11966_v7 = vld [vmem:[%s12357_s10 + $0x28] sm:$0xff]  ;;  %v11959_v15 = vld [vmem:[%s12357_s10 + $0x80] sm:$0xff]  ;;  %v11949_v20 = vld [vmem:[%s12357_s10 + $0x30] sm:$0xff] }
  0x19   : > { %10374 = vmatmul.msk.bf16.vlgmr.msra.gmra.mxu1 %vm380_vm1, %v718_v28  ;;  %v1261_v49 = vsel %vm1254_vm2, %v1258_v35, %v1260_v46  ;;  %v737_v59 = vor.u32 %v735_v55, %v733_v48  ;;  %v741_v60 = vrot.slane %v739_v56, 1  ;;  %v819_v62 = vshll.u32 %v11957_v57, 16  ;;  %v11967_v23 = vld [vmem:[%s12357_s10 + $0x30] sm:$0xff]  ;;  %v11930_v24 = vld [vmem:[%s12357_s10 + $0x28] sm:$0xff]  ;;  %v11950_v36 = vld [vmem:[%s12357_s10 + $0x38] sm:$0xff] }
  0x1a   : > { %v734_v50 = vsel %vm706_vm3, %v729_v47, %v733_v48  ;;  %v1263_v63 = vsel %vm1254_vm2, %v1260_v46, %v1262_v58  ;;  %v823_v2 = vshrl.u32 %v11957_v57, 16  ;;  %v827_v3 = vshll.u32 %v11958_v61, 16  ;;  %v611_v40 = vld [vmem:[%s12357_s10 + $0x90] sm:$0x1]  ;;  %v11969_v57 = vld [vmem:[%s12357_s10 + $0x40] sm:$0xff] }
  0x1b   : > { %v742_v0 = vsel %vm706_vm3, %v737_v59, %v741_v60  ;;  %v12404_v1 = vrot.slane %v819_v62, 1  ;;  %v743_v9 = vshrl.u32 %v11947_v51, 16  ;;  %v747_v10 = vshll.u32 %v11948_v4, 16  ;;  %v11931_v41 = vld [vmem:[%s12357_s10 + $0x30] sm:$0xff] }
  0x1c   : > { %v829_v6 = vrot.slane %v827_v3, 1  ;;  %v1264_v12 = vrot.slane %v11966_v7, 1  ;;  %v831_v18 = vshrl.u32 %v11958_v61, 16  ;;  %v835_v19 = vshll.u32 %v11959_v15, 16  ;;  %v1593_v3 = vld [vmem:[%s15552_s1 + $0x4] sm:$0xc] }
  0x1d   : > { %v825_v5 = vor.u32 %v823_v2, %v12404_v1  ;;  %v745_v13 = vor.u32 %v743_v9, %v741_v60  ;;  %v749_v14 = vrot.slane %v747_v10, 1  ;;  %v751_v25 = vshrl.u32 %v11948_v4, 16  ;;  %v11976_v7 = vld [vmem:[%s12357_s10 + $0x78] sm:$0xff]  ;;  %v11952_v10 = vld [vmem:[%s12357_s10 + $0x48] sm:$0xff] }
  0x1e   : > { %v1265_v16 = vsel %vm1254_vm2, %v1262_v58, %v1264_v12  ;;  %v833_v21 = vor.u32 %v831_v18, %v829_v6  ;;  %v837_v22 = vrot.slane %v835_v19, 1  ;;  %v755_v26 = vshll.u32 %v11949_v20, 16  ;;  %v11932_v58 = vld [vmem:[%s12357_s10 + $0x38] sm:$0xff] }
  0x1f   : > { %v830_v11 = vsel %vm706_vm3, %v825_v5, %v829_v6  ;;  %v750_v17 = vsel %vm706_vm3, %v745_v13, %v749_v14  ;;  %v1266_v28 = vrot.slane %v11967_v23, 1  ;;  %v753_v29 = vor.u32 %v751_v25, %v749_v14  ;;  %v12454_v6 = vld [vmem:[%s12357_s10 + $0x70] sm:$0xff]  ;;  %v12462_v14 = vld [vmem:[%s12357_s10 + $0x48] sm:$0xff] }
  0x20   : > { %v838_v27 = vsel %vm706_vm3, %v833_v21, %v837_v22  ;;  %v757_v30 = vrot.slane %v755_v26, 1  ;;  %v839_v34 = vshrl.u32 %v11959_v15, 16  ;;  %v686_v45 = vunpack.c.l.b16 %v611_v40  ;;  %v11933_v15 = vld [vmem:[%s12357_s10 + $0x40] sm:$0xff]  ;;  %v2595_v23 = vld [vmem:[%s15552_s1 + $0x8] sm:$0xc] }
  0x21   : > { %10299 = vmatmul.msk.bf16.gmra.mxu3 %vm380_vm1, %v11940_v32  ;;  %v1267_v32 = vsel %vm1254_vm2, %v1264_v12, %v1266_v28  ;;  %v767_v59 = vshrl.u32 %v11950_v36, 16  ;;  %v1270_v62 = vrot.slane %v11969_v57, 1  ;;  %v1725_v4 = vunpack.c.l.b16 %v1593_v3  ;;  %v3032_v26 = vld [vmem:[%s15552_s1 + $0xc] sm:$0x3] }
  0x22   : > { %10285 = vmatmul.msk.bf16.gmra.mxu0 %vm380_vm1, %v11926_v31  ;;  %v11960_v31 = vld [vmem:[%s12357_s10 + $0x88] sm:$0xff]  ;;  %v758_v33 = vsel %vm706_vm3, %v753_v29, %v757_v30  ;;  %v841_v37 = vor.u32 %v839_v34, %v837_v22  ;;  %v1284_v12 = vrot.slane %v11976_v7, 1  ;;  %v3218_v29 = vsel %vm435_vm0, %v3032_v26, 0  ;;  %v12484_v34 = vld [vmem:[%s12357_s10 + $0x80] sm:$0xff] }
  0x23   : > { %v843_v35 = vshll.u32 %v11960_v31, 16  ;;  %v847_v52 = vshrl.u32 %v11960_v31, 16  ;;  %3227 = vmatpush.bf16.msrb.mxu2 %v3218_v29  ;;  %v1286_v40 = vrot.slane %v12484_v34, 1 }
  0x28   : > { %10465 = vmatmul.msk.bf16.gmra.mxu2 %vm380_vm1, %v1259_v38  ;;  %v845_v38 = vrot.slane %v843_v35, 1 }
  0x29   : > { %10375 = vmatmul.msk.bf16.gmra.mxu1 %vm380_vm1, %v726_v39  ;;  %v11968_v39 = vld [vmem:[%s12357_s10 + $0x38] sm:$0xff] }
  0x2a   : > { %v846_v44 = vsel %vm706_vm3, %v841_v37, %v845_v38  ;;  %v1268_v46 = vrot.slane %v11968_v39, 1  ;;  %v849_v55 = vor.u32 %v847_v52, %v845_v38  ;;  %v12491_v39 = vld [vmem:[%s12357_s10 + $0x50] sm:$0xff] }
  0x2c   : > { %v1271_v2 = vsel %vm1254_vm2, %v1268_v46, %v1270_v62 }
  0x31   : > { %10300 = vmatmul.msk.bf16.gmra.mxu3 %vm380_vm1, %v11941_v43  ;;  %v763_v43 = vshll.u32 %v11950_v36, 16 }
  0x32   : > { %10286 = vmatmul.msk.bf16.gmra.mxu0 %vm380_vm1, %v11927_v42  ;;  %v759_v42 = vshrl.u32 %v11949_v20, 16  ;;  %v1272_v20 = vrot.slane %v12462_v14, 1 }
  0x33   : > { %v765_v48 = vrot.slane %v763_v43, 1 }
  0x34   : > { %v761_v47 = vor.u32 %v759_v42, %v757_v30  ;;  %v1273_v25 = vsel %vm1254_vm2, %v1270_v62, %v1272_v20 }
  0x36   : > { %v766_v51 = vsel %vm706_vm3, %v761_v47, %v765_v48 }
  0x38   : > { %10466 = vmatmul.msk.bf16.gmra.mxu2 %vm380_vm1, %v1261_v49  ;;  %v705_v49 = vpack.c.b16 %v686_v45, %v686_v45  ;;  %v783_v45 = vshrl.u32 %v11952_v10, 16 }
  0x39   : > { %10376 = vmatmul.msk.bf16.gmra.mxu1 %vm380_vm1, %v734_v50  ;;  %v1269_v50 = vsel %vm1254_vm2, %v1266_v28, %v1268_v46  ;;  %v787_v46 = vshll.u32 %v12491_v39, 16 }
  0x41   : > { %10301 = vmatmul.msk.bf16.gmra.mxu3 %vm380_vm1, %v11942_v54  ;;  %v11951_v54 = vld [vmem:[%s12357_s10 + $0x40] sm:$0xff] }
  0x42   : > { %10287 = vmatmul.msk.bf16.gmra.mxu0 %vm380_vm1, %v11928_v53  ;;  %v851_v53 = vshll.u32 %v705_v49, 16  ;;  %v771_v60 = vshll.u32 %v11951_v54, 16  ;;  %v1287_v49 = vsel %vm1254_vm2, %v1284_v12, %v1286_v40 }
  0x44   : > { %v853_v56 = vrot.slane %v851_v53, 1 }
  0x46   : > { %v854_v61 = vsel %vm706_vm3, %v849_v55, %v853_v56  ;;  %v789_v55 = vrot.slane %v787_v46, 1 }
  0x48   : > { %10467 = vmatmul.msk.bf16.gmra.mxu2 %vm380_vm1, %v1263_v63  ;;  %v769_v63 = vor.u32 %v767_v59, %v765_v48 }
  0x49   : > { %10377 = vmatmul.msk.bf16.gmra.mxu1 %vm380_vm1, %v742_v0  ;;  %v773_v0 = vrot.slane %v771_v60, 1 }
  0x4b   : > { %v774_v5 = vsel %vm706_vm3, %v769_v63, %v773_v0  ;;  %v12512_v63 = vld [vmem:[%s12357_s10 + $0x88] sm:$0xff] }
  0x4c   : > { %v1288_v7 = vrot.slane %v12512_v63, 1 }
  0x51   : > { %10388 = vmatmul.msk.bf16.vlgmr.msrb.gmra.mxu3 %vm380_vm1, %v830_v11  ;;  %v1282_v11 = vrot.slane %v12454_v6, 1 }
  0x52   : > { %10288 = vmatmul.msk.bf16.gmra.mxu0 %vm380_vm1, %v11929_v8  ;;  %v1726_v8 = vpack.c.b16 %v1725_v4, %v1725_v4 }
  0x53   : > { %v1285_v19 = vsel %vm1254_vm2, %v1282_v11, %v1284_v12  ;;  %v11935_v12 = vld [vmem:[%s12357_s10 + $0x50] sm:$0xff] }
  0x54   : > { %v1727_v9 = vrot.slane %v1726_v8, 2  ;;  %v12523_v8 = vld [vmem:[%s12357_s10 + $0x58] sm:$0xff] }
  0x56   : > { %v1783_v13 = vsel %vm435_vm0, %v1727_v9, 0 }
  0x57   : > { %1792 = vmatpush.bf16.msrb.mxu3 %v1783_v13  ;;  %v791_v13 = vshrl.u32 %v12491_v39, 16 }
  0x58   : > { %10468 = vmatmul.msk.bf16.gmra.mxu2 %vm380_vm1, %v1265_v16  ;;  %v775_v16 = vshrl.u32 %v11951_v54, 16 }
  0x59   : > { %10378 = vmatmul.msk.bf16.gmra.mxu1 %vm380_vm1, %v750_v17  ;;  %v779_v17 = vshll.u32 %v11952_v10, 16 }
  0x5a   : > { %v777_v21 = vor.u32 %v775_v16, %v773_v0 }
  0x5b   : > { %v781_v22 = vrot.slane %v779_v17, 1  ;;  %v1289_v17 = vsel %vm1254_vm2, %v1286_v40, %v1288_v7  ;;  %v12549_v40 = vld [vmem:[%s12357_s10 + $0x60] sm:$0xff] }
  0x5d   : > { %v782_v31 = vsel %vm706_vm3, %v777_v21, %v781_v22  ;;  %v785_v54 = vor.u32 %v783_v45, %v781_v22 }
  0x5f   : > { %v790_v60 = vsel %vm706_vm3, %v785_v54, %v789_v55 }
  0x61   : > { %10389 = vmatmul.msk.bf16.gmra.mxu3 %vm380_vm1, %v838_v27 }
  0x62   : > { %10289 = vmatmul.msk.bf16.gmra.mxu0 %vm380_vm1, %v11930_v24  ;;  %v2728_v24 = vunpack.c.l.b16 %v2595_v23  ;;  %v793_v23 = vor.u32 %v791_v13, %v789_v55  ;;  %v12578_v13 = vld [vmem:[%s12357_s10 + $0x68] sm:$0xff] }
  0x64   : > { %v2729_v28 = vpack.c.b16 %v2728_v24, %v2728_v24 }
  0x66   : > { %v2730_v35 = vrot.slane %v2729_v28, 2 }
  0x68   : > { %10469 = vmatmul.msk.bf16.gmra.mxu2 %vm380_vm1, %v1267_v32  ;;  %v2786_v37 = vsel %vm435_vm0, %v2730_v35, 0 }
  0x69   : > { %10379 = vmatmul.msk.bf16.gmra.mxu1 %vm380_vm1, %v758_v33 }
  0x6a   : > { %2795 = vmatpush.bf16.msrb.mxu1 %v2786_v37 }
  0x71   : > { %10390 = vmatmul.msk.bf16.gmra.mxu3 %vm380_vm1, %v846_v44  ;;  %v11934_v44 = vld [vmem:[%s12357_s10 + $0x48] sm:$0xff] }
  0x72   : > { %10290 = vmatmul.msk.bf16.gmra.mxu0 %vm380_vm1, %v11931_v41  ;;  %v12495_v41 = vld [vmem:[%s12357_s10 + $0x50] sm:$0xff] }
  0x78   : > { %10470 = vmatmul.msk.bf16.gmra.mxu2 %vm380_vm1, %v1269_v50 }
  0x79   : > { %10380 = vmatmul.msk.bf16.gmra.mxu1 %vm380_vm1, %v766_v51  ;;  %v1274_v51 = vrot.slane %v12495_v41, 1 }
  0x7b   : > { %v1275_v57 = vsel %vm1254_vm2, %v1272_v20, %v1274_v51  ;;  %v1159_v20 = vld [vmem:[%s12357_s10 + $0x90] sm:$0x1] }
  0x7c   : > { %v1234_v26 = vunpack.c.l.b16 %v1159_v20  ;;  %v11937_v20 = vld [vmem:[%s12357_s10 + $0x60] sm:$0xff] }
  0x81   : > { %10391 = vmatmul.msk.bf16.gmra.mxu3 %vm380_vm1, %v854_v61 }
  0x82   : > { %10291 = vmatmul.msk.bf16.gmra.mxu0 %vm380_vm1, %v11932_v58 }
  0x88   : > { %10471 = vmatmul.msk.bf16.gmra.mxu2 %vm380_vm1, %v1271_v2 }
  0x89   : > { %10381 = vmatmul.msk.bf16.gmra.mxu1 %vm380_vm1, %v774_v5  ;;  %v12518_v5 = vld [vmem:[%s12357_s10 + $0x58] sm:$0xff] }
  0x8a   : > { %v795_v14 = vshll.u32 %v12518_v5, 16 }
  0x8c   : > { %v797_v24 = vrot.slane %v795_v14, 1 }
  0x8f   : > { %v448_v18 = vpop.f32.mrf.mxu0 }
  0x90   : > { %539 = vst.msk [vmem:[#allocation3] sm:$0xff] %vm538_vm4, %v448_v18 }
  0x91   : > { %10478 = vmatmul.msk.bf16.vlgmr.msra.gmra.mxu3 %vm380_vm1, %v1285_v19  ;;  %v1276_v19 = vrot.slane %v12523_v8, 1 }
  0x92   : > { %10292 = vmatmul.msk.bf16.gmra.mxu0 %vm380_vm1, %v11933_v15 }
  0x94   : > { %v518_v27 = vpop.f32.mrf.mxu3 }
  0x95   : > { %567 = vst.msk [vmem:[#allocation3 + $0xe0] sm:$0xff] %vm538_vm4, %v518_v27  ;;  %v1277_v27 = vsel %vm1254_vm2, %v1274_v51, %v1276_v19 }
  0x96   : > { %v925_v30 = vpop.f32.mrf.mxu1 }
  0x97   : > { %v1015_v32 = vld [vmem:[#allocation3] sm:$0xff]  ;;  %v450_v33 = vpop.f32.mrf.mxu0 }
  0x98   : > { %10472 = vmatmul.msk.bf16.gmra.mxu2 %vm380_vm1, %v1273_v25  ;;  %v1051_v36 = vadd.f32 %v1015_v32, %v925_v30  ;;  %540 = vst.msk [vmem:[#allocation3 + $0x8] sm:$0xff] %vm538_vm4, %v450_v33  ;;  %v798_v30 = vsel %vm706_vm3, %v793_v23, %v797_v24  ;;  %v1253_v33 = vpack.c.b16 %v1234_v26, %v1234_v26 }
  0x99   : > { %10382 = vmatmul.msk.bf16.gmra.mxu1 %vm380_vm1, %v782_v31 }
  0x9a   : > { %1087 = vst.msk [vmem:[#allocation3] sm:$0xff] %vm538_vm4, %v1051_v36  ;;  %v1290_v39 = vrot.slane %v1253_v33, 1 }
  0x9b   : > { %v1358_v38 = vpop.f32.mrf.mxu2 }
  0x9c   : > { %v520_v42 = vpop.f32.mrf.mxu3 }
  0x9d   : > { %568 = vst.msk [vmem:[#allocation3 + $0xe8] sm:$0xff] %vm538_vm4, %v520_v42 }
  0x9e   : > { %v927_v43 = vpop.f32.mrf.mxu1 }
  0x9f   : > { %v1016_v47 = vld [vmem:[#allocation3 + $0x8] sm:$0xff]  ;;  %v453_v48 = vpop.f32.mrf.mxu0 }
  0xa0   : > { %v1052_v50 = vadd.f32 %v1016_v47, %v927_v43  ;;  %541 = vst.msk [vmem:[#allocation3 + $0x10] sm:$0xff] %vm538_vm4, %v453_v48  ;;  %v11936_v43 = vld [vmem:[%s12357_s10 + $0x58] sm:$0xff]  ;;  %v1291_v48 = vsel %vm1254_vm2, %v1288_v7, %v1290_v39 }
  0xa1   : > { %v1448_v52 = vld [vmem:[#allocation3] sm:$0xff]  ;;  %10479 = vmatmul.msk.bf16.gmra.mxu3 %vm380_vm1, %v1287_v49 }
  0xa2   : > { %1088 = vst.msk [vmem:[#allocation3 + $0x8] sm:$0xff] %vm538_vm4, %v1052_v50  ;;  %v1484_v53 = vadd.f32 %v1448_v52, %v1358_v38  ;;  %10293 = vmatmul.msk.bf16.gmra.mxu0 %vm380_vm1, %v11934_v44  ;;  %v12545_v38 = vld [vmem:[%s12357_s10 + $0x60] sm:$0xff]  ;;  %v799_v44 = vshrl.u32 %v12518_v5, 16  ;;  %v1278_v50 = vrot.slane %v12549_v40, 1 }
  0xa3   : > { %v1360_v56 = vpop.f32.mrf.mxu2  ;;  %v803_v45 = vshll.u32 %v12545_v38, 16 }
  0xa4   : > { %1520 = vst.msk [vmem:[#allocation3] sm:$0xff] %vm538_vm4, %v1484_v53  ;;  %v523_v58 = vpop.f32.mrf.mxu3  ;;  %v801_v53 = vor.u32 %v799_v44, %v797_v24 }
  0xa5   : > { %569 = vst.msk [vmem:[#allocation3 + $0xf0] sm:$0xff] %vm538_vm4, %v523_v58  ;;  %v805_v54 = vrot.slane %v803_v45, 1  ;;  %v11979_v58 = vld [vmem:[%s12357_s10 + $0x8] sm:$0xf0] }
  0xa6   : > { %v930_v59 = vpop.f32.mrf.mxu1 }
  0xa7   : > { %v1017_v61 = vld [vmem:[#allocation3 + $0x10] sm:$0xff]  ;;  %v455_v62 = vpop.f32.mrf.mxu0  ;;  %v806_v63 = vsel %vm706_vm3, %v801_v53, %v805_v54 }
  0xa8   : > { %10473 = vmatmul.msk.bf16.gmra.mxu2 %vm380_vm1, %v1275_v57  ;;  %v1053_v0 = vadd.f32 %v1017_v61, %v930_v59  ;;  %542 = vst.msk [vmem:[#allocation3 + $0x18] sm:$0xff] %vm538_vm4, %v455_v62  ;;  %v1279_v57 = vsel %vm1254_vm2, %v1276_v19, %v1278_v50  ;;  %v3464_v59 = vld [vmem:[%s15552_s1 + $0xc] sm:$0xc] }
  0xa9   : > { %10383 = vmatmul.msk.bf16.gmra.mxu1 %vm380_vm1, %v790_v60  ;;  %v1449_v2 = vld [vmem:[#allocation3 + $0x8] sm:$0xff]  ;;  %v3730_v61 = vunpack.c.l.b16 %v3464_v59 }
  0xaa   : > { %1089 = vst.msk [vmem:[#allocation3 + $0x10] sm:$0xff] %vm538_vm4, %v1053_v0  ;;  %v1485_v3 = vadd.f32 %v1449_v2, %v1360_v56  ;;  %v10484_v56 = vld [vmem:[%s12357_s10 + $0x8] sm:$0xe]  ;;  %v11998_v59 = vld [vmem:[%s12357_s10 + $0x10] sm:$0xff] }
  0xab   : > { %v1363_v4 = vpop.f32.mrf.mxu2  ;;  %v3731_v5 = vpack.c.b16 %v3730_v61, %v3730_v61 }
  0xac   : > { %1521 = vst.msk [vmem:[#allocation3 + $0x8] sm:$0xff] %vm538_vm4, %v1485_v3  ;;  %v525_v9 = vpop.f32.mrf.mxu3  ;;  %v12572_v3 = vld [vmem:[%s12357_s10 + $0x10] sm:$0xff] }
  0xad   : > { %570 = vst.msk [vmem:[#allocation3 + $0xf8] sm:$0xff] %vm538_vm4, %v525_v9  ;;  %v3732_v9 = vrot.slane %v3731_v5, 2 }
  0xae   : > { %v932_v10 = vpop.f32.mrf.mxu1 }
  0xaf   : > { %v1018_v15 = vld [vmem:[#allocation3 + $0x18] sm:$0xff]  ;;  %v458_v16 = vpop.f32.mrf.mxu0 }
  0xb0   : > { %v1054_v18 = vadd.f32 %v1018_v15, %v932_v10  ;;  %543 = vst.msk [vmem:[#allocation3 + $0x20] sm:$0xff] %vm538_vm4, %v458_v16  ;;  %v1688_v15 = vrot.slane %v12572_v3, 1  ;;  %v3788_v16 = vsel %vm435_vm0, %v3732_v9, 0 }
  0xb1   : > { %v1450_v21 = vld [vmem:[#allocation3 + $0x10] sm:$0xff]  ;;  %10480 = vmatmul.msk.bf16.gmra.mxu3 %vm380_vm1, %v1289_v17  ;;  %v12584_v17 = vld [vmem:[%s12357_s10 + $0x68] sm:$0xff] }
  0xb2   : > { %1090 = vst.msk [vmem:[#allocation3 + $0x18] sm:$0xff] %vm538_vm4, %v1054_v18  ;;  %v1486_v22 = vadd.f32 %v1450_v21, %v1363_v4  ;;  %10294 = vmatmul.msk.bf16.gmra.mxu0 %vm380_vm1, %v11935_v12  ;;  %v10485_v4 = vor.u32 %v11979_v58, %v10484_v56  ;;  %3797 = vmatpush.bf16.msra.mxu3 %v3788_v16  ;;  %v807_v21 = vshrl.u32 %v12545_v38, 16  ;;  %v815_v56 = vshrl.u32 %v12578_v13, 16 }
  0xb3   : > { %v1365_v25 = vpop.f32.mrf.mxu2 }
  0xb4   : > { %1522 = vst.msk [vmem:[#allocation3 + $0x10] sm:$0xff] %vm538_vm4, %v1486_v22  ;;  %v528_v28 = vpop.f32.mrf.mxu3  ;;  %v1687_v14 = vrot.slane %v10485_v4, 1  ;;  %v811_v22 = vshll.u32 %v12578_v13, 16 }
  0xb5   : > { %571 = vst.msk [vmem:[#allocation3 + $0x100] sm:$0xff] %vm538_vm4, %v528_v28 }
  0xb6   : > { %v935_v29 = vpop.f32.mrf.mxu1 }
  0xb7   : > { %v1019_v31 = vld [vmem:[#allocation3 + $0x20] sm:$0xff]  ;;  %v460_v32 = vpop.f32.mrf.mxu0 }
  0xb8   : > { %10474 = vmatmul.msk.bf16.gmra.mxu2 %vm380_vm1, %v1277_v27  ;;  %v1055_v34 = vadd.f32 %v1019_v31, %v935_v29  ;;  %544 = vst.msk [vmem:[#allocation3 + $0x28] sm:$0xff] %vm538_vm4, %v460_v32  ;;  %v1280_v27 = vrot.slane %v12584_v17, 1  ;;  %v813_v31 = vrot.slane %v811_v22, 1  ;;  %v12634_v17 = vld [vmem:[%s12357_s10 + $0x20] sm:$0xff]  ;;  %v12033_v22 = vld [vmem:[%s12357_s10 + $0x10] sm:$0xf0] }
  0xb9   : > { %10384 = vmatmul.msk.bf16.gmra.mxu1 %vm380_vm1, %v798_v30  ;;  %v1451_v35 = vld [vmem:[#allocation3 + $0x18] sm:$0xff]  ;;  %v809_v30 = vor.u32 %v807_v21, %v805_v54 }
  0xba   : > { %1091 = vst.msk [vmem:[#allocation3 + $0x20] sm:$0xff] %vm538_vm4, %v1055_v34  ;;  %v1487_v36 = vadd.f32 %v1451_v35, %v1365_v25  ;;  %v1689_v25 = vsel %vm1254_vm2, %v1687_v14, %v1688_v15  ;;  %v1281_v33 = vsel %vm1254_vm2, %v1278_v50, %v1280_v27  ;;  %v1043_v35 = vld [vmem:[#allocation3 + $0xe0] sm:$0xff]  ;;  %v1283_v9 = vsel %vm1254_vm2, %v1280_v27, %v1282_v11 }
  0xbb   : > { %v1368_v37 = vpop.f32.mrf.mxu2  ;;  %v814_v39 = vsel %vm706_vm3, %v809_v30, %v813_v31  ;;  %v11997_v50 = vld [vmem:[%s12357_s10 + $0x8] sm:$0xf0] }
  0xbc   : > { %1523 = vst.msk [vmem:[#allocation3 + $0x18] sm:$0xff] %vm538_vm4, %v1487_v36  ;;  %v530_v41 = vpop.f32.mrf.mxu3  ;;  %v4034_v36 = vld [vmem:[%s15552_s1 + $0x10] sm:$0x3]  ;;  %v12015_v30 = vld [vmem:[%s12357_s10 + $0x8] sm:$0xf0] }
  0xbd   : > { %572 = vst.msk [vmem:[#allocation3 + $0x108] sm:$0xff] %vm538_vm4, %v530_v41  ;;  %v4221_v40 = vsel %vm435_vm0, %v4034_v36, 0 }
  0xbe   : > { %v937_v42 = vpop.f32.mrf.mxu1  ;;  %4230 = vmatpush.bf16.msra.mxu0 %v4221_v40 }
  0xbf   : > { %v1020_v46 = vld [vmem:[#allocation3 + $0x28] sm:$0xff]  ;;  %v463_v47 = vpop.f32.mrf.mxu0 }
  0xc0   : > { %v1056_v49 = vadd.f32 %v1020_v46, %v937_v42  ;;  %545 = vst.msk [vmem:[#allocation3 + $0x30] sm:$0xff] %vm538_vm4, %v463_v47 }
  0xc1   : > { %v1452_v51 = vld [vmem:[#allocation3 + $0x20] sm:$0xff]  ;;  %10481 = vmatmul.msk.bf16.gmra.mxu3 %vm380_vm1, %v1291_v48 }
  0xc2   : > { %1092 = vst.msk [vmem:[#allocation3 + $0x28] sm:$0xff] %vm538_vm4, %v1056_v49  ;;  %v1488_v52 = vadd.f32 %v1452_v51, %v1368_v37  ;;  %10295 = vmatmul.msk.bf16.gmra.mxu0 %vm380_vm1, %v11936_v43  ;;  %v12605_v43 = vld [vmem:[%s12357_s10 + $0x18] sm:$0xff]  ;;  %v10574_v49 = vld [vmem:[%s12357_s10 + $0x8] sm:$0xe] }
  0xc3   : > { %v1370_v55 = vpop.f32.mrf.mxu2  ;;  %v1690_v48 = vrot.slane %v12605_v43, 1 }
  0xc4   : > { %1524 = vst.msk [vmem:[#allocation3 + $0x20] sm:$0xff] %vm538_vm4, %v1488_v52  ;;  %v533_v60 = vpop.f32.mrf.mxu3  ;;  %v1044_v52 = vld [vmem:[#allocation3 + $0xe8] sm:$0xff] }
  0xc5   : > { %573 = vst.msk [vmem:[#allocation3 + $0x110] sm:$0xff] %vm538_vm4, %v533_v60  ;;  %v1691_v58 = vsel %vm1254_vm2, %v1688_v15, %v1690_v48  ;;  %v10575_v60 = vor.u32 %v11997_v50, %v10574_v49 }
  0xc6   : > { %v940_v62 = vpop.f32.mrf.mxu1 }
  0xc7   : > { %v1021_v0 = vld [vmem:[#allocation3 + $0x30] sm:$0xff]  ;;  %v465_v2 = vpop.f32.mrf.mxu0  ;;  %v2125_v4 = vshrl.u32 %v10575_v60, 16  ;;  %v2128_v5 = vshll.u32 %v10575_v60, 16 }
  0xc8   : > { %10475 = vmatmul.msk.bf16.gmra.mxu2 %vm380_vm1, %v1279_v57  ;;  %v1057_v7 = vadd.f32 %v1021_v0, %v940_v62  ;;  %546 = vst.msk [vmem:[#allocation3 + $0x38] sm:$0xff] %vm538_vm4, %v465_v2  ;;  %v817_v2 = vor.u32 %v815_v56, %v813_v31  ;;  %v12648_v31 = vld [vmem:[%s12357_s10 + $0x18] sm:$0xff]  ;;  %v1047_v56 = vld [vmem:[#allocation3 + $0x100] sm:$0xff] }
  0xc9   : > { %10385 = vmatmul.msk.bf16.gmra.mxu1 %vm380_vm1, %v806_v63  ;;  %v1453_v8 = vld [vmem:[#allocation3 + $0x28] sm:$0xff] }
  0xca   : > { %1093 = vst.msk [vmem:[#allocation3 + $0x30] sm:$0xff] %vm538_vm4, %v1057_v7  ;;  %v1489_v10 = vadd.f32 %v1453_v8, %v1370_v55  ;;  %v11938_v55 = vld [vmem:[%s12357_s10 + $0x68] sm:$0xff]  ;;  %v2133_v7 = vshrl.u32 %v11998_v59, 16  ;;  %v2136_v8 = vshll.u32 %v11998_v59, 16  ;;  %v822_v15 = vsel %vm706_vm3, %v817_v2, %v12404_v1  ;;  %v10754_v1 = vld [vmem:[%s12357_s10 + $0x10] sm:$0xc] }
  0xcb   : > { %v1373_v12 = vpop.f32.mrf.mxu2 }
  0xcc   : > { %1525 = vst.msk [vmem:[#allocation3 + $0x28] sm:$0xff] %vm538_vm4, %v1489_v10  ;;  %v535_v18 = vpop.f32.mrf.mxu3  ;;  %v2138_v6 = vrot.slane %v2136_v8, 2 }
  0xcd   : > { %574 = vst.msk [vmem:[#allocation3 + $0x118] sm:$0xff] %vm538_vm4, %v535_v18  ;;  %v2127_v18 = vrot.slane %v2125_v4, 1 }
  0xce   : > { %v942_v19 = vpop.f32.mrf.mxu1 }
  0xcf   : > { %v1022_v23 = vld [vmem:[#allocation3 + $0x38] sm:$0xff]  ;;  %v468_v24 = vpop.f32.mrf.mxu0 }
  0xd0   : > { %v1058_v26 = vadd.f32 %v1022_v23, %v942_v19  ;;  %547 = vst.msk [vmem:[#allocation3 + $0x40] sm:$0xff] %vm538_vm4, %v468_v24  ;;  %v2130_v19 = vrot.slane %v2128_v5, 2 }
  0xd1   : > { %v1454_v28 = vld [vmem:[#allocation3 + $0x30] sm:$0xff]  ;;  %10554 = vmatmul.msk.bf16.vlgmr.msrb.gmra.mxu3 %vm380_vm1, %v1689_v25 }
  0xd2   : > { %1094 = vst.msk [vmem:[#allocation3 + $0x38] sm:$0xff] %vm538_vm4, %v1058_v26  ;;  %v1490_v29 = vadd.f32 %v1454_v28, %v1373_v12  ;;  %10296 = vmatmul.msk.bf16.gmra.mxu0 %vm380_vm1, %v11937_v20  ;;  %v1045_v12 = vld [vmem:[#allocation3 + $0xf0] sm:$0xff]  ;;  %v2135_v20 = vrot.slane %v2133_v7, 1  ;;  %v1692_v26 = vrot.slane %v12634_v17, 1  ;;  %v2131_v27 = vor.u32 %v2130_v19, %v2127_v18 }
  0xd3   : > { %v1375_v32 = vpop.f32.mrf.mxu2 }
  0xd4   : > { %1526 = vst.msk [vmem:[#allocation3 + $0x30] sm:$0xff] %vm538_vm4, %v1490_v29  ;;  %v995_v34 = vpop.f32.mrf.mxu3  ;;  %v12643_v28 = vor.u32 %v2138_v6, %v2135_v20  ;;  %v10664_v29 = vld [vmem:[%s12357_s10 + $0x8] sm:$0xc]  ;;  %v1693_v40 = vsel %vm1254_vm2, %v1690_v48, %v1692_v26  ;;  %v12000_v20 = vld [vmem:[%s12357_s10 + $0x20] sm:$0xff] }
  0xd5   : > { %v1079_v37 = vadd.f32 %v1043_v35, %v995_v34  ;;  %v1046_v34 = vld [vmem:[#allocation3 + $0xf8] sm:$0xff] }
  0xd6   : > { %v945_v38 = vpop.f32.mrf.mxu1 }
  0xd7   : > { %v1023_v41 = vld [vmem:[#allocation3 + $0x40] sm:$0xff]  ;;  %v470_v42 = vpop.f32.mrf.mxu0  ;;  %1115 = vst.msk [vmem:[#allocation3 + $0xe0] sm:$0xff] %vm538_vm4, %v1079_v37  ;;  %v12652_v37 = vld [vmem:[%s12357_s10 + $0x10] sm:$0xff] }
  0xd8   : > { %10476 = vmatmul.msk.bf16.gmra.mxu2 %vm380_vm1, %v1281_v33  ;;  %v1059_v44 = vadd.f32 %v1023_v41, %v945_v38  ;;  %548 = vst.msk [vmem:[#allocation3 + $0x48] sm:$0xff] %vm538_vm4, %v470_v42  ;;  %v10665_v38 = vor.u32 %v12015_v30, %v10664_v29  ;;  %v2140_v41 = vsel %vm2123_vm5, %v2131_v27, %v12643_v28  ;;  %v11999_v42 = vld [vmem:[%s12357_s10 + $0x18] sm:$0xff]  ;;  %v2691_v50 = vrot.slane %v12652_v37, 2 }
  0xd9   : > { %10386 = vmatmul.msk.bf16.gmra.mxu1 %vm380_vm1, %v814_v39  ;;  %v1455_v45 = vld [vmem:[#allocation3 + $0x38] sm:$0xff] }
  0xda   : > { %1095 = vst.msk [vmem:[#allocation3 + $0x40] sm:$0xff] %vm538_vm4, %v1059_v44  ;;  %v1491_v46 = vadd.f32 %v1455_v45, %v1375_v32  ;;  %v10755_v32 = vor.u32 %v12033_v22, %v10754_v1  ;;  %v2690_v48 = vrot.slane %v10665_v38, 2 }
  0xdb   : > { %v1378_v47 = vpop.f32.mrf.mxu2 }
  0xdc   : > { %1527 = vst.msk [vmem:[#allocation3 + $0x38] sm:$0xff] %vm538_vm4, %v1491_v46  ;;  %v997_v51 = vpop.f32.mrf.mxu3  ;;  %v3126_v45 = vrot.slane %v10755_v32, 2  ;;  %v3127_v46 = vrot.slane %v12648_v31, 2  ;;  %v2692_v59 = vsel %vm2689_vm6, %v2690_v48, %v2691_v50 }
  0xdd   : > { %v1080_v53 = vadd.f32 %v1044_v52, %v997_v51  ;;  %v2142_v52 = vshrl.u32 %v11999_v42, 16 }
  0xde   : > { %v947_v54 = vpop.f32.mrf.mxu1 }
  0xdf   : > { %v473_v57 = vpop.f32.mrf.mxu0  ;;  %1116 = vst.msk [vmem:[#allocation3 + $0xe8] sm:$0xff] %vm538_vm4, %v1080_v53  ;;  %v1024_v61 = vld [vmem:[#allocation3 + $0x48] sm:$0xff]  ;;  %v2145_v53 = vshll.u32 %v11999_v42, 16 }
  0xe0   : > { %v1060_v62 = vadd.f32 %v1024_v61, %v947_v54  ;;  %549 = vst.msk [vmem:[#allocation3 + $0x50] sm:$0xff] %vm538_vm4, %v473_v57  ;;  %v3128_v54 = vsel %vm2689_vm6, %v3126_v45, %v3127_v46  ;;  %v12676_v61 = vld [vmem:[%s12357_s10 + $0x28] sm:$0xff] }
  0xe1   : > { %v1456_v63 = vld [vmem:[#allocation3 + $0x40] sm:$0xff]  ;;  %10555 = vmatmul.msk.bf16.gmra.mxu3 %vm380_vm1, %v1691_v58  ;;  %v1694_v7 = vrot.slane %v12676_v61, 1 }
  0xe2   : > { %v1492_v0 = vadd.f32 %v1456_v63, %v1378_v47  ;;  %10297 = vmatmul.msk.bf16.gmra.mxu0 %vm380_vm1, %v11938_v55  ;;  %1096 = vst.msk [vmem:[#allocation3 + $0x48] sm:$0xff] %vm538_vm4, %v1060_v62  ;;  %v2144_v62 = vrot.slane %v2142_v52, 1  ;;  %v2147_v63 = vrot.slane %v2145_v53, 2  ;;  %v12001_v52 = vld [vmem:[%s12357_s10 + $0x28] sm:$0xff] }
  0xe3   : > { %v1380_v3 = vpop.f32.mrf.mxu2  ;;  %v1695_v18 = vsel %vm1254_vm2, %v1692_v26, %v1694_v7  ;;  %v2163_v61 = vshll.u32 %v12001_v52, 16 }
  0xe4   : > { %1528 = vst.msk [vmem:[#allocation3 + $0x40] sm:$0xff] %vm538_vm4, %v1492_v0  ;;  %v1000_v10 = vpop.f32.mrf.mxu3  ;;  %v2148_v8 = vor.u32 %v2147_v63, %v2144_v62 }
  0xe5   : > { %v1081_v13 = vadd.f32 %v1045_v12, %v1000_v10  ;;  %v1048_v12 = vld [vmem:[#allocation3 + $0x108] sm:$0xff] }
  0xe6   : > { %v950_v14 = vpop.f32.mrf.mxu1  ;;  %v2149_v19 = vsel %vm2123_vm5, %v12643_v28, %v2148_v8  ;;  %v1049_v28 = vld [vmem:[#allocation3 + $0x110] sm:$0xff] }
  0xe7   : > { %v475_v16 = vpop.f32.mrf.mxu0  ;;  %1117 = vst.msk [vmem:[#allocation3 + $0xf0] sm:$0xff] %vm538_vm4, %v1081_v13  ;;  %v1025_v11 = vld [vmem:[#allocation3 + $0x50] sm:$0xff] }
  0xe8   : > { %10477 = vmatmul.msk.bf16.gmra.mxu2 %vm380_vm1, %v1283_v9  ;;  %v1061_v21 = vadd.f32 %v1025_v11, %v950_v14  ;;  %550 = vst.msk [vmem:[#allocation3 + $0x58] sm:$0xff] %vm538_vm4, %v475_v16  ;;  %v12684_v9 = vld [vmem:[%s12357_s10 + $0x20] sm:$0xff] }
  0xe9   : > { %10387 = vmatmul.msk.bf16.gmra.mxu1 %vm380_vm1, %v822_v15  ;;  %v1457_v23 = vld [vmem:[#allocation3 + $0x48] sm:$0xff]  ;;  %v12688_v15 = vld [vmem:[%s12357_s10 + $0x18] sm:$0xff]  ;;  %v3129_v11 = vrot.slane %v12684_v9, 2  ;;  %v2165_v9 = vrot.slane %v2163_v61, 2 }
  0xea   : > { %1097 = vst.msk [vmem:[#allocation3 + $0x50] sm:$0xff] %vm538_vm4, %v1061_v21  ;;  %v1493_v25 = vadd.f32 %v1457_v23, %v1380_v3  ;;  %v2693_v22 = vrot.slane %v12688_v15, 2 }
  0xeb   : > { %v1383_v24 = vpop.f32.mrf.mxu2  ;;  %v3130_v26 = vsel %vm2689_vm6, %v3127_v46, %v3129_v11  ;;  %v1050_v46 = vld [vmem:[#allocation3 + $0x118] sm:$0xff] }
  0xec   : > { %1529 = vst.msk [vmem:[#allocation3 + $0x48] sm:$0xff] %vm538_vm4, %v1493_v25  ;;  %v1002_v33 = vpop.f32.mrf.mxu3  ;;  %v2154_v25 = vshll.u32 %v12000_v20, 16  ;;  %v2694_v32 = vsel %vm2689_vm6, %v2691_v50, %v2693_v22 }
  0xed   : > { %v1082_v35 = vadd.f32 %v1046_v34, %v1002_v33  ;;  %v12710_v34 = vld [vmem:[%s12357_s10 + $0x30] sm:$0xff] }
  0xee   : > { %v952_v36 = vpop.f32.mrf.mxu1 }
  0xef   : > { %v478_v39 = vpop.f32.mrf.mxu0  ;;  %1118 = vst.msk [vmem:[#allocation3 + $0xf8] sm:$0xff] %vm538_vm4, %v1082_v35  ;;  %v1026_v44 = vld [vmem:[#allocation3 + $0x58] sm:$0xff] }
  0xf0   : > { %v1062_v47 = vadd.f32 %v1026_v44, %v952_v36  ;;  %551 = vst.msk [vmem:[#allocation3 + $0x60] sm:$0xff] %vm538_vm4, %v478_v39  ;;  %v2156_v36 = vrot.slane %v2154_v25, 2  ;;  %v12718_v44 = vld [vmem:[%s12357_s10 + $0x28] sm:$0xff] }
  0xf1   : > { %v1458_v49 = vld [vmem:[#allocation3 + $0x50] sm:$0xff]  ;;  %10556 = vmatmul.msk.bf16.gmra.mxu3 %vm380_vm1, %v1693_v40 }
  0xf2   : > { %10644 = vmatmul.msk.bf16.vlgmr.msrb.gmra.mxu0 %vm380_vm1, %v2140_v41  ;;  %1098 = vst.msk [vmem:[#allocation3 + $0x58] sm:$0xff] %vm538_vm4, %v1062_v47  ;;  %v1494_v51 = vadd.f32 %v1458_v49, %v1383_v24  ;;  %v2151_v24 = vshrl.u32 %v12000_v20, 16  ;;  %v1696_v41 = vrot.slane %v12710_v34, 1 }
  0xf3   : > { %v1385_v43 = vpop.f32.mrf.mxu2 }
  0xf4   : > { %1530 = vst.msk [vmem:[#allocation3 + $0x50] sm:$0xff] %vm538_vm4, %v1494_v51  ;;  %v1005_v55 = vpop.f32.mrf.mxu3  ;;  %v2153_v35 = vrot.slane %v2151_v24, 1  ;;  %v1697_v50 = vsel %vm1254_vm2, %v1694_v7, %v1696_v41  ;;  %v12739_v7 = vld [vmem:[%s12357_s10 + $0x38] sm:$0xff]  ;;  %v12002_v24 = vld [vmem:[%s12357_s10 + $0x30] sm:$0xff] }
  0xf5   : > { %v1083_v57 = vadd.f32 %v1047_v56, %v1005_v55  ;;  %v2172_v34 = vshll.u32 %v12002_v24, 16 }
  0xf6   : > { %v955_v58 = vpop.f32.mrf.mxu1  ;;  %v2157_v42 = vor.u32 %v2156_v36, %v2153_v35 }
  0xf7   : > { %v480_v60 = vpop.f32.mrf.mxu0  ;;  %1119 = vst.msk [vmem:[#allocation3 + $0x100] sm:$0xff] %vm538_vm4, %v1083_v57  ;;  %v1027_v0 = vld [vmem:[#allocation3 + $0x60] sm:$0xff] }
  0xf8   : > { %10824 = vmatmul.msk.bf16.vlgmr.msrb.gmra.mxu2 %vm380_vm1, %v3128_v54  ;;  %v1063_v2 = vadd.f32 %v1027_v0, %v955_v58  ;;  %552 = vst.msk [vmem:[#allocation3 + $0x68] sm:$0xff] %vm538_vm4, %v480_v60  ;;  %v2158_v51 = vsel %vm2123_vm5, %v2148_v8, %v2157_v42  ;;  %v3131_v54 = vrot.slane %v12718_v44, 2  ;;  %v2160_v60 = vshrl.u32 %v12001_v52, 16  ;;  %v1476_v0 = vld [vmem:[#allocation3 + $0xe0] sm:$0xff] }
  0xf9   : > { %10734 = vmatmul.msk.bf16.vlgmr.msrb.gmra.mxu1 %vm380_vm1, %v2692_v59  ;;  %v1459_v3 = vld [vmem:[#allocation3 + $0x58] sm:$0xff]  ;;  %v2174_v44 = vrot.slane %v2172_v34, 2 }
  0xfa   : > { %1099 = vst.msk [vmem:[#allocation3 + $0x60] sm:$0xff] %vm538_vm4, %v1063_v2  ;;  %v1495_v5 = vadd.f32 %v1459_v3, %v1385_v43  ;;  %v12722_v43 = vld [vmem:[%s12357_s10 + $0x20] sm:$0xff]  ;;  %v3132_v62 = vsel %vm2689_vm6, %v3129_v11, %v3131_v54  ;;  %v2162_v8 = vrot.slane %v2160_v60, 1  ;;  %v12003_v60 = vld [vmem:[%s12357_s10 + $0x38] sm:$0xff] }
  0xfb   : > { %v1388_v4 = vpop.f32.mrf.mxu2  ;;  %v2695_v58 = vrot.slane %v12722_v43, 2 }
  0xfc   : > { %1531 = vst.msk [vmem:[#allocation3 + $0x58] sm:$0xff] %vm538_vm4, %v1495_v5  ;;  %v1007_v10 = vpop.f32.mrf.mxu3 }
  0xfd   : > { %v1084_v13 = vadd.f32 %v1048_v12, %v1007_v10 }
  0xfe   : > { %v957_v14 = vpop.f32.mrf.mxu1 }
  0xff   : > { %v483_v16 = vpop.f32.mrf.mxu0  ;;  %1120 = vst.msk [vmem:[#allocation3 + $0x108] sm:$0xff] %vm538_vm4, %v1084_v13  ;;  %v1028_v6 = vld [vmem:[#allocation3 + $0x68] sm:$0xff] }
 0x100   : > { %v1064_v21 = vadd.f32 %v1028_v6, %v957_v14  ;;  %553 = vst.msk [vmem:[#allocation3 + $0x70] sm:$0xff] %vm538_vm4, %v483_v16  ;;  %v1698_v16 = vrot.slane %v12739_v7, 1  ;;  %v1477_v6 = vld [vmem:[#allocation3 + $0xe8] sm:$0xff]  ;;  %v2181_v7 = vshll.u32 %v12003_v60, 16 }
 0x101   : > { %v1460_v1 = vld [vmem:[#allocation3 + $0x60] sm:$0xff]  ;;  %10557 = vmatmul.msk.bf16.gmra.mxu3 %vm380_vm1, %v1695_v18  ;;  %v2166_v18 = vor.u32 %v2165_v9, %v2162_v8 }
 0x102   : > { %10645 = vmatmul.msk.bf16.gmra.mxu0 %vm380_vm1, %v2149_v19  ;;  %1100 = vst.msk [vmem:[#allocation3 + $0x68] sm:$0xff] %vm538_vm4, %v1064_v21  ;;  %v1496_v23 = vadd.f32 %v1460_v1, %v1388_v4  ;;  %v2696_v4 = vsel %vm2689_vm6, %v2693_v22, %v2695_v58  ;;  %v12747_v19 = vld [vmem:[%s12357_s10 + $0x30] sm:$0xff]  ;;  %v12751_v1 = vld [vmem:[%s12357_s10 + $0x28] sm:$0xff]  ;;  %v1699_v22 = vsel %vm1254_vm2, %v1696_v41, %v1698_v16  ;;  %v12768_v41 = vld [vmem:[%s12357_s10 + $0x40] sm:$0xff] }
 0x103   : > { %v1390_v17 = vpop.f32.mrf.mxu2 }
 0x104   : > { %1532 = vst.msk [vmem:[#allocation3 + $0x60] sm:$0xff] %vm538_vm4, %v1496_v23  ;;  %v1010_v27 = vpop.f32.mrf.mxu3  ;;  %v2167_v23 = vsel %vm2123_vm5, %v2157_v42, %v2166_v18 }
 0x105   : > { %v1085_v29 = vadd.f32 %v1049_v28, %v1010_v27 }
 0x106   : > { %v960_v30 = vpop.f32.mrf.mxu1 }
 0x107   : > { %v485_v33 = vpop.f32.mrf.mxu0  ;;  %1121 = vst.msk [vmem:[#allocation3 + $0x110] sm:$0xff] %vm538_vm4, %v1085_v29  ;;  %v1029_v31 = vld [vmem:[#allocation3 + $0x70] sm:$0xff] }
 0x108   : > { %10825 = vmatmul.msk.bf16.gmra.mxu2 %vm380_vm1, %v3130_v26  ;;  %v1065_v37 = vadd.f32 %v1029_v31, %v960_v30  ;;  %554 = vst.msk [vmem:[#allocation3 + $0x78] sm:$0xff] %vm538_vm4, %v485_v33  ;;  %v3133_v26 = vrot.slane %v12747_v19, 2  ;;  %v2697_v30 = vrot.slane %v12751_v1, 2  ;;  %v2169_v33 = vshrl.u32 %v12002_v24, 16  ;;  %v1478_v31 = vld [vmem:[#allocation3 + $0xf0] sm:$0xff] }
 0x109   : > { %10735 = vmatmul.msk.bf16.gmra.mxu1 %vm380_vm1, %v2694_v32  ;;  %v1461_v38 = vld [vmem:[#allocation3 + $0x68] sm:$0xff]  ;;  %v2183_v19 = vrot.slane %v2181_v7, 2 }
 0x10a   : > { %1101 = vst.msk [vmem:[#allocation3 + $0x70] sm:$0xff] %vm538_vm4, %v1065_v37  ;;  %v1497_v40 = vadd.f32 %v1461_v38, %v1390_v17  ;;  %v3134_v35 = vsel %vm2689_vm6, %v3131_v54, %v3133_v26  ;;  %v2171_v42 = vrot.slane %v2169_v33, 1  ;;  %v12004_v33 = vld [vmem:[%s12357_s10 + $0x40] sm:$0xff] }
 0x10b   : > { %v1393_v39 = vpop.f32.mrf.mxu2 }
 0x10c   : > { %1533 = vst.msk [vmem:[#allocation3 + $0x68] sm:$0xff] %vm538_vm4, %v1497_v40  ;;  %v1012_v45 = vpop.f32.mrf.mxu3 }
 0x10d   : > { %v1086_v47 = vadd.f32 %v1050_v46, %v1012_v45 }
 0x10e   : > { %v962_v49 = vpop.f32.mrf.mxu1 }
 0x10f   : > { %v488_v48 = vpop.f32.mrf.mxu0  ;;  %1122 = vst.msk [vmem:[#allocation3 + $0x118] sm:$0xff] %vm538_vm4, %v1086_v47  ;;  %v1030_v53 = vld [vmem:[#allocation3 + $0x78] sm:$0xff] }
 0x110   : > { %v1066_v55 = vadd.f32 %v1030_v53, %v962_v49  ;;  %555 = vst.msk [vmem:[#allocation3 + $0x80] sm:$0xff] %vm538_vm4, %v488_v48  ;;  %v1700_v48 = vrot.slane %v12768_v41, 1  ;;  %v1479_v53 = vld [vmem:[#allocation3 + $0xf8] sm:$0xff]  ;;  %v2190_v41 = vshll.u32 %v12004_v33, 16 }
 0x111   : > { %v1462_v56 = vld [vmem:[#allocation3 + $0x70] sm:$0xff]  ;;  %10558 = vmatmul.msk.bf16.gmra.mxu3 %vm380_vm1, %v1697_v50  ;;  %v2175_v50 = vor.u32 %v2174_v44, %v2171_v42 }
 0x112   : > { %10646 = vmatmul.msk.bf16.gmra.mxu0 %vm380_vm1, %v2158_v51  ;;  %1102 = vst.msk [vmem:[#allocation3 + $0x78] sm:$0xff] %vm538_vm4, %v1066_v55  ;;  %v1498_v59 = vadd.f32 %v1462_v56, %v1393_v39  ;;  %v2698_v39 = vsel %vm2689_vm6, %v2695_v58, %v2697_v30  ;;  %v12776_v51 = vld [vmem:[%s12357_s10 + $0x38] sm:$0xff]  ;;  %v12780_v56 = vld [vmem:[%s12357_s10 + $0x30] sm:$0xff]  ;;  %v1701_v58 = vsel %vm1254_vm2, %v1698_v16, %v1700_v48  ;;  %v12797_v16 = vld [vmem:[%s12357_s10 + $0x48] sm:$0xff] }
 0x113   : > { %v1395_v57 = vpop.f32.mrf.mxu2 }
 0x114   : > { %1534 = vst.msk [vmem:[#allocation3 + $0x70] sm:$0xff] %vm538_vm4, %v1498_v59  ;;  %v1428_v63 = vpop.f32.mrf.mxu3  ;;  %v2176_v59 = vsel %vm2123_vm5, %v2166_v18, %v2175_v50 }
 0x115   : > { %v1512_v2 = vadd.f32 %v1476_v0, %v1428_v63 }
 0x116   : > { %v965_v3 = vpop.f32.mrf.mxu1 }
 0x117   : > { %v490_v5 = vpop.f32.mrf.mxu0  ;;  %1548 = vst.msk [vmem:[#allocation3 + $0xe0] sm:$0xff] %vm538_vm4, %v1512_v2  ;;  %v1031_v10 = vld [vmem:[#allocation3 + $0x80] sm:$0xff] }
 0x118   : > { %10826 = vmatmul.msk.bf16.gmra.mxu2 %vm380_vm1, %v3132_v62  ;;  %v1067_v12 = vadd.f32 %v1031_v10, %v965_v3  ;;  %556 = vst.msk [vmem:[#allocation3 + $0x88] sm:$0xff] %vm538_vm4, %v490_v5  ;;  %v3135_v62 = vrot.slane %v12776_v51, 2  ;;  %v2699_v3 = vrot.slane %v12780_v56, 2  ;;  %v2178_v5 = vshrl.u32 %v12003_v60, 16  ;;  %v1480_v10 = vld [vmem:[#allocation3 + $0x100] sm:$0xff] }
 0x119   : > { %10736 = vmatmul.msk.bf16.gmra.mxu1 %vm380_vm1, %v2696_v4  ;;  %v1463_v13 = vld [vmem:[#allocation3 + $0x78] sm:$0xff]  ;;  %v2192_v51 = vrot.slane %v2190_v41, 2 }
 0x11a   : > { %1103 = vst.msk [vmem:[#allocation3 + $0x80] sm:$0xff] %vm538_vm4, %v1067_v12  ;;  %v1499_v15 = vadd.f32 %v1463_v13, %v1395_v57  ;;  %v3136_v8 = vsel %vm2689_vm6, %v3133_v26, %v3135_v62  ;;  %v2180_v18 = vrot.slane %v2178_v5, 1  ;;  %v12005_v5 = vld [vmem:[%s12357_s10 + $0x48] sm:$0xff] }
 0x11b   : > { %v1398_v14 = vpop.f32.mrf.mxu2 }
 0x11c   : > { %1535 = vst.msk [vmem:[#allocation3 + $0x78] sm:$0xff] %vm538_vm4, %v1499_v15  ;;  %v1430_v20 = vpop.f32.mrf.mxu3 }
 0x11d   : > { %v1513_v11 = vadd.f32 %v1477_v6, %v1430_v20 }
 0x11e   : > { %v967_v21 = vpop.f32.mrf.mxu1 }
 0x11f   : > { %v493_v17 = vpop.f32.mrf.mxu0  ;;  %1549 = vst.msk [vmem:[#allocation3 + $0xe8] sm:$0xff] %vm538_vm4, %v1513_v11  ;;  %v1032_v25 = vld [vmem:[#allocation3 + $0x88] sm:$0xff] }
 0x120   : > { %v1068_v27 = vadd.f32 %v1032_v25, %v967_v21  ;;  %557 = vst.msk [vmem:[#allocation3 + $0x90] sm:$0xff] %vm538_vm4, %v493_v17  ;;  %v1702_v17 = vrot.slane %v12797_v16, 1  ;;  %v1481_v25 = vld [vmem:[#allocation3 + $0x108] sm:$0xff]  ;;  %v2199_v16 = vshll.u32 %v12005_v5, 16 }
 0x121   : > { %v1464_v28 = vld [vmem:[#allocation3 + $0x80] sm:$0xff]  ;;  %10559 = vmatmul.msk.bf16.gmra.mxu3 %vm380_vm1, %v1699_v22  ;;  %v2184_v22 = vor.u32 %v2183_v19, %v2180_v18 }
 0x122   : > { %10647 = vmatmul.msk.bf16.gmra.mxu0 %vm380_vm1, %v2167_v23  ;;  %1104 = vst.msk [vmem:[#allocation3 + $0x88] sm:$0xff] %vm538_vm4, %v1068_v27  ;;  %v1500_v32 = vadd.f32 %v1464_v28, %v1398_v14  ;;  %v2700_v14 = vsel %vm2689_vm6, %v2697_v30, %v2699_v3  ;;  %v12805_v23 = vld [vmem:[%s12357_s10 + $0x40] sm:$0xff]  ;;  %v12809_v28 = vld [vmem:[%s12357_s10 + $0x38] sm:$0xff]  ;;  %v1703_v30 = vsel %vm1254_vm2, %v1700_v48, %v1702_v17  ;;  %v12826_v48 = vld [vmem:[%s12357_s10 + $0x50] sm:$0xff] }
 0x123   : > { %v1400_v29 = vpop.f32.mrf.mxu2 }
 0x124   : > { %1536 = vst.msk [vmem:[#allocation3 + $0x80] sm:$0xff] %vm538_vm4, %v1500_v32  ;;  %v1433_v36 = vpop.f32.mrf.mxu3  ;;  %v2185_v32 = vsel %vm2123_vm5, %v2175_v50, %v2184_v22 }
 0x125   : > { %v1514_v37 = vadd.f32 %v1478_v31, %v1433_v36 }
 0x126   : > { %v970_v38 = vpop.f32.mrf.mxu1 }
 0x127   : > { %v495_v40 = vpop.f32.mrf.mxu0  ;;  %1550 = vst.msk [vmem:[#allocation3 + $0xf0] sm:$0xff] %vm538_vm4, %v1514_v37  ;;  %v1033_v45 = vld [vmem:[#allocation3 + $0x90] sm:$0xff] }
 0x128   : > { %10827 = vmatmul.msk.bf16.gmra.mxu2 %vm380_vm1, %v3134_v35  ;;  %v1069_v46 = vadd.f32 %v1033_v45, %v970_v38  ;;  %558 = vst.msk [vmem:[#allocation3 + $0x98] sm:$0xff] %vm538_vm4, %v495_v40  ;;  %v3137_v35 = vrot.slane %v12805_v23, 2  ;;  %v2701_v38 = vrot.slane %v12809_v28, 2  ;;  %v2187_v40 = vshrl.u32 %v12004_v33, 16  ;;  %v1482_v45 = vld [vmem:[#allocation3 + $0x110] sm:$0xff] }
 0x129   : > { %10737 = vmatmul.msk.bf16.gmra.mxu1 %vm380_vm1, %v2698_v39  ;;  %v1465_v47 = vld [vmem:[#allocation3 + $0x88] sm:$0xff]  ;;  %v2201_v23 = vrot.slane %v2199_v16, 2  ;;  %v12007_v16 = vld [vmem:[%s12357_s10 + $0x58] sm:$0xff] }
 0x12a   : > { %1105 = vst.msk [vmem:[#allocation3 + $0x90] sm:$0xff] %vm538_vm4, %v1069_v46  ;;  %v1501_v43 = vadd.f32 %v1465_v47, %v1400_v29  ;;  %v3138_v42 = vsel %vm2689_vm6, %v3135_v62, %v3137_v35  ;;  %v2189_v50 = vrot.slane %v2187_v40, 1  ;;  %v12006_v40 = vld [vmem:[%s12357_s10 + $0x50] sm:$0xff] }
 0x12b   : > { %v1403_v49 = vpop.f32.mrf.mxu2 }
 0x12c   : > { %1537 = vst.msk [vmem:[#allocation3 + $0x88] sm:$0xff] %vm538_vm4, %v1501_v43  ;;  %v1435_v52 = vpop.f32.mrf.mxu3 }
 0x12d   : > { %v1515_v54 = vadd.f32 %v1479_v53, %v1435_v52 }
 0x12e   : > { %v972_v55 = vpop.f32.mrf.mxu1 }
 0x12f   : > { %v498_v57 = vpop.f32.mrf.mxu0  ;;  %1551 = vst.msk [vmem:[#allocation3 + $0xf8] sm:$0xff] %vm538_vm4, %v1515_v54  ;;  %v1034_v61 = vld [vmem:[#allocation3 + $0x98] sm:$0xff] }
 0x130   : > { %v1070_v63 = vadd.f32 %v1034_v61, %v972_v55  ;;  %559 = vst.msk [vmem:[#allocation3 + $0xa0] sm:$0xff] %vm538_vm4, %v498_v57  ;;  %v1704_v57 = vrot.slane %v12826_v48, 1  ;;  %v1483_v61 = vld [vmem:[#allocation3 + $0x118] sm:$0xff]  ;;  %v2208_v48 = vshll.u32 %v12006_v40, 16 }
 0x131   : > { %v1466_v0 = vld [vmem:[#allocation3 + $0x90] sm:$0xff]  ;;  %10560 = vmatmul.msk.bf16.gmra.mxu3 %vm380_vm1, %v1701_v58  ;;  %v2193_v58 = vor.u32 %v2192_v51, %v2189_v50 }
 0x132   : > { %10648 = vmatmul.msk.bf16.gmra.mxu0 %vm380_vm1, %v2176_v59  ;;  %1106 = vst.msk [vmem:[#allocation3 + $0x98] sm:$0xff] %vm538_vm4, %v1070_v63  ;;  %v1502_v4 = vadd.f32 %v1466_v0, %v1403_v49  ;;  %v2702_v49 = vsel %vm2689_vm6, %v2699_v3, %v2701_v38  ;;  %v12834_v59 = vld [vmem:[%s12357_s10 + $0x48] sm:$0xff]  ;;  %v12838_v0 = vld [vmem:[%s12357_s10 + $0x40] sm:$0xff]  ;;  %v1705_v3 = vsel %vm1254_vm2, %v1702_v17, %v1704_v57  ;;  %v12855_v17 = vld [vmem:[%s12357_s10 + $0x58] sm:$0xff] }
 0x133   : > { %v1405_v2 = vpop.f32.mrf.mxu2 }
 0x134   : > { %1538 = vst.msk [vmem:[#allocation3 + $0x90] sm:$0xff] %vm538_vm4, %v1502_v4  ;;  %v1438_v9 = vpop.f32.mrf.mxu3  ;;  %v2194_v4 = vsel %vm2123_vm5, %v2184_v22, %v2193_v58 }
 0x135   : > { %v1516_v12 = vadd.f32 %v1480_v10, %v1438_v9 }
 0x136   : > { %v975_v13 = vpop.f32.mrf.mxu1 }
 0x137   : > { %v500_v15 = vpop.f32.mrf.mxu0  ;;  %1552 = vst.msk [vmem:[#allocation3 + $0x100] sm:$0xff] %vm538_vm4, %v1516_v12  ;;  %v1035_v20 = vld [vmem:[#allocation3 + $0xa0] sm:$0xff] }
 0x138   : > { %10828 = vmatmul.msk.bf16.gmra.mxu2 %vm380_vm1, %v3136_v8  ;;  %v1071_v6 = vadd.f32 %v1035_v20, %v975_v13  ;;  %560 = vst.msk [vmem:[#allocation3 + $0xa8] sm:$0xff] %vm538_vm4, %v500_v15  ;;  %v3139_v8 = vrot.slane %v12834_v59, 2  ;;  %v2703_v13 = vrot.slane %v12838_v0, 2  ;;  %v2196_v15 = vshrl.u32 %v12005_v5, 16  ;;  %v1884_v20 = vld [vmem:[#allocation3] sm:$0xff] }
 0x139   : > { %10738 = vmatmul.msk.bf16.gmra.mxu1 %vm380_vm1, %v2700_v14  ;;  %v1467_v11 = vld [vmem:[#allocation3 + $0x98] sm:$0xff]  ;;  %v2210_v59 = vrot.slane %v2208_v48, 2  ;;  %v1889_v48 = vld [vmem:[#allocation3 + $0x28] sm:$0xff] }
 0x13a   : > { %1107 = vst.msk [vmem:[#allocation3 + $0xa0] sm:$0xff] %vm538_vm4, %v1071_v6  ;;  %v1503_v1 = vadd.f32 %v1467_v11, %v1405_v2  ;;  %v3140_v18 = vsel %vm2689_vm6, %v3137_v35, %v3139_v8  ;;  %v2198_v22 = vrot.slane %v2196_v15, 1 }
 0x13b   : > { %v1408_v21 = vpop.f32.mrf.mxu2 }
 0x13c   : > { %1539 = vst.msk [vmem:[#allocation3 + $0x98] sm:$0xff] %vm538_vm4, %v1503_v1  ;;  %v1440_v24 = vpop.f32.mrf.mxu3 }
 0x13d   : > { %v1517_v26 = vadd.f32 %v1481_v25, %v1440_v24 }
 0x13e   : > { %v977_v27 = vpop.f32.mrf.mxu1 }
 0x13f   : > { %v503_v29 = vpop.f32.mrf.mxu0  ;;  %1553 = vst.msk [vmem:[#allocation3 + $0x108] sm:$0xff] %vm538_vm4, %v1517_v26  ;;  %v1036_v34 = vld [vmem:[#allocation3 + $0xa8] sm:$0xff] }
 0x140   : > { %v1072_v36 = vadd.f32 %v1036_v34, %v977_v27  ;;  %561 = vst.msk [vmem:[#allocation3 + $0xb0] sm:$0xff] %vm538_vm4, %v503_v29  ;;  %v1706_v29 = vrot.slane %v12855_v17, 1  ;;  %v1885_v34 = vld [vmem:[#allocation3 + $0x8] sm:$0xff] }
 0x141   : > { %v1468_v31 = vld [vmem:[#allocation3 + $0xa0] sm:$0xff]  ;;  %10561 = vmatmul.msk.bf16.gmra.mxu3 %vm380_vm1, %v1703_v30  ;;  %v2202_v30 = vor.u32 %v2201_v23, %v2198_v22  ;;  %v2214_v22 = vshrl.u32 %v12007_v16, 16  ;;  %v2217_v23 = vshll.u32 %v12007_v16, 16 }
 0x142   : > { %10649 = vmatmul.msk.bf16.gmra.mxu0 %vm380_vm1, %v2185_v32  ;;  %1108 = vst.msk [vmem:[#allocation3 + $0xa8] sm:$0xff] %vm538_vm4, %v1072_v36  ;;  %v1504_v39 = vadd.f32 %v1468_v31, %v1408_v21  ;;  %v2704_v21 = vsel %vm2689_vm6, %v2701_v38, %v2703_v13  ;;  %v12863_v32 = vld [vmem:[%s12357_s10 + $0x50] sm:$0xff]  ;;  %v12867_v31 = vld [vmem:[%s12357_s10 + $0x48] sm:$0xff]  ;;  %v1707_v38 = vsel %vm1254_vm2, %v1704_v57, %v1706_v29  ;;  %v12888_v57 = vld [vmem:[%s12357_s10 + $0x60] sm:$0xff] }
 0x143   : > { %v1410_v37 = vpop.f32.mrf.mxu2 }
 0x144   : > { %1540 = vst.msk [vmem:[#allocation3 + $0xa0] sm:$0xff] %vm538_vm4, %v1504_v39  ;;  %v1443_v44 = vpop.f32.mrf.mxu3  ;;  %v2203_v39 = vsel %vm2123_vm5, %v2193_v58, %v2202_v30 }
 0x145   : > { %v1518_v46 = vadd.f32 %v1482_v45, %v1443_v44 }
 0x146   : > { %v980_v47 = vpop.f32.mrf.mxu1 }
 0x147   : > { %v505_v43 = vpop.f32.mrf.mxu0  ;;  %1554 = vst.msk [vmem:[#allocation3 + $0x110] sm:$0xff] %vm538_vm4, %v1518_v46  ;;  %v1037_v52 = vld [vmem:[#allocation3 + $0xb0] sm:$0xff] }
 0x148   : > { %10829 = vmatmul.msk.bf16.gmra.mxu2 %vm380_vm1, %v3138_v42  ;;  %v1073_v53 = vadd.f32 %v1037_v52, %v980_v47  ;;  %562 = vst.msk [vmem:[#allocation3 + $0xb8] sm:$0xff] %vm538_vm4, %v505_v43  ;;  %v3141_v42 = vrot.slane %v12863_v32, 2  ;;  %v2705_v47 = vrot.slane %v12867_v31, 2  ;;  %v2205_v43 = vshrl.u32 %v12006_v40, 16  ;;  %v1886_v52 = vld [vmem:[#allocation3 + $0x10] sm:$0xff] }
 0x149   : > { %10739 = vmatmul.msk.bf16.gmra.mxu1 %vm380_vm1, %v2702_v49  ;;  %v1469_v54 = vld [vmem:[#allocation3 + $0xa8] sm:$0xff] }
 0x14a   : > { %1109 = vst.msk [vmem:[#allocation3 + $0xb0] sm:$0xff] %vm538_vm4, %v1073_v53  ;;  %v1505_v56 = vadd.f32 %v1469_v54, %v1410_v37  ;;  %v3142_v50 = vsel %vm2689_vm6, %v3139_v8, %v3141_v42  ;;  %v2207_v58 = vrot.slane %v2205_v43, 1 }
 0x14b   : > { %v1413_v55 = vpop.f32.mrf.mxu2 }
 0x14c   : > { %1541 = vst.msk [vmem:[#allocation3 + $0xa8] sm:$0xff] %vm538_vm4, %v1505_v56  ;;  %v1445_v60 = vpop.f32.mrf.mxu3 }
 0x14d   : > { %v1519_v62 = vadd.f32 %v1483_v61, %v1445_v60 }
 0x14e   : > { %v982_v63 = vpop.f32.mrf.mxu1 }
 0x14f   : > { %v508_v2 = vpop.f32.mrf.mxu0  ;;  %1555 = vst.msk [vmem:[#allocation3 + $0x118] sm:$0xff] %vm538_vm4, %v1519_v62  ;;  %v1038_v7 = vld [vmem:[#allocation3 + $0xb8] sm:$0xff] }
 0x150   : > { %v1074_v9 = vadd.f32 %v1038_v7, %v982_v63  ;;  %563 = vst.msk [vmem:[#allocation3 + $0xc0] sm:$0xff] %vm538_vm4, %v508_v2  ;;  %v1708_v2 = vrot.slane %v12888_v57, 1  ;;  %v1887_v7 = vld [vmem:[#allocation3 + $0x18] sm:$0xff] }
 0x151   : > { %v1470_v10 = vld [vmem:[#allocation3 + $0xb0] sm:$0xff]  ;;  %10562 = vmatmul.msk.bf16.gmra.mxu3 %vm380_vm1, %v1705_v3  ;;  %v12895_v3 = vor.u32 %v2210_v59, %v2207_v58  ;;  %v12008_v58 = vld [vmem:[%s12357_s10 + $0x60] sm:$0xff] }
 0x152   : > { %10650 = vmatmul.msk.bf16.gmra.mxu0 %vm380_vm1, %v2194_v4  ;;  %1110 = vst.msk [vmem:[#allocation3 + $0xb8] sm:$0xff] %vm538_vm4, %v1074_v9  ;;  %v1506_v14 = vadd.f32 %v1470_v10, %v1413_v55  ;;  %v2706_v55 = vsel %vm2689_vm6, %v2703_v13, %v2705_v47  ;;  %v12898_v4 = vld [vmem:[%s12357_s10 + $0x58] sm:$0xff]  ;;  %v12902_v10 = vld [vmem:[%s12357_s10 + $0x50] sm:$0xff] }
 0x153   : > { %v1415_v12 = vpop.f32.mrf.mxu2  ;;  %v2212_v15 = vsel %vm2123_vm5, %v2202_v30, %v12895_v3 }
 0x154   : > { %1542 = vst.msk [vmem:[#allocation3 + $0xb0] sm:$0xff] %vm538_vm4, %v1506_v14  ;;  %v1794_v19 = vpop.f32.mrf.mxu3  ;;  %v1709_v14 = vsel %vm1254_vm2, %v1706_v29, %v1708_v2 }
 0x155   : > { %v1920_v6 = vadd.f32 %v1884_v20, %v1794_v19  ;;  %v3143_v20 = vrot.slane %v12898_v4, 2  ;;  %v12983_v4 = vld [vmem:[%s12357_s10 + $0x70] sm:$0xff] }
 0x156   : > { %v985_v11 = vpop.f32.mrf.mxu1 }
 0x157   : > { %v510_v1 = vpop.f32.mrf.mxu0  ;;  %1956 = vst.msk [vmem:[#allocation3] sm:$0xff] %vm538_vm4, %v1920_v6  ;;  %v1039_v24 = vld [vmem:[#allocation3 + $0xc0] sm:$0xff] }
 0x158   : > { %10830 = vmatmul.msk.bf16.gmra.mxu2 %vm380_vm1, %v3140_v18  ;;  %v1075_v25 = vadd.f32 %v1039_v24, %v985_v11  ;;  %564 = vst.msk [vmem:[#allocation3 + $0xc8] sm:$0xff] %vm538_vm4, %v510_v1  ;;  %v2707_v1 = vrot.slane %v12902_v10, 2  ;;  %v3144_v24 = vsel %vm2689_vm6, %v3141_v42, %v3143_v20 }
 0x159   : > { %10740 = vmatmul.msk.bf16.gmra.mxu1 %vm380_vm1, %v2704_v21  ;;  %v1471_v26 = vld [vmem:[#allocation3 + $0xb8] sm:$0xff] }
 0x15a   : > { %1111 = vst.msk [vmem:[#allocation3 + $0xc0] sm:$0xff] %vm538_vm4, %v1075_v25  ;;  %v1507_v28 = vadd.f32 %v1471_v26, %v1415_v12  ;;  %v4983_v25 = vld [vmem:[%s15555_s4] sm:$0x3] }
 0x15b   : > { %v1418_v27 = vpop.f32.mrf.mxu2  ;;  %v5512_v26 = vld [vmem:[%s15554_s3] sm:$0xf]  ;;  %v5302_v29 = vsel %vm435_vm0, %v4983_v25, 0 }
 0x15c   : > { %1543 = vst.msk [vmem:[#allocation3 + $0xb8] sm:$0xff] %vm538_vm4, %v1507_v28  ;;  %v1796_v33 = vpop.f32.mrf.mxu3  ;;  %v1888_v28 = vld [vmem:[#allocation3 + $0x20] sm:$0xff]  ;;  %v5832_v30 = vsel %vm5830_vm7, %v5512_v26, 0  ;;  %5311 = vmatpush.bf16.msra.mxu1 %v5302_v29  ;;  %v1891_v25 = vld [vmem:[#allocation3 + $0x38] sm:$0xff] }
 0x15d   : > { %v1921_v35 = vadd.f32 %v1885_v34, %v1796_v33  ;;  %v2708_v34 = vsel %vm2689_vm6, %v2705_v47, %v2707_v1  ;;  %5841 = vmatpush.bf16.msra.mxu2 %v5832_v30 }
 0x15e   : > { %v987_v36 = vpop.f32.mrf.mxu1  ;;  %v2450_v13 = vld [vmem:[#allocation3] sm:$0xff] }
 0x15f   : > { %v513_v37 = vpop.f32.mrf.mxu0  ;;  %1957 = vst.msk [vmem:[#allocation3 + $0x8] sm:$0xff] %vm538_vm4, %v1921_v35  ;;  %v1040_v41 = vld [vmem:[#allocation3 + $0xc8] sm:$0xff] }
 0x160   : > { %v1076_v44 = vadd.f32 %v1040_v41, %v987_v36  ;;  %565 = vst.msk [vmem:[#allocation3 + $0xd0] sm:$0xff] %vm538_vm4, %v513_v37  ;;  %v12938_v37 = vld [vmem:[%s12357_s10 + $0x68] sm:$0xff] }
 0x161   : > { %v1472_v45 = vld [vmem:[#allocation3 + $0xc0] sm:$0xff]  ;;  %10563 = vmatmul.msk.bf16.gmra.mxu3 %vm380_vm1, %v1707_v38  ;;  %v2216_v38 = vrot.slane %v2214_v22, 1 }
 0x162   : > { %10651 = vmatmul.msk.bf16.gmra.mxu0 %vm380_vm1, %v2203_v39  ;;  %1112 = vst.msk [vmem:[#allocation3 + $0xc8] sm:$0xff] %vm538_vm4, %v1076_v44  ;;  %v1508_v49 = vadd.f32 %v1472_v45, %v1418_v27  ;;  %v2219_v39 = vrot.slane %v2217_v23, 2  ;;  %v12993_v23 = vld [vmem:[%s12357_s10 + $0x68] sm:$0xff] }
 0x163   : > { %v1420_v46 = vpop.f32.mrf.mxu2 }
 0x164   : > { %1544 = vst.msk [vmem:[#allocation3 + $0xc0] sm:$0xff] %vm538_vm4, %v1508_v49  ;;  %v1799_v51 = vpop.f32.mrf.mxu3  ;;  %v12944_v47 = vor.u32 %v2219_v39, %v2216_v38  ;;  %v12948_v49 = vld [vmem:[%s12357_s10 + $0x60] sm:$0xff] }
 0x165   : > { %v1922_v53 = vadd.f32 %v1886_v52, %v1799_v51  ;;  %v12952_v52 = vld [vmem:[%s12357_s10 + $0x58] sm:$0xff] }
 0x166   : > { %v990_v54 = vpop.f32.mrf.mxu1  ;;  %v2451_v36 = vld [vmem:[#allocation3 + $0x8] sm:$0xff]  ;;  %v2709_v57 = vrot.slane %v12952_v52, 2 }
 0x167   : > { %v515_v56 = vpop.f32.mrf.mxu0  ;;  %1958 = vst.msk [vmem:[#allocation3 + $0x10] sm:$0xff] %vm538_vm4, %v1922_v53  ;;  %v1041_v60 = vld [vmem:[#allocation3 + $0xd0] sm:$0xff] }
 0x168   : > { %10831 = vmatmul.msk.bf16.gmra.mxu2 %vm380_vm1, %v3142_v50  ;;  %v1077_v61 = vadd.f32 %v1041_v60, %v990_v54  ;;  %566 = vst.msk [vmem:[#allocation3 + $0xd8] sm:$0xff] %vm538_vm4, %v515_v56  ;;  %v2221_v56 = vsel %vm2123_vm5, %v12895_v3, %v12944_v47  ;;  %v3145_v60 = vrot.slane %v12948_v49, 2  ;;  %v2226_v3 = vshll.u32 %v12008_v58, 16  ;;  %v13028_v49 = vld [vmem:[%s12357_s10 + $0x78] sm:$0xff] }
 0x169   : > { %10741 = vmatmul.msk.bf16.gmra.mxu1 %vm380_vm1, %v2706_v55  ;;  %v1473_v62 = vld [vmem:[#allocation3 + $0xc8] sm:$0xff] }
 0x16a   : > { %1113 = vst.msk [vmem:[#allocation3 + $0xd0] sm:$0xff] %vm538_vm4, %v1077_v61  ;;  %v1509_v0 = vadd.f32 %v1473_v62, %v1420_v46  ;;  %v1710_v46 = vrot.slane %v12938_v37, 1 }
 0x16b   : > { %v1423_v63 = vpop.f32.mrf.mxu2 }
 0x16c   : > { %1545 = vst.msk [vmem:[#allocation3 + $0xc8] sm:$0xff] %vm538_vm4, %v1509_v0  ;;  %v1801_v5 = vpop.f32.mrf.mxu3  ;;  %v1711_v55 = vsel %vm1254_vm2, %v1708_v2, %v1710_v46  ;;  %v2223_v2 = vshrl.u32 %v12008_v58, 16 }
 0x16d   : > { %v1923_v8 = vadd.f32 %v1887_v7, %v1801_v5  ;;  %v3146_v7 = vsel %vm2689_vm6, %v3143_v20, %v3145_v60 }
 0x16e   : > { %v992_v9 = vpop.f32.mrf.mxu1  ;;  %v2452_v54 = vld [vmem:[#allocation3 + $0x10] sm:$0xff] }
 0x16f   : > { %v2360_v12 = vpop.f32.mrf.mxu0  ;;  %1959 = vst.msk [vmem:[#allocation3 + $0x18] sm:$0xff] %vm538_vm4, %v1923_v8  ;;  %v1042_v18 = vld [vmem:[#allocation3 + $0xd8] sm:$0xff] }
 0x170   : > { %v2486_v19 = vadd.f32 %v2450_v13, %v2360_v12  ;;  %v1078_v6 = vadd.f32 %v1042_v18, %v992_v9  ;;  %v1890_v9 = vld [vmem:[#allocation3 + $0x30] sm:$0xff]  ;;  %v2225_v18 = vrot.slane %v2223_v2, 1  ;;  %v1893_v2 = vld [vmem:[#allocation3 + $0x48] sm:$0xff] }
 0x171   : > { %v1474_v11 = vld [vmem:[#allocation3 + $0xd0] sm:$0xff]  ;;  %10564 = vmatmul.msk.bf16.gmra.mxu3 %vm380_vm1, %v1709_v14  ;;  %v2710_v14 = vsel %vm2689_vm6, %v2707_v1, %v2709_v57  ;;  %v1712_v1 = vrot.slane %v12983_v4, 1 }
 0x172   : > { %2522 = vst.msk [vmem:[#allocation3] sm:$0xff] %vm538_vm4, %v2486_v19  ;;  %10652 = vmatmul.msk.bf16.gmra.mxu0 %vm380_vm1, %v2212_v15  ;;  %v1510_v17 = vadd.f32 %v1474_v11, %v1423_v63  ;;  %v2228_v19 = vrot.slane %v2226_v3, 2 }
 0x173   : > { %v1425_v21 = vpop.f32.mrf.mxu2  ;;  %1114 = vst.msk [vmem:[#allocation3 + $0xd8] sm:$0xff] %vm538_vm4, %v1078_v6 }
 0x174   : > { %1546 = vst.msk [vmem:[#allocation3 + $0xd0] sm:$0xff] %vm538_vm4, %v1510_v17  ;;  %v1804_v27 = vpop.f32.mrf.mxu3  ;;  %v12989_v17 = vor.u32 %v2228_v19, %v2225_v18 }
 0x175   : > { %v1924_v32 = vadd.f32 %v1888_v28, %v1804_v27  ;;  %v12997_v28 = vld [vmem:[%s12357_s10 + $0x60] sm:$0xff] }
 0x176   : > { %v2797_v33 = vpop.f32.mrf.mxu1  ;;  %v2453_v16 = vld [vmem:[#allocation3 + $0x18] sm:$0xff]  ;;  %v2711_v37 = vrot.slane %v12997_v28, 2 }
 0x177   : > { %v2362_v35 = vpop.f32.mrf.mxu0  ;;  %1960 = vst.msk [vmem:[#allocation3 + $0x20] sm:$0xff] %vm538_vm4, %v1924_v32  ;;  %v1713_v32 = vsel %vm1254_vm2, %v1710_v46, %v1712_v1 }
 0x178   : > { %10832 = vmatmul.msk.bf16.gmra.mxu2 %vm380_vm1, %v3144_v24  ;;  %v2487_v40 = vadd.f32 %v2451_v36, %v2362_v35  ;;  %v3147_v36 = vrot.slane %v12993_v23, 2  ;;  %v13073_v23 = vld [vmem:[%s12357_s10 + $0x80] sm:$0xff] }
 0x179   : > { %v2887_v41 = vld [vmem:[#allocation3] sm:$0xff]  ;;  %10742 = vmatmul.msk.bf16.gmra.mxu1 %vm380_vm1, %v2708_v34 }
 0x17a   : > { %v2923_v31 = vadd.f32 %v2887_v41, %v2797_v33  ;;  %2523 = vst.msk [vmem:[#allocation3 + $0x8] sm:$0xff] %vm538_vm4, %v2487_v40  ;;  %v1475_v42 = vld [vmem:[#allocation3 + $0xd8] sm:$0xff]  ;;  %v2230_v33 = vsel %vm2123_vm5, %v12944_v47, %v12989_v17  ;;  %v12009_v34 = vld [vmem:[%s12357_s10 + $0x68] sm:$0xff] }
 0x17b   : > { %v3229_v44 = vpop.f32.mrf.mxu2  ;;  %v1511_v45 = vadd.f32 %v1475_v42, %v1425_v21  ;;  %v2235_v42 = vshll.u32 %v12009_v34, 16  ;;  %v1892_v47 = vld [vmem:[#allocation3 + $0x40] sm:$0xff] }
 0x17c   : > { %2959 = vst.msk [vmem:[#allocation3] sm:$0xff] %vm538_vm4, %v2923_v31  ;;  %v1806_v43 = vpop.f32.mrf.mxu3  ;;  %v2232_v31 = vshrl.u32 %v12009_v34, 16 }
 0x17d   : > { %1547 = vst.msk [vmem:[#allocation3 + $0xd8] sm:$0xff] %vm538_vm4, %v1511_v45  ;;  %v1925_v50 = vadd.f32 %v1889_v48, %v1806_v43  ;;  %v3148_v45 = vsel %vm2689_vm6, %v3145_v60, %v3147_v36 }
 0x17e   : > { %v2799_v51 = vpop.f32.mrf.mxu1  ;;  %v2454_v30 = vld [vmem:[#allocation3 + $0x20] sm:$0xff] }
 0x17f   : > { %v2365_v53 = vpop.f32.mrf.mxu0  ;;  %1961 = vst.msk [vmem:[#allocation3 + $0x28] sm:$0xff] %vm538_vm4, %v1925_v50  ;;  %v2712_v50 = vsel %vm2689_vm6, %v2709_v57, %v2711_v37 }
 0x180   : > { %v2488_v59 = vadd.f32 %v2452_v54, %v2365_v53  ;;  %v2234_v54 = vrot.slane %v2232_v31, 1  ;;  %v1895_v31 = vld [vmem:[#allocation3 + $0x58] sm:$0xff] }
 0x181   : > { %v2888_v61 = vld [vmem:[#allocation3 + $0x8] sm:$0xff]  ;;  %10565 = vmatmul.msk.bf16.gmra.mxu3 %vm380_vm1, %v1711_v55  ;;  %v2237_v55 = vrot.slane %v2235_v42, 2 }
 0x182   : > { %v2924_v62 = vadd.f32 %v2888_v61, %v2799_v51  ;;  %2524 = vst.msk [vmem:[#allocation3 + $0x10] sm:$0xff] %vm538_vm4, %v2488_v59  ;;  %10653 = vmatmul.msk.bf16.gmra.mxu0 %vm380_vm1, %v2221_v56  ;;  %v1714_v61 = vrot.slane %v13028_v49, 1 }
 0x183   : > { %v3231_v63 = vpop.f32.mrf.mxu2  ;;  %v3319_v0 = vld [vmem:[#allocation3] sm:$0xff] }
 0x184   : > { %2960 = vst.msk [vmem:[#allocation3 + $0x8] sm:$0xff] %vm538_vm4, %v2924_v62  ;;  %v3355_v5 = vadd.f32 %v3319_v0, %v3229_v44  ;;  %v1809_v8 = vpop.f32.mrf.mxu3  ;;  %v13034_v62 = vor.u32 %v2237_v55, %v2234_v54 }
 0x185   : > { %v1926_v12 = vadd.f32 %v1890_v9, %v1809_v8 }
 0x186   : > { %3391 = vst.msk [vmem:[#allocation3] sm:$0xff] %vm538_vm4, %v3355_v5  ;;  %v2802_v13 = vpop.f32.mrf.mxu1  ;;  %v2455_v53 = vld [vmem:[#allocation3 + $0x28] sm:$0xff] }
 0x187   : > { %v2367_v15 = vpop.f32.mrf.mxu0  ;;  %1962 = vst.msk [vmem:[#allocation3 + $0x30] sm:$0xff] %vm538_vm4, %v1926_v12  ;;  %v1715_v12 = vsel %vm1254_vm2, %v1712_v1, %v1714_v61 }
 0x188   : > { %10833 = vmatmul.msk.bf16.gmra.mxu2 %vm380_vm1, %v3146_v7  ;;  %v2489_v20 = vadd.f32 %v2453_v16, %v2367_v15  ;;  %v13042_v7 = vld [vmem:[%s12357_s10 + $0x68] sm:$0xff] }
 0x189   : > { %v2889_v6 = vld [vmem:[#allocation3 + $0x10] sm:$0xff]  ;;  %10743 = vmatmul.msk.bf16.gmra.mxu1 %vm380_vm1, %v2710_v14  ;;  %v12010_v14 = vld [vmem:[%s12357_s10 + $0x70] sm:$0xff]  ;;  %v2713_v4 = vrot.slane %v13042_v7, 2 }
 0x18a   : > { %v2925_v11 = vadd.f32 %v2889_v6, %v2802_v13  ;;  %2525 = vst.msk [vmem:[#allocation3 + $0x18] sm:$0xff] %vm538_vm4, %v2489_v20  ;;  %v2239_v13 = vsel %vm2123_vm5, %v12989_v17, %v13034_v62 }
 0x18b   : > { %v3234_v10 = vpop.f32.mrf.mxu2  ;;  %v3320_v21 = vld [vmem:[#allocation3 + $0x8] sm:$0xff] }
 0x18c   : > { %2961 = vst.msk [vmem:[#allocation3 + $0x10] sm:$0xff] %vm538_vm4, %v2925_v11  ;;  %v3356_v22 = vadd.f32 %v3320_v21, %v3231_v63  ;;  %v1811_v24 = vpop.f32.mrf.mxu3  ;;  %v13038_v63 = vld [vmem:[%s12357_s10 + $0x70] sm:$0xff]  ;;  %v2241_v11 = vshrl.u32 %v12010_v14, 16 }
 0x18d   : > { %v1927_v26 = vadd.f32 %v1891_v25, %v1811_v24  ;;  %v3149_v16 = vrot.slane %v13038_v63, 2  ;;  %v13118_v63 = vld [vmem:[%s12357_s10 + $0x88] sm:$0xff] }
 0x18e   : > { %3392 = vst.msk [vmem:[#allocation3 + $0x8] sm:$0xff] %vm538_vm4, %v3356_v22  ;;  %v2804_v27 = vpop.f32.mrf.mxu1  ;;  %v2456_v9 = vld [vmem:[#allocation3 + $0x30] sm:$0xff] }
 0x18f   : > { %v2370_v29 = vpop.f32.mrf.mxu0  ;;  %1963 = vst.msk [vmem:[#allocation3 + $0x38] sm:$0xff] %vm538_vm4, %v1927_v26  ;;  %v3150_v1 = vsel %vm2689_vm6, %v3147_v36, %v3149_v16  ;;  %v1894_v22 = vld [vmem:[#allocation3 + $0x50] sm:$0xff]  ;;  %v2714_v26 = vsel %vm2689_vm6, %v2711_v37, %v2713_v4 }
 0x190   : > { %v2490_v35 = vadd.f32 %v2454_v30, %v2370_v29  ;;  %v2243_v30 = vrot.slane %v2241_v11, 1  ;;  %v1897_v11 = vld [vmem:[#allocation3 + $0x68] sm:$0xff] }
 0x191   : > { %v2890_v38 = vld [vmem:[#allocation3 + $0x18] sm:$0xff]  ;;  %10566 = vmatmul.msk.bf16.gmra.mxu3 %vm380_vm1, %v1713_v32 }
 0x192   : > { %v2926_v39 = vadd.f32 %v2890_v38, %v2804_v27  ;;  %2526 = vst.msk [vmem:[#allocation3 + $0x20] sm:$0xff] %vm538_vm4, %v2490_v35  ;;  %10654 = vmatmul.msk.bf16.gmra.mxu0 %vm380_vm1, %v2230_v33  ;;  %v1716_v38 = vrot.slane %v13073_v23, 1 }
 0x193   : > { %v3236_v40 = vpop.f32.mrf.mxu2  ;;  %v3321_v41 = vld [vmem:[#allocation3 + $0x10] sm:$0xff] }
 0x194   : > { %2962 = vst.msk [vmem:[#allocation3 + $0x18] sm:$0xff] %vm538_vm4, %v2926_v39  ;;  %v3357_v44 = vadd.f32 %v3321_v41, %v3234_v10  ;;  %v1814_v46 = vpop.f32.mrf.mxu3  ;;  %v2244_v10 = vshll.u32 %v12010_v14, 16 }
 0x195   : > { %v1928_v43 = vadd.f32 %v1892_v47, %v1814_v46 }
 0x196   : > { %3393 = vst.msk [vmem:[#allocation3 + $0x10] sm:$0xff] %vm538_vm4, %v3357_v44  ;;  %v2807_v48 = vpop.f32.mrf.mxu1  ;;  %v2457_v29 = vld [vmem:[#allocation3 + $0x38] sm:$0xff]  ;;  %v2246_v32 = vrot.slane %v2244_v10, 2 }
 0x197   : > { %v2372_v51 = vpop.f32.mrf.mxu0  ;;  %1964 = vst.msk [vmem:[#allocation3 + $0x40] sm:$0xff] %vm538_vm4, %v1928_v43  ;;  %v1717_v43 = vsel %vm1254_vm2, %v1714_v61, %v1716_v38 }
 0x198   : > { %10834 = vmatmul.msk.bf16.gmra.mxu2 %vm380_vm1, %v3148_v45  ;;  %v2491_v56 = vadd.f32 %v2455_v53, %v2372_v51  ;;  %v13079_v39 = vor.u32 %v2246_v32, %v2243_v30  ;;  %v13087_v45 = vld [vmem:[%s12357_s10 + $0x70] sm:$0xff] }
 0x199   : > { %v2891_v58 = vld [vmem:[#allocation3 + $0x20] sm:$0xff]  ;;  %10744 = vmatmul.msk.bf16.gmra.mxu1 %vm380_vm1, %v2712_v50  ;;  %v12011_v50 = vld [vmem:[%s12357_s10 + $0x78] sm:$0xff]  ;;  %v2715_v49 = vrot.slane %v13087_v45, 2 }
 0x19a   : > { %v2927_v59 = vadd.f32 %v2891_v58, %v2807_v48  ;;  %2527 = vst.msk [vmem:[#allocation3 + $0x28] sm:$0xff] %vm538_vm4, %v2491_v56  ;;  %v2248_v48 = vsel %vm2123_vm5, %v13034_v62, %v13079_v39 }
 0x19b   : > { %v3239_v52 = vpop.f32.mrf.mxu2  ;;  %v3322_v60 = vld [vmem:[#allocation3 + $0x18] sm:$0xff] }
 0x19c   : > { %2963 = vst.msk [vmem:[#allocation3 + $0x20] sm:$0xff] %vm538_vm4, %v2927_v59  ;;  %v3358_v57 = vadd.f32 %v3322_v60, %v3236_v40  ;;  %v1816_v0 = vpop.f32.mrf.mxu3  ;;  %v13083_v40 = vld [vmem:[%s12357_s10 + $0x78] sm:$0xff]  ;;  %v2250_v59 = vshrl.u32 %v12011_v50, 16 }
 0x19d   : > { %v1929_v3 = vadd.f32 %v1893_v2, %v1816_v0  ;;  %v3151_v53 = vrot.slane %v13083_v40, 2  ;;  %v13163_v40 = vld [vmem:[%s12357_s10 + $0x90] sm:$0xff] }
 0x19e   : > { %3394 = vst.msk [vmem:[#allocation3 + $0x18] sm:$0xff] %vm538_vm4, %v3358_v57  ;;  %v2809_v5 = vpop.f32.mrf.mxu1  ;;  %v2458_v47 = vld [vmem:[#allocation3 + $0x40] sm:$0xff] }
 0x19f   : > { %v2375_v8 = vpop.f32.mrf.mxu0  ;;  %1965 = vst.msk [vmem:[#allocation3 + $0x48] sm:$0xff] %vm538_vm4, %v1929_v3  ;;  %v3152_v61 = vsel %vm2689_vm6, %v3149_v16, %v3151_v53  ;;  %v1896_v57 = vld [vmem:[#allocation3 + $0x60] sm:$0xff]  ;;  %v2716_v3 = vsel %vm2689_vm6, %v2713_v4, %v2715_v49 }
 0x1a0   : > { %v2492_v15 = vadd.f32 %v2456_v9, %v2375_v8  ;;  %v2252_v9 = vrot.slane %v2250_v59, 1  ;;  %v1899_v59 = vld [vmem:[#allocation3 + $0x78] sm:$0xff] }
 0x1a1   : > { %v2892_v18 = vld [vmem:[#allocation3 + $0x28] sm:$0xff]  ;;  %10567 = vmatmul.msk.bf16.gmra.mxu3 %vm380_vm1, %v1715_v12 }
 0x1a2   : > { %v2928_v19 = vadd.f32 %v2892_v18, %v2809_v5  ;;  %2528 = vst.msk [vmem:[#allocation3 + $0x30] sm:$0xff] %vm538_vm4, %v2492_v15  ;;  %10655 = vmatmul.msk.bf16.gmra.mxu0 %vm380_vm1, %v2239_v13  ;;  %v1718_v18 = vrot.slane %v13118_v63, 1 }
 0x1a3   : > { %v3241_v20 = vpop.f32.mrf.mxu2  ;;  %v3323_v6 = vld [vmem:[#allocation3 + $0x20] sm:$0xff] }
 0x1a4   : > { %2964 = vst.msk [vmem:[#allocation3 + $0x28] sm:$0xff] %vm538_vm4, %v2928_v19  ;;  %v3359_v21 = vadd.f32 %v3323_v6, %v3239_v52  ;;  %v1819_v17 = vpop.f32.mrf.mxu3  ;;  %v2253_v52 = vshll.u32 %v12011_v50, 16 }
 0x1a5   : > { %v1930_v24 = vadd.f32 %v1894_v22, %v1819_v17 }
 0x1a6   : > { %3395 = vst.msk [vmem:[#allocation3 + $0x20] sm:$0xff] %vm538_vm4, %v3359_v21  ;;  %v2812_v25 = vpop.f32.mrf.mxu1  ;;  %v2459_v8 = vld [vmem:[#allocation3 + $0x48] sm:$0xff]  ;;  %v2255_v12 = vrot.slane %v2253_v52, 2 }
 0x1a7   : > { %v2377_v27 = vpop.f32.mrf.mxu0  ;;  %1966 = vst.msk [vmem:[#allocation3 + $0x50] sm:$0xff] %vm538_vm4, %v1930_v24  ;;  %v1719_v24 = vsel %vm1254_vm2, %v1716_v38, %v1718_v18 }
 0x1a8   : > { %10835 = vmatmul.msk.bf16.gmra.mxu2 %vm380_vm1, %v3150_v1  ;;  %v2493_v33 = vadd.f32 %v2457_v29, %v2377_v27  ;;  %v13124_v19 = vor.u32 %v2255_v12, %v2252_v9  ;;  %v13132_v1 = vld [vmem:[%s12357_s10 + $0x78] sm:$0xff] }
 0x1a9   : > { %v2893_v34 = vld [vmem:[#allocation3 + $0x30] sm:$0xff]  ;;  %10745 = vmatmul.msk.bf16.gmra.mxu1 %vm380_vm1, %v2714_v26  ;;  %v12012_v26 = vld [vmem:[%s12357_s10 + $0x80] sm:$0xff]  ;;  %v2717_v23 = vrot.slane %v13132_v1, 2 }
 0x1aa   : > { %v2929_v35 = vadd.f32 %v2893_v34, %v2812_v25  ;;  %2529 = vst.msk [vmem:[#allocation3 + $0x38] sm:$0xff] %vm538_vm4, %v2493_v33  ;;  %v2257_v25 = vsel %vm2123_vm5, %v13079_v39, %v13124_v19  ;;  %v1592_v9 = vld [vmem:[%s12357_s10 + $0x98] sm:$0x1] }
 0x1ab   : > { %v3244_v28 = vpop.f32.mrf.mxu2  ;;  %v3324_v36 = vld [vmem:[#allocation3 + $0x28] sm:$0xff] }
 0x1ac   : > { %2965 = vst.msk [vmem:[#allocation3 + $0x30] sm:$0xff] %vm538_vm4, %v2929_v35  ;;  %v3360_v37 = vadd.f32 %v3324_v36, %v3241_v20  ;;  %v1821_v41 = vpop.f32.mrf.mxu3  ;;  %v13128_v20 = vld [vmem:[%s12357_s10 + $0x80] sm:$0xff]  ;;  %v2259_v35 = vshrl.u32 %v12012_v26, 16 }
 0x1ad   : > { %v1931_v42 = vadd.f32 %v1895_v31, %v1821_v41  ;;  %v3153_v29 = vrot.slane %v13128_v20, 2 }
 0x1ae   : > { %3396 = vst.msk [vmem:[#allocation3 + $0x28] sm:$0xff] %vm538_vm4, %v3360_v37  ;;  %v2814_v44 = vpop.f32.mrf.mxu1  ;;  %v2460_v22 = vld [vmem:[#allocation3 + $0x50] sm:$0xff] }
 0x1af   : > { %v2380_v46 = vpop.f32.mrf.mxu0  ;;  %1967 = vst.msk [vmem:[#allocation3 + $0x58] sm:$0xff] %vm538_vm4, %v1931_v42  ;;  %v3154_v38 = vsel %vm2689_vm6, %v3151_v53, %v3153_v29  ;;  %v1898_v37 = vld [vmem:[#allocation3 + $0x70] sm:$0xff]  ;;  %v2718_v42 = vsel %vm2689_vm6, %v2715_v49, %v2717_v23 }
 0x1b0   : > { %v2494_v51 = vadd.f32 %v2458_v47, %v2380_v46  ;;  %v2261_v47 = vrot.slane %v2259_v35, 1  ;;  %v12051_v35 = vld [vmem:[%s12357_s10 + $0x10] sm:$0xf0] }
 0x1b1   : > { %v2894_v54 = vld [vmem:[#allocation3 + $0x38] sm:$0xff]  ;;  %10568 = vmatmul.msk.bf16.gmra.mxu3 %vm380_vm1, %v1717_v43 }
 0x1b2   : > { %v2930_v55 = vadd.f32 %v2894_v54, %v2814_v44  ;;  %2530 = vst.msk [vmem:[#allocation3 + $0x40] sm:$0xff] %vm538_vm4, %v2494_v51  ;;  %10656 = vmatmul.msk.bf16.gmra.mxu0 %vm380_vm1, %v2248_v48  ;;  %v1720_v54 = vrot.slane %v13163_v40, 1 }
 0x1b3   : > { %v3246_v56 = vpop.f32.mrf.mxu2  ;;  %v3325_v58 = vld [vmem:[#allocation3 + $0x30] sm:$0xff] }
 0x1b4   : > { %2966 = vst.msk [vmem:[#allocation3 + $0x38] sm:$0xff] %vm538_vm4, %v2930_v55  ;;  %v3361_v60 = vadd.f32 %v3325_v58, %v3244_v28  ;;  %v1824_v62 = vpop.f32.mrf.mxu3  ;;  %v2262_v28 = vshll.u32 %v12012_v26, 16 }
 0x1b5   : > { %v1932_v0 = vadd.f32 %v1896_v57, %v1824_v62 }
 0x1b6   : > { %3397 = vst.msk [vmem:[#allocation3 + $0x30] sm:$0xff] %vm538_vm4, %v3361_v60  ;;  %v2817_v2 = vpop.f32.mrf.mxu1  ;;  %v2461_v46 = vld [vmem:[#allocation3 + $0x58] sm:$0xff]  ;;  %v2264_v43 = vrot.slane %v2262_v28, 2 }
 0x1b7   : > { %v2382_v5 = vpop.f32.mrf.mxu0  ;;  %1968 = vst.msk [vmem:[#allocation3 + $0x60] sm:$0xff] %vm538_vm4, %v1932_v0  ;;  %v1721_v0 = vsel %vm1254_vm2, %v1718_v18, %v1720_v54 }
 0x1b8   : > { %10836 = vmatmul.msk.bf16.gmra.mxu2 %vm380_vm1, %v3152_v61  ;;  %v2495_v13 = vadd.f32 %v2459_v8, %v2382_v5  ;;  %v13169_v55 = vor.u32 %v2264_v43, %v2261_v47  ;;  %v13177_v61 = vld [vmem:[%s12357_s10 + $0x80] sm:$0xff] }
 0x1b9   : > { %v2895_v14 = vld [vmem:[#allocation3 + $0x40] sm:$0xff]  ;;  %10746 = vmatmul.msk.bf16.gmra.mxu1 %vm380_vm1, %v2716_v3  ;;  %v2719_v63 = vrot.slane %v13177_v61, 2 }
 0x1ba   : > { %v2931_v15 = vadd.f32 %v2895_v14, %v2817_v2  ;;  %2531 = vst.msk [vmem:[#allocation3 + $0x48] sm:$0xff] %vm538_vm4, %v2495_v13  ;;  %v2266_v2 = vsel %vm2123_vm5, %v13124_v19, %v13169_v55  ;;  %v12013_v3 = vld [vmem:[%s12357_s10 + $0x88] sm:$0xff] }
 0x1bb   : > { %v3249_v7 = vpop.f32.mrf.mxu2  ;;  %v3326_v16 = vld [vmem:[#allocation3 + $0x38] sm:$0xff]  ;;  %v2271_v18 = vshll.u32 %v12013_v3, 16 }
 0x1bc   : > { %2967 = vst.msk [vmem:[#allocation3 + $0x40] sm:$0xff] %vm538_vm4, %v2931_v15  ;;  %v3362_v4 = vadd.f32 %v3326_v16, %v3246_v56  ;;  %v1826_v6 = vpop.f32.mrf.mxu3  ;;  %v13173_v56 = vld [vmem:[%s12357_s10 + $0x88] sm:$0xff]  ;;  %v2268_v16 = vshrl.u32 %v12013_v3, 16 }
 0x1bd   : > { %v1933_v10 = vadd.f32 %v1897_v11, %v1826_v6  ;;  %v3155_v8 = vrot.slane %v13173_v56, 2  ;;  %v1900_v11 = vld [vmem:[#allocation3 + $0x80] sm:$0xff]  ;;  %v2273_v26 = vrot.slane %v2271_v18, 2 }
 0x1be   : > { %3398 = vst.msk [vmem:[#allocation3 + $0x38] sm:$0xff] %vm538_vm4, %v3362_v4  ;;  %v2819_v21 = vpop.f32.mrf.mxu1  ;;  %v2462_v57 = vld [vmem:[#allocation3 + $0x60] sm:$0xff] }
 0x1bf   : > { %v2385_v17 = vpop.f32.mrf.mxu0  ;;  %1969 = vst.msk [vmem:[#allocation3 + $0x68] sm:$0xff] %vm538_vm4, %v1933_v10  ;;  %v3156_v4 = vsel %vm2689_vm6, %v3153_v29, %v3155_v8 }
 0x1c0   : > { %v2496_v27 = vadd.f32 %v2460_v22, %v2385_v17  ;;  %v2720_v17 = vsel %vm2689_vm6, %v2717_v23, %v2719_v63 }
 0x1c1   : > { %v2896_v30 = vld [vmem:[#allocation3 + $0x48] sm:$0xff]  ;;  %10569 = vmatmul.msk.bf16.gmra.mxu3 %vm380_vm1, %v1719_v24 }
 0x1c2   : > { %v2932_v32 = vadd.f32 %v2896_v30, %v2819_v21  ;;  %2532 = vst.msk [vmem:[#allocation3 + $0x50] sm:$0xff] %vm538_vm4, %v2496_v27  ;;  %10657 = vmatmul.msk.bf16.gmra.mxu0 %vm380_vm1, %v2257_v25  ;;  %v2270_v25 = vrot.slane %v2268_v16, 1 }
 0x1c3   : > { %v3251_v33 = vpop.f32.mrf.mxu2  ;;  %v3327_v34 = vld [vmem:[#allocation3 + $0x40] sm:$0xff] }
 0x1c4   : > { %2968 = vst.msk [vmem:[#allocation3 + $0x48] sm:$0xff] %vm538_vm4, %v2932_v32  ;;  %v3363_v36 = vadd.f32 %v3327_v34, %v3249_v7  ;;  %v1829_v39 = vpop.f32.mrf.mxu3  ;;  %v1667_v7 = vunpack.c.l.b16 %v1592_v9  ;;  %v10844_v34 = vld [vmem:[%s12357_s10 + $0x10] sm:$0xc] }
 0x1c5   : > { %v1934_v41 = vadd.f32 %v1898_v37, %v1829_v39  ;;  %v1901_v39 = vld [vmem:[#allocation3 + $0x88] sm:$0xff]  ;;  %v13220_v37 = vld [vmem:[%s12357_s10 + $0x88] sm:$0xff] }
 0x1c6   : > { %3399 = vst.msk [vmem:[#allocation3 + $0x40] sm:$0xff] %vm538_vm4, %v3363_v36  ;;  %v2822_v31 = vpop.f32.mrf.mxu1  ;;  %v2463_v24 = vld [vmem:[#allocation3 + $0x68] sm:$0xff]  ;;  %v1686_v20 = vpack.c.b16 %v1667_v7, %v1667_v7 }
 0x1c7   : > { %v2387_v44 = vpop.f32.mrf.mxu0  ;;  %1970 = vst.msk [vmem:[#allocation3 + $0x70] sm:$0xff] %vm538_vm4, %v1934_v41  ;;  %v13217_v36 = vld [vmem:[%s12357_s10 + $0x90] sm:$0xff] }
 0x1c8   : > { %10837 = vmatmul.msk.bf16.gmra.mxu2 %vm380_vm1, %v3154_v38  ;;  %v2497_v48 = vadd.f32 %v2461_v46, %v2387_v44  ;;  %v1722_v23 = vrot.slane %v1686_v20, 1  ;;  %v10845_v44 = vor.u32 %v12051_v35, %v10844_v34 }
 0x1c9   : > { %v2897_v50 = vld [vmem:[#allocation3 + $0x50] sm:$0xff]  ;;  %10747 = vmatmul.msk.bf16.gmra.mxu1 %vm380_vm1, %v2718_v42  ;;  %v12014_v42 = vld [vmem:[%s12357_s10 + $0x90] sm:$0xff] }
 0x1ca   : > { %v2933_v51 = vadd.f32 %v2897_v50, %v2822_v31  ;;  %2533 = vst.msk [vmem:[#allocation3 + $0x58] sm:$0xff] %vm538_vm4, %v2497_v48  ;;  %v1723_v43 = vsel %vm1254_vm2, %v1720_v54, %v1722_v23  ;;  %v12052_v50 = vld [vmem:[%s12357_s10 + $0x18] sm:$0xff]  ;;  %v2277_v54 = vshrl.u32 %v12014_v42, 16 }
 0x1cb   : > { %v3254_v45 = vpop.f32.mrf.mxu2  ;;  %v3328_v53 = vld [vmem:[#allocation3 + $0x48] sm:$0xff] }
 0x1cc   : > { %2969 = vst.msk [vmem:[#allocation3 + $0x50] sm:$0xff] %vm538_vm4, %v2933_v51  ;;  %v3364_v49 = vadd.f32 %v3328_v53, %v3251_v33  ;;  %v1831_v58 = vpop.f32.mrf.mxu3  ;;  %v13211_v33 = vor.u32 %v2273_v26, %v2270_v25  ;;  %v13260_v25 = vld [vmem:[%s12357_s10 + $0x98] sm:$0xff] }
 0x1cd   : > { %v1935_v52 = vadd.f32 %v1899_v59, %v1831_v58  ;;  %v2280_v59 = vshll.u32 %v12014_v42, 16 }
 0x1ce   : > { %3400 = vst.msk [vmem:[#allocation3 + $0x48] sm:$0xff] %vm538_vm4, %v3364_v49  ;;  %v2824_v60 = vpop.f32.mrf.mxu1  ;;  %v2464_v47 = vld [vmem:[#allocation3 + $0x70] sm:$0xff]  ;;  %v2275_v48 = vsel %vm2123_vm5, %v13169_v55, %v13211_v33  ;;  %v2721_v49 = vrot.slane %v13220_v37, 2  ;;  %v3560_v55 = vshrl.u32 %v10845_v44, 16 }
 0x1cf   : > { %v2390_v62 = vpop.f32.mrf.mxu0  ;;  %1971 = vst.msk [vmem:[#allocation3 + $0x78] sm:$0xff] %vm538_vm4, %v1935_v52 }
 0x1d0   : > { %v2498_v5 = vadd.f32 %v2462_v57, %v2390_v62  ;;  %v3568_v62 = vshrl.u32 %v12052_v50, 16  ;;  %v3571_v57 = vshll.u32 %v12052_v50, 16  ;;  %v2722_v9 = vsel %vm2689_vm6, %v2719_v63, %v2721_v49 }
 0x1d1   : > { %v2898_v12 = vld [vmem:[#allocation3 + $0x58] sm:$0xff]  ;;  %10570 = vmatmul.msk.bf16.gmra.mxu3 %vm380_vm1, %v1721_v0  ;;  %v3562_v7 = vrot.slane %v3560_v55, 2 }
 0x1d2   : > { %v2934_v13 = vadd.f32 %v2898_v12, %v2824_v60  ;;  %2534 = vst.msk [vmem:[#allocation3 + $0x60] sm:$0xff] %vm538_vm4, %v2498_v5  ;;  %10658 = vmatmul.msk.bf16.gmra.mxu0 %vm380_vm1, %v2266_v2  ;;  %v3563_v60 = vshll.u32 %v10845_v44, 16  ;;  %v1902_v5 = vld [vmem:[#allocation3 + $0x90] sm:$0xff]  ;;  %v3570_v18 = vrot.slane %v3568_v62, 2 }
 0x1d3   : > { %v3256_v14 = vpop.f32.mrf.mxu2  ;;  %v3329_v15 = vld [vmem:[#allocation3 + $0x50] sm:$0xff] }
 0x1d4   : > { %2970 = vst.msk [vmem:[#allocation3 + $0x58] sm:$0xff] %vm538_vm4, %v2934_v13  ;;  %v3365_v19 = vadd.f32 %v3329_v15, %v3254_v45  ;;  %v1834_v6 = vpop.f32.mrf.mxu3  ;;  %v3157_v45 = vrot.slane %v13217_v36, 2  ;;  %v2282_v15 = vrot.slane %v2280_v59, 2 }
 0x1d5   : > { %v1936_v10 = vadd.f32 %v1900_v11, %v1834_v6 }
 0x1d6   : > { %3401 = vst.msk [vmem:[#allocation3 + $0x50] sm:$0xff] %vm538_vm4, %v3365_v19  ;;  %v2827_v21 = vpop.f32.mrf.mxu1  ;;  %v3158_v2 = vsel %vm2689_vm6, %v3155_v8, %v3157_v45  ;;  %v2465_v56 = vld [vmem:[#allocation3 + $0x78] sm:$0xff]  ;;  %v3565_v8 = vrot.slane %v3563_v60, 3  ;;  %v3573_v19 = vrot.slane %v3571_v57, 3 }
 0x1d7   : > { %v2392_v22 = vpop.f32.mrf.mxu0  ;;  %1972 = vst.msk [vmem:[#allocation3 + $0x80] sm:$0xff] %vm538_vm4, %v1936_v10 }
 0x1d8   : > { %10838 = vmatmul.msk.bf16.gmra.mxu2 %vm380_vm1, %v3156_v4  ;;  %v2499_v27 = vadd.f32 %v2463_v24, %v2392_v22  ;;  %v2028_v4 = vld [vmem:[%s12357_s10 + $0x98] sm:$0x3]  ;;  %v3566_v22 = vor.u32 %v3565_v8, %v3562_v7  ;;  %v13256_v24 = vor.u32 %v3573_v19, %v3570_v18  ;;  %v1905_v8 = vld [vmem:[#allocation3 + $0xa8] sm:$0xff] }
 0x1d9   : > { %v2899_v29 = vld [vmem:[#allocation3 + $0x60] sm:$0xff]  ;;  %10748 = vmatmul.msk.bf16.gmra.mxu1 %vm380_vm1, %v2720_v17  ;;  %v2103_v10 = vunpack.c.l.b16 %v2028_v4 }
 0x1da   : > { %v2935_v1 = vadd.f32 %v2899_v29, %v2827_v21  ;;  %2535 = vst.msk [vmem:[#allocation3 + $0x68] sm:$0xff] %vm538_vm4, %v2499_v27  ;;  %v1903_v27 = vld [vmem:[#allocation3 + $0x98] sm:$0xff] }
 0x1db   : > { %v3259_v30 = vpop.f32.mrf.mxu2  ;;  %v3330_v32 = vld [vmem:[#allocation3 + $0x58] sm:$0xff] }
 0x1dc   : > { %2971 = vst.msk [vmem:[#allocation3 + $0x60] sm:$0xff] %vm538_vm4, %v2935_v1  ;;  %v3366_v28 = vadd.f32 %v3330_v32, %v3256_v14  ;;  %v1836_v38 = vpop.f32.mrf.mxu3  ;;  %v2279_v14 = vrot.slane %v2277_v54, 1  ;;  %v2122_v32 = vpack.c.b16 %v2103_v10, %v2103_v10  ;;  %v3031_v54 = vld [vmem:[%s12357_s10 + $0xa0] sm:$0x3]  ;;  %v12054_v10 = vld [vmem:[%s12357_s10 + $0x28] sm:$0xff] }
 0x1dd   : > { %v1937_v41 = vadd.f32 %v1901_v39, %v1836_v38  ;;  %v12053_v38 = vld [vmem:[%s12357_s10 + $0x20] sm:$0xff] }
 0x1de   : > { %3402 = vst.msk [vmem:[#allocation3 + $0x58] sm:$0xff] %vm538_vm4, %v3366_v28  ;;  %v2829_v31 = vpop.f32.mrf.mxu1  ;;  %v13254_v17 = vor.u32 %v2282_v15, %v2279_v14  ;;  %v2466_v34 = vld [vmem:[#allocation3 + $0x80] sm:$0xff]  ;;  %v3575_v28 = vsel %vm3558_vm8, %v3566_v22, %v13256_v24  ;;  %v3580_v50 = vshll.u32 %v12053_v38, 16 }
 0x1df   : > { %v2395_v46 = vpop.f32.mrf.mxu0  ;;  %1973 = vst.msk [vmem:[#allocation3 + $0x88] sm:$0xff] %vm538_vm4, %v1937_v41  ;;  %v3159_v41 = vrot.slane %v13260_v25, 2 }
 0x1e0   : > { %v2500_v51 = vadd.f32 %v2464_v47, %v2395_v46  ;;  %v2284_v35 = vsel %vm2123_vm5, %v13211_v33, %v13254_v17  ;;  %v2286_v46 = vshrl.u32 %v2122_v32, 16 }
 0x1e1   : > { %v2900_v53 = vld [vmem:[#allocation3 + $0x68] sm:$0xff]  ;;  %10571 = vmatmul.msk.bf16.gmra.mxu3 %vm380_vm1, %v1723_v43  ;;  %v2289_v43 = vshll.u32 %v2122_v32, 16  ;;  %v3586_v32 = vshrl.u32 %v12054_v10, 16 }
 0x1e2   : > { %v2936_v58 = vadd.f32 %v2900_v53, %v2829_v31  ;;  %2536 = vst.msk [vmem:[#allocation3 + $0x70] sm:$0xff] %vm538_vm4, %v2500_v51  ;;  %10659 = vmatmul.msk.bf16.gmra.mxu0 %vm380_vm1, %v2275_v48  ;;  %v3577_v48 = vshrl.u32 %v12053_v38, 16  ;;  %v3160_v53 = vsel %vm2689_vm6, %v3157_v45, %v3159_v41  ;;  %v2288_v60 = vrot.slane %v2286_v46, 1  ;;  %v12069_v38 = vld [vmem:[%s12357_s10 + $0x10] sm:$0xf0] }
 0x1e3   : > { %v3261_v40 = vpop.f32.mrf.mxu2  ;;  %v3331_v52 = vld [vmem:[#allocation3 + $0x60] sm:$0xff]  ;;  %v2291_v36 = vrot.slane %v2289_v43, 2  ;;  %v12088_v43 = vld [vmem:[%s12357_s10 + $0x10] sm:$0xff]  ;;  %v3588_v25 = vrot.slane %v3586_v32, 2 }
 0x1e4   : > { %2972 = vst.msk [vmem:[#allocation3 + $0x68] sm:$0xff] %vm538_vm4, %v2936_v58  ;;  %v3367_v0 = vadd.f32 %v3331_v52, %v3259_v30  ;;  %v1839_v3 = vpop.f32.mrf.mxu3  ;;  %v13264_v30 = vld [vmem:[%s12357_s10 + $0x90] sm:$0xff]  ;;  %v3579_v45 = vrot.slane %v3577_v48, 2 }
 0x1e5   : > { %v1938_v12 = vadd.f32 %v1902_v5, %v1839_v3  ;;  %v2723_v33 = vrot.slane %v13264_v30, 2  ;;  %v3106_v5 = vunpack.c.l.b16 %v3031_v54  ;;  %v2292_v14 = vor.u32 %v2291_v36, %v2288_v60 }
 0x1e6   : > { %3403 = vst.msk [vmem:[#allocation3 + $0x60] sm:$0xff] %vm538_vm4, %v3367_v0  ;;  %v2832_v13 = vpop.f32.mrf.mxu1  ;;  %v2467_v57 = vld [vmem:[#allocation3 + $0x88] sm:$0xff]  ;;  %v3582_v0 = vrot.slane %v3580_v50, 3 }
 0x1e7   : > { %v2397_v16 = vpop.f32.mrf.mxu0  ;;  %1974 = vst.msk [vmem:[#allocation3 + $0x90] sm:$0xff] %vm538_vm4, %v1938_v12  ;;  %v2724_v52 = vsel %vm2689_vm6, %v2721_v49, %v2723_v33 }
 0x1e8   : > { %10839 = vmatmul.msk.bf16.gmra.mxu2 %vm380_vm1, %v3158_v2  ;;  %v2501_v61 = vadd.f32 %v2465_v56, %v2397_v16  ;;  %v2594_v2 = vld [vmem:[%s12357_s10 + $0x98] sm:$0x3]  ;;  %v13296_v15 = vor.u32 %v3582_v0, %v3579_v45  ;;  %v3125_v16 = vpack.c.b16 %v3106_v5, %v3106_v5 }
 0x1e9   : > { %v2901_v63 = vld [vmem:[#allocation3 + $0x70] sm:$0xff]  ;;  %10749 = vmatmul.msk.bf16.gmra.mxu1 %vm380_vm1, %v2722_v9  ;;  %v2669_v49 = vunpack.c.l.b16 %v2594_v2  ;;  %v1907_v2 = vld [vmem:[#allocation3 + $0xb8] sm:$0xff] }
 0x1ea   : > { %v2937_v6 = vadd.f32 %v2901_v63, %v2832_v13  ;;  %2537 = vst.msk [vmem:[#allocation3 + $0x78] sm:$0xff] %vm538_vm4, %v2501_v61  ;;  %v3161_v22 = vrot.slane %v3125_v16, 2 }
 0x1eb   : > { %v3264_v11 = vpop.f32.mrf.mxu2  ;;  %v3332_v21 = vld [vmem:[#allocation3 + $0x68] sm:$0xff]  ;;  %v2688_v4 = vpack.c.b16 %v2669_v49, %v2669_v49 }
 0x1ec   : > { %2973 = vst.msk [vmem:[#allocation3 + $0x70] sm:$0xff] %vm538_vm4, %v2937_v6  ;;  %v3368_v20 = vadd.f32 %v3332_v21, %v3261_v40  ;;  %v1841_v26 = vpop.f32.mrf.mxu3  ;;  %v1904_v40 = vld [vmem:[#allocation3 + $0xa0] sm:$0xff]  ;;  %v2293_v6 = vsel %vm2123_vm5, %v13254_v17, %v2292_v14 }
 0x1ed   : > { %v1939_v29 = vadd.f32 %v1903_v27, %v1841_v26  ;;  %v2725_v17 = vrot.slane %v2688_v4, 2 }
 0x1ee   : > { %3404 = vst.msk [vmem:[#allocation3 + $0x68] sm:$0xff] %vm538_vm4, %v3368_v20  ;;  %v2834_v1 = vpop.f32.mrf.mxu1  ;;  %v2468_v63 = vld [vmem:[#allocation3 + $0x90] sm:$0xff] }
 0x1ef   : > { %v2400_v23 = vpop.f32.mrf.mxu0  ;;  %1975 = vst.msk [vmem:[#allocation3 + $0x98] sm:$0xff] %vm538_vm4, %v1939_v29  ;;  %v11024_v29 = vld [vmem:[%s12357_s10 + $0x8] sm:$0xe] }
 0x1f0   : > { %v2502_v39 = vadd.f32 %v2466_v34, %v2400_v23  ;;  %v3589_v23 = vshll.u32 %v12054_v10, 16 }
 0x1f1   : > { %v2902_v31 = vld [vmem:[#allocation3 + $0x78] sm:$0xff]  ;;  %10914 = vmatmul.msk.bf16.vlgmr.msra.gmra.mxu3 %vm380_vm1, %v3575_v28  ;;  %v10934_v28 = vld [vmem:[%s12357_s10 + $0x10] sm:$0x8] }
 0x1f2   : > { %v2938_v42 = vadd.f32 %v2902_v31, %v2834_v1  ;;  %2538 = vst.msk [vmem:[#allocation3 + $0x80] sm:$0xff] %vm538_vm4, %v2502_v39  ;;  %10660 = vmatmul.msk.bf16.gmra.mxu0 %vm380_vm1, %v2284_v35  ;;  %v12087_v1 = vld [vmem:[%s12357_s10 + $0x8] sm:$0xf0]  ;;  %v3162_v35 = vsel %vm2689_vm6, %v3159_v41, %v3161_v22  ;;  %v1906_v31 = vld [vmem:[#allocation3 + $0xb0] sm:$0xff]  ;;  %v3591_v41 = vrot.slane %v3589_v23, 3  ;;  %v13354_v23 = vld [vmem:[%s12357_s10 + $0x20] sm:$0xff] }
 0x1f3   : > { %v3266_v44 = vpop.f32.mrf.mxu2  ;;  %v3333_v47 = vld [vmem:[#allocation3 + $0x70] sm:$0xff]  ;;  %v1908_v22 = vld [vmem:[#allocation3 + $0xc0] sm:$0xff] }
 0x1f4   : > { %2974 = vst.msk [vmem:[#allocation3 + $0x78] sm:$0xff] %vm538_vm4, %v2938_v42  ;;  %v3369_v51 = vadd.f32 %v3333_v47, %v3264_v11  ;;  %v1844_v58 = vpop.f32.mrf.mxu3  ;;  %v3584_v11 = vsel %vm3558_vm8, %v13256_v24, %v13296_v15  ;;  %v11025_v42 = vor.u32 %v12087_v1, %v11024_v29  ;;  %v2726_v47 = vsel %vm2689_vm6, %v2723_v33, %v2725_v17 }
 0x1f5   : > { %v1940_v59 = vadd.f32 %v1904_v40, %v1844_v58 }
 0x1f6   : > { %3405 = vst.msk [vmem:[#allocation3 + $0x70] sm:$0xff] %vm538_vm4, %v3369_v51  ;;  %v2837_v55 = vpop.f32.mrf.mxu1  ;;  %v2469_v50 = vld [vmem:[#allocation3 + $0x98] sm:$0xff]  ;;  %v13325_v51 = vld [vmem:[%s12357_s10 + $0x18] sm:$0xff]  ;;  %v5078_v54 = vshrl.u32 %v11025_v42, 16 }
 0x1f7   : > { %v2402_v62 = vpop.f32.mrf.mxu0  ;;  %1976 = vst.msk [vmem:[#allocation3 + $0xa0] sm:$0xff] %vm538_vm4, %v1940_v59  ;;  %v5081_v59 = vshll.u32 %v11025_v42, 16  ;;  %v4130_v36 = vrot.slane %v13325_v51, 3 }
 0x1f8   : > { %10840 = vmatmul.msk.bf16.gmra.mxu2 %vm380_vm1, %v3160_v53  ;;  %v2503_v3 = vadd.f32 %v2467_v57, %v2402_v62  ;;  %v10935_v53 = vor.u32 %v12069_v38, %v10934_v28  ;;  %v13330_v62 = vor.u32 %v3591_v41, %v3588_v25 }
 0x1f9   : > { %v2903_v9 = vld [vmem:[#allocation3 + $0x80] sm:$0xff]  ;;  %10750 = vmatmul.msk.bf16.gmra.mxu1 %vm380_vm1, %v2724_v52  ;;  %v5089_v52 = vshll.u32 %v12088_v43, 16 }
 0x1fa   : > { %v2939_v12 = vadd.f32 %v2903_v9, %v2837_v55  ;;  %2539 = vst.msk [vmem:[#allocation3 + $0x88] sm:$0xff] %vm538_vm4, %v2503_v3  ;;  %v5086_v55 = vshrl.u32 %v12088_v43, 16  ;;  %v4129_v57 = vrot.slane %v10935_v53, 3  ;;  %v5080_v3 = vrot.slane %v5078_v54, 1 }
 0x1fb   : > { %v3269_v37 = vpop.f32.mrf.mxu2  ;;  %v3334_v13 = vld [vmem:[#allocation3 + $0x78] sm:$0xff]  ;;  %v5091_v49 = vrot.slane %v5089_v52, 2 }
 0x1fc   : > { %2975 = vst.msk [vmem:[#allocation3 + $0x80] sm:$0xff] %vm538_vm4, %v2939_v12  ;;  %v3370_v7 = vadd.f32 %v3334_v13, %v3266_v44  ;;  %v1846_v56 = vpop.f32.mrf.mxu3  ;;  %v5083_v12 = vrot.slane %v5081_v59, 2  ;;  %v4131_v16 = vsel %vm4128_vm9, %v4129_v57, %v4130_v36 }
 0x1fd   : > { %v1941_v18 = vadd.f32 %v1905_v8, %v1846_v56  ;;  %v12055_v56 = vld [vmem:[%s12357_s10 + $0x30] sm:$0xff] }
 0x1fe   : > { %3406 = vst.msk [vmem:[#allocation3 + $0x78] sm:$0xff] %vm538_vm4, %v3370_v7  ;;  %v2839_v19 = vpop.f32.mrf.mxu1  ;;  %v2470_v14 = vld [vmem:[#allocation3 + $0xa0] sm:$0xff]  ;;  %v3593_v7 = vsel %vm3558_vm8, %v13296_v15, %v13330_v62  ;;  %v5084_v4 = vor.u32 %v5083_v12, %v5080_v3  ;;  %v12090_v12 = vld [vmem:[%s12357_s10 + $0x20] sm:$0xff] }
 0x1ff   : > { %v2405_v61 = vpop.f32.mrf.mxu0  ;;  %1977 = vst.msk [vmem:[#allocation3 + $0xa8] sm:$0xff] %vm538_vm4, %v1941_v18 }
 0x200   : > { %v2504_v21 = vadd.f32 %v2468_v63, %v2405_v61 }
 0x201   : > { %v2904_v20 = vld [vmem:[#allocation3 + $0x88] sm:$0xff]  ;;  %10915 = vmatmul.msk.bf16.gmra.mxu3 %vm380_vm1, %v3584_v11  ;;  %v3598_v11 = vshll.u32 %v12055_v56, 16 }
 0x202   : > { %v2940_v26 = vadd.f32 %v2904_v20, %v2839_v19  ;;  %2540 = vst.msk [vmem:[#allocation3 + $0x90] sm:$0xff] %vm538_vm4, %v2504_v21  ;;  %10661 = vmatmul.msk.bf16.gmra.mxu0 %vm380_vm1, %v2293_v6  ;;  %v3595_v6 = vshrl.u32 %v12055_v56, 16 }
 0x203   : > { %v3271_v27 = vpop.f32.mrf.mxu2  ;;  %v3335_v24 = vld [vmem:[#allocation3 + $0x80] sm:$0xff]  ;;  %v3600_v32 = vrot.slane %v3598_v11, 3 }
 0x204   : > { %2976 = vst.msk [vmem:[#allocation3 + $0x88] sm:$0xff] %vm538_vm4, %v2940_v26  ;;  %v3371_v34 = vadd.f32 %v3335_v24, %v3269_v37  ;;  %v1849_v39 = vpop.f32.mrf.mxu3  ;;  %v5088_v37 = vrot.slane %v5086_v55, 1  ;;  %v3597_v24 = vrot.slane %v3595_v6, 2 }
 0x205   : > { %v1942_v44 = vadd.f32 %v1906_v31, %v1849_v39 }
 0x206   : > { %3407 = vst.msk [vmem:[#allocation3 + $0x80] sm:$0xff] %vm538_vm4, %v3371_v34  ;;  %v2842_v46 = vpop.f32.mrf.mxu1  ;;  %v13346_v61 = vor.u32 %v5091_v49, %v5088_v37  ;;  %v2471_v1 = vld [vmem:[#allocation3 + $0xa8] sm:$0xff] }
 0x207   : > { %v2407_v48 = vpop.f32.mrf.mxu0  ;;  %1978 = vst.msk [vmem:[#allocation3 + $0xb0] sm:$0xff] %vm538_vm4, %v1942_v44  ;;  %v13359_v44 = vor.u32 %v3600_v32, %v3597_v24  ;;  %v12057_v24 = vld [vmem:[%s12357_s10 + $0x40] sm:$0xff] }
 0x208   : > { %10841 = vmatmul.msk.bf16.gmra.mxu2 %vm380_vm1, %v3162_v35  ;;  %v2505_v58 = vadd.f32 %v2469_v50, %v2407_v48  ;;  %v5093_v17 = vsel %vm2123_vm5, %v5084_v4, %v13346_v61  ;;  %v1909_v48 = vld [vmem:[#allocation3 + $0xc8] sm:$0xff]  ;;  %v5107_v4 = vshll.u32 %v12090_v12, 16 }
 0x209   : > { %v2905_v40 = vld [vmem:[#allocation3 + $0x90] sm:$0xff]  ;;  %10751 = vmatmul.msk.bf16.gmra.mxu1 %vm380_vm1, %v2726_v47  ;;  %v3602_v54 = vsel %vm3558_vm8, %v13330_v62, %v13359_v44 }
 0x20a   : > { %v2941_v30 = vadd.f32 %v2905_v40, %v2842_v46  ;;  %2541 = vst.msk [vmem:[#allocation3 + $0x98] sm:$0xff] %vm538_vm4, %v2505_v58  ;;  %v4132_v46 = vrot.slane %v13354_v23, 3  ;;  %v3613_v23 = vshrl.u32 %v12057_v24, 16 }
 0x20b   : > { %v3274_v33 = vpop.f32.mrf.mxu2  ;;  %v3336_v60 = vld [vmem:[#allocation3 + $0x88] sm:$0xff] }
 0x20c   : > { %2977 = vst.msk [vmem:[#allocation3 + $0x90] sm:$0xff] %vm538_vm4, %v2941_v30  ;;  %v3372_v45 = vadd.f32 %v3336_v60, %v3271_v27  ;;  %v1851_v0 = vpop.f32.mrf.mxu3  ;;  %v12089_v27 = vld [vmem:[%s12357_s10 + $0x18] sm:$0xff]  ;;  %v4133_v30 = vsel %vm4128_vm9, %v4130_v36, %v4132_v46 }
 0x20d   : > { %v1943_v5 = vadd.f32 %v1907_v2, %v1851_v0  ;;  %v5095_v39 = vshrl.u32 %v12089_v27, 16  ;;  %v5098_v31 = vshll.u32 %v12089_v27, 16  ;;  %v1910_v2 = vld [vmem:[#allocation3 + $0xd0] sm:$0xff] }
 0x20e   : > { %3408 = vst.msk [vmem:[#allocation3 + $0x88] sm:$0xff] %vm538_vm4, %v3372_v45  ;;  %v2844_v9 = vpop.f32.mrf.mxu1  ;;  %v2472_v40 = vld [vmem:[#allocation3 + $0xb0] sm:$0xff] }
 0x20f   : > { %v2410_v13 = vpop.f32.mrf.mxu0  ;;  %1979 = vst.msk [vmem:[#allocation3 + $0xb8] sm:$0xff] %vm538_vm4, %v1943_v5  ;;  %v5097_v41 = vrot.slane %v5095_v39, 1  ;;  %v5100_v53 = vrot.slane %v5098_v31, 2  ;;  %v3616_v31 = vshll.u32 %v12057_v24, 16 }
 0x210   : > { %v2506_v8 = vadd.f32 %v2470_v14, %v2410_v13 }
 0x211   : > { %v2906_v18 = vld [vmem:[#allocation3 + $0x98] sm:$0xff]  ;;  %10916 = vmatmul.msk.bf16.gmra.mxu3 %vm380_vm1, %v3593_v7  ;;  %v13377_v60 = vor.u32 %v5100_v53, %v5097_v41  ;;  %v13386_v7 = vld [vmem:[%s12357_s10 + $0x28] sm:$0xff]  ;;  %v3615_v53 = vrot.slane %v3613_v23, 2 }
 0x212   : > { %v2942_v19 = vadd.f32 %v2906_v18, %v2844_v9  ;;  %2542 = vst.msk [vmem:[#allocation3 + $0xa0] sm:$0xff] %vm538_vm4, %v2506_v8  ;;  %11004 = vmatmul.msk.bf16.vlgmr.msra.gmra.mxu0 %vm380_vm1, %v4131_v16 }
 0x213   : > { %v3276_v15 = vpop.f32.mrf.mxu2  ;;  %v3337_v63 = vld [vmem:[#allocation3 + $0x90] sm:$0xff]  ;;  %v5102_v9 = vsel %vm2123_vm5, %v13346_v61, %v13377_v60 }
 0x214   : > { %2978 = vst.msk [vmem:[#allocation3 + $0x98] sm:$0xff] %vm538_vm4, %v2942_v19  ;;  %v3373_v10 = vadd.f32 %v3337_v63, %v3274_v33  ;;  %v1854_v21 = vpop.f32.mrf.mxu3  ;;  %v12056_v33 = vld [vmem:[%s12357_s10 + $0x38] sm:$0xff]  ;;  %v5104_v19 = vshrl.u32 %v12090_v12, 16  ;;  %v4134_v63 = vrot.slane %v13386_v7, 3 }
 0x215   : > { %v1944_v20 = vadd.f32 %v1908_v22, %v1854_v21  ;;  %v3604_v51 = vshrl.u32 %v12056_v33, 16  ;;  %v3607_v36 = vshll.u32 %v12056_v33, 16 }
 0x216   : > { %3409 = vst.msk [vmem:[#allocation3 + $0x90] sm:$0xff] %vm538_vm4, %v3373_v10  ;;  %v2847_v26 = vpop.f32.mrf.mxu1  ;;  %v2473_v49 = vld [vmem:[#allocation3 + $0xb8] sm:$0xff] }
 0x217   : > { %v2412_v29 = vpop.f32.mrf.mxu0  ;;  %1980 = vst.msk [vmem:[#allocation3 + $0xc0] sm:$0xff] %vm538_vm4, %v1944_v20  ;;  %v3606_v13 = vrot.slane %v3604_v51, 2  ;;  %v3609_v14 = vrot.slane %v3607_v36, 3  ;;  %v1911_v10 = vld [vmem:[#allocation3 + $0xd8] sm:$0xff]  ;;  %v5106_v20 = vrot.slane %v5104_v19, 1 }
 0x218   : > { %v2507_v34 = vadd.f32 %v2471_v1, %v2412_v29  ;;  %v4135_v1 = vsel %vm4128_vm9, %v4132_v46, %v4134_v63  ;;  %v1912_v46 = vld [vmem:[#allocation3 + $0xe0] sm:$0xff] }
 0x219   : > { %v2907_v35 = vld [vmem:[#allocation3 + $0xa0] sm:$0xff]  ;;  %11094 = vmatmul.msk.bf16.vlgmr.msra.gmra.mxu1 %vm380_vm1, %v5093_v17 }
 0x21a   : > { %v2943_v28 = vadd.f32 %v2907_v35, %v2847_v26  ;;  %2543 = vst.msk [vmem:[#allocation3 + $0xa8] sm:$0xff] %vm538_vm4, %v2507_v34  ;;  %v5109_v26 = vrot.slane %v5107_v4, 2 }
 0x21b   : > { %v3279_v38 = vpop.f32.mrf.mxu2  ;;  %v3338_v42 = vld [vmem:[#allocation3 + $0x98] sm:$0xff] }
 0x21c   : > { %2979 = vst.msk [vmem:[#allocation3 + $0xa0] sm:$0xff] %vm538_vm4, %v2943_v28  ;;  %v3374_v47 = vadd.f32 %v3338_v42, %v3276_v15  ;;  %v1856_v43 = vpop.f32.mrf.mxu3  ;;  %v13391_v15 = vor.u32 %v3609_v14, %v3606_v13  ;;  %v13409_v28 = vor.u32 %v5109_v26, %v5106_v20  ;;  %v12058_v13 = vld [vmem:[%s12357_s10 + $0x48] sm:$0xff] }
 0x21d   : > { %v1945_v50 = vadd.f32 %v1909_v48, %v1856_v43  ;;  %v3622_v7 = vshrl.u32 %v12058_v13, 16  ;;  %v3625_v4 = vshll.u32 %v12058_v13, 16 }
 0x21e   : > { %3410 = vst.msk [vmem:[#allocation3 + $0x98] sm:$0xff] %vm538_vm4, %v3374_v47  ;;  %v2849_v25 = vpop.f32.mrf.mxu1  ;;  %v2474_v27 = vld [vmem:[#allocation3 + $0xc0] sm:$0xff]  ;;  %v3611_v29 = vsel %vm3558_vm8, %v13359_v44, %v13391_v15  ;;  %v5111_v48 = vsel %vm2123_vm5, %v13377_v60, %v13409_v28 }
 0x21f   : > { %v2415_v58 = vpop.f32.mrf.mxu0  ;;  %1981 = vst.msk [vmem:[#allocation3 + $0xc8] sm:$0xff] %vm538_vm4, %v1945_v50  ;;  %v12091_v50 = vld [vmem:[%s12357_s10 + $0x28] sm:$0xff]  ;;  %v3624_v26 = vrot.slane %v3622_v7, 2 }
 0x220   : > { %v2508_v59 = vadd.f32 %v2472_v40, %v2415_v58  ;;  %v3618_v58 = vrot.slane %v3616_v31, 3  ;;  %v13418_v40 = vld [vmem:[%s12357_s10 + $0x30] sm:$0xff] }
 0x221   : > { %v2908_v55 = vld [vmem:[#allocation3 + $0xa8] sm:$0xff]  ;;  %10917 = vmatmul.msk.bf16.gmra.mxu3 %vm380_vm1, %v3602_v54 }
 0x222   : > { %v2944_v52 = vadd.f32 %v2908_v55, %v2849_v25  ;;  %2544 = vst.msk [vmem:[#allocation3 + $0xb0] sm:$0xff] %vm538_vm4, %v2508_v59  ;;  %11005 = vmatmul.msk.bf16.gmra.mxu0 %vm380_vm1, %v4133_v30  ;;  %v5113_v55 = vshrl.u32 %v12091_v50, 16 }
 0x223   : > { %v3281_v62 = vpop.f32.mrf.mxu2  ;;  %v3339_v57 = vld [vmem:[#allocation3 + $0xa0] sm:$0xff] }
 0x224   : > { %2980 = vst.msk [vmem:[#allocation3 + $0xa8] sm:$0xff] %vm538_vm4, %v2944_v52  ;;  %v3375_v45 = vadd.f32 %v3339_v57, %v3279_v38  ;;  %v1859_v0 = vpop.f32.mrf.mxu3  ;;  %v5116_v52 = vshll.u32 %v12091_v50, 16  ;;  %v4136_v57 = vrot.slane %v13418_v40, 3 }
 0x225   : > { %v1946_v3 = vadd.f32 %v1910_v2, %v1859_v0 }
 0x226   : > { %3411 = vst.msk [vmem:[#allocation3 + $0xa0] sm:$0xff] %vm538_vm4, %v3375_v45  ;;  %v2852_v5 = vpop.f32.mrf.mxu1  ;;  %v2475_v41 = vld [vmem:[#allocation3 + $0xc8] sm:$0xff] }
 0x227   : > { %v2417_v37 = vpop.f32.mrf.mxu0  ;;  %1982 = vst.msk [vmem:[#allocation3 + $0xd0] sm:$0xff] %vm538_vm4, %v1946_v3  ;;  %v1913_v45 = vld [vmem:[#allocation3 + $0xe8] sm:$0xff]  ;;  %v5115_v3 = vrot.slane %v5113_v55, 1 }
 0x228   : > { %v2509_v16 = vadd.f32 %v2473_v49, %v2417_v37  ;;  %v4137_v49 = vsel %vm4128_vm9, %v4134_v63, %v4136_v57  ;;  %v1914_v63 = vld [vmem:[#allocation3 + $0xf0] sm:$0xff] }
 0x229   : > { %v2909_v56 = vld [vmem:[#allocation3 + $0xb0] sm:$0xff]  ;;  %11095 = vmatmul.msk.bf16.gmra.mxu1 %vm380_vm1, %v5102_v9 }
 0x22a   : > { %v2945_v8 = vadd.f32 %v2909_v56, %v2852_v5  ;;  %2545 = vst.msk [vmem:[#allocation3 + $0xb8] sm:$0xff] %vm538_vm4, %v2509_v16  ;;  %v5118_v5 = vrot.slane %v5116_v52, 2 }
 0x22b   : > { %v3284_v18 = vpop.f32.mrf.mxu2  ;;  %v3340_v61 = vld [vmem:[#allocation3 + $0xa8] sm:$0xff] }
 0x22c   : > { %2981 = vst.msk [vmem:[#allocation3 + $0xb0] sm:$0xff] %vm538_vm4, %v2945_v8  ;;  %v3376_v6 = vadd.f32 %v3340_v61, %v3281_v62  ;;  %v1861_v11 = vpop.f32.mrf.mxu3  ;;  %v13423_v62 = vor.u32 %v3618_v58, %v3615_v53  ;;  %v13441_v8 = vor.u32 %v5118_v5, %v5115_v3  ;;  %v12059_v53 = vld [vmem:[%s12357_s10 + $0x50] sm:$0xff] }
 0x22d   : > { %v1947_v21 = vadd.f32 %v1911_v10, %v1861_v11  ;;  %v3631_v40 = vshrl.u32 %v12059_v53, 16  ;;  %v3634_v52 = vshll.u32 %v12059_v53, 16 }
 0x22e   : > { %3412 = vst.msk [vmem:[#allocation3 + $0xa8] sm:$0xff] %vm538_vm4, %v3376_v6  ;;  %v2854_v22 = vpop.f32.mrf.mxu1  ;;  %v2476_v12 = vld [vmem:[#allocation3 + $0xd0] sm:$0xff]  ;;  %v3620_v37 = vsel %vm3558_vm8, %v13391_v15, %v13423_v62  ;;  %v5120_v10 = vsel %vm2123_vm5, %v13409_v28, %v13441_v8 }
 0x22f   : > { %v2420_v17 = vpop.f32.mrf.mxu0  ;;  %1983 = vst.msk [vmem:[#allocation3 + $0xd8] sm:$0xff] %vm538_vm4, %v1947_v21  ;;  %v12092_v21 = vld [vmem:[%s12357_s10 + $0x30] sm:$0xff]  ;;  %v3633_v5 = vrot.slane %v3631_v40, 2 }
 0x230   : > { %v2510_v32 = vadd.f32 %v2474_v27, %v2420_v17  ;;  %v3627_v17 = vrot.slane %v3625_v4, 3  ;;  %v13450_v27 = vld [vmem:[%s12357_s10 + $0x38] sm:$0xff] }
 0x231   : > { %v2910_v34 = vld [vmem:[#allocation3 + $0xb8] sm:$0xff]  ;;  %10918 = vmatmul.msk.bf16.gmra.mxu3 %vm380_vm1, %v3611_v29 }
 0x232   : > { %v2946_v35 = vadd.f32 %v2910_v34, %v2854_v22  ;;  %2546 = vst.msk [vmem:[#allocation3 + $0xc0] sm:$0xff] %vm538_vm4, %v2510_v32  ;;  %11006 = vmatmul.msk.bf16.gmra.mxu0 %vm380_vm1, %v4135_v1  ;;  %v5122_v34 = vshrl.u32 %v12092_v21, 16 }
 0x233   : > { %v3286_v38 = vpop.f32.mrf.mxu2  ;;  %v3341_v39 = vld [vmem:[#allocation3 + $0xb0] sm:$0xff] }
 0x234   : > { %2982 = vst.msk [vmem:[#allocation3 + $0xb8] sm:$0xff] %vm538_vm4, %v2946_v35  ;;  %v3377_v42 = vadd.f32 %v3341_v39, %v3284_v18  ;;  %v1864_v44 = vpop.f32.mrf.mxu3  ;;  %v5125_v35 = vshll.u32 %v12092_v21, 16  ;;  %v4138_v39 = vrot.slane %v13450_v27, 3 }
 0x235   : > { %v1948_v47 = vadd.f32 %v1912_v46, %v1864_v44 }
 0x236   : > { %3413 = vst.msk [vmem:[#allocation3 + $0xb0] sm:$0xff] %vm538_vm4, %v3377_v42  ;;  %v2857_v43 = vpop.f32.mrf.mxu1  ;;  %v2477_v20 = vld [vmem:[#allocation3 + $0xd8] sm:$0xff] }
 0x237   : > { %v2422_v25 = vpop.f32.mrf.mxu0  ;;  %1984 = vst.msk [vmem:[#allocation3 + $0xe0] sm:$0xff] %vm538_vm4, %v1948_v47  ;;  %v1915_v42 = vld [vmem:[#allocation3 + $0xf8] sm:$0xff]  ;;  %v5124_v47 = vrot.slane %v5122_v34, 1 }
 0x238   : > { %v2511_v54 = vadd.f32 %v2475_v41, %v2422_v25  ;;  %v4139_v41 = vsel %vm4128_vm9, %v4136_v57, %v4138_v39  ;;  %v1916_v57 = vld [vmem:[#allocation3 + $0x100] sm:$0xff] }
 0x239   : > { %v2911_v30 = vld [vmem:[#allocation3 + $0xc0] sm:$0xff]  ;;  %11096 = vmatmul.msk.bf16.gmra.mxu1 %vm380_vm1, %v5111_v48 }
 0x23a   : > { %v2947_v33 = vadd.f32 %v2911_v30, %v2857_v43  ;;  %2547 = vst.msk [vmem:[#allocation3 + $0xc8] sm:$0xff] %vm538_vm4, %v2511_v54  ;;  %v5127_v43 = vrot.slane %v5125_v35, 2 }
 0x23b   : > { %v3289_v59 = vpop.f32.mrf.mxu2  ;;  %v3342_v60 = vld [vmem:[#allocation3 + $0xb8] sm:$0xff] }
 0x23c   : > { %2983 = vst.msk [vmem:[#allocation3 + $0xc0] sm:$0xff] %vm538_vm4, %v2947_v33  ;;  %v3378_v51 = vadd.f32 %v3342_v60, %v3286_v38  ;;  %v1866_v36 = vpop.f32.mrf.mxu3  ;;  %v13455_v38 = vor.u32 %v3627_v17, %v3624_v26  ;;  %v13473_v33 = vor.u32 %v5127_v43, %v5124_v47  ;;  %v12060_v26 = vld [vmem:[%s12357_s10 + $0x58] sm:$0xff] }
 0x23d   : > { %v1949_v0 = vadd.f32 %v1913_v45, %v1866_v36  ;;  %v3640_v27 = vshrl.u32 %v12060_v26, 16  ;;  %v3643_v35 = vshll.u32 %v12060_v26, 16 }
 0x23e   : > { %3414 = vst.msk [vmem:[#allocation3 + $0xb8] sm:$0xff] %vm538_vm4, %v3378_v51  ;;  %v2859_v2 = vpop.f32.mrf.mxu1  ;;  %v2478_v50 = vld [vmem:[#allocation3 + $0xe0] sm:$0xff]  ;;  %v3629_v25 = vsel %vm3558_vm8, %v13423_v62, %v13455_v38  ;;  %v5129_v45 = vsel %vm2123_vm5, %v13441_v8, %v13473_v33 }
 0x23f   : > { %v2425_v9 = vpop.f32.mrf.mxu0  ;;  %1985 = vst.msk [vmem:[#allocation3 + $0xe8] sm:$0xff] %vm538_vm4, %v1949_v0  ;;  %v12093_v0 = vld [vmem:[%s12357_s10 + $0x38] sm:$0xff]  ;;  %v3642_v43 = vrot.slane %v3640_v27, 2 }
 0x240   : > { %v2512_v14 = vadd.f32 %v2476_v12, %v2425_v9  ;;  %v3636_v9 = vrot.slane %v3634_v52, 3  ;;  %v13482_v12 = vld [vmem:[%s12357_s10 + $0x40] sm:$0xff] }
 0x241   : > { %v2912_v16 = vld [vmem:[#allocation3 + $0xc8] sm:$0xff]  ;;  %10919 = vmatmul.msk.bf16.gmra.mxu3 %vm380_vm1, %v3620_v37 }
 0x242   : > { %v2948_v56 = vadd.f32 %v2912_v16, %v2859_v2  ;;  %2548 = vst.msk [vmem:[#allocation3 + $0xd0] sm:$0xff] %vm538_vm4, %v2512_v14  ;;  %11007 = vmatmul.msk.bf16.gmra.mxu0 %vm380_vm1, %v4137_v49  ;;  %v5131_v16 = vshrl.u32 %v12093_v0, 16 }
 0x243   : > { %v3291_v18 = vpop.f32.mrf.mxu2  ;;  %v3343_v19 = vld [vmem:[#allocation3 + $0xc0] sm:$0xff] }
 0x244   : > { %2984 = vst.msk [vmem:[#allocation3 + $0xc8] sm:$0xff] %vm538_vm4, %v2948_v56  ;;  %v3379_v61 = vadd.f32 %v3343_v19, %v3289_v59  ;;  %v1869_v15 = vpop.f32.mrf.mxu3  ;;  %v5134_v56 = vshll.u32 %v12093_v0, 16  ;;  %v4140_v19 = vrot.slane %v13482_v12, 3 }
 0x245   : > { %v1950_v6 = vadd.f32 %v1914_v63, %v1869_v15 }
 0x246   : > { %3415 = vst.msk [vmem:[#allocation3 + $0xc0] sm:$0xff] %vm538_vm4, %v3379_v61  ;;  %v2862_v11 = vpop.f32.mrf.mxu1  ;;  %v2479_v3 = vld [vmem:[#allocation3 + $0xe8] sm:$0xff] }
 0x247   : > { %v2427_v22 = vpop.f32.mrf.mxu0  ;;  %1986 = vst.msk [vmem:[#allocation3 + $0xf0] sm:$0xff] %vm538_vm4, %v1950_v6  ;;  %v1917_v61 = vld [vmem:[#allocation3 + $0x108] sm:$0xff]  ;;  %v5133_v6 = vrot.slane %v5131_v16, 1 }
 0x248   : > { %v2513_v29 = vadd.f32 %v2477_v20, %v2427_v22  ;;  %v4141_v20 = vsel %vm4128_vm9, %v4138_v39, %v4140_v19  ;;  %v1918_v39 = vld [vmem:[#allocation3 + $0x110] sm:$0xff] }
 0x249   : > { %v2913_v1 = vld [vmem:[#allocation3 + $0xd0] sm:$0xff]  ;;  %11097 = vmatmul.msk.bf16.gmra.mxu1 %vm380_vm1, %v5120_v10 }
 0x24a   : > { %v2949_v24 = vadd.f32 %v2913_v1, %v2862_v11  ;;  %2549 = vst.msk [vmem:[#allocation3 + $0xd8] sm:$0xff] %vm538_vm4, %v2513_v29  ;;  %v5136_v11 = vrot.slane %v5134_v56, 2 }
 0x24b   : > { %v3294_v32 = vpop.f32.mrf.mxu2  ;;  %v3344_v28 = vld [vmem:[#allocation3 + $0xc8] sm:$0xff] }
 0x24c   : > { %2985 = vst.msk [vmem:[#allocation3 + $0xd0] sm:$0xff] %vm538_vm4, %v2949_v24  ;;  %v3380_v23 = vadd.f32 %v3344_v28, %v3291_v18  ;;  %v1871_v31 = vpop.f32.mrf.mxu3  ;;  %v13487_v18 = vor.u32 %v3636_v9, %v3633_v5  ;;  %v13505_v24 = vor.u32 %v5136_v11, %v5133_v6  ;;  %v12061_v5 = vld [vmem:[%s12357_s10 + $0x60] sm:$0xff] }
 0x24d   : > { %v1951_v44 = vadd.f32 %v1915_v42, %v1871_v31  ;;  %v3649_v12 = vshrl.u32 %v12061_v5, 16  ;;  %v3652_v56 = vshll.u32 %v12061_v5, 16 }
 0x24e   : > { %3416 = vst.msk [vmem:[#allocation3 + $0xc8] sm:$0xff] %vm538_vm4, %v3380_v23  ;;  %v2864_v46 = vpop.f32.mrf.mxu1  ;;  %v2480_v21 = vld [vmem:[#allocation3 + $0xf0] sm:$0xff]  ;;  %v3638_v22 = vsel %vm3558_vm8, %v13455_v38, %v13487_v18  ;;  %v5138_v42 = vsel %vm2123_vm5, %v13473_v33, %v13505_v24 }
 0x24f   : > { %v2430_v48 = vpop.f32.mrf.mxu0  ;;  %1987 = vst.msk [vmem:[#allocation3 + $0xf8] sm:$0xff] %vm538_vm4, %v1951_v44  ;;  %v12094_v44 = vld [vmem:[%s12357_s10 + $0x40] sm:$0xff] }
 0x250   : > { %v2514_v58 = vadd.f32 %v2478_v50, %v2430_v48  ;;  %v3645_v48 = vrot.slane %v3643_v35, 3  ;;  %v13514_v50 = vld [vmem:[%s12357_s10 + $0x48] sm:$0xff] }
 0x251   : > { %v2914_v54 = vld [vmem:[#allocation3 + $0xd8] sm:$0xff]  ;;  %10920 = vmatmul.msk.bf16.gmra.mxu3 %vm380_vm1, %v3629_v25 }
 0x252   : > { %v2950_v30 = vadd.f32 %v2914_v54, %v2864_v46  ;;  %2550 = vst.msk [vmem:[#allocation3 + $0xe0] sm:$0xff] %vm538_vm4, %v2514_v58  ;;  %11008 = vmatmul.msk.bf16.gmra.mxu0 %vm380_vm1, %v4139_v41  ;;  %v5140_v54 = vshrl.u32 %v12094_v44, 16 }
 0x253   : > { %v3296_v59 = vpop.f32.mrf.mxu2  ;;  %v3345_v55 = vld [vmem:[#allocation3 + $0xd0] sm:$0xff] }
 0x254   : > { %2986 = vst.msk [vmem:[#allocation3 + $0xd8] sm:$0xff] %vm538_vm4, %v2950_v30  ;;  %v3381_v60 = vadd.f32 %v3345_v55, %v3294_v32  ;;  %v1874_v62 = vpop.f32.mrf.mxu3  ;;  %v5143_v30 = vshll.u32 %v12094_v44, 16  ;;  %v4142_v55 = vrot.slane %v13514_v50, 3 }
 0x255   : > { %v1952_v51 = vadd.f32 %v1916_v57, %v1874_v62 }
 0x256   : > { %3417 = vst.msk [vmem:[#allocation3 + $0xd0] sm:$0xff] %vm538_vm4, %v3381_v60  ;;  %v2867_v36 = vpop.f32.mrf.mxu1  ;;  %v2481_v47 = vld [vmem:[#allocation3 + $0xf8] sm:$0xff] }
 0x257   : > { %v2432_v2 = vpop.f32.mrf.mxu0  ;;  %1988 = vst.msk [vmem:[#allocation3 + $0x100] sm:$0xff] %vm538_vm4, %v1952_v51  ;;  %v1919_v60 = vld [vmem:[#allocation3 + $0x118] sm:$0xff]  ;;  %v5142_v51 = vrot.slane %v5140_v54, 1 }
 0x258   : > { %v2515_v37 = vadd.f32 %v2479_v3, %v2432_v2  ;;  %v4143_v3 = vsel %vm4128_vm9, %v4140_v19, %v4142_v55  ;;  %v3889_v19 = vld [vmem:[#allocation3] sm:$0xff] }
 0x259   : > { %v2915_v49 = vld [vmem:[#allocation3 + $0xe0] sm:$0xff]  ;;  %11098 = vmatmul.msk.bf16.gmra.mxu1 %vm380_vm1, %v5129_v45 }
 0x25a   : > { %v2951_v13 = vadd.f32 %v2915_v49, %v2867_v36  ;;  %2551 = vst.msk [vmem:[#allocation3 + $0xe8] sm:$0xff] %vm538_vm4, %v2515_v37  ;;  %v5145_v36 = vrot.slane %v5143_v30, 2 }
 0x25b   : > { %v3299_v14 = vpop.f32.mrf.mxu2  ;;  %v3346_v8 = vld [vmem:[#allocation3 + $0xd8] sm:$0xff] }
 0x25c   : > { %2987 = vst.msk [vmem:[#allocation3 + $0xe0] sm:$0xff] %vm538_vm4, %v2951_v13  ;;  %v3382_v7 = vadd.f32 %v3346_v8, %v3296_v59  ;;  %v1876_v4 = vpop.f32.mrf.mxu3  ;;  %v13519_v59 = vor.u32 %v3645_v48, %v3642_v43  ;;  %v13537_v13 = vor.u32 %v5145_v36, %v5142_v51 }
 0x25d   : > { %v1953_v15 = vadd.f32 %v1917_v61, %v1876_v4 }
 0x25e   : > { %3418 = vst.msk [vmem:[#allocation3 + $0xd8] sm:$0xff] %vm538_vm4, %v3382_v7  ;;  %v2869_v63 = vpop.f32.mrf.mxu1  ;;  %v2482_v0 = vld [vmem:[#allocation3 + $0x100] sm:$0xff]  ;;  %v3647_v2 = vsel %vm3558_vm8, %v13487_v18, %v13519_v59  ;;  %v5147_v61 = vsel %vm2123_vm5, %v13505_v24, %v13537_v13 }
 0x25f   : > { %v2435_v10 = vpop.f32.mrf.mxu0  ;;  %1989 = vst.msk [vmem:[#allocation3 + $0x108] sm:$0xff] %vm538_vm4, %v1953_v15  ;;  %v12095_v15 = vld [vmem:[%s12357_s10 + $0x48] sm:$0xff] }
 0x260   : > { %v2516_v17 = vadd.f32 %v2480_v21, %v2435_v10  ;;  %v3651_v10 = vrot.slane %v3649_v12, 2  ;;  %v3654_v21 = vrot.slane %v3652_v56, 3  ;;  %v5152_v24 = vshll.u32 %v12095_v15, 16 }
 0x261   : > { %v2916_v29 = vld [vmem:[#allocation3 + $0xe8] sm:$0xff]  ;;  %10921 = vmatmul.msk.bf16.gmra.mxu3 %vm380_vm1, %v3638_v22 }
 0x262   : > { %v2952_v1 = vadd.f32 %v2916_v29, %v2869_v63  ;;  %2552 = vst.msk [vmem:[#allocation3 + $0xf0] sm:$0xff] %vm538_vm4, %v2516_v17  ;;  %11009 = vmatmul.msk.bf16.gmra.mxu0 %vm380_vm1, %v4141_v20  ;;  %v6078_v63 = vld [vmem:[%s15554_s3 + $0x4] sm:$0xf]  ;;  %v13549_v22 = vld [vmem:[%s12357_s10 + $0x50] sm:$0xff]  ;;  %v5154_v44 = vrot.slane %v5152_v24, 2 }
 0x263   : > { %v3301_v32 = vpop.f32.mrf.mxu2  ;;  %v3347_v34 = vld [vmem:[#allocation3 + $0xe0] sm:$0xff]  ;;  %v6264_v20 = vsel %vm5830_vm7, %v6078_v63, 0  ;;  %v4144_v27 = vrot.slane %v13549_v22, 3  ;;  %v3892_v63 = vld [vmem:[#allocation3 + $0x18] sm:$0xff] }
 0x264   : > { %2988 = vst.msk [vmem:[#allocation3 + $0xe8] sm:$0xff] %vm538_vm4, %v2952_v1  ;;  %v3383_v28 = vadd.f32 %v3347_v34, %v3299_v14  ;;  %v1879_v38 = vpop.f32.mrf.mxu3  ;;  %6273 = vmatpush.bf16.msrb.mxu3 %v6264_v20  ;;  %v5149_v1 = vshrl.u32 %v12095_v15, 16  ;;  %v13555_v34 = vor.u32 %v3654_v21, %v3651_v10 }
 0x265   : > { %v1954_v23 = vadd.f32 %v1918_v39, %v1879_v38  ;;  %v3890_v39 = vld [vmem:[#allocation3 + $0x8] sm:$0xff]  ;;  %v4145_v48 = vsel %vm4128_vm9, %v4142_v55, %v4144_v27  ;;  %v12292_v55 = vmov 0  }
 0x266   : > { %3419 = vst.msk [vmem:[#allocation3 + $0xe0] sm:$0xff] %vm538_vm4, %v3383_v28  ;;  %v2872_v31 = vpop.f32.mrf.mxu1  ;;  %v2483_v11 = vld [vmem:[#allocation3 + $0x108] sm:$0xff]  ;;  %v3656_v43 = vsel %vm3558_vm8, %v13519_v59, %v13555_v34 }
 0x267   : > { %v2437_v46 = vpop.f32.mrf.mxu0  ;;  %1990 = vst.msk [vmem:[#allocation3 + $0x110] sm:$0xff] %vm538_vm4, %v1954_v23 }
 0x268   : > { %v2517_v25 = vadd.f32 %v2481_v47, %v2437_v46  ;;  %4868 = vst.msk [vmem:[#allocation2] sm:$0xf] %vm4867_vm10, %v12292_v55 }
 0x269   : > { %v2917_v41 = vld [vmem:[#allocation3 + $0xf0] sm:$0xff]  ;;  %11099 = vmatmul.msk.bf16.gmra.mxu1 %vm380_vm1, %v5138_v42  ;;  %v5151_v42 = vrot.slane %v5149_v1, 1  ;;  %4869 = vst.msk [vmem:[#allocation2 + $0x4] sm:$0xf] %vm4867_vm10, %v12292_v55 }
 0x26a   : > { %v2953_v53 = vadd.f32 %v2917_v41, %v2872_v31  ;;  %2553 = vst.msk [vmem:[#allocation3 + $0xf8] sm:$0xff] %vm538_vm4, %v2517_v25  ;;  %v12062_v25 = vld [vmem:[%s12357_s10 + $0x68] sm:$0xff] }
 0x26b   : > { %v3304_v58 = vpop.f32.mrf.mxu2  ;;  %v3348_v33 = vld [vmem:[#allocation3 + $0xe8] sm:$0xff]  ;;  %v13573_v30 = vor.u32 %v5154_v44, %v5151_v42  ;;  %v3658_v50 = vshrl.u32 %v12062_v25, 16  ;;  %v3661_v59 = vshll.u32 %v12062_v25, 16  ;;  %4870 = vst.msk [vmem:[#allocation2 + $0x8] sm:$0xf] %vm4867_vm10, %v12292_v55  ;;  %v12097_v25 = vld [vmem:[%s12357_s10 + $0x58] sm:$0xff] }
 0x26c   : > { %2989 = vst.msk [vmem:[#allocation3 + $0xf0] sm:$0xff] %vm538_vm4, %v2953_v53  ;;  %v3384_v40 = vadd.f32 %v3348_v33, %v3301_v32  ;;  %v1881_v52 = vpop.f32.mrf.mxu3 }
 0x26d   : > { %v1955_v62 = vadd.f32 %v1919_v60, %v1881_v52  ;;  %v3891_v60 = vld [vmem:[#allocation3 + $0x10] sm:$0xff]  ;;  %v3660_v5 = vrot.slane %v3658_v50, 2  ;;  %4943 = vst.msk [vmem:[#allocation2 + $0x9c] sm:$0xf] %vm4867_vm10, %v12292_v55 }
 0x26e   : > { %3420 = vst.msk [vmem:[#allocation3 + $0xe8] sm:$0xff] %vm538_vm4, %v3384_v40  ;;  %v2874_v57 = vpop.f32.mrf.mxu1  ;;  %v2484_v47 = vld [vmem:[#allocation3 + $0x110] sm:$0xff] }
 0x26f   : > { %v2440_v45 = vpop.f32.mrf.mxu0  ;;  %1991 = vst.msk [vmem:[#allocation3 + $0x118] sm:$0xff] %vm538_vm4, %v1955_v62 }
 0x270   : > { %v2518_v9 = vadd.f32 %v2482_v0, %v2440_v45  ;;  %v5156_v45 = vsel %vm2123_vm5, %v13537_v13, %v13573_v30  ;;  %v12096_v0 = vld [vmem:[%s12357_s10 + $0x50] sm:$0xff]  ;;  %4944 = vst.msk [vmem:[#allocation2 + $0xa0] sm:$0xf] %vm4867_vm10, %v12292_v55 }
 0x271   : > { %v2918_v37 = vld [vmem:[#allocation3 + $0xf8] sm:$0xff]  ;;  %10922 = vmatmul.msk.bf16.gmra.mxu3 %vm380_vm1, %v3647_v2  ;;  %v5158_v12 = vshrl.u32 %v12096_v0, 16  ;;  %v5161_v56 = vshll.u32 %v12096_v0, 16  ;;  %4945 = vst.msk [vmem:[#allocation2 + $0xa4] sm:$0xf] %vm4867_vm10, %v12292_v55 }
 0x272   : > { %v2954_v49 = vadd.f32 %v2918_v37, %v2874_v57  ;;  %2554 = vst.msk [vmem:[#allocation3 + $0x100] sm:$0xff] %vm538_vm4, %v2518_v9  ;;  %11010 = vmatmul.msk.bf16.gmra.mxu0 %vm380_vm1, %v4143_v3  ;;  %v3663_v9 = vrot.slane %v3661_v59, 3  ;;  %v13586_v37 = vld [vmem:[%s12357_s10 + $0x58] sm:$0xff] }
 0x273   : > { %v3306_v14 = vpop.f32.mrf.mxu2  ;;  %v3349_v16 = vld [vmem:[#allocation3 + $0xf0] sm:$0xff]  ;;  %v5160_v21 = vrot.slane %v5158_v12, 1  ;;  %v5163_v20 = vrot.slane %v5161_v56, 2 }
 0x274   : > { %2990 = vst.msk [vmem:[#allocation3 + $0xf8] sm:$0xff] %vm538_vm4, %v2954_v49  ;;  %v3385_v8 = vadd.f32 %v3349_v16, %v3304_v58  ;;  %v3799_v18 = vpop.f32.mrf.mxu3  ;;  %v4430_v58 = vlaneseq }
 0x275   : > { %v3925_v7 = vadd.f32 %v3889_v19, %v3799_v18  ;;  %v13597_v19 = vor.u32 %v3663_v9, %v3660_v5 }
 0x276   : > { %3421 = vst.msk [vmem:[#allocation3 + $0xf0] sm:$0xff] %vm538_vm4, %v3385_v8  ;;  %v2877_v4 = vpop.f32.mrf.mxu1  ;;  %v13577_v57 = vshrl.u32 %v4430_v58, 7  ;;  %v2485_v3 = vld [vmem:[#allocation3 + $0x118] sm:$0xff]  ;;  %v6510_v8 = vld [vmem:[%s15554_s3 + $0x8] sm:$0xf] }
 0x277   : > { %v2442_v6 = vpop.f32.mrf.mxu0  ;;  %3961 = vst.msk [vmem:[#allocation3] sm:$0xff] %vm538_vm4, %v3925_v7  ;;  %v4146_v7 = vrot.slane %v13586_v37, 3  ;;  %v3665_v1 = vsel %vm3558_vm8, %v13555_v34, %v13597_v19  ;;  %v13621_v34 = vor.u32 %v5163_v20, %v5160_v21 }
 0x278   : > { %v2519_v26 = vadd.f32 %v2483_v11, %v2442_v6  ;;  %v4467_v16 = vmul.u32 58255, %v13577_v57  ;;  %v13640_v50 = vadd.s32 16, %v13577_v57 }
 0x279   : > { %v2919_v17 = vld [vmem:[#allocation3 + $0x100] sm:$0xff]  ;;  %11100 = vmatmul.msk.bf16.gmra.mxu1 %vm380_vm1, %v5147_v61  ;;  %v4147_v24 = vsel %vm4128_vm9, %v4144_v27, %v4146_v7 }
 0x27a   : > { %v2955_v29 = vadd.f32 %v2919_v17, %v2877_v4  ;;  %2555 = vst.msk [vmem:[#allocation3 + $0x108] sm:$0xff] %vm538_vm4, %v2519_v26  ;;  %v6830_v4 = vsel %vm5830_vm7, %v6510_v8, 0  ;;  %v4503_v6 = vshra.s32 %v4467_v16, 20  ;;  %v13606_v26 = vadd.s32 8, %v13577_v57 }
 0x27b   : > { %v3350_v32 = vld [vmem:[#allocation3 + $0xf8] sm:$0xff]  ;;  %v3309_v35 = vpop.f32.mrf.mxu2  ;;  %6839 = vmatpush.bf16.msrb.mxu0 %v6830_v4 }
 0x27c   : > { %2991 = vst.msk [vmem:[#allocation3 + $0x100] sm:$0xff] %vm538_vm4, %v2955_v29  ;;  %v3386_v28 = vadd.f32 %v3350_v32, %v3306_v14  ;;  %v3801_v38 = vpop.f32.mrf.mxu3  ;;  %v4468_v22 = vmul.u32 58255, %v13606_v26 }
 0x27d   : > { %v3926_v23 = vadd.f32 %v3890_v39, %v3801_v38  ;;  %v4539_v39 = vmul.u32 18, %v4503_v6 }
 0x27e   : > { %3422 = vst.msk [vmem:[#allocation3 + $0xf8] sm:$0xff] %vm538_vm4, %v3386_v28  ;;  %v2879_v31 = vpop.f32.mrf.mxu1  ;;  %v4322_v29 = vld [vmem:[#allocation3] sm:$0xff] }
 0x27f   : > { %v2445_v46 = vpop.f32.mrf.mxu0  ;;  %3962 = vst.msk [vmem:[#allocation3 + $0x8] sm:$0xff] %vm538_vm4, %v3926_v23 }
 0x280   : > { %v2520_v41 = vadd.f32 %v2484_v47, %v2445_v46  ;;  %v3893_v47 = vld [vmem:[#allocation3 + $0x20] sm:$0xff] }
 0x281   : > { %v2920_v53 = vld [vmem:[#allocation3 + $0x108] sm:$0xff]  ;;  %10923 = vmatmul.msk.bf16.gmra.mxu3 %vm380_vm1, %v3656_v43  ;;  %v4575_v43 = vsub.s32 %v13577_v57, %v4539_v39  ;;  %v13674_v39 = vadd.s32 24, %v13577_v57 }
 0x282   : > { %v2956_v54 = vadd.f32 %v2920_v53, %v2879_v31  ;;  %2556 = vst.msk [vmem:[#allocation3 + $0x110] sm:$0xff] %vm538_vm4, %v2520_v41  ;;  %11011 = vmatmul.msk.bf16.gmra.mxu0 %vm380_vm1, %v4145_v48  ;;  %v13627_v48 = vld [vmem:[%s12357_s10 + $0x60] sm:$0xff] }
 0x283   : > { %v3351_v33 = vld [vmem:[#allocation3 + $0x100] sm:$0xff]  ;;  %v3311_v62 = vpop.f32.mrf.mxu2  ;;  %v13634_v53 = vld [vmem:[%s15553_s2] ss:$0 sm:$0xff]  ;;  %vm4611_vm11 = vcmp.lt.s32.totalorder %v4575_v43, 16 }
 0x284   : > { %2992 = vst.msk [vmem:[#allocation3 + $0x108] sm:$0xff] %vm538_vm4, %v2956_v54  ;;  %v3387_v40 = vadd.f32 %v3351_v33, %v3309_v35  ;;  %v3804_v52 = vpop.f32.mrf.mxu3  ;;  %v12063_v35 = vld [vmem:[%s12357_s10 + $0x70] sm:$0xff]  ;;  %v5165_v54 = vsel %vm2123_vm5, %v13573_v30, %v13621_v34  ;;  %v4504_v33 = vshra.s32 %v4468_v22, 20  ;;  %v12098_v43 = vld [vmem:[%s12357_s10 + $0x60] sm:$0xff] }
 0x285   : > { %v3927_v51 = vadd.f32 %v3891_v60, %v3804_v52  ;;  %v3667_v31 = vshrl.u32 %v12063_v35, 16  ;;  %v3670_v42 = vshll.u32 %v12063_v35, 16 }
 0x286   : > { %3423 = vst.msk [vmem:[#allocation3 + $0x100] sm:$0xff] %vm538_vm4, %v3387_v40  ;;  %v2882_v36 = vpop.f32.mrf.mxu1  ;;  %v4323_v55 = vld [vmem:[#allocation3 + $0x8] sm:$0xff]  ;;  %v4540_v0 = vmul.u32 18, %v4504_v33 }
 0x287   : > { %v2447_v2 = vpop.f32.mrf.mxu0  ;;  %3963 = vst.msk [vmem:[#allocation3 + $0x10] sm:$0xff] %vm538_vm4, %v3927_v51  ;;  %v3669_v40 = vrot.slane %v3667_v31, 2  ;;  %v3672_v52 = vrot.slane %v3670_v42, 3 }
 0x288   : > { %v2521_v49 = vadd.f32 %v2485_v3, %v2447_v2  ;;  %v4469_v2 = vmul.u32 58255, %v13640_v50  ;;  %v5170_v3 = vshll.u32 %v12097_v25, 16  ;;  %v4576_v35 = vsub.s32 %v13606_v26, %v4540_v0 }
 0x289   : > { %v2921_v14 = vld [vmem:[#allocation3 + $0x110] sm:$0xff]  ;;  %11101 = vmatmul.msk.bf16.gmra.mxu1 %vm380_vm1, %v5156_v45  ;;  %v5167_v45 = vshrl.u32 %v12097_v25, 16  ;;  %v13649_v9 = vor.u32 %v3672_v52, %v3669_v40 }
 0x28a   : > { %v2957_v13 = vadd.f32 %v2921_v14, %v2882_v36  ;;  %2557 = vst.msk [vmem:[#allocation3 + $0x118] sm:$0xff] %vm538_vm4, %v2521_v49  ;;  %v4148_v36 = vrot.slane %v13627_v48, 3  ;;  %v7076_v49 = vld [vmem:[%s15554_s3 + $0xc] sm:$0xf]  ;;  %v7640_v14 = vld [vmem:[%s15554_s3 + $0x10] sm:$0xf] }
 0x28b   : > { %v3352_v18 = vld [vmem:[#allocation3 + $0x108] sm:$0xff]  ;;  %v3314_v32 = vpop.f32.mrf.mxu2  ;;  %v7395_v12 = vsel %vm5830_vm7, %v7076_v49, 0  ;;  %v7786_v56 = vsel %vm5830_vm7, %v7640_v14, 0  ;;  %v5169_v4 = vrot.slane %v5167_v45, 1  ;;  %v5172_v21 = vrot.slane %v5170_v3, 2 }
 0x28c   : > { %2993 = vst.msk [vmem:[#allocation3 + $0x110] sm:$0xff] %vm538_vm4, %v2957_v13  ;;  %v3388_v61 = vadd.f32 %v3352_v18, %v3311_v62  ;;  %v3806_v15 = vpop.f32.mrf.mxu3  ;;  %v3894_v18 = vld [vmem:[#allocation3 + $0x28] sm:$0xff]  ;;  %7404 = vmatpush.bf16.msrb.mxu1 %v7395_v12  ;;  %7795 = vmatpush.bf16.msrb.mxu2 %v7786_v56  ;;  %vm4612_vm12 = vcmp.lt.s32.totalorder %v4576_v35, 16  ;;  %v5176_v3 = vshrl.u32 %v12098_v43, 16 }
 0x28d   : > { %v3928_v11 = vadd.f32 %v3892_v63, %v3806_v15  ;;  %v12105_v15 = vld [vmem:[#allocation2] sm:$0xf0] }
 0x28e   : > { %3424 = vst.msk [vmem:[#allocation3 + $0x108] sm:$0xff] %vm538_vm4, %v3388_v61  ;;  %v2884_v10 = vpop.f32.mrf.mxu1  ;;  %v11114_v61 = vld [vmem:[#allocation2] sm:$0xc] }
 0x28f   : > { %v4232_v17 = vpop.f32.mrf.mxu0  ;;  %3964 = vst.msk [vmem:[#allocation3 + $0x18] sm:$0xff] %vm538_vm4, %v3928_v11 }
 0x290   : > { %v4358_v28 = vadd.f32 %v4322_v29, %v4232_v17  ;;  %v4324_v29 = vld [vmem:[#allocation3 + $0x10] sm:$0xff] }
 0x291   : > { %v2922_v38 = vld [vmem:[#allocation3 + $0x118] sm:$0xff]  ;;  %10924 = vmatmul.msk.bf16.gmra.mxu3 %vm380_vm1, %v3665_v1  ;;  %v3674_v1 = vsel %vm3558_vm8, %v13597_v19, %v13649_v9  ;;  %v13679_v19 = vor.u32 %v5172_v21, %v5169_v4 }
 0x292   : > { %v2958_v23 = vadd.f32 %v2922_v38, %v2884_v10  ;;  %4394 = vst.msk [vmem:[#allocation3] sm:$0xff] %vm538_vm4, %v4358_v28  ;;  %11012 = vmatmul.msk.bf16.gmra.mxu0 %vm380_vm1, %v4147_v24  ;;  %v4505_v10 = vshra.s32 %v4469_v2, 20  ;;  %v4149_v24 = vsel %vm4128_vm9, %v4146_v7, %v4148_v36  ;;  %v11115_v38 = vor.u32 %v12105_v15, %v11114_v61 }
 0x293   : > { %v3353_v27 = vld [vmem:[#allocation3 + $0x110] sm:$0xff]  ;;  %v3316_v51 = vpop.f32.mrf.mxu2 }
 0x294   : > { %2994 = vst.msk [vmem:[#allocation3 + $0x118] sm:$0xff] %vm538_vm4, %v2958_v23  ;;  %v3389_v44 = vadd.f32 %v3353_v27, %v3314_v32  ;;  %v3809_v46 = vpop.f32.mrf.mxu3  ;;  %v12064_v32 = vld [vmem:[%s12357_s10 + $0x78] sm:$0xff]  ;;  %v4541_v37 = vmul.u32 18, %v4505_v10  ;;  %v5607_v27 = vshrl.u32 %v11115_v38, 16  ;;  %v5610_v31 = vshll.u32 %v11115_v38, 16 }
 0x295   : > { %v3929_v41 = vadd.f32 %v3893_v47, %v3809_v46  ;;  %v3676_v26 = vshrl.u32 %v12064_v32, 16  ;;  %v3679_v22 = vshll.u32 %v12064_v32, 16  ;;  %v3895_v46 = vld [vmem:[#allocation3 + $0x30] sm:$0xff]  ;;  %v4470_v47 = vmul.u32 58255, %v13674_v39 }
 0x296   : > { %3425 = vst.msk [vmem:[#allocation3 + $0x110] sm:$0xff] %vm538_vm4, %v3389_v44  ;;  %v5313_v58 = vpop.f32.mrf.mxu1  ;;  %v5612_v0 = vrot.slane %v5610_v31, 3 }
 0x297   : > { %v4234_v59 = vpop.f32.mrf.mxu0  ;;  %3965 = vst.msk [vmem:[#allocation3 + $0x20] sm:$0xff] %vm538_vm4, %v3929_v41  ;;  %v4577_v41 = vsub.s32 %v13640_v50, %v4541_v37  ;;  %v3678_v40 = vrot.slane %v3676_v26, 2  ;;  %v3681_v52 = vrot.slane %v3679_v22, 3 }
 0x298   : > { %v4359_v60 = vadd.f32 %v4323_v55, %v4234_v59  ;;  %v4325_v55 = vld [vmem:[#allocation3 + $0x18] sm:$0xff] }
 0x299   : > { %v4647_v62 = vld [vmem:[#allocation3] sm:$0xff]  ;;  %11102 = vmatmul.msk.bf16.gmra.mxu1 %vm380_vm1, %v5165_v54  ;;  %v5174_v54 = vsel %vm2123_vm5, %v13621_v34, %v13679_v19  ;;  %v4506_v34 = vshra.s32 %v4470_v47, 20  ;;  %vm4613_vm13 = vcmp.lt.s32.totalorder %v4577_v41, 16 }
 0x29a   : > { %v4687_v30 = vadd.f32 %v13634_v53, %v4647_v62  ;;  %5403 = vst.msk [vmem:[#allocation3] sm:$0xff] %vm538_vm4, %v5313_v58  ;;  %v13693_v62 = vadd.s32 32, %v13577_v57  ;;  %v12099_v47 = vld [vmem:[%s12357_s10 + $0x68] sm:$0xff] }
 0x29b   : > { %4395 = vst.msk [vmem:[#allocation3 + $0x8] sm:$0xff] %vm538_vm4, %v4359_v60  ;;  %v3354_v5 = vld [vmem:[#allocation3 + $0x118] sm:$0xff]  ;;  %v13690_v60 = vld [vmem:[%s12357_s10 + $0x68] sm:$0xff] }
 0x29c   : > { %v4723_v16 = vmax.f32 %v4687_v30, 0.0  ;;  %v3390_v13 = vadd.f32 %v3354_v5, %v3316_v51  ;;  %v3811_v8 = vpop.f32.mrf.mxu3  ;;  %v5609_v30 = vrot.slane %v5607_v27, 2  ;;  %v4150_v12 = vrot.slane %v13690_v60, 3 }
 0x29d   : > { %v3930_v6 = vadd.f32 %v3894_v18, %v3811_v8  ;;  %v4471_v56 = vmul.u32 58255, %v13693_v62  ;;  %v13774_v60 = vadd.s32 56, %v13577_v57 }
 0x29e   : > { %v4831_v63 = vsel %vm4611_vm11, %v4723_v16, 0.0  ;;  %3426 = vst.msk [vmem:[#allocation3 + $0x118] sm:$0xff] %vm538_vm4, %v3390_v13  ;;  %v5315_v11 = vpop.f32.mrf.mxu1  ;;  %v5179_v16 = vshll.u32 %v12098_v43, 16  ;;  %v13700_v13 = vor.u32 %v3681_v52, %v3678_v40  ;;  %v5613_v18 = vor.u32 %v5612_v0, %v5609_v30  ;;  %v4326_v32 = vld [vmem:[#allocation3 + $0x20] sm:$0xff]  ;;  %v13739_v52 = vld [vmem:[%s12357_s10 + $0x70] sm:$0xff] }
 0x29f   : > { %v4871_v20 = vpack.c.bf16 %v4831_v63, %v4831_v63  ;;  %v4237_v17 = vpop.f32.mrf.mxu0  ;;  %3966 = vst.msk [vmem:[#allocation3 + $0x28] sm:$0xff] %vm538_vm4, %v3930_v6  ;;  %v3896_v63 = vld [vmem:[#allocation3 + $0x38] sm:$0xff]  ;;  %v4542_v6 = vmul.u32 18, %v4506_v34  ;;  %v4507_v38 = vshra.s32 %v4471_v56, 20 }
 0x2a0   : > { %v4360_v28 = vadd.f32 %v4324_v29, %v4237_v17  ;;  %v5181_v29 = vrot.slane %v5179_v16, 2  ;;  %v3683_v35 = vsel %vm3558_vm8, %v13649_v9, %v13700_v13  ;;  %v13723_v9 = vadd.s32 40, %v13577_v57 }
 0x2a1   : > { %4907 = vst.msk [vmem:[#allocation2 + $0xc] sm:$0xf] %vm4867_vm10, %v4871_v20  ;;  %10925 = vmatmul.msk.bf16.gmra.mxu3 %vm380_vm1, %v3674_v1  ;;  %v4578_v26 = vsub.s32 %v13674_v39, %v4542_v6  ;;  %v4543_v22 = vmul.u32 18, %v4507_v38  ;;  %v4152_v16 = vrot.slane %v13739_v52, 3  ;;  %v13825_v52 = vadd.s32 72, %v13577_v57 }
 0x2a2   : > { %v4648_v23 = vld [vmem:[#allocation3 + $0x8] sm:$0xff]  ;;  %4396 = vst.msk [vmem:[#allocation3 + $0x10] sm:$0xff] %vm538_vm4, %v4360_v28  ;;  %11013 = vmatmul.msk.bf16.gmra.mxu0 %vm380_vm1, %v4149_v24  ;;  %v4151_v28 = vsel %vm4128_vm9, %v4148_v36, %v4150_v12 }
 0x2a3   : > { %v4688_v7 = vadd.f32 %v13634_v53, %v4648_v23  ;;  %5404 = vst.msk [vmem:[#allocation3 + $0x8] sm:$0xff] %vm538_vm4, %v5315_v11  ;;  %v5178_v11 = vrot.slane %v5176_v3, 1  ;;  %v12065_v23 = vld [vmem:[%s12357_s10 + $0x80] sm:$0xff]  ;;  %vm4614_vm14 = vcmp.lt.s32.totalorder %v4578_v26, 16 }
 0x2a4   : > { %v3814_v44 = vpop.f32.mrf.mxu3  ;;  %v3685_v27 = vshrl.u32 %v12065_v23, 16  ;;  %v3688_v31 = vshll.u32 %v12065_v23, 16  ;;  %v12066_v23 = vld [vmem:[%s12357_s10 + $0x88] sm:$0xff] }
 0x2a5   : > { %v4724_v42 = vmax.f32 %v4688_v7, 0.0  ;;  %v3931_v25 = vadd.f32 %v3895_v46, %v3814_v44  ;;  %v13728_v48 = vor.u32 %v5181_v29, %v5178_v11  ;;  %v3897_v44 = vld [vmem:[#allocation3 + $0x40] sm:$0xff]  ;;  %v4472_v46 = vmul.u32 58255, %v13723_v9 }
 0x2a6   : > { %v5318_v58 = vpop.f32.mrf.mxu1  ;;  %v3690_v40 = vrot.slane %v3688_v31, 3  ;;  %v3899_v31 = vld [vmem:[#allocation3 + $0x50] sm:$0xff] }
 0x2a7   : > { %v4832_v33 = vsel %vm4612_vm12, %v4724_v42, 0.0  ;;  %v4239_v59 = vpop.f32.mrf.mxu0  ;;  %3967 = vst.msk [vmem:[#allocation3 + $0x30] sm:$0xff] %vm538_vm4, %v3931_v25 }
 0x2a8   : > { %v4872_v51 = vpack.c.bf16 %v4832_v33, %v4832_v33  ;;  %v4361_v45 = vadd.f32 %v4325_v55, %v4239_v59  ;;  %v12106_v50 = vld [vmem:[#allocation2 + $0x8] sm:$0xff]  ;;  %v4327_v59 = vld [vmem:[#allocation3 + $0x28] sm:$0xff]  ;;  %v3687_v55 = vrot.slane %v3685_v27, 2 }
 0x2a9   : > { %v4649_v2 = vld [vmem:[#allocation3 + $0x10] sm:$0xff]  ;;  %11103 = vmatmul.msk.bf16.gmra.mxu1 %vm380_vm1, %v5174_v54  ;;  %v5615_v49 = vshrl.u32 %v12106_v50, 16  ;;  %v5618_v14 = vshll.u32 %v12106_v50, 16  ;;  %v4579_v54 = vsub.s32 %v13693_v62, %v4543_v22  ;;  %v5185_v62 = vshrl.u32 %v12099_v47, 16 }
 0x2aa   : > { %4908 = vst.msk [vmem:[#allocation2 + $0x10] sm:$0xf] %vm4867_vm10, %v4872_v51  ;;  %v4689_v5 = vadd.f32 %v13634_v53, %v4649_v2  ;;  %v13742_v51 = vadd.s32 48, %v13577_v57  ;;  %v3697_v22 = vshll.u32 %v12066_v23, 16 }
 0x2ab   : > { %5405 = vst.msk [vmem:[#allocation3 + $0x10] sm:$0xff] %vm538_vm4, %v5318_v58  ;;  %v5617_v4 = vrot.slane %v5615_v49, 2  ;;  %v5620_v61 = vrot.slane %v5618_v14, 3  ;;  %v5183_v58 = vsel %vm2123_vm5, %v13679_v19, %v13728_v48  ;;  %v4508_v19 = vshra.s32 %v4472_v46, 20 }
 0x2ac   : > { %v4725_v8 = vmax.f32 %v4689_v5, 0.0  ;;  %4397 = vst.msk [vmem:[#allocation3 + $0x18] sm:$0xff] %vm538_vm4, %v4361_v45  ;;  %v3816_v15 = vpop.f32.mrf.mxu3  ;;  %v5188_v49 = vshll.u32 %v12099_v47, 16  ;;  %vm4615_vm15 = vcmp.lt.s32.totalorder %v4579_v54, 16  ;;  %v13750_v14 = vor.u32 %v3690_v40, %v3687_v55 }
 0x2ad   : > { %v3932_v21 = vadd.f32 %v3896_v63, %v3816_v15  ;;  %v13705_v17 = vor.u32 %v5620_v61, %v5617_v4  ;;  %v4473_v56 = vmul.u32 58255, %v13742_v51  ;;  %v3898_v15 = vld [vmem:[#allocation3 + $0x48] sm:$0xff]  ;;  %v4544_v63 = vmul.u32 18, %v4508_v19 }
 0x2ae   : > { %v4833_v10 = vsel %vm4613_vm13, %v4725_v8, 0.0  ;;  %v5320_v20 = vpop.f32.mrf.mxu1  ;;  %v5187_v6 = vrot.slane %v5185_v62, 1  ;;  %v5190_v29 = vrot.slane %v5188_v49, 2  ;;  %v13793_v55 = vadd.s32 64, %v13577_v57 }
 0x2af   : > { %v4873_v1 = vpack.c.bf16 %v4833_v10, %v4833_v10  ;;  %v4242_v24 = vpop.f32.mrf.mxu0  ;;  %3968 = vst.msk [vmem:[#allocation3 + $0x38] sm:$0xff] %vm538_vm4, %v3932_v21  ;;  %v5622_v7 = vsel %vm3558_vm8, %v5613_v18, %v13705_v17  ;;  %v4509_v38 = vshra.s32 %v4473_v56, 20  ;;  %v4580_v26 = vsub.s32 %v13723_v9, %v4544_v63 }
 0x2b0   : > { %v4362_v37 = vadd.f32 %v4326_v32, %v4242_v24  ;;  %11184 = vmatmul.msk.bf16.vlgmr.msra.gmra.mxu2 %vm538_vm4, %v5622_v7  ;;  %v4328_v32 = vld [vmem:[#allocation3 + $0x30] sm:$0xff]  ;;  %v4475_v49 = vmul.u32 58255, %v13793_v55 }
 0x2b1   : > { %4909 = vst.msk [vmem:[#allocation2 + $0x14] sm:$0xf] %vm4867_vm10, %v4873_v1  ;;  %10926 = vmatmul.msk.bf16.gmra.mxu3 %vm380_vm1, %v3683_v35  ;;  %v3692_v35 = vsel %vm3558_vm8, %v13700_v13, %v13750_v14  ;;  %v13779_v13 = vor.u32 %v5190_v29, %v5187_v6  ;;  %vm4616_vm0 = vcmp.lt.s32.totalorder %v4580_v26, 16 }
 0x2b2   : > { %4398 = vst.msk [vmem:[#allocation3 + $0x20] sm:$0xff] %vm538_vm4, %v4362_v37  ;;  %11014 = vmatmul.msk.bf16.gmra.mxu0 %vm380_vm1, %v4151_v28  ;;  %v4153_v28 = vsel %vm4128_vm9, %v4150_v12, %v4152_v16 }
 0x2b3   : > { %v4650_v36 = vld [vmem:[#allocation3 + $0x18] sm:$0xff] }
 0x2b4   : > { %v4690_v39 = vadd.f32 %v13634_v53, %v4650_v36  ;;  %5406 = vst.msk [vmem:[#allocation3 + $0x18] sm:$0xff] %vm538_vm4, %v5320_v20  ;;  %v3819_v42 = vpop.f32.mrf.mxu3  ;;  %v3694_v36 = vshrl.u32 %v12066_v23, 16  ;;  %v12067_v23 = vld [vmem:[%s12357_s10 + $0x90] sm:$0xff] }
 0x2b5   : > { %v3933_v25 = vadd.f32 %v3897_v44, %v3819_v42  ;;  %v12100_v42 = vld [vmem:[%s12357_s10 + $0x70] sm:$0xff] }
 0x2b6   : > { %v4726_v43 = vmax.f32 %v4690_v39, 0.0  ;;  %v5323_v41 = vpop.f32.mrf.mxu1  ;;  %v4474_v39 = vmul.u32 58255, %v13774_v60  ;;  %v3696_v54 = vrot.slane %v3694_v36, 2 }
 0x2b7   : > { %v4244_v33 = vpop.f32.mrf.mxu0  ;;  %3969 = vst.msk [vmem:[#allocation3 + $0x40] sm:$0xff] %vm538_vm4, %v3933_v25 }
 0x2b8   : > { %v4834_v45 = vsel %vm4614_vm14, %v4726_v43, 0.0  ;;  %v4363_v50 = vadd.f32 %v4327_v59, %v4244_v33  ;;  %v12107_v30 = vld [vmem:[#allocation2 + $0x10] sm:$0xff]  ;;  %v5192_v43 = vsel %vm2123_vm5, %v13728_v48, %v13779_v13  ;;  %v3699_v33 = vrot.slane %v3697_v22, 3  ;;  %v13790_v59 = vld [vmem:[%s12357_s10 + $0x78] sm:$0xff]  ;;  %v3901_v22 = vld [vmem:[#allocation3 + $0x60] sm:$0xff] }
 0x2b9   : > { %v4874_v0 = vpack.c.bf16 %v4834_v45, %v4834_v45  ;;  %v4651_v2 = vld [vmem:[#allocation3 + $0x20] sm:$0xff]  ;;  %11104 = vmatmul.msk.bf16.gmra.mxu1 %vm380_vm1, %v5183_v58  ;;  %v5624_v3 = vshrl.u32 %v12107_v30, 16  ;;  %v5627_v5 = vshll.u32 %v12107_v30, 16  ;;  %v4329_v58 = vld [vmem:[#allocation3 + $0x38] sm:$0xff]  ;;  %v4510_v48 = vshra.s32 %v4474_v39, 20 }
 0x2ba   : > { %v4691_v34 = vadd.f32 %v13634_v53, %v4651_v2  ;;  %5407 = vst.msk [vmem:[#allocation3 + $0x20] sm:$0xff] %vm538_vm4, %v5323_v41 }
 0x2bb   : > { %4910 = vst.msk [vmem:[#allocation2 + $0x18] sm:$0xf] %vm4867_vm10, %v4874_v0  ;;  %v5626_v18 = vrot.slane %v5624_v3, 2  ;;  %v5629_v4 = vrot.slane %v5627_v5, 3  ;;  %v13801_v3 = vor.u32 %v3699_v33, %v3696_v54  ;;  %v4154_v5 = vrot.slane %v13790_v59, 3 }
 0x2bc   : > { %v4727_v8 = vmax.f32 %v4691_v34, 0.0  ;;  %4399 = vst.msk [vmem:[#allocation3 + $0x28] sm:$0xff] %vm538_vm4, %v4363_v50  ;;  %v3821_v61 = vpop.f32.mrf.mxu3  ;;  %v5197_v34 = vshll.u32 %v12100_v42, 16  ;;  %v13844_v54 = vadd.s32 80, %v13577_v57  ;;  %v13876_v59 = vadd.s32 88, %v13577_v57 }
 0x2bd   : > { %v3934_v10 = vadd.f32 %v3898_v15, %v3821_v61  ;;  %v13755_v20 = vor.u32 %v5629_v4, %v5626_v18  ;;  %v3900_v61 = vld [vmem:[#allocation3 + $0x58] sm:$0xff]  ;;  %v4546_v15 = vmul.u32 18, %v4510_v48 }
 0x2be   : > { %v4835_v11 = vsel %vm4615_vm15, %v4727_v8, 0.0  ;;  %v5325_v21 = vpop.f32.mrf.mxu1  ;;  %v5199_v29 = vrot.slane %v5197_v34, 2  ;;  %v4477_v34 = vmul.u32 58255, %v13844_v54 }
 0x2bf   : > { %v4875_v1 = vpack.c.bf16 %v4835_v11, %v4835_v11  ;;  %v4247_v24 = vpop.f32.mrf.mxu0  ;;  %3970 = vst.msk [vmem:[#allocation3 + $0x48] sm:$0xff] %vm538_vm4, %v3934_v10  ;;  %v5631_v7 = vsel %vm3558_vm8, %v13705_v17, %v13755_v20  ;;  %v4545_v17 = vmul.u32 18, %v4509_v38  ;;  %v4511_v38 = vshra.s32 %v4475_v49, 20 }
 0x2c0   : > { %v4364_v37 = vadd.f32 %v4328_v32, %v4247_v24  ;;  %11185 = vmatmul.msk.bf16.gmra.mxu2 %vm538_vm4, %v5631_v7  ;;  %v4330_v32 = vld [vmem:[#allocation3 + $0x40] sm:$0xff]  ;;  %v4582_v26 = vsub.s32 %v13774_v60, %v4546_v15 }
 0x2c1   : > { %4911 = vst.msk [vmem:[#allocation2 + $0x1c] sm:$0xf] %vm4867_vm10, %v4875_v1  ;;  %10927 = vmatmul.msk.bf16.gmra.mxu3 %vm380_vm1, %v3692_v35  ;;  %v4581_v25 = vsub.s32 %v13742_v51, %v4545_v17  ;;  %v5194_v51 = vshrl.u32 %v12100_v42, 16  ;;  %v3701_v35 = vsel %vm3558_vm8, %v13750_v14, %v13801_v3  ;;  %v3706_v17 = vshll.u32 %v12067_v23, 16 }
 0x2c2   : > { %4400 = vst.msk [vmem:[#allocation3 + $0x30] sm:$0xff] %vm538_vm4, %v4364_v37  ;;  %11015 = vmatmul.msk.bf16.gmra.mxu0 %vm380_vm1, %v4153_v28  ;;  %v4155_v28 = vsel %vm4128_vm9, %v4152_v16, %v4154_v5  ;;  %vm4618_vm11 = vcmp.lt.s32.totalorder %v4582_v26, 16 }
 0x2c3   : > { %v4652_v12 = vld [vmem:[#allocation3 + $0x28] sm:$0xff]  ;;  %vm4617_vm6 = vcmp.lt.s32.totalorder %v4581_v25, 16  ;;  %v5196_v63 = vrot.slane %v5194_v51, 1 }
 0x2c4   : > { %v4692_v9 = vadd.f32 %v13634_v53, %v4652_v12  ;;  %5408 = vst.msk [vmem:[#allocation3 + $0x28] sm:$0xff] %vm538_vm4, %v5325_v21  ;;  %v3824_v27 = vpop.f32.mrf.mxu3  ;;  %v3703_v12 = vshrl.u32 %v12067_v23, 16  ;;  %v12068_v23 = vld [vmem:[%s12357_s10 + $0x98] sm:$0xff] }
 0x2c5   : > { %v3935_v46 = vadd.f32 %v3899_v31, %v3824_v27  ;;  %v13830_v14 = vor.u32 %v5199_v29, %v5196_v63  ;;  %v12101_v27 = vld [vmem:[%s12357_s10 + $0x78] sm:$0xff] }
 0x2c6   : > { %v4728_v44 = vmax.f32 %v4692_v9, 0.0  ;;  %v5328_v47 = vpop.f32.mrf.mxu1  ;;  %v4476_v9 = vmul.u32 58255, %v13825_v52  ;;  %v3705_v25 = vrot.slane %v3703_v12, 2 }
 0x2c7   : > { %v4249_v41 = vpop.f32.mrf.mxu0  ;;  %3971 = vst.msk [vmem:[#allocation3 + $0x50] sm:$0xff] %vm538_vm4, %v3935_v46 }
 0x2c8   : > { %v4836_v40 = vsel %vm4616_vm0, %v4728_v44, 0.0  ;;  %v4365_v45 = vadd.f32 %v4329_v58, %v4249_v41  ;;  %v12108_v50 = vld [vmem:[#allocation2 + $0x18] sm:$0xff]  ;;  %v5201_v44 = vsel %vm2123_vm5, %v13779_v13, %v13830_v14  ;;  %v3708_v41 = vrot.slane %v3706_v17, 3  ;;  %v13841_v58 = vld [vmem:[%s12357_s10 + $0x80] sm:$0xff] }
 0x2c9   : > { %v4876_v30 = vpack.c.bf16 %v4836_v40, %v4836_v40  ;;  %v4653_v0 = vld [vmem:[#allocation3 + $0x30] sm:$0xff]  ;;  %11105 = vmatmul.msk.bf16.gmra.mxu1 %vm380_vm1, %v5192_v43  ;;  %v5633_v19 = vshrl.u32 %v12108_v50, 16  ;;  %v5636_v62 = vshll.u32 %v12108_v50, 16  ;;  %v4331_v43 = vld [vmem:[#allocation3 + $0x48] sm:$0xff]  ;;  %v4512_v13 = vshra.s32 %v4476_v9, 20 }
 0x2ca   : > { %v4693_v2 = vadd.f32 %v13634_v53, %v4653_v0  ;;  %5409 = vst.msk [vmem:[#allocation3 + $0x30] sm:$0xff] %vm538_vm4, %v5328_v47  ;;  %v3903_v17 = vld [vmem:[#allocation3 + $0x70] sm:$0xff] }
 0x2cb   : > { %4912 = vst.msk [vmem:[#allocation2 + $0x20] sm:$0xf] %vm4867_vm10, %v4876_v30  ;;  %v5635_v8 = vrot.slane %v5633_v19, 2  ;;  %v5638_v18 = vrot.slane %v5636_v62, 3  ;;  %v13852_v19 = vor.u32 %v3708_v41, %v3705_v25  ;;  %v4156_v62 = vrot.slane %v13841_v58, 3 }
 0x2cc   : > { %v4729_v56 = vmax.f32 %v4693_v2, 0.0  ;;  %4401 = vst.msk [vmem:[#allocation3 + $0x38] sm:$0xff] %vm538_vm4, %v4365_v45  ;;  %v3826_v4 = vpop.f32.mrf.mxu3  ;;  %v5206_v2 = vshll.u32 %v12101_v27, 16  ;;  %v13895_v25 = vadd.s32 96, %v13577_v57 }
 0x2cd   : > { %v3936_v11 = vadd.f32 %v3900_v61, %v3826_v4  ;;  %v13806_v21 = vor.u32 %v5638_v18, %v5635_v8  ;;  %v3902_v4 = vld [vmem:[#allocation3 + $0x68] sm:$0xff]  ;;  %v4548_v61 = vmul.u32 18, %v4512_v13 }
 0x2ce   : > { %v4837_v6 = vsel %vm4617_vm6, %v4729_v56, 0.0  ;;  %v5330_v10 = vpop.f32.mrf.mxu1  ;;  %v5208_v29 = vrot.slane %v5206_v2, 2 }
 0x2cf   : > { %v4877_v1 = vpack.c.bf16 %v4837_v6, %v4837_v6  ;;  %v4252_v24 = vpop.f32.mrf.mxu0  ;;  %3972 = vst.msk [vmem:[#allocation3 + $0x58] sm:$0xff] %vm538_vm4, %v3936_v11  ;;  %v5640_v7 = vsel %vm3558_vm8, %v13755_v20, %v13806_v21  ;;  %v4547_v20 = vmul.u32 18, %v4511_v38  ;;  %v4513_v38 = vshra.s32 %v4477_v34, 20 }
 0x2d0   : > { %v4366_v37 = vadd.f32 %v4330_v32, %v4252_v24  ;;  %11186 = vmatmul.msk.bf16.gmra.mxu2 %vm538_vm4, %v5640_v7  ;;  %v4332_v32 = vld [vmem:[#allocation3 + $0x50] sm:$0xff]  ;;  %v4584_v26 = vsub.s32 %v13825_v52, %v4548_v61  ;;  %v4479_v34 = vmul.u32 58255, %v13895_v25  ;;  %v3904_v61 = vld [vmem:[#allocation3 + $0x78] sm:$0xff] }
 0x2d1   : > { %4913 = vst.msk [vmem:[#allocation2 + $0x24] sm:$0xf] %vm4867_vm10, %v4877_v1  ;;  %10928 = vmatmul.msk.bf16.gmra.mxu3 %vm380_vm1, %v3701_v35  ;;  %v4583_v46 = vsub.s32 %v13793_v55, %v4547_v20  ;;  %v5203_v55 = vshrl.u32 %v12101_v27, 16  ;;  %v3710_v35 = vsel %vm3558_vm8, %v13801_v3, %v13852_v19  ;;  %v3715_v20 = vshll.u32 %v12068_v23, 16 }
 0x2d2   : > { %4402 = vst.msk [vmem:[#allocation3 + $0x40] sm:$0xff] %vm538_vm4, %v4366_v37  ;;  %11016 = vmatmul.msk.bf16.gmra.mxu0 %vm380_vm1, %v4155_v28  ;;  %v4157_v28 = vsel %vm4128_vm9, %v4154_v5, %v4156_v62  ;;  %vm4620_vm13 = vcmp.lt.s32.totalorder %v4584_v26, 16 }
 0x2d3   : > { %v4654_v16 = vld [vmem:[#allocation3 + $0x38] sm:$0xff]  ;;  %vm4619_vm12 = vcmp.lt.s32.totalorder %v4583_v46, 16  ;;  %v5205_v15 = vrot.slane %v5203_v55, 1 }
 0x2d4   : > { %v4694_v60 = vadd.f32 %v13634_v53, %v4654_v16  ;;  %5410 = vst.msk [vmem:[#allocation3 + $0x38] sm:$0xff] %vm538_vm4, %v5330_v10  ;;  %v3829_v36 = vpop.f32.mrf.mxu3  ;;  %v3712_v16 = vshrl.u32 %v12068_v23, 16 }
 0x2d5   : > { %v3937_v39 = vadd.f32 %v3901_v22, %v3829_v36  ;;  %v13881_v3 = vor.u32 %v5208_v29, %v5205_v15  ;;  %v13887_v36 = vld [vmem:[%s12357_s10 + $0x88] sm:$0xff]  ;;  %v12102_v22 = vld [vmem:[%s12357_s10 + $0x80] sm:$0xff] }
 0x2d6   : > { %v4730_v31 = vmax.f32 %v4694_v60, 0.0  ;;  %v5333_v42 = vpop.f32.mrf.mxu1  ;;  %v4478_v60 = vmul.u32 58255, %v13876_v59  ;;  %v4333_v46 = vld [vmem:[#allocation3 + $0x58] sm:$0xff]  ;;  %v5212_v13 = vshrl.u32 %v12102_v22, 16 }
 0x2d7   : > { %v4254_v47 = vpop.f32.mrf.mxu0  ;;  %3973 = vst.msk [vmem:[#allocation3 + $0x60] sm:$0xff] %vm538_vm4, %v3937_v39  ;;  %v5210_v39 = vsel %vm2123_vm5, %v13830_v14, %v13881_v3 }
 0x2d8   : > { %v4838_v33 = vsel %vm4618_vm11, %v4730_v31, 0.0  ;;  %v4367_v40 = vadd.f32 %v4331_v43, %v4254_v47  ;;  %v12109_v45 = vld [vmem:[#allocation2 + $0x20] sm:$0xff]  ;;  %v3714_v47 = vrot.slane %v3712_v16, 2  ;;  %v3717_v43 = vrot.slane %v3715_v20, 3 }
 0x2d9   : > { %v4878_v50 = vpack.c.bf16 %v4838_v33, %v4838_v33  ;;  %v4655_v30 = vld [vmem:[#allocation3 + $0x40] sm:$0xff]  ;;  %11106 = vmatmul.msk.bf16.gmra.mxu1 %vm380_vm1, %v5201_v44  ;;  %v5642_v48 = vshrl.u32 %v12109_v45, 16  ;;  %v5645_v51 = vshll.u32 %v12109_v45, 16  ;;  %v3463_v45 = vld [vmem:[%s12357_s10 + $0xa0] sm:$0x7]  ;;  %v4514_v14 = vshra.s32 %v4478_v60, 20 }
 0x2da   : > { %v4695_v0 = vadd.f32 %v13634_v53, %v4655_v30  ;;  %5411 = vst.msk [vmem:[#allocation3 + $0x40] sm:$0xff] %vm538_vm4, %v5333_v42  ;;  %v13905_v2 = vor.u32 %v3717_v43, %v3714_v47  ;;  %v12103_v60 = vld [vmem:[%s12357_s10 + $0x88] sm:$0xff]  ;;  %v13943_v43 = vld [vmem:[%s12357_s10 + $0x90] sm:$0xff] }
 0x2db   : > { %4914 = vst.msk [vmem:[#allocation2 + $0x28] sm:$0xf] %vm4867_vm10, %v4878_v50  ;;  %v5644_v56 = vrot.slane %v5642_v48, 2  ;;  %v5647_v8 = vrot.slane %v5645_v51, 3  ;;  %v5215_v51 = vshll.u32 %v12102_v22, 16  ;;  %v4550_v15 = vmul.u32 18, %v4514_v14 }
 0x2dc   : > { %v4731_v49 = vmax.f32 %v4695_v0, 0.0  ;;  %4403 = vst.msk [vmem:[#allocation3 + $0x48] sm:$0xff] %vm538_vm4, %v4367_v40  ;;  %v3831_v18 = vpop.f32.mrf.mxu3  ;;  %v3719_v23 = vsel %vm3558_vm8, %v13852_v19, %v13905_v2 }
 0x2dd   : > { %v3938_v6 = vadd.f32 %v3902_v4, %v3831_v18  ;;  %v13857_v10 = vor.u32 %v5647_v8, %v5644_v56  ;;  %v4586_v26 = vsub.s32 %v13876_v59, %v4550_v15 }
 0x2de   : > { %v4839_v63 = vsel %vm4619_vm12, %v4731_v49, 0.0  ;;  %v5335_v11 = vpop.f32.mrf.mxu1  ;;  %v3538_v49 = vunpack.c.l.b16 %v3463_v45 }
 0x2df   : > { %v4879_v1 = vpack.c.bf16 %v4839_v63, %v4839_v63  ;;  %v4257_v24 = vpop.f32.mrf.mxu0  ;;  %3974 = vst.msk [vmem:[#allocation3 + $0x68] sm:$0xff] %vm538_vm4, %v3938_v6  ;;  %v5649_v7 = vsel %vm3558_vm8, %v13806_v21, %v13857_v10  ;;  %v4549_v21 = vmul.u32 18, %v4513_v38  ;;  %v5214_v6 = vrot.slane %v5212_v13, 1  ;;  %v4334_v38 = vld [vmem:[#allocation3 + $0x60] sm:$0xff] }
 0x2e0   : > { %v4368_v37 = vadd.f32 %v4332_v32, %v4257_v24  ;;  %11187 = vmatmul.msk.bf16.gmra.mxu2 %vm538_vm4, %v5649_v7  ;;  %v5217_v32 = vrot.slane %v5215_v51, 2  ;;  %v3557_v7 = vpack.c.b16 %v3538_v49, %v3538_v49  ;;  %vm4622_vm15 = vcmp.lt.s32.totalorder %v4586_v26, 16 }
 0x2e1   : > { %4915 = vst.msk [vmem:[#allocation2 + $0x2c] sm:$0xf] %vm4867_vm10, %v4879_v1  ;;  %10929 = vmatmul.msk.bf16.gmra.mxu3 %vm380_vm1, %v3710_v35  ;;  %v4585_v42 = vsub.s32 %v13844_v54, %v4549_v21  ;;  %v4158_v54 = vrot.slane %v13887_v36, 3  ;;  %v4160_v51 = vrot.slane %v13943_v43, 3 }
 0x2e2   : > { %4404 = vst.msk [vmem:[#allocation3 + $0x50] sm:$0xff] %vm538_vm4, %v4368_v37  ;;  %11017 = vmatmul.msk.bf16.gmra.mxu0 %vm380_vm1, %v4157_v28  ;;  %v4515_v37 = vshra.s32 %v4479_v34, 20  ;;  %v13932_v19 = vor.u32 %v5217_v32, %v5214_v6  ;;  %v3721_v16 = vshrl.u32 %v3557_v7, 16  ;;  %v3724_v20 = vshll.u32 %v3557_v7, 16 }
 0x2e3   : > { %v4656_v5 = vld [vmem:[#allocation3 + $0x48] sm:$0xff]  ;;  %vm4621_vm14 = vcmp.lt.s32.totalorder %v4585_v42, 16  ;;  %v4159_v63 = vsel %vm4128_vm9, %v4156_v62, %v4158_v54 }
 0x2e4   : > { %v4696_v52 = vadd.f32 %v13634_v53, %v4656_v5  ;;  %5412 = vst.msk [vmem:[#allocation3 + $0x48] sm:$0xff] %vm538_vm4, %v5335_v11  ;;  %v3834_v12 = vpop.f32.mrf.mxu3  ;;  %v13927_v5 = vadd.s32 104, %v13577_v57  ;;  %v3726_v47 = vrot.slane %v3724_v20, 3 }
 0x2e5   : > { %v3939_v27 = vadd.f32 %v3903_v17, %v3834_v12  ;;  %v3905_v12 = vld [vmem:[#allocation3 + $0x80] sm:$0xff] }
 0x2e6   : > { %v4732_v9 = vmax.f32 %v4696_v52, 0.0  ;;  %v5338_v31 = vpop.f32.mrf.mxu1  ;;  %v4480_v17 = vmul.u32 58255, %v13927_v5 }
 0x2e7   : > { %v4259_v44 = vpop.f32.mrf.mxu0  ;;  %3975 = vst.msk [vmem:[#allocation3 + $0x70] sm:$0xff] %vm538_vm4, %v3939_v27 }
 0x2e8   : > { %v4840_v41 = vsel %vm4620_vm13, %v4732_v9, 0.0  ;;  %v4369_v33 = vadd.f32 %v4333_v46, %v4259_v44  ;;  %v12110_v40 = vld [vmem:[#allocation2 + $0x28] sm:$0xff]  ;;  %v4335_v44 = vld [vmem:[#allocation3 + $0x68] sm:$0xff]  ;;  %v3723_v46 = vrot.slane %v3721_v16, 2 }
 0x2e9   : > { %v4880_v50 = vpack.c.bf16 %v4840_v41, %v4840_v41  ;;  %v4657_v30 = vld [vmem:[#allocation3 + $0x50] sm:$0xff]  ;;  %11107 = vmatmul.msk.bf16.gmra.mxu1 %vm380_vm1, %v5210_v39  ;;  %v5651_v0 = vshrl.u32 %v12110_v40, 16  ;;  %v5654_v48 = vshll.u32 %v12110_v40, 16  ;;  %v13946_v41 = vadd.s32 112, %v13577_v57  ;;  %v12104_v16 = vld [vmem:[%s12357_s10 + $0x90] sm:$0xff] }
 0x2ea   : > { %v4697_v55 = vadd.f32 %v13634_v53, %v4657_v30  ;;  %5413 = vst.msk [vmem:[#allocation3 + $0x50] sm:$0xff] %vm538_vm4, %v5338_v31  ;;  %v5219_v31 = vsel %vm2123_vm5, %v13881_v3, %v13932_v19  ;;  %v4516_v3 = vshra.s32 %v4480_v17, 20  ;;  %v11204_v17 = vld [vmem:[#allocation2] sm:$0x8] }
 0x2eb   : > { %4916 = vst.msk [vmem:[#allocation2 + $0x30] sm:$0xf] %vm4867_vm10, %v4880_v50  ;;  %v5653_v8 = vrot.slane %v5651_v0, 2  ;;  %v5656_v18 = vrot.slane %v5654_v48, 3  ;;  %v5224_v0 = vshll.u32 %v12103_v60, 16  ;;  %v3727_v48 = vor.u32 %v3726_v47, %v3723_v46 }
 0x2ec   : > { %v4733_v56 = vmax.f32 %v4697_v55, 0.0  ;;  %4405 = vst.msk [vmem:[#allocation3 + $0x58] sm:$0xff] %vm538_vm4, %v4369_v33  ;;  %v3836_v4 = vpop.f32.mrf.mxu3  ;;  %v4481_v34 = vmul.u32 58255, %v13946_v41 }
 0x2ed   : > { %v3940_v29 = vadd.f32 %v3904_v61, %v3836_v4  ;;  %v13914_v24 = vor.u32 %v5656_v18, %v5653_v8  ;;  %v3906_v4 = vld [vmem:[#allocation3 + $0x88] sm:$0xff]  ;;  %v4552_v61 = vmul.u32 18, %v4516_v3 }
 0x2ee   : > { %v4841_v11 = vsel %vm4621_vm14, %v4733_v56, 0.0  ;;  %v5340_v1 = vpop.f32.mrf.mxu1 }
 0x2ef   : > { %v4881_v35 = vpack.c.bf16 %v4841_v11, %v4841_v11  ;;  %v4262_v28 = vpop.f32.mrf.mxu0  ;;  %3976 = vst.msk [vmem:[#allocation3 + $0x78] sm:$0xff] %vm538_vm4, %v3940_v29  ;;  %v5658_v62 = vsel %vm3558_vm8, %v13857_v10, %v13914_v24  ;;  %v4551_v10 = vmul.u32 18, %v4515_v37  ;;  %v4517_v37 = vshra.s32 %v4481_v34, 20 }
 0x2f0   : > { %v4370_v58 = vadd.f32 %v4334_v38, %v4262_v28  ;;  %11188 = vmatmul.msk.bf16.gmra.mxu2 %vm538_vm4, %v5658_v62  ;;  %v4336_v28 = vld [vmem:[#allocation3 + $0x70] sm:$0xff]  ;;  %v3728_v38 = vsel %vm3558_vm8, %v13905_v2, %v3727_v48  ;;  %v4588_v62 = vsub.s32 %v13927_v5, %v4552_v61  ;;  %v13974_v2 = vadd.s32 120, %v13577_v57 }
 0x2f1   : > { %4917 = vst.msk [vmem:[#allocation2 + $0x34] sm:$0xf] %vm4867_vm10, %v4881_v35  ;;  %10930 = vmatmul.msk.bf16.gmra.mxu3 %vm380_vm1, %v3719_v23  ;;  %v4587_v39 = vsub.s32 %v13895_v25, %v4551_v10  ;;  %v5221_v25 = vshrl.u32 %v12103_v60, 16  ;;  %v4161_v23 = vsel %vm4128_vm9, %v4158_v54, %v4160_v51  ;;  %v12123_v60 = vld [vmem:[#allocation2] sm:$0xf0] }
 0x2f2   : > { %4406 = vst.msk [vmem:[#allocation3 + $0x60] sm:$0xff] %vm538_vm4, %v4370_v58  ;;  %11018 = vmatmul.msk.bf16.gmra.mxu0 %vm380_vm1, %v4159_v63  ;;  %vm4624_vm6 = vcmp.lt.s32.totalorder %v4588_v62, 16  ;;  %v4482_v10 = vmul.u32 58255, %v13974_v2 }
 0x2f3   : > { %v4658_v21 = vld [vmem:[#allocation3 + $0x58] sm:$0xff]  ;;  %vm4623_vm0 = vcmp.lt.s32.totalorder %v4587_v39, 16  ;;  %v5223_v15 = vrot.slane %v5221_v25, 1  ;;  %v5233_v25 = vshll.u32 %v12104_v16, 16 }
 0x2f4   : > { %v4698_v59 = vadd.f32 %v13634_v53, %v4658_v21  ;;  %5414 = vst.msk [vmem:[#allocation3 + $0x58] sm:$0xff] %vm538_vm4, %v5340_v1  ;;  %v3839_v52 = vpop.f32.mrf.mxu3  ;;  %v5226_v1 = vrot.slane %v5224_v0, 2  ;;  %v3907_v21 = vld [vmem:[#allocation3 + $0x90] sm:$0xff] }
 0x2f5   : > { %v3941_v9 = vadd.f32 %v3905_v12, %v3839_v52 }
 0x2f6   : > { %v4734_v22 = vmax.f32 %v4698_v59, 0.0  ;;  %v5343_v27 = vpop.f32.mrf.mxu1  ;;  %v13979_v36 = vor.u32 %v5226_v1, %v5223_v15  ;;  %v4982_v1 = vld [vmem:[%s12357_s10 + $0x98] sm:$0x3] }
 0x2f7   : > { %v4264_v42 = vpop.f32.mrf.mxu0  ;;  %3977 = vst.msk [vmem:[#allocation3 + $0x80] sm:$0xff] %vm538_vm4, %v3941_v9  ;;  %v4337_v9 = vld [vmem:[#allocation3 + $0x78] sm:$0xff] }
 0x2f8   : > { %v4842_v33 = vsel %vm4622_vm15, %v4734_v22, 0.0  ;;  %v4371_v40 = vadd.f32 %v4335_v44, %v4264_v42  ;;  %v12111_v45 = vld [vmem:[#allocation2 + $0x30] sm:$0xff]  ;;  %v5228_v12 = vsel %vm2123_vm5, %v13932_v19, %v13979_v36  ;;  %v4518_v19 = vshra.s32 %v4482_v10, 20  ;;  %v3909_v10 = vld [vmem:[#allocation3 + $0xa0] sm:$0xff] }
 0x2f9   : > { %v4882_v50 = vpack.c.bf16 %v4842_v33, %v4842_v33  ;;  %v4659_v30 = vld [vmem:[#allocation3 + $0x60] sm:$0xff]  ;;  %11108 = vmatmul.msk.bf16.gmra.mxu1 %vm380_vm1, %v5219_v31  ;;  %v5660_v13 = vshrl.u32 %v12111_v45, 16  ;;  %v5663_v55 = vshll.u32 %v12111_v45, 16  ;;  %v13993_v31 = vadd.s32 128, %v13577_v57  ;;  %v14003_v45 = vld [vmem:[%s15553_s2] ss:$0 sm:$0xff] }
 0x2fa   : > { %v4699_v14 = vadd.f32 %v13634_v53, %v4659_v30  ;;  %5415 = vst.msk [vmem:[#allocation3 + $0x60] sm:$0xff] %vm538_vm4, %v5343_v27  ;;  %v13990_v27 = vld [vmem:[%s12357_s10 + $0x98] sm:$0xff]  ;;  %v13998_v33 = vld [vmem:[#allocation2 + $0x8] sm:$0xff]  ;;  %vm6604_vm15 = vsmask.f32 4352 }
 0x2fb   : > { %4918 = vst.msk [vmem:[#allocation2 + $0x38] sm:$0xf] %vm4867_vm10, %v4882_v50  ;;  %v5662_v56 = vrot.slane %v5660_v13, 2  ;;  %v5665_v8 = vrot.slane %v5663_v55, 3  ;;  %v4483_v13 = vmul.u32 58255, %v13993_v31 }
 0x2fc   : > { %v4735_v49 = vmax.f32 %v4699_v14, 0.0  ;;  %4407 = vst.msk [vmem:[#allocation3 + $0x68] sm:$0xff] %vm538_vm4, %v4371_v40  ;;  %v3841_v18 = vpop.f32.mrf.mxu3  ;;  %v5230_v40 = vshrl.u32 %v12104_v16, 16  ;;  %v4162_v14 = vrot.slane %v13990_v27, 3 }
 0x2fd   : > { %v3942_v6 = vadd.f32 %v3906_v4, %v3841_v18  ;;  %v13957_v29 = vor.u32 %v5665_v8, %v5662_v56  ;;  %v4554_v56 = vmul.u32 18, %v4518_v19  ;;  %v6173_v18 = vrot.slane %v13998_v33, 3  ;;  %v3911_v33 = vld [vmem:[#allocation3 + $0xb0] sm:$0xff] }
 0x2fe   : > { %v4843_v63 = vsel %vm4623_vm0, %v4735_v49, 0.0  ;;  %v5345_v11 = vpop.f32.mrf.mxu1  ;;  %v3908_v49 = vld [vmem:[#allocation3 + $0x98] sm:$0xff]  ;;  %v5232_v4 = vrot.slane %v5230_v40, 1  ;;  %v14051_v40 = vld [vmem:[#allocation2 + $0x10] sm:$0xff] }
 0x2ff   : > { %v4883_v32 = vpack.c.bf16 %v4843_v63, %v4843_v63  ;;  %v4267_v35 = vpop.f32.mrf.mxu0  ;;  %3978 = vst.msk [vmem:[#allocation3 + $0x88] sm:$0xff] %vm538_vm4, %v3942_v6  ;;  %v5667_v58 = vsel %vm3558_vm8, %v13914_v24, %v13957_v29  ;;  %v4553_v24 = vmul.u32 18, %v4517_v37  ;;  %v4590_v62 = vsub.s32 %v13974_v2, %v4554_v56 }
 0x300   : > { %v4372_v7 = vadd.f32 %v4336_v28, %v4267_v35  ;;  %11189 = vmatmul.msk.bf16.gmra.mxu2 %vm538_vm4, %v5667_v58  ;;  %v4338_v28 = vld [vmem:[#allocation3 + $0x80] sm:$0xff]  ;;  %v4033_v58 = vld [vmem:[%s12357_s10 + $0xa0] sm:$0x7] }
 0x301   : > { %4919 = vst.msk [vmem:[#allocation2 + $0x3c] sm:$0xf] %vm4867_vm10, %v4883_v32  ;;  %10931 = vmatmul.msk.bf16.gmra.mxu3 %vm380_vm1, %v3728_v38  ;;  %v4163_v38 = vsel %vm4128_vm9, %v4160_v51, %v4162_v14  ;;  %v14032_v51 = vadd.s32 136, %v13577_v57  ;;  %vm4626_vm12 = vcmp.lt.s32.totalorder %v4590_v62, 16 }
 0x302   : > { %4408 = vst.msk [vmem:[#allocation3 + $0x70] sm:$0xff] %vm538_vm4, %v4372_v7  ;;  %11019 = vmatmul.msk.bf16.gmra.mxu0 %vm380_vm1, %v4161_v23  ;;  %v4519_v23 = vshra.s32 %v4483_v13, 20 }
 0x303   : > { %v4660_v54 = vld [vmem:[#allocation3 + $0x68] sm:$0xff]  ;;  %v4484_v16 = vmul.u32 58255, %v14032_v51 }
 0x304   : > { %v4700_v26 = vadd.f32 %v13634_v53, %v4660_v54  ;;  %5416 = vst.msk [vmem:[#allocation3 + $0x68] sm:$0xff] %vm538_vm4, %v5345_v11  ;;  %v3844_v5 = vpop.f32.mrf.mxu3  ;;  %v4589_v53 = vsub.s32 %v13946_v41, %v4553_v24  ;;  %v11205_v41 = vor.u32 %v12123_v60, %v11204_v17  ;;  %v5235_v11 = vrot.slane %v5233_v25, 2  ;;  %v11294_v25 = vld [vmem:[#allocation2] sm:$0x8] }
 0x305   : > { %v3943_v59 = vadd.f32 %v3907_v21, %v3844_v5  ;;  %v5057_v54 = vunpack.c.l.b16 %v4982_v1  ;;  %v4555_v2 = vmul.u32 18, %v4519_v23 }
 0x306   : > { %v4736_v20 = vmax.f32 %v4700_v26, 0.0  ;;  %v5348_v52 = vpop.f32.mrf.mxu1  ;;  %vm4625_vm11 = vcmp.lt.s32.totalorder %v4589_v53, 16  ;;  %v6172_v8 = vrot.slane %v11205_v41, 3  ;;  %v4108_v26 = vunpack.c.l.b16 %v4033_v58 }
 0x307   : > { %v4269_v22 = vpop.f32.mrf.mxu0  ;;  %3979 = vst.msk [vmem:[#allocation3 + $0x90] sm:$0xff] %vm538_vm4, %v3943_v59  ;;  %v4591_v60 = vsub.s32 %v13993_v31, %v4555_v2  ;;  %v4520_v41 = vshra.s32 %v4484_v16, 20 }
 0x308   : > { %v4844_v39 = vsel %vm4624_vm6, %v4736_v20, 0.0  ;;  %v4373_v42 = vadd.f32 %v4337_v9, %v4269_v22  ;;  %v12112_v44 = vld [vmem:[#allocation2 + $0x38] sm:$0xff]  ;;  %v6174_v43 = vsel %vm4128_vm9, %v6172_v8, %v6173_v18  ;;  %v5076_v20 = vpack.c.b16 %v5057_v54, %v5057_v54  ;;  %v4339_v22 = vld [vmem:[#allocation3 + $0x88] sm:$0xff] }
 0x309   : > { %v4884_v46 = vpack.c.bf16 %v4844_v39, %v4844_v39  ;;  %v4661_v47 = vld [vmem:[#allocation3 + $0x70] sm:$0xff]  ;;  %11109 = vmatmul.msk.bf16.gmra.mxu1 %vm380_vm1, %v5228_v12  ;;  %v5669_v30 = vshrl.u32 %v12112_v44, 16  ;;  %v5672_v3 = vshll.u32 %v12112_v44, 16  ;;  %v4127_v9 = vpack.c.b16 %v4108_v26, %v4108_v26  ;;  %v3910_v8 = vld [vmem:[#allocation3 + $0xa8] sm:$0xff] }
 0x30a   : > { %v4701_v50 = vadd.f32 %v14003_v45, %v4661_v47  ;;  %5417 = vst.msk [vmem:[#allocation3 + $0x70] sm:$0xff] %vm538_vm4, %v5348_v52  ;;  %v14047_v39 = vadd.s32 144, %v13577_v57  ;;  %vm4627_vm13 = vcmp.lt.s32.totalorder %v4591_v60, 16 }
 0x30b   : > { %4920 = vst.msk [vmem:[#allocation2 + $0x40] sm:$0xf] %vm4867_vm10, %v4884_v46  ;;  %v5671_v0 = vrot.slane %v5669_v30, 2  ;;  %v5674_v48 = vrot.slane %v5672_v3, 3  ;;  %v5242_v3 = vshll.u32 %v5076_v20, 16  ;;  %v4164_v13 = vrot.slane %v4127_v9, 3 }
 0x30c   : > { %v4737_v55 = vmax.f32 %v4701_v50, 0.0  ;;  %4409 = vst.msk [vmem:[#allocation3 + $0x78] sm:$0xff] %vm538_vm4, %v4373_v42  ;;  %v3846_v34 = vpop.f32.mrf.mxu3 }
 0x30d   : > { %v3944_v15 = vadd.f32 %v3908_v49, %v3846_v34  ;;  %v14012_v6 = vor.u32 %v5674_v48, %v5671_v0  ;;  %v12141_v49 = vld [vmem:[#allocation2] sm:$0xf0] }
 0x30e   : > { %v4845_v61 = vsel %vm4625_vm11, %v4737_v55, 0.0  ;;  %v5350_v63 = vpop.f32.mrf.mxu1  ;;  %v4485_v55 = vmul.u32 58255, %v14047_v39  ;;  %v4340_v23 = vld [vmem:[#allocation3 + $0x90] sm:$0xff]  ;;  %v11295_v58 = vor.u32 %v12141_v49, %v11294_v25 }
 0x30f   : > { %v4885_v32 = vpack.c.bf16 %v4845_v61, %v4845_v61  ;;  %v4272_v35 = vpop.f32.mrf.mxu0  ;;  %3980 = vst.msk [vmem:[#allocation3 + $0x98] sm:$0xff] %vm538_vm4, %v3944_v15  ;;  %v5676_v7 = vsel %vm3558_vm8, %v13957_v29, %v14012_v6  ;;  %v14037_v29 = vor.u32 %v5235_v11, %v5232_v4  ;;  %v4556_v4 = vmul.u32 18, %v4520_v41 }
 0x310   : > { %v4374_v37 = vadd.f32 %v4338_v28, %v4272_v35  ;;  %11190 = vmatmul.msk.bf16.gmra.mxu2 %vm538_vm4, %v5676_v7  ;;  %v6175_v61 = vrot.slane %v14051_v40, 3  ;;  %v5244_v35 = vrot.slane %v5242_v3, 2  ;;  %v4521_v7 = vshra.s32 %v4485_v55, 20 }
 0x311   : > { %4921 = vst.msk [vmem:[#allocation2 + $0x44] sm:$0xf] %vm4867_vm10, %v4885_v32  ;;  %11274 = vmatmul.msk.bf16.vlgmr.msrb.gmra.mxu3 %vm538_vm4, %v6174_v43  ;;  %v5237_v17 = vsel %vm2123_vm5, %v13979_v36, %v14037_v29  ;;  %v5239_v36 = vshrl.u32 %v5076_v20, 16  ;;  %v4592_v54 = vsub.s32 %v14032_v51, %v4556_v4  ;;  %v6606_v26 = vshrl.u32 %v11295_v58, 16 }
 0x312   : > { %4410 = vst.msk [vmem:[#allocation3 + $0x80] sm:$0xff] %vm538_vm4, %v4374_v37  ;;  %11020 = vmatmul.msk.bf16.gmra.mxu0 %vm380_vm1, %v4163_v38  ;;  %v4165_v37 = vsel %vm4128_vm9, %v4162_v14, %v4164_v13  ;;  %v6176_v27 = vsel %vm4128_vm9, %v6173_v18, %v6175_v61  ;;  %v14077_v14 = vadd.s32 152, %v13577_v57  ;;  %v4557_v2 = vmul.u32 18, %v4521_v7  ;;  %v11384_v18 = vld [vmem:[#allocation2 + $0x8] sm:$0x8] }
 0x313   : > { %v4662_v24 = vld [vmem:[#allocation3 + $0x78] sm:$0xff]  ;;  %v5241_v15 = vrot.slane %v5239_v36, 1  ;;  %vm4628_vm14 = vcmp.lt.s32.totalorder %v4592_v54, 16 }
 0x314   : > { %v4702_v5 = vadd.f32 %v14003_v45, %v4662_v24  ;;  %5418 = vst.msk [vmem:[#allocation3 + $0x78] sm:$0xff] %vm538_vm4, %v5350_v63  ;;  %v3849_v21 = vpop.f32.mrf.mxu3  ;;  %v12142_v24 = vld [vmem:[#allocation2 + $0x8] sm:$0xff]  ;;  %v4486_v16 = vmul.u32 58255, %v14077_v14 }
 0x315   : > { %v3945_v52 = vadd.f32 %v3909_v10, %v3849_v21  ;;  %v6614_v20 = vshrl.u32 %v12142_v24, 16 }
 0x316   : > { %v4738_v59 = vmax.f32 %v4702_v5, 0.0  ;;  %v5353_v12 = vpop.f32.mrf.mxu1  ;;  %v6609_v5 = vshll.u32 %v11295_v58, 16 }
 0x317   : > { %v4274_v53 = vpop.f32.mrf.mxu0  ;;  %3981 = vst.msk [vmem:[#allocation3 + $0xa0] sm:$0xff] %vm538_vm4, %v3945_v52  ;;  %v12159_v52 = vld [vmem:[#allocation2 + $0x8] sm:$0xf0]  ;;  %v6616_v25 = vrot.slane %v6614_v20, 3 }
 0x318   : > { %v4846_v42 = vsel %vm4626_vm12, %v4738_v59, 0.0  ;;  %v4375_v44 = vadd.f32 %v4339_v22, %v4274_v53  ;;  %v12113_v46 = vld [vmem:[#allocation2 + $0x40] sm:$0xff]  ;;  %v6617_v59 = vshll.u32 %v12142_v24, 16  ;;  %v4593_v22 = vsub.s32 %v14047_v39, %v4557_v2  ;;  %v14094_v39 = vld [vmem:[#allocation2 + $0x18] sm:$0xff] }
 0x319   : > { %v4886_v47 = vpack.c.bf16 %v4846_v42, %v4846_v42  ;;  %v4663_v19 = vld [vmem:[#allocation3 + $0x80] sm:$0xff]  ;;  %11110 = vmatmul.msk.bf16.gmra.mxu1 %vm380_vm1, %v5237_v17  ;;  %v5678_v50 = vshrl.u32 %v12113_v46, 16  ;;  %v5681_v30 = vshll.u32 %v12113_v46, 16  ;;  %v4341_v42 = vld [vmem:[#allocation3 + $0x98] sm:$0xff]  ;;  %v6611_v46 = vrot.slane %v6609_v5, 4 }
 0x31a   : > { %v4703_v31 = vadd.f32 %v14003_v45, %v4663_v19  ;;  %5419 = vst.msk [vmem:[#allocation3 + $0x80] sm:$0xff] %vm538_vm4, %v5353_v12  ;;  %v12160_v19 = vld [vmem:[#allocation2 + $0x10] sm:$0xff]  ;;  %v6619_v13 = vrot.slane %v6617_v59, 4  ;;  %vm4629_vm0 = vcmp.lt.s32.totalorder %v4593_v22, 16 }
 0x31b   : > { %4922 = vst.msk [vmem:[#allocation2 + $0x48] sm:$0xf] %vm4867_vm10, %v4886_v47  ;;  %v5680_v48 = vrot.slane %v5678_v50, 2  ;;  %v5683_v34 = vrot.slane %v5681_v30, 3  ;;  %v14089_v47 = vadd.s32 160, %v13577_v57  ;;  %v11385_v50 = vor.u32 %v12159_v52, %v11384_v18 }
 0x31c   : > { %v4739_v0 = vmax.f32 %v4703_v31, 0.0  ;;  %4411 = vst.msk [vmem:[#allocation3 + $0x88] sm:$0xff] %vm538_vm4, %v4375_v44  ;;  %v3851_v56 = vpop.f32.mrf.mxu3  ;;  %v6608_v44 = vrot.slane %v6606_v26, 3 }
 0x31d   : > { %v3946_v11 = vadd.f32 %v3910_v8, %v3851_v56  ;;  %v14059_v32 = vor.u32 %v5683_v34, %v5680_v48  ;;  %v4487_v49 = vmul.u32 58255, %v14089_v47  ;;  %v7179_v56 = vshrl.u32 %v12160_v19, 16 }
 0x31e   : > { %v4847_v63 = vsel %vm4627_vm13, %v4739_v0, 0.0  ;;  %v5355_v1 = vpop.f32.mrf.mxu1  ;;  %v6612_v34 = vor.u32 %v6611_v46, %v6608_v44  ;;  %v4342_v24 = vld [vmem:[#allocation3 + $0xa0] sm:$0xff] }
 0x31f   : > { %v4887_v28 = vpack.c.bf16 %v4847_v63, %v4847_v63  ;;  %v4277_v38 = vpop.f32.mrf.mxu0  ;;  %3982 = vst.msk [vmem:[#allocation3 + $0xa8] sm:$0xff] %vm538_vm4, %v3946_v11  ;;  %v5685_v43 = vsel %vm3558_vm8, %v14012_v6, %v14059_v32  ;;  %v5245_v6 = vor.u32 %v5244_v35, %v5241_v15  ;;  %v7182_v63 = vshll.u32 %v12160_v19, 16 }
 0x320   : > { %v4376_v62 = vadd.f32 %v4340_v23, %v4277_v38  ;;  %11191 = vmatmul.msk.bf16.gmra.mxu2 %vm538_vm4, %v5685_v43  ;;  %v14102_v38 = vor.u32 %v6619_v13, %v6616_v25  ;;  %v7171_v23 = vshrl.u32 %v11385_v50, 16  ;;  %v7174_v43 = vshll.u32 %v11385_v50, 16 }
 0x321   : > { %4923 = vst.msk [vmem:[#allocation2 + $0x4c] sm:$0xf] %vm4867_vm10, %v4887_v28  ;;  %11275 = vmatmul.msk.bf16.gmra.mxu3 %vm538_vm4, %v6176_v27  ;;  %v5246_v53 = vsel %vm2123_vm5, %v14037_v29, %v5245_v6  ;;  %v4522_v29 = vshra.s32 %v4486_v16, 20  ;;  %v6177_v28 = vrot.slane %v14094_v39, 3  ;;  %v4523_v6 = vshra.s32 %v4487_v49, 20  ;;  %v5441_v39 = vld [vmem:[#allocation3 + $0x10] sm:$0xff] }
 0x322   : > { %4412 = vst.msk [vmem:[#allocation3 + $0x90] sm:$0xff] %vm538_vm4, %v4376_v62  ;;  %11021 = vmatmul.msk.bf16.gmra.mxu0 %vm380_vm1, %v4165_v37  ;;  %v7181_v26 = vrot.slane %v7179_v56, 3  ;;  %v7184_v5 = vrot.slane %v7182_v63, 4  ;;  %v7176_v16 = vrot.slane %v7174_v43, 4 }
 0x323   : > { %v4664_v51 = vld [vmem:[#allocation3 + $0x88] sm:$0xff]  ;;  %v4558_v35 = vmul.u32 18, %v4522_v29  ;;  %v6178_v18 = vsel %vm4128_vm9, %v6175_v61, %v6177_v28  ;;  %v4559_v59 = vmul.u32 18, %v4523_v6  ;;  %v5439_v61 = vld [vmem:[#allocation3] sm:$0xff] }
 0x324   : > { %v4704_v21 = vadd.f32 %v14003_v45, %v4664_v51  ;;  %5420 = vst.msk [vmem:[#allocation3 + $0x88] sm:$0xff] %vm538_vm4, %v5355_v1  ;;  %v3854_v10 = vpop.f32.mrf.mxu3  ;;  %v3912_v1 = vld [vmem:[#allocation3 + $0xb8] sm:$0xff] }
 0x325   : > { %v3947_v17 = vadd.f32 %v3911_v33, %v3854_v10  ;;  %v4594_v33 = vsub.s32 %v14077_v14, %v4558_v35  ;;  %v6621_v10 = vsel %vm6604_vm15, %v6612_v34, %v14102_v38  ;;  %v7173_v14 = vrot.slane %v7171_v23, 3  ;;  %v14141_v34 = vld [vmem:[#allocation2 + $0x20] sm:$0xff]  ;;  %v5440_v35 = vld [vmem:[#allocation3 + $0x8] sm:$0xff] }
 0x326   : > { %v4740_v12 = vmax.f32 %v4704_v21, 0.0  ;;  %v5358_v60 = vpop.f32.mrf.mxu1  ;;  %v12143_v21 = vld [vmem:[#allocation2 + $0x10] sm:$0xff]  ;;  %v6179_v6 = vrot.slane %v14141_v34, 3  ;;  %v5443_v34 = vld [vmem:[#allocation3 + $0x20] sm:$0xff] }
 0x327   : > { %v4279_v9 = vpop.f32.mrf.mxu0  ;;  %3983 = vst.msk [vmem:[#allocation3 + $0xb0] sm:$0xff] %vm538_vm4, %v3947_v17  ;;  %v6623_v17 = vshrl.u32 %v12143_v21, 16  ;;  %v4343_v50 = vld [vmem:[#allocation3 + $0xa8] sm:$0xff] }
 0x328   : > { %v4848_v41 = vsel %vm4628_vm14, %v4740_v12, 0.0  ;;  %v4377_v36 = vadd.f32 %v4341_v42, %v4279_v9  ;;  %v12114_v31 = vld [vmem:[#allocation2 + $0x48] sm:$0xff]  ;;  %v14128_v12 = vor.u32 %v7184_v5, %v7181_v26  ;;  %v6626_v42 = vshll.u32 %v12143_v21, 16 }
 0x329   : > { %v4888_v30 = vpack.c.bf16 %v4848_v41, %v4848_v41  ;;  %v4665_v3 = vld [vmem:[#allocation3 + $0x90] sm:$0xff]  ;;  %11111 = vmatmul.msk.bf16.gmra.mxu1 %vm380_vm1, %v5246_v53  ;;  %v5687_v0 = vshrl.u32 %v12114_v31, 16  ;;  %v5690_v48 = vshll.u32 %v12114_v31, 16  ;;  %vm4630_vm1 = vcmp.lt.s32.totalorder %v4594_v33, 16  ;;  %v3913_v53 = vld [vmem:[#allocation3 + $0xc0] sm:$0xff] }
 0x32a   : > { %v4705_v55 = vadd.f32 %v14003_v45, %v4665_v3  ;;  %5421 = vst.msk [vmem:[#allocation3 + $0x90] sm:$0xff] %vm538_vm4, %v5358_v60  ;;  %v7177_v41 = vor.u32 %v7176_v16, %v7173_v14  ;;  %v12161_v3 = vld [vmem:[#allocation2 + $0x18] sm:$0xff]  ;;  %v6625_v49 = vrot.slane %v6623_v17, 3  ;;  %v6628_v56 = vrot.slane %v6626_v42, 4 }
 0x32b   : > { %4924 = vst.msk [vmem:[#allocation2 + $0x50] sm:$0xf] %vm4867_vm10, %v4888_v30  ;;  %v5689_v4 = vrot.slane %v5687_v0, 2  ;;  %v5692_v15 = vrot.slane %v5690_v48, 3  ;;  %v14134_v30 = vadd.s32 176, %v13577_v57  ;;  %v6180_v17 = vsel %vm4128_vm9, %v6177_v28, %v6179_v6 }
 0x32c   : > { %v4741_v8 = vmax.f32 %v4705_v55, 0.0  ;;  %4413 = vst.msk [vmem:[#allocation3 + $0x98] sm:$0xff] %vm538_vm4, %v4377_v36  ;;  %v3856_v11 = vpop.f32.mrf.mxu3  ;;  %v4595_v36 = vsub.s32 %v14089_v47, %v4559_v59  ;;  %v7186_v13 = vsel %vm6604_vm15, %v7177_v41, %v14128_v12 }
 0x32d   : > { %v3948_v7 = vadd.f32 %v3912_v1, %v3856_v11  ;;  %v14104_v62 = vor.u32 %v5692_v15, %v5689_v4  ;;  %v4489_v63 = vmul.u32 58255, %v14134_v30  ;;  %v7188_v11 = vshrl.u32 %v12161_v3, 16 }
 0x32e   : > { %v4849_v37 = vsel %vm4629_vm0, %v4741_v8, 0.0  ;;  %v5360_v58 = vpop.f32.mrf.mxu1  ;;  %vm4631_vm6 = vcmp.lt.s32.totalorder %v4595_v36, 16 }
 0x32f   : > { %v4889_v54 = vpack.c.bf16 %v4849_v37, %v4849_v37  ;;  %v4282_v27 = vpop.f32.mrf.mxu0  ;;  %3984 = vst.msk [vmem:[#allocation3 + $0xb8] sm:$0xff] %vm538_vm4, %v3948_v7  ;;  %v5694_v2 = vsel %vm3558_vm8, %v14059_v32, %v14104_v62  ;;  %v14121_v32 = vadd.s32 168, %v13577_v57  ;;  %v4525_v14 = vshra.s32 %v4489_v63, 20 }
 0x330   : > { %v4378_v51 = vadd.f32 %v4342_v24, %v4282_v27  ;;  %11192 = vmatmul.msk.bf16.gmra.mxu2 %vm538_vm4, %v5694_v2  ;;  %v7190_v59 = vrot.slane %v7188_v11, 3 }
 0x331   : > { %4925 = vst.msk [vmem:[#allocation2 + $0x54] sm:$0xf] %vm4867_vm10, %v4889_v54  ;;  %11276 = vmatmul.msk.bf16.gmra.mxu3 %vm538_vm4, %v6178_v18  ;;  %v4488_v9 = vmul.u32 58255, %v14121_v32  ;;  %v3914_v54 = vld [vmem:[#allocation3 + $0xc8] sm:$0xff] }
 0x332   : > { %4414 = vst.msk [vmem:[#allocation3 + $0xa0] sm:$0xff] %vm538_vm4, %v4378_v51  ;;  %11364 = vmatmul.msk.bf16.vlgmr.msrb.gmra.mxu0 %vm538_vm4, %v6621_v10  ;;  %v14149_v51 = vor.u32 %v6628_v56, %v6625_v49  ;;  %v4344_v10 = vld [vmem:[#allocation3 + $0xb0] sm:$0xff] }
 0x333   : > { %v4666_v20 = vld [vmem:[#allocation3 + $0x98] sm:$0xff]  ;;  %v5843_v52 = vpop.f32.mrf.mxu2  ;;  %v4524_v47 = vshra.s32 %v4488_v9, 20 }
 0x334   : > { %v4706_v40 = vadd.f32 %v14003_v45, %v4666_v20  ;;  %5422 = vst.msk [vmem:[#allocation3 + $0x98] sm:$0xff] %vm538_vm4, %v5360_v58  ;;  %v3859_v60 = vpop.f32.mrf.mxu3  ;;  %v5933_v22 = vadd.f32 %v5843_v52, %v5439_v61  ;;  %v7191_v58 = vshll.u32 %v12161_v3, 16  ;;  %v12144_v61 = vld [vmem:[#allocation2 + $0x18] sm:$0xff] }
 0x335   : > { %v3949_v46 = vadd.f32 %v3913_v53, %v3859_v60  ;;  %v4560_v24 = vmul.u32 18, %v4524_v47  ;;  %v6630_v60 = vsel %vm6604_vm15, %v14102_v38, %v14149_v51  ;;  %v4561_v53 = vmul.u32 18, %v4525_v14 }
 0x336   : > { %v4742_v44 = vmax.f32 %v4706_v40, 0.0  ;;  %v5363_v19 = vpop.f32.mrf.mxu1  ;;  %5969 = vst.msk [vmem:[#allocation3] sm:$0xff] %vm538_vm4, %v5933_v22  ;;  %v7193_v40 = vrot.slane %v7191_v58, 4  ;;  %v6632_v38 = vshrl.u32 %v12144_v61, 16  ;;  %v6635_v41 = vshll.u32 %v12144_v61, 16 }
 0x337   : > { %v4284_v31 = vpop.f32.mrf.mxu0  ;;  %3985 = vst.msk [vmem:[#allocation3 + $0xc0] sm:$0xff] %vm538_vm4, %v3949_v46  ;;  %v4596_v52 = vsub.s32 %v14121_v32, %v4560_v24  ;;  %v4597_v3 = vsub.s32 %v14134_v30, %v4561_v53 }
 0x338   : > { %v4850_v29 = vsel %vm4630_vm1, %v4742_v44, 0.0  ;;  %v4379_v25 = vadd.f32 %v4343_v50, %v4284_v31  ;;  %v12115_v55 = vld [vmem:[#allocation2 + $0x50] sm:$0xff]  ;;  %v14178_v9 = vor.u32 %v7193_v40, %v7190_v59  ;;  %v3915_v44 = vld [vmem:[#allocation3 + $0xd0] sm:$0xff]  ;;  %v6637_v63 = vrot.slane %v6635_v41, 4  ;;  %v3917_v41 = vld [vmem:[#allocation3 + $0xe0] sm:$0xff] }
 0x339   : > { %v4890_v0 = vpack.c.bf16 %v4850_v29, %v4850_v29  ;;  %v4667_v48 = vld [vmem:[#allocation3 + $0xa0] sm:$0xff]  ;;  %11454 = vmatmul.msk.bf16.vlgmr.msrb.gmra.mxu1 %vm538_vm4, %v7186_v13  ;;  %v5696_v4 = vshrl.u32 %v12115_v55, 16  ;;  %v5699_v15 = vshll.u32 %v12115_v55, 16  ;;  %vm4632_vm11 = vcmp.lt.s32.totalorder %v4596_v52, 16  ;;  %v12162_v55 = vld [vmem:[#allocation2 + $0x20] sm:$0xff] }
 0x33a   : > { %v4707_v8 = vadd.f32 %v14003_v45, %v4667_v48  ;;  %5423 = vst.msk [vmem:[#allocation3 + $0xa0] sm:$0xff] %vm538_vm4, %v5363_v19  ;;  %v14184_v13 = vadd.s32 192, %v13577_v57  ;;  %v7195_v47 = vsel %vm6604_vm15, %v14128_v12, %v14178_v9  ;;  %vm4633_vm12 = vcmp.lt.s32.totalorder %v4597_v3, 16 }
 0x33b   : > { %4926 = vst.msk [vmem:[#allocation2 + $0x58] sm:$0xf] %vm4867_vm10, %v4890_v0  ;;  %v5845_v23 = vpop.f32.mrf.mxu2  ;;  %v5698_v37 = vrot.slane %v5696_v4, 2  ;;  %v5701_v7 = vrot.slane %v5699_v15, 3  ;;  %v14191_v4 = vld [vmem:[#allocation2 + $0x28] sm:$0xff]  ;;  %v6634_v15 = vrot.slane %v6632_v38, 3 }
 0x33c   : > { %v4743_v1 = vmax.f32 %v4707_v8, 0.0  ;;  %4415 = vst.msk [vmem:[#allocation3 + $0xa8] sm:$0xff] %vm538_vm4, %v4379_v25  ;;  %v3861_v43 = vpop.f32.mrf.mxu3  ;;  %v5934_v27 = vadd.f32 %v5845_v23, %v5440_v35  ;;  %v4345_v25 = vld [vmem:[#allocation3 + $0xb8] sm:$0xff]  ;;  %v4491_v12 = vmul.u32 58255, %v14184_v13  ;;  %v7197_v23 = vshrl.u32 %v12162_v55, 16 }
 0x33d   : > { %v3950_v26 = vadd.f32 %v3914_v54, %v3861_v43  ;;  %v14152_v21 = vor.u32 %v5701_v7, %v5698_v37  ;;  %v5442_v7 = vld [vmem:[#allocation3 + $0x18] sm:$0xff] }
 0x33e   : > { %v4851_v2 = vsel %vm4631_vm6, %v4743_v1, 0.0  ;;  %v5365_v5 = vpop.f32.mrf.mxu1  ;;  %5970 = vst.msk [vmem:[#allocation3 + $0x8] sm:$0xff] %vm538_vm4, %v5934_v27  ;;  %v7200_v27 = vshll.u32 %v12162_v55, 16  ;;  %v4346_v61 = vld [vmem:[#allocation3 + $0xc0] sm:$0xff]  ;;  %v4527_v52 = vshra.s32 %v4491_v12, 20 }
 0x33f   : > { %v4891_v33 = vpack.c.bf16 %v4851_v2, %v4851_v2  ;;  %v4287_v18 = vpop.f32.mrf.mxu0  ;;  %3986 = vst.msk [vmem:[#allocation3 + $0xc8] sm:$0xff] %vm538_vm4, %v3950_v26  ;;  %v5703_v20 = vsel %vm3558_vm8, %v14104_v62, %v14152_v21  ;;  %v14171_v62 = vadd.s32 184, %v13577_v57  ;;  %v3916_v2 = vld [vmem:[#allocation3 + $0xd8] sm:$0xff] }
 0x340   : > { %v4380_v16 = vadd.f32 %v4344_v10, %v4287_v18  ;;  %11193 = vmatmul.msk.bf16.gmra.mxu2 %vm538_vm4, %v5703_v20  ;;  %v14199_v18 = vor.u32 %v6637_v63, %v6634_v15  ;;  %v7202_v53 = vrot.slane %v7200_v27, 4 }
 0x341   : > { %4927 = vst.msk [vmem:[#allocation2 + $0x5c] sm:$0xf] %vm4867_vm10, %v4891_v33  ;;  %11277 = vmatmul.msk.bf16.gmra.mxu3 %vm538_vm4, %v6180_v17  ;;  %v4490_v19 = vmul.u32 58255, %v14171_v62  ;;  %v6181_v33 = vrot.slane %v14191_v4, 3  ;;  %v5445_v4 = vld [vmem:[#allocation3 + $0x30] sm:$0xff] }
 0x342   : > { %4416 = vst.msk [vmem:[#allocation3 + $0xb0] sm:$0xff] %vm538_vm4, %v4380_v16  ;;  %11365 = vmatmul.msk.bf16.gmra.mxu0 %vm538_vm4, %v6630_v60  ;;  %v6639_v38 = vsel %vm6604_vm15, %v14149_v51, %v14199_v18 }
 0x343   : > { %v4668_v32 = vld [vmem:[#allocation3 + $0xa8] sm:$0xff]  ;;  %v5848_v28 = vpop.f32.mrf.mxu2  ;;  %v4526_v30 = vshra.s32 %v4490_v19, 20 }
 0x344   : > { %v4708_v22 = vadd.f32 %v14003_v45, %v4668_v32  ;;  %5424 = vst.msk [vmem:[#allocation3 + $0xa8] sm:$0xff] %vm538_vm4, %v5365_v5  ;;  %v3864_v42 = vpop.f32.mrf.mxu3  ;;  %v5935_v46 = vadd.f32 %v5848_v28, %v5441_v39  ;;  %v7199_v32 = vrot.slane %v7197_v23, 3  ;;  %v6182_v28 = vsel %vm4128_vm9, %v6179_v6, %v6181_v33 }
 0x345   : > { %v3951_v31 = vadd.f32 %v3915_v44, %v3864_v42  ;;  %v4562_v5 = vmul.u32 18, %v4526_v30  ;;  %v4563_v42 = vmul.u32 18, %v4527_v52 }
 0x346   : > { %v4744_v36 = vmax.f32 %v4708_v22, 0.0  ;;  %v5368_v50 = vpop.f32.mrf.mxu1  ;;  %5971 = vst.msk [vmem:[#allocation3 + $0x10] sm:$0xff] %vm538_vm4, %v5935_v46  ;;  %v12145_v22 = vld [vmem:[#allocation2 + $0x20] sm:$0xff]  ;;  %v14228_v46 = vor.u32 %v7202_v53, %v7199_v32 }
 0x347   : > { %v4289_v29 = vpop.f32.mrf.mxu0  ;;  %3987 = vst.msk [vmem:[#allocation3 + $0xd0] sm:$0xff] %vm538_vm4, %v3951_v31  ;;  %v4598_v39 = vsub.s32 %v14171_v62, %v4562_v5  ;;  %v6641_v51 = vshrl.u32 %v12145_v22, 16  ;;  %v4599_v55 = vsub.s32 %v14184_v13, %v4563_v42 }
 0x348   : > { %v4852_v0 = vsel %vm4632_vm11, %v4744_v36, 0.0  ;;  %v4381_v48 = vadd.f32 %v4345_v25, %v4289_v29  ;;  %v12116_v49 = vld [vmem:[#allocation2 + $0x58] sm:$0xff]  ;;  %v7204_v30 = vsel %vm6604_vm15, %v14178_v9, %v14228_v46 }
 0x349   : > { %v4892_v56 = vpack.c.bf16 %v4852_v0, %v4852_v0  ;;  %v4669_v8 = vld [vmem:[#allocation3 + $0xb0] sm:$0xff]  ;;  %11455 = vmatmul.msk.bf16.gmra.mxu1 %vm538_vm4, %v7195_v47  ;;  %v5705_v1 = vshrl.u32 %v12116_v49, 16  ;;  %v5708_v35 = vshll.u32 %v12116_v49, 16  ;;  %vm4634_vm13 = vcmp.lt.s32.totalorder %v4598_v39, 16  ;;  %v12163_v49 = vld [vmem:[#allocation2 + $0x28] sm:$0xff] }
 0x34a   : > { %v4709_v11 = vadd.f32 %v14003_v45, %v4669_v8  ;;  %5425 = vst.msk [vmem:[#allocation3 + $0xb0] sm:$0xff] %vm538_vm4, %v5368_v50  ;;  %v6644_v50 = vshll.u32 %v12145_v22, 16  ;;  %v14234_v47 = vadd.s32 208, %v13577_v57  ;;  %vm4635_vm14 = vcmp.lt.s32.totalorder %v4599_v55, 16 }
 0x34b   : > { %4928 = vst.msk [vmem:[#allocation2 + $0x60] sm:$0xf] %vm4867_vm10, %v4892_v56  ;;  %v5850_v58 = vpop.f32.mrf.mxu2  ;;  %v5707_v43 = vrot.slane %v5705_v1, 2  ;;  %v5710_v54 = vrot.slane %v5708_v35, 3  ;;  %v14241_v1 = vld [vmem:[#allocation2 + $0x30] sm:$0xff]  ;;  %v6643_v35 = vrot.slane %v6641_v51, 3 }
 0x34c   : > { %v4745_v37 = vmax.f32 %v4709_v11, 0.0  ;;  %4417 = vst.msk [vmem:[#allocation3 + $0xb8] sm:$0xff] %vm538_vm4, %v4381_v48  ;;  %v3866_v24 = vpop.f32.mrf.mxu3  ;;  %v5936_v26 = vadd.f32 %v5850_v58, %v5442_v7  ;;  %v4347_v48 = vld [vmem:[#allocation3 + $0xc8] sm:$0xff]  ;;  %v6646_v12 = vrot.slane %v6644_v50, 4  ;;  %v4493_v9 = vmul.u32 58255, %v14234_v47  ;;  %v3919_v50 = vld [vmem:[#allocation3 + $0xf0] sm:$0xff] }
 0x34d   : > { %v3952_v14 = vadd.f32 %v3916_v2, %v3866_v24  ;;  %v14202_v20 = vor.u32 %v5710_v54, %v5707_v43  ;;  %v7206_v58 = vshrl.u32 %v12163_v49, 16  ;;  %v5444_v54 = vld [vmem:[#allocation3 + $0x28] sm:$0xff] }
 0x34e   : > { %v4853_v10 = vsel %vm4633_vm12, %v4745_v37, 0.0  ;;  %v5370_v16 = vpop.f32.mrf.mxu1  ;;  %5972 = vst.msk [vmem:[#allocation3 + $0x18] sm:$0xff] %vm538_vm4, %v5936_v26  ;;  %v7209_v26 = vshll.u32 %v12163_v49, 16  ;;  %v4348_v22 = vld [vmem:[#allocation3 + $0xd0] sm:$0xff]  ;;  %v4529_v39 = vshra.s32 %v4493_v9, 20 }
 0x34f   : > { %v4893_v59 = vpack.c.bf16 %v4853_v10, %v4853_v10  ;;  %v4292_v40 = vpop.f32.mrf.mxu0  ;;  %3988 = vst.msk [vmem:[#allocation3 + $0xd8] sm:$0xff] %vm538_vm4, %v3952_v14  ;;  %v5712_v60 = vsel %vm3558_vm8, %v14152_v21, %v14202_v20  ;;  %v14221_v21 = vadd.s32 200, %v13577_v57  ;;  %v3918_v10 = vld [vmem:[#allocation3 + $0xe8] sm:$0xff] }
 0x350   : > { %v4382_v17 = vadd.f32 %v4346_v61, %v4292_v40  ;;  %11194 = vmatmul.msk.bf16.gmra.mxu2 %vm538_vm4, %v5712_v60  ;;  %v14249_v40 = vor.u32 %v6646_v12, %v6643_v35  ;;  %v7211_v42 = vrot.slane %v7209_v26, 4 }
 0x351   : > { %4929 = vst.msk [vmem:[#allocation2 + $0x64] sm:$0xf] %vm4867_vm10, %v4893_v59  ;;  %11278 = vmatmul.msk.bf16.gmra.mxu3 %vm538_vm4, %v6182_v28  ;;  %v4492_v31 = vmul.u32 58255, %v14221_v21  ;;  %v6183_v59 = vrot.slane %v14241_v1, 3  ;;  %v14329_v1 = vld [vmem:[%s15553_s2] ss:$0 sm:$0xff] }
 0x352   : > { %4418 = vst.msk [vmem:[#allocation3 + $0xc0] sm:$0xff] %vm538_vm4, %v4382_v17  ;;  %11366 = vmatmul.msk.bf16.gmra.mxu0 %vm538_vm4, %v6639_v38  ;;  %v6648_v51 = vsel %vm6604_vm15, %v14199_v18, %v14249_v40 }
 0x353   : > { %v4670_v62 = vld [vmem:[#allocation3 + $0xb8] sm:$0xff]  ;;  %v5853_v6 = vpop.f32.mrf.mxu2  ;;  %v4528_v13 = vshra.s32 %v4492_v31, 20 }
 0x354   : > { %v4710_v44 = vadd.f32 %v14003_v45, %v4670_v62  ;;  %5426 = vst.msk [vmem:[#allocation3 + $0xb8] sm:$0xff] %vm538_vm4, %v5370_v16  ;;  %v3869_v19 = vpop.f32.mrf.mxu3  ;;  %v5937_v36 = vadd.f32 %v5853_v6, %v5443_v34  ;;  %v7208_v62 = vrot.slane %v7206_v58, 3  ;;  %v6184_v6 = vsel %vm4128_vm9, %v6181_v33, %v6183_v59 }
 0x355   : > { %v3953_v29 = vadd.f32 %v3917_v41, %v3869_v19  ;;  %v4564_v16 = vmul.u32 18, %v4528_v13  ;;  %v4565_v19 = vmul.u32 18, %v4529_v39 }
 0x356   : > { %v4746_v3 = vmax.f32 %v4710_v44, 0.0  ;;  %v5373_v25 = vpop.f32.mrf.mxu1  ;;  %5973 = vst.msk [vmem:[#allocation3 + $0x20] sm:$0xff] %vm538_vm4, %v5937_v36  ;;  %v12146_v44 = vld [vmem:[#allocation2 + $0x28] sm:$0xff]  ;;  %v14278_v36 = vor.u32 %v7211_v42, %v7208_v62 }
 0x357   : > { %v4294_v0 = vpop.f32.mrf.mxu0  ;;  %3989 = vst.msk [vmem:[#allocation3 + $0xe0] sm:$0xff] %vm538_vm4, %v3953_v29  ;;  %v4600_v34 = vsub.s32 %v14221_v21, %v4564_v16  ;;  %v6650_v18 = vshrl.u32 %v12146_v44, 16  ;;  %v4601_v49 = vsub.s32 %v14234_v47, %v4565_v19  ;;  %v12147_v19 = vld [vmem:[#allocation2 + $0x30] sm:$0xff] }
 0x358   : > { %v4854_v56 = vsel %vm4634_vm13, %v4746_v3, 0.0  ;;  %v4383_v8 = vadd.f32 %v4347_v48, %v4294_v0  ;;  %v12117_v15 = vld [vmem:[#allocation2 + $0x60] sm:$0xff]  ;;  %v7213_v13 = vsel %vm6604_vm15, %v14228_v46, %v14278_v36 }
 0x359   : > { %v4894_v63 = vpack.c.bf16 %v4854_v56, %v4854_v56  ;;  %v4671_v11 = vld [vmem:[#allocation3 + $0xc0] sm:$0xff]  ;;  %11456 = vmatmul.msk.bf16.gmra.mxu1 %vm538_vm4, %v7204_v30  ;;  %v5714_v37 = vshrl.u32 %v12117_v15, 16  ;;  %v5717_v7 = vshll.u32 %v12117_v15, 16  ;;  %vm4636_vm0 = vcmp.lt.s32.totalorder %v4600_v34, 16  ;;  %v12164_v15 = vld [vmem:[#allocation2 + $0x30] sm:$0xff] }
 0x35a   : > { %v4711_v23 = vadd.f32 %v14003_v45, %v4671_v11  ;;  %5427 = vst.msk [vmem:[#allocation3 + $0xc0] sm:$0xff] %vm538_vm4, %v5373_v25  ;;  %v6653_v25 = vshll.u32 %v12146_v44, 16  ;;  %v14284_v30 = vadd.s32 224, %v13577_v57  ;;  %vm4637_vm1 = vcmp.lt.s32.totalorder %v4601_v49, 16 }
 0x35b   : > { %4930 = vst.msk [vmem:[#allocation2 + $0x68] sm:$0xf] %vm4867_vm10, %v4894_v63  ;;  %v5855_v27 = vpop.f32.mrf.mxu2  ;;  %v5716_v24 = vrot.slane %v5714_v37, 2  ;;  %v5719_v2 = vrot.slane %v5717_v7, 3  ;;  %v14291_v37 = vld [vmem:[#allocation2 + $0x38] sm:$0xff]  ;;  %v6652_v7 = vrot.slane %v6650_v18, 3 }
 0x35c   : > { %v4747_v43 = vmax.f32 %v4711_v23, 0.0  ;;  %4419 = vst.msk [vmem:[#allocation3 + $0xc8] sm:$0xff] %vm538_vm4, %v4383_v8  ;;  %v3871_v5 = vpop.f32.mrf.mxu3  ;;  %v5938_v14 = vadd.f32 %v5855_v27, %v5444_v54  ;;  %v4349_v8 = vld [vmem:[#allocation3 + $0xd8] sm:$0xff]  ;;  %v6655_v9 = vrot.slane %v6653_v25, 4  ;;  %v4495_v46 = vmul.u32 58255, %v14284_v30  ;;  %v3921_v25 = vld [vmem:[#allocation3 + $0x100] sm:$0xff] }
 0x35d   : > { %v3954_v52 = vadd.f32 %v3918_v10, %v3871_v5  ;;  %v14252_v60 = vor.u32 %v5719_v2, %v5716_v24  ;;  %v7215_v27 = vshrl.u32 %v12164_v15, 16  ;;  %v5446_v2 = vld [vmem:[#allocation3 + $0x38] sm:$0xff] }
 0x35e   : > { %v4855_v61 = vsel %vm4635_vm14, %v4747_v43, 0.0  ;;  %v5375_v17 = vpop.f32.mrf.mxu1  ;;  %5974 = vst.msk [vmem:[#allocation3 + $0x28] sm:$0xff] %vm538_vm4, %v5938_v14  ;;  %v7218_v14 = vshll.u32 %v12164_v15, 16  ;;  %v4350_v42 = vld [vmem:[#allocation3 + $0xe0] sm:$0xff]  ;;  %v4531_v44 = vshra.s32 %v4495_v46, 20 }
 0x35f   : > { %v4895_v32 = vpack.c.bf16 %v4855_v61, %v4855_v61  ;;  %v4297_v53 = vpop.f32.mrf.mxu0  ;;  %3990 = vst.msk [vmem:[#allocation3 + $0xe8] sm:$0xff] %vm538_vm4, %v3954_v52  ;;  %v5721_v38 = vsel %vm3558_vm8, %v14202_v20, %v14252_v60  ;;  %v14271_v20 = vadd.s32 216, %v13577_v57 }
 0x360   : > { %v4384_v28 = vadd.f32 %v4348_v22, %v4297_v53  ;;  %11195 = vmatmul.msk.bf16.gmra.mxu2 %vm538_vm4, %v5721_v38  ;;  %v4567_v18 = vmul.u32 18, %v4531_v44 }
 0x361   : > { %4931 = vst.msk [vmem:[#allocation2 + $0x6c] sm:$0xf] %vm4867_vm10, %v4895_v32  ;;  %11279 = vmatmul.msk.bf16.gmra.mxu3 %vm538_vm4, %v6184_v6  ;;  %v4494_v29 = vmul.u32 58255, %v14271_v20  ;;  %v14299_v32 = vor.u32 %v6655_v9, %v6652_v7 }
 0x362   : > { %4420 = vst.msk [vmem:[#allocation3 + $0xd0] sm:$0xff] %vm538_vm4, %v4384_v28  ;;  %11367 = vmatmul.msk.bf16.gmra.mxu0 %vm538_vm4, %v6648_v51  ;;  %v7217_v51 = vrot.slane %v7215_v27, 3  ;;  %v4603_v15 = vsub.s32 %v14284_v30, %v4567_v18 }
 0x363   : > { %v4672_v21 = vld [vmem:[#allocation3 + $0xc8] sm:$0xff]  ;;  %v5858_v33 = vpop.f32.mrf.mxu2  ;;  %v4530_v47 = vshra.s32 %v4494_v29, 20 }
 0x364   : > { %v4712_v41 = vadd.f32 %v14003_v45, %v4672_v21  ;;  %5428 = vst.msk [vmem:[#allocation3 + $0xc8] sm:$0xff] %vm538_vm4, %v5375_v17  ;;  %v3874_v31 = vpop.f32.mrf.mxu3  ;;  %v5939_v3 = vadd.f32 %v5858_v33, %v5445_v4  ;;  %v6185_v17 = vrot.slane %v14291_v37, 3  ;;  %v7220_v21 = vrot.slane %v7218_v14, 4  ;;  %v5449_v37 = vld [vmem:[#allocation3 + $0x50] sm:$0xff] }
 0x365   : > { %v3955_v0 = vadd.f32 %v3919_v50, %v3874_v31  ;;  %v4566_v52 = vmul.u32 18, %v4530_v47  ;;  %v6657_v33 = vsel %vm6604_vm15, %v14249_v40, %v14299_v32  ;;  %v5447_v40 = vld [vmem:[#allocation3 + $0x40] sm:$0xff]  ;;  %vm4639_vm11 = vcmp.lt.s32.totalorder %v4603_v15, 16 }
 0x366   : > { %v4748_v55 = vmax.f32 %v4712_v41, 0.0  ;;  %v5378_v48 = vpop.f32.mrf.mxu1  ;;  %5975 = vst.msk [vmem:[#allocation3 + $0x30] sm:$0xff] %vm538_vm4, %v5939_v3  ;;  %v6186_v4 = vsel %vm4128_vm9, %v6183_v59, %v6185_v17  ;;  %v14333_v50 = vor.u32 %v7220_v21, %v7217_v51  ;;  %v6659_v3 = vshrl.u32 %v12147_v19, 16 }
 0x367   : > { %v4299_v56 = vpop.f32.mrf.mxu0  ;;  %3991 = vst.msk [vmem:[#allocation3 + $0xf0] sm:$0xff] %vm538_vm4, %v3955_v0  ;;  %v4602_v41 = vsub.s32 %v14271_v20, %v4566_v52 }
 0x368   : > { %v4856_v63 = vsel %vm4636_vm0, %v4748_v55, 0.0  ;;  %v4385_v11 = vadd.f32 %v4349_v8, %v4299_v56  ;;  %v12118_v35 = vld [vmem:[#allocation2 + $0x68] sm:$0xff]  ;;  %v7222_v47 = vsel %vm6604_vm15, %v14278_v36, %v14333_v50 }
 0x369   : > { %v4896_v12 = vpack.c.bf16 %v4856_v63, %v4856_v63  ;;  %v4673_v23 = vld [vmem:[#allocation3 + $0xd0] sm:$0xff]  ;;  %11457 = vmatmul.msk.bf16.gmra.mxu1 %vm538_vm4, %v7213_v13  ;;  %v5723_v43 = vshrl.u32 %v12118_v35, 16  ;;  %v5726_v54 = vshll.u32 %v12118_v35, 16  ;;  %vm4638_vm6 = vcmp.lt.s32.totalorder %v4602_v41, 16 }
 0x36a   : > { %v4713_v58 = vadd.f32 %v14003_v45, %v4673_v23  ;;  %5429 = vst.msk [vmem:[#allocation3 + $0xd0] sm:$0xff] %vm538_vm4, %v5378_v48  ;;  %v3920_v45 = vld [vmem:[#allocation3 + $0xf8] sm:$0xff]  ;;  %v6662_v48 = vshll.u32 %v12147_v19, 16  ;;  %v14339_v13 = vadd.s32 240, %v13577_v57  ;;  %v12165_v35 = vld [vmem:[#allocation2 + $0x38] sm:$0xff] }
 0x36b   : > { %4932 = vst.msk [vmem:[#allocation2 + $0x70] sm:$0xf] %vm4867_vm10, %v4896_v12  ;;  %v5860_v26 = vpop.f32.mrf.mxu2  ;;  %v5725_v5 = vrot.slane %v5723_v43, 2  ;;  %v5728_v10 = vrot.slane %v5726_v54, 3  ;;  %v14346_v43 = vld [vmem:[#allocation2 + $0x40] sm:$0xff]  ;;  %v6661_v54 = vrot.slane %v6659_v3, 3 }
 0x36c   : > { %v4749_v24 = vmax.f32 %v4713_v58, 0.0  ;;  %4421 = vst.msk [vmem:[#allocation3 + $0xd8] sm:$0xff] %vm538_vm4, %v4385_v11  ;;  %v3876_v16 = vpop.f32.mrf.mxu3  ;;  %v5940_v61 = vadd.f32 %v5860_v26, %v5446_v2  ;;  %v4351_v11 = vld [vmem:[#allocation3 + $0xe8] sm:$0xff]  ;;  %v6664_v46 = vrot.slane %v6662_v48, 4  ;;  %v4497_v36 = vmul.u32 58255, %v14339_v13  ;;  %v3923_v48 = vld [vmem:[#allocation3 + $0x110] sm:$0xff] }
 0x36d   : > { %v3956_v22 = vadd.f32 %v3920_v45, %v3876_v16  ;;  %v14302_v28 = vor.u32 %v5728_v10, %v5725_v5  ;;  %v7224_v26 = vshrl.u32 %v12165_v35, 16  ;;  %v5448_v10 = vld [vmem:[#allocation3 + $0x48] sm:$0xff] }
 0x36e   : > { %v4857_v53 = vsel %vm4637_vm1, %v4749_v24, 0.0  ;;  %v5380_v39 = vpop.f32.mrf.mxu1  ;;  %5976 = vst.msk [vmem:[#allocation3 + $0x38] sm:$0xff] %vm538_vm4, %v5940_v61  ;;  %v7227_v61 = vshll.u32 %v12165_v35, 16  ;;  %v4352_v19 = vld [vmem:[#allocation3 + $0xf0] sm:$0xff]  ;;  %v4533_v41 = vshra.s32 %v4497_v36, 20 }
 0x36f   : > { %v4897_v38 = vpack.c.bf16 %v4857_v53, %v4857_v53  ;;  %v4302_v62 = vpop.f32.mrf.mxu0  ;;  %3992 = vst.msk [vmem:[#allocation3 + $0xf8] sm:$0xff] %vm538_vm4, %v3956_v22  ;;  %v5730_v6 = vsel %vm3558_vm8, %v14252_v60, %v14302_v28  ;;  %v14321_v60 = vadd.s32 232, %v13577_v57  ;;  %v3922_v53 = vld [vmem:[#allocation3 + $0x108] sm:$0xff] }
 0x370   : > { %v4386_v34 = vadd.f32 %v4350_v42, %v4302_v62  ;;  %11196 = vmatmul.msk.bf16.gmra.mxu2 %vm538_vm4, %v5730_v6  ;;  %v14354_v62 = vor.u32 %v6664_v46, %v6661_v54  ;;  %v7229_v18 = vrot.slane %v7227_v61, 4 }
 0x371   : > { %4933 = vst.msk [vmem:[#allocation2 + $0x74] sm:$0xf] %vm4867_vm10, %v4897_v38  ;;  %11280 = vmatmul.msk.bf16.gmra.mxu3 %vm538_vm4, %v6186_v4  ;;  %v4496_v0 = vmul.u32 58255, %v14321_v60  ;;  %v6187_v38 = vrot.slane %v14346_v43, 3  ;;  %v5451_v43 = vld [vmem:[#allocation3 + $0x60] sm:$0xff] }
 0x372   : > { %4422 = vst.msk [vmem:[#allocation3 + $0xe0] sm:$0xff] %vm538_vm4, %v4386_v34  ;;  %11368 = vmatmul.msk.bf16.gmra.mxu0 %vm538_vm4, %v6657_v33  ;;  %v6666_v3 = vsel %vm6604_vm15, %v14299_v32, %v14354_v62 }
 0x373   : > { %v4674_v20 = vld [vmem:[#allocation3 + $0xd8] sm:$0xff]  ;;  %v5863_v31 = vpop.f32.mrf.mxu2  ;;  %v4532_v30 = vshra.s32 %v4496_v0, 20 }
 0x374   : > { %v4714_v59 = vadd.f32 %v14329_v1, %v4674_v20  ;;  %5430 = vst.msk [vmem:[#allocation3 + $0xd8] sm:$0xff] %vm538_vm4, %v5380_v39  ;;  %v3879_v29 = vpop.f32.mrf.mxu3  ;;  %v5941_v55 = vadd.f32 %v5863_v31, %v5447_v40  ;;  %v7226_v20 = vrot.slane %v7224_v26, 3  ;;  %v6188_v31 = vsel %vm4128_vm9, %v6185_v17, %v6187_v38 }
 0x375   : > { %v3957_v56 = vadd.f32 %v3921_v25, %v3879_v29  ;;  %v4568_v39 = vmul.u32 18, %v4532_v30  ;;  %v4569_v29 = vmul.u32 18, %v4533_v41 }
 0x376   : > { %v4750_v49 = vmax.f32 %v4714_v59, 0.0  ;;  %v5383_v8 = vpop.f32.mrf.mxu1  ;;  %5977 = vst.msk [vmem:[#allocation3 + $0x40] sm:$0xff] %vm538_vm4, %v5941_v55  ;;  %v12148_v59 = vld [vmem:[#allocation2 + $0x38] sm:$0xff]  ;;  %v14383_v55 = vor.u32 %v7229_v18, %v7226_v20 }
 0x377   : > { %v4304_v63 = vpop.f32.mrf.mxu0  ;;  %3993 = vst.msk [vmem:[#allocation3 + $0x100] sm:$0xff] %vm538_vm4, %v3957_v56  ;;  %v4604_v40 = vsub.s32 %v14321_v60, %v4568_v39  ;;  %v6668_v32 = vshrl.u32 %v12148_v59, 16  ;;  %v4605_v35 = vsub.s32 %v14339_v13, %v4569_v29 }
 0x378   : > { %v4858_v12 = vsel %vm4638_vm6, %v4750_v49, 0.0  ;;  %v4387_v23 = vadd.f32 %v4351_v11, %v4304_v63  ;;  %v12119_v7 = vld [vmem:[#allocation2 + $0x70] sm:$0xff]  ;;  %v7231_v30 = vsel %vm6604_vm15, %v14333_v50, %v14383_v55 }
 0x379   : > { %v4898_v9 = vpack.c.bf16 %v4858_v12, %v4858_v12  ;;  %v4675_v58 = vld [vmem:[#allocation3 + $0xe0] sm:$0xff]  ;;  %11458 = vmatmul.msk.bf16.gmra.mxu1 %vm538_vm4, %v7222_v47  ;;  %v5732_v24 = vshrl.u32 %v12119_v7, 16  ;;  %v5735_v2 = vshll.u32 %v12119_v7, 16  ;;  %vm4640_vm12 = vcmp.lt.s32.totalorder %v4604_v40, 16  ;;  %v12166_v7 = vld [vmem:[#allocation2 + $0x40] sm:$0xff] }
 0x37a   : > { %v4715_v27 = vadd.f32 %v14329_v1, %v4675_v58  ;;  %5431 = vst.msk [vmem:[#allocation3 + $0xe0] sm:$0xff] %vm538_vm4, %v5383_v8  ;;  %v6671_v8 = vshll.u32 %v12148_v59, 16  ;;  %v14389_v47 = vadd.s32 256, %v13577_v57  ;;  %vm4641_vm13 = vcmp.lt.s32.totalorder %v4605_v35, 16  ;;  %v12167_v35 = vld [vmem:[#allocation2 + $0x48] sm:$0xff] }
 0x37b   : > { %4934 = vst.msk [vmem:[#allocation2 + $0x78] sm:$0xf] %vm4867_vm10, %v4898_v9  ;;  %v5865_v14 = vpop.f32.mrf.mxu2  ;;  %v5734_v16 = vrot.slane %v5732_v24, 2  ;;  %v5737_v45 = vrot.slane %v5735_v2, 3  ;;  %v14396_v24 = vld [vmem:[#allocation2 + $0x48] sm:$0xff]  ;;  %v6670_v2 = vrot.slane %v6668_v32, 3 }
 0x37c   : > { %v4751_v5 = vmax.f32 %v4715_v27, 0.0  ;;  %4423 = vst.msk [vmem:[#allocation3 + $0xe8] sm:$0xff] %vm538_vm4, %v4387_v23  ;;  %v3881_v52 = vpop.f32.mrf.mxu3  ;;  %v5942_v22 = vadd.f32 %v5865_v14, %v5448_v10  ;;  %v4353_v23 = vld [vmem:[#allocation3 + $0xf8] sm:$0xff]  ;;  %v6673_v36 = vrot.slane %v6671_v8, 4  ;;  %v4499_v50 = vmul.u32 58255, %v14389_v47  ;;  %v6005_v8 = vld [vmem:[#allocation3] sm:$0xff] }
 0x37d   : > { %v3958_v44 = vadd.f32 %v3922_v53, %v3881_v52  ;;  %v14357_v6 = vor.u32 %v5737_v45, %v5734_v16  ;;  %v7233_v14 = vshrl.u32 %v12166_v7, 16  ;;  %v5450_v45 = vld [vmem:[#allocation3 + $0x58] sm:$0xff] }
 0x37e   : > { %v4859_v42 = vsel %vm4639_vm11, %v4751_v5, 0.0  ;;  %v5385_v34 = vpop.f32.mrf.mxu1  ;;  %5978 = vst.msk [vmem:[#allocation3 + $0x48] sm:$0xff] %vm538_vm4, %v5942_v22  ;;  %v7236_v22 = vshll.u32 %v12166_v7, 16  ;;  %v4354_v59 = vld [vmem:[#allocation3 + $0x100] sm:$0xff]  ;;  %v4535_v40 = vshra.s32 %v4499_v50, 20 }
 0x37f   : > { %v4899_v51 = vpack.c.bf16 %v4859_v42, %v4859_v42  ;;  %v4307_v21 = vpop.f32.mrf.mxu0  ;;  %3994 = vst.msk [vmem:[#allocation3 + $0x108] sm:$0xff] %vm538_vm4, %v3958_v44  ;;  %v5739_v33 = vsel %vm3558_vm8, %v14302_v28, %v14357_v6  ;;  %v14376_v28 = vadd.s32 248, %v13577_v57  ;;  %v3924_v42 = vld [vmem:[#allocation3 + $0x118] sm:$0xff] }
 0x380   : > { %v4388_v4 = vadd.f32 %v4352_v19, %v4307_v21  ;;  %11197 = vmatmul.msk.bf16.gmra.mxu2 %vm538_vm4, %v5739_v33  ;;  %v14404_v21 = vor.u32 %v6673_v36, %v6670_v2  ;;  %v7238_v29 = vrot.slane %v7236_v22, 4 }
 0x381   : > { %4935 = vst.msk [vmem:[#allocation2 + $0x7c] sm:$0xf] %vm4867_vm10, %v4899_v51  ;;  %11281 = vmatmul.msk.bf16.gmra.mxu3 %vm538_vm4, %v6188_v31  ;;  %v4498_v56 = vmul.u32 58255, %v14376_v28  ;;  %v6189_v51 = vrot.slane %v14396_v24, 3  ;;  %v5453_v24 = vld [vmem:[#allocation3 + $0x70] sm:$0xff] }
 0x382   : > { %4424 = vst.msk [vmem:[#allocation3 + $0xf0] sm:$0xff] %vm538_vm4, %v4388_v4  ;;  %11369 = vmatmul.msk.bf16.gmra.mxu0 %vm538_vm4, %v6666_v3  ;;  %v6675_v32 = vsel %vm6604_vm15, %v14354_v62, %v14404_v21 }
 0x383   : > { %v4676_v60 = vld [vmem:[#allocation3 + $0xe8] sm:$0xff]  ;;  %v5868_v17 = vpop.f32.mrf.mxu2  ;;  %v4534_v13 = vshra.s32 %v4498_v56, 20 }
 0x384   : > { %v4716_v25 = vadd.f32 %v14329_v1, %v4676_v60  ;;  %5432 = vst.msk [vmem:[#allocation3 + $0xe8] sm:$0xff] %vm538_vm4, %v5385_v34  ;;  %v3884_v0 = vpop.f32.mrf.mxu3  ;;  %v5943_v49 = vadd.f32 %v5868_v17, %v5449_v37  ;;  %v7235_v60 = vrot.slane %v7233_v14, 3  ;;  %v6190_v17 = vsel %vm4128_vm9, %v6187_v38, %v6189_v51 }
 0x385   : > { %v3959_v63 = vadd.f32 %v3923_v48, %v3884_v0  ;;  %v4570_v34 = vmul.u32 18, %v4534_v13  ;;  %v4571_v0 = vmul.u32 18, %v4535_v40  ;;  %v7242_v14 = vshrl.u32 %v12167_v35, 16 }
 0x386   : > { %v4752_v15 = vmax.f32 %v4716_v25, 0.0  ;;  %v5388_v11 = vpop.f32.mrf.mxu1  ;;  %5979 = vst.msk [vmem:[#allocation3 + $0x50] sm:$0xff] %vm538_vm4, %v5943_v49  ;;  %v12149_v25 = vld [vmem:[#allocation2 + $0x40] sm:$0xff]  ;;  %v14433_v49 = vor.u32 %v7238_v29, %v7235_v60 }
 0x387   : > { %v4309_v12 = vpop.f32.mrf.mxu0  ;;  %3995 = vst.msk [vmem:[#allocation3 + $0x110] sm:$0xff] %vm538_vm4, %v3959_v63  ;;  %v4606_v37 = vsub.s32 %v14376_v28, %v4570_v34  ;;  %v6677_v62 = vshrl.u32 %v12149_v25, 16 }
 0x388   : > { %v4860_v9 = vsel %vm4640_vm12, %v4752_v15, 0.0  ;;  %v4389_v58 = vadd.f32 %v4353_v23, %v4309_v12  ;;  %v12120_v54 = vld [vmem:[#allocation2 + $0x78] sm:$0xff]  ;;  %v7240_v13 = vsel %vm6604_vm15, %v14383_v55, %v14433_v49 }
 0x389   : > { %v4900_v46 = vpack.c.bf16 %v4860_v9, %v4860_v9  ;;  %v4677_v27 = vld [vmem:[#allocation3 + $0xf0] sm:$0xff]  ;;  %11459 = vmatmul.msk.bf16.gmra.mxu1 %vm538_vm4, %v7231_v30  ;;  %v5741_v5 = vshrl.u32 %v12120_v54, 16  ;;  %v5744_v10 = vshll.u32 %v12120_v54, 16  ;;  %vm4642_vm14 = vcmp.lt.s32.totalorder %v4606_v37, 16  ;;  %v4355_v30 = vld [vmem:[#allocation3 + $0x108] sm:$0xff] }
 0x38a   : > { %v4717_v26 = vadd.f32 %v14329_v1, %v4677_v27  ;;  %5433 = vst.msk [vmem:[#allocation3 + $0xf0] sm:$0xff] %vm538_vm4, %v5388_v11  ;;  %v6680_v11 = vshll.u32 %v12149_v25, 16  ;;  %v4607_v9 = vsub.s32 %v14389_v47, %v4571_v0  ;;  %v14439_v54 = vadd.s32 272, %v13577_v57 }
 0x38b   : > { %4936 = vst.msk [vmem:[#allocation2 + $0x80] sm:$0xf] %vm4867_vm10, %v4900_v46  ;;  %v5870_v61 = vpop.f32.mrf.mxu2  ;;  %v5743_v52 = vrot.slane %v5741_v5, 2  ;;  %v5746_v53 = vrot.slane %v5744_v10, 3  ;;  %v6679_v36 = vrot.slane %v6677_v62, 3  ;;  %v14446_v10 = vld [vmem:[#allocation2 + $0x50] sm:$0xff] }
 0x38c   : > { %v4753_v16 = vmax.f32 %v4717_v26, 0.0  ;;  %4425 = vst.msk [vmem:[#allocation3 + $0xf8] sm:$0xff] %vm538_vm4, %v4389_v58  ;;  %v3886_v39 = vpop.f32.mrf.mxu3  ;;  %v5944_v44 = vadd.f32 %v5870_v61, %v5450_v45  ;;  %v6682_v50 = vrot.slane %v6680_v11, 4  ;;  %vm4643_vm0 = vcmp.lt.s32.totalorder %v4607_v9, 16  ;;  %v12150_v62 = vld [vmem:[#allocation2 + $0x48] sm:$0xff] }
 0x38d   : > { %v3960_v41 = vadd.f32 %v3924_v42, %v3886_v39  ;;  %v14407_v33 = vor.u32 %v5746_v53, %v5743_v52  ;;  %v7245_v52 = vshll.u32 %v12167_v35, 16  ;;  %v4501_v55 = vmul.u32 58255, %v14439_v54  ;;  %v8032_v53 = vld [vmem:[%s15554_s3 + $0x14] sm:$0xf] }
 0x38e   : > { %v4861_v19 = vsel %vm4641_vm13, %v4753_v16, 0.0  ;;  %v5390_v4 = vpop.f32.mrf.mxu1  ;;  %5980 = vst.msk [vmem:[#allocation3 + $0x58] sm:$0xff] %vm538_vm4, %v5944_v44  ;;  %v5452_v39 = vld [vmem:[#allocation3 + $0x68] sm:$0xff]  ;;  %v14458_v40 = vor.u32 %v6682_v50, %v6679_v36  ;;  %v6686_v35 = vshrl.u32 %v12150_v62, 16  ;;  %v6689_v9 = vshll.u32 %v12150_v62, 16 }
 0x38f   : > { %v4901_v20 = vpack.c.bf16 %v4861_v19, %v4861_v19  ;;  %v4312_v18 = vpop.f32.mrf.mxu0  ;;  %3996 = vst.msk [vmem:[#allocation3 + $0x118] sm:$0xff] %vm538_vm4, %v3960_v41  ;;  %v5748_v3 = vsel %vm3558_vm8, %v14357_v6, %v14407_v33  ;;  %v14426_v6 = vadd.s32 264, %v13577_v57  ;;  %v8329_v19 = vsel %vm5830_vm7, %v8032_v53, 0 }
 0x390   : > { %v4390_v31 = vadd.f32 %v4354_v59, %v4312_v18  ;;  %11198 = vmatmul.msk.bf16.gmra.mxu2 %vm538_vm4, %v5748_v3  ;;  %v6191_v59 = vrot.slane %v14446_v10, 3  ;;  %8338 = vmatpush.bf16.msra.mxu3 %v8329_v19 }
 0x391   : > { %4937 = vst.msk [vmem:[#allocation2 + $0x84] sm:$0xf] %vm4867_vm10, %v4901_v20  ;;  %11282 = vmatmul.msk.bf16.gmra.mxu3 %vm538_vm4, %v6190_v17  ;;  %v4500_v63 = vmul.u32 58255, %v14426_v6  ;;  %v4356_v17 = vld [vmem:[#allocation3 + $0x110] sm:$0xff] }
 0x392   : > { %4426 = vst.msk [vmem:[#allocation3 + $0x100] sm:$0xff] %vm538_vm4, %v4390_v31  ;;  %11370 = vmatmul.msk.bf16.gmra.mxu0 %vm538_vm4, %v6675_v32  ;;  %v4537_v32 = vshra.s32 %v4501_v55, 20  ;;  %v6691_v55 = vrot.slane %v6689_v9, 4  ;;  %v6009_v9 = vld [vmem:[#allocation3 + $0x20] sm:$0xff] }
 0x393   : > { %v4678_v28 = vld [vmem:[#allocation3 + $0xf8] sm:$0xff]  ;;  %v5873_v38 = vpop.f32.mrf.mxu2  ;;  %v4536_v47 = vshra.s32 %v4500_v63, 20 }
 0x394   : > { %v4718_v48 = vadd.f32 %v14329_v1, %v4678_v28  ;;  %5434 = vst.msk [vmem:[#allocation3 + $0xf8] sm:$0xff] %vm538_vm4, %v5390_v4  ;;  %v5945_v56 = vadd.f32 %v5873_v38, %v5451_v43  ;;  %v6275_v15 = vpop.f32.mrf.mxu3  ;;  %v6006_v4 = vld [vmem:[#allocation3 + $0x8] sm:$0xff]  ;;  %v14465_v28 = vadd.s32 280, %v13577_v57  ;;  %v7244_v43 = vrot.slane %v7242_v14, 3 }
 0x395   : > { %v6365_v23 = vadd.f32 %v6275_v15, %v6005_v8  ;;  %v4572_v18 = vmul.u32 18, %v4536_v47  ;;  %v7247_v38 = vrot.slane %v7245_v52, 4  ;;  %v6192_v57 = vsel %vm4128_vm9, %v6189_v51, %v6191_v59  ;;  %v14502_v52 = vld [vmem:[#allocation2 + $0x58] sm:$0xff] }
 0x396   : > { %v4754_v12 = vmax.f32 %v4718_v48, 0.0  ;;  %v5393_v7 = vpop.f32.mrf.mxu1  ;;  %5981 = vst.msk [vmem:[#allocation3 + $0x60] sm:$0xff] %vm538_vm4, %v5945_v56  ;;  %v6684_v8 = vsel %vm6604_vm15, %v14404_v21, %v14458_v40  ;;  %v4502_v15 = vmul.u32 58255, %v14465_v28  ;;  %v8575_v21 = vld [vmem:[%s15554_s3 + $0x18] sm:$0xf]  ;;  %v4357_v36 = vld [vmem:[#allocation3 + $0x118] sm:$0xff] }
 0x397   : > { %v4314_v58 = vpop.f32.mrf.mxu0  ;;  %6401 = vst.msk [vmem:[#allocation3] sm:$0xff] %vm538_vm4, %v6365_v23  ;;  %v4608_v56 = vsub.s32 %v14426_v6, %v4572_v18  ;;  %v4573_v6 = vmul.u32 18, %v4537_v32  ;;  %v14488_v11 = vor.u32 %v7247_v38, %v7244_v43  ;;  %v6007_v23 = vld [vmem:[#allocation3 + $0x10] sm:$0xff] }
 0x398   : > { %v4862_v46 = vsel %vm4642_vm14, %v4754_v12, 0.0  ;;  %v4391_v27 = vadd.f32 %v4355_v30, %v4314_v58  ;;  %v12121_v2 = vld [vmem:[#allocation2 + $0x80] sm:$0xff]  ;;  %v8872_v58 = vsel %vm5830_vm7, %v8575_v21, 0 }
 0x399   : > { %v4902_v26 = vpack.c.bf16 %v4862_v46, %v4862_v46  ;;  %v4679_v5 = vld [vmem:[#allocation3 + $0x100] sm:$0xff]  ;;  %11460 = vmatmul.msk.bf16.gmra.mxu1 %vm538_vm4, %v7240_v13  ;;  %v5750_v45 = vshrl.u32 %v12121_v2, 16  ;;  %v5753_v61 = vshll.u32 %v12121_v2, 16  ;;  %vm4644_vm1 = vcmp.lt.s32.totalorder %v4608_v56, 16  ;;  %8881 = vmatpush.bf16.msra.mxu0 %v8872_v58  ;;  %v12151_v56 = vld [vmem:[#allocation2 + $0x50] sm:$0xff] }
 0x39a   : > { %v4719_v16 = vadd.f32 %v14329_v1, %v4679_v5  ;;  %5435 = vst.msk [vmem:[#allocation3 + $0x100] sm:$0xff] %vm538_vm4, %v5393_v7  ;;  %v4609_v13 = vsub.s32 %v14439_v54, %v4573_v6  ;;  %v12168_v5 = vld [vmem:[#allocation2 + $0x50] sm:$0xff]  ;;  %v7249_v14 = vsel %vm6604_vm15, %v14433_v49, %v14488_v11  ;;  %v6688_v54 = vrot.slane %v6686_v35, 3 }
 0x39b   : > { %4938 = vst.msk [vmem:[#allocation2 + $0x88] sm:$0xf] %vm4867_vm10, %v4902_v26  ;;  %v5875_v42 = vpop.f32.mrf.mxu2  ;;  %v5752_v44 = vrot.slane %v5750_v45, 2  ;;  %v5755_v34 = vrot.slane %v5753_v61, 3  ;;  %v4538_v26 = vshra.s32 %v4502_v15, 20  ;;  %v7251_v49 = vshrl.u32 %v12168_v5, 16 }
 0x39c   : > { %v4755_v22 = vmax.f32 %v4719_v16, 0.0  ;;  %4427 = vst.msk [vmem:[#allocation3 + $0x108] sm:$0xff] %vm538_vm4, %v4391_v27  ;;  %v5946_v41 = vadd.f32 %v5875_v42, %v5452_v39  ;;  %v6277_v20 = vpop.f32.mrf.mxu3  ;;  %vm4645_vm6 = vcmp.lt.s32.totalorder %v4609_v13, 16  ;;  %v6698_v35 = vshll.u32 %v12151_v56, 16 }
 0x39d   : > { %v6366_v3 = vadd.f32 %v6277_v20, %v6006_v4  ;;  %v14461_v29 = vor.u32 %v5755_v34, %v5752_v44  ;;  %v4574_v42 = vmul.u32 18, %v4538_v26  ;;  %v5454_v34 = vld [vmem:[#allocation3 + $0x78] sm:$0xff]  ;;  %v7254_v20 = vshll.u32 %v12168_v5, 16 }
 0x39e   : > { %v4863_v31 = vsel %vm4643_vm0, %v4755_v22, 0.0  ;;  %v5395_v60 = vpop.f32.mrf.mxu1  ;;  %5982 = vst.msk [vmem:[#allocation3 + $0x68] sm:$0xff] %vm538_vm4, %v5946_v41  ;;  %v6437_v38 = vld [vmem:[#allocation3] sm:$0xff] }
 0x39f   : > { %v4903_v25 = vpack.c.bf16 %v4863_v31, %v4863_v31  ;;  %v4317_v37 = vpop.f32.mrf.mxu0  ;;  %6402 = vst.msk [vmem:[#allocation3 + $0x8] sm:$0xff] %vm538_vm4, %v6366_v3  ;;  %v5757_v48 = vsel %vm3558_vm8, %v14407_v33, %v14461_v29  ;;  %v6008_v31 = vld [vmem:[#allocation3 + $0x18] sm:$0xff]  ;;  %v4610_v43 = vsub.s32 %v14465_v28, %v4574_v42  ;;  %v7256_v6 = vrot.slane %v7254_v20, 4  ;;  %v6010_v20 = vld [vmem:[#allocation3 + $0x28] sm:$0xff] }
 0x3a0   : > { %v4392_v0 = vadd.f32 %v4356_v17, %v4317_v37  ;;  %11199 = vmatmul.msk.bf16.gmra.mxu2 %vm538_vm4, %v5757_v48  ;;  %v6700_v42 = vrot.slane %v6698_v35, 4 }
 0x3a1   : > { %4939 = vst.msk [vmem:[#allocation2 + $0x8c] sm:$0xf] %vm4867_vm10, %v4903_v25  ;;  %11283 = vmatmul.msk.bf16.gmra.mxu3 %vm538_vm4, %v6192_v57  ;;  %v14509_v25 = vor.u32 %v6691_v55, %v6688_v54  ;;  %vm4646_vm11 = vcmp.lt.s32.totalorder %v4610_v43, 16 }
 0x3a2   : > { %4428 = vst.msk [vmem:[#allocation3 + $0x110] sm:$0xff] %vm538_vm4, %v4392_v0  ;;  %11371 = vmatmul.msk.bf16.gmra.mxu0 %vm538_vm4, %v6684_v8 }
 0x3a3   : > { %v4680_v33 = vld [vmem:[#allocation3 + $0x108] sm:$0xff]  ;;  %v5878_v51 = vpop.f32.mrf.mxu2  ;;  %v6693_v15 = vsel %vm6604_vm15, %v14458_v40, %v14509_v25  ;;  %v9118_v40 = vld [vmem:[%s15554_s3 + $0x1c] sm:$0xf] }
 0x3a4   : > { %v4720_v63 = vadd.f32 %v14329_v1, %v4680_v33  ;;  %5436 = vst.msk [vmem:[#allocation3 + $0x108] sm:$0xff] %vm538_vm4, %v5395_v60  ;;  %v5947_v12 = vadd.f32 %v5878_v51, %v5453_v24  ;;  %v6280_v7 = vpop.f32.mrf.mxu3  ;;  %v6193_v60 = vrot.slane %v14502_v52, 3  ;;  %v7253_v33 = vrot.slane %v7251_v49, 3 }
 0x3a5   : > { %v6367_v46 = vadd.f32 %v6280_v7, %v6007_v23  ;;  %v6695_v51 = vshrl.u32 %v12151_v56, 16  ;;  %v9550_v23 = vld [vmem:[%s15554_s3 + $0x20] sm:$0xf] }
 0x3a6   : > { %v4756_v30 = vmax.f32 %v4720_v63, 0.0  ;;  %v5398_v27 = vpop.f32.mrf.mxu1  ;;  %5983 = vst.msk [vmem:[#allocation3 + $0x70] sm:$0xff] %vm538_vm4, %v5947_v12  ;;  %v6194_v28 = vsel %vm4128_vm9, %v6191_v59, %v6193_v60  ;;  %v5455_v59 = vld [vmem:[#allocation3 + $0x80] sm:$0xff]  ;;  %v14534_v12 = vor.u32 %v7256_v6, %v7253_v33  ;;  %v12152_v6 = vld [vmem:[#allocation2 + $0x58] sm:$0xff] }
 0x3a7   : > { %v4319_v2 = vpop.f32.mrf.mxu0  ;;  %6403 = vst.msk [vmem:[#allocation3 + $0x10] sm:$0xff] %vm538_vm4, %v6367_v46  ;;  %v9869_v46 = vsel %vm5830_vm7, %v9550_v23, 0  ;;  %v12170_v23 = vld [vmem:[#allocation2 + $0x60] sm:$0xff] }
 0x3a8   : > { %v4864_v47 = vsel %vm4644_vm1, %v4756_v30, 0.0  ;;  %v4393_v50 = vadd.f32 %v4357_v36, %v4319_v2  ;;  %v12122_v16 = vld [vmem:[#allocation2 + $0x88] sm:$0xff]  ;;  %9878 = vmatpush.bf16.msra.mxu2 %v9869_v46  ;;  %v6438_v36 = vld [vmem:[#allocation3 + $0x8] sm:$0xff]  ;;  %v5458_v46 = vld [vmem:[#allocation3 + $0x98] sm:$0xff] }
 0x3a9   : > { %v4904_v45 = vpack.c.bf16 %v4864_v47, %v4864_v47  ;;  %v4681_v61 = vld [vmem:[#allocation3 + $0x110] sm:$0xff]  ;;  %11461 = vmatmul.msk.bf16.gmra.mxu1 %vm538_vm4, %v7249_v14  ;;  %v5759_v22 = vshrl.u32 %v12122_v16, 16  ;;  %v5762_v39 = vshll.u32 %v12122_v16, 16  ;;  %v7258_v16 = vsel %vm6604_vm15, %v14488_v11, %v14534_v12 }
 0x3aa   : > { %v4721_v53 = vadd.f32 %v14329_v1, %v4681_v61  ;;  %5437 = vst.msk [vmem:[#allocation3 + $0x110] sm:$0xff] %vm538_vm4, %v5398_v27  ;;  %v12169_v61 = vld [vmem:[#allocation2 + $0x58] sm:$0xff] }
 0x3ab   : > { %4940 = vst.msk [vmem:[#allocation2 + $0x90] sm:$0xf] %vm4867_vm10, %v4904_v45  ;;  %v5880_v19 = vpop.f32.mrf.mxu2  ;;  %v5761_v41 = vrot.slane %v5759_v22, 2  ;;  %v5764_v4 = vrot.slane %v5762_v39, 3  ;;  %v6697_v45 = vrot.slane %v6695_v51, 3  ;;  %v14551_v39 = vld [vmem:[#allocation2 + $0x60] sm:$0xff] }
 0x3ac   : > { %v4757_v44 = vmax.f32 %v4721_v53, 0.0  ;;  %4429 = vst.msk [vmem:[#allocation3 + $0x118] sm:$0xff] %vm538_vm4, %v4393_v50  ;;  %v5948_v18 = vadd.f32 %v5880_v19, %v5454_v34  ;;  %v6282_v3 = vpop.f32.mrf.mxu3  ;;  %v7260_v19 = vshrl.u32 %v12169_v61, 16  ;;  %v6707_v51 = vshll.u32 %v12152_v6, 16 }
 0x3ad   : > { %v6368_v17 = vadd.f32 %v6282_v3, %v6008_v31  ;;  %v14511_v0 = vor.u32 %v5764_v4, %v5761_v41  ;;  %v7263_v41 = vshll.u32 %v12169_v61, 16  ;;  %v6195_v31 = vrot.slane %v14551_v39, 3  ;;  %v12177_v61 = vld [vmem:[#allocation2 + $0xc] sm:$0xff] }
 0x3ae   : > { %v4865_v37 = vsel %vm4645_vm6, %v4757_v44, 0.0  ;;  %v5400_v32 = vpop.f32.mrf.mxu1  ;;  %5984 = vst.msk [vmem:[#allocation3 + $0x78] sm:$0xff] %vm538_vm4, %v5948_v18  ;;  %v5456_v44 = vld [vmem:[#allocation3 + $0x88] sm:$0xff]  ;;  %v14557_v3 = vor.u32 %v6700_v42, %v6697_v45 }
 0x3af   : > { %v4905_v48 = vpack.c.bf16 %v4865_v37, %v4865_v37  ;;  %v6841_v62 = vpop.f32.mrf.mxu0  ;;  %6404 = vst.msk [vmem:[#allocation3 + $0x18] sm:$0xff] %vm538_vm4, %v6368_v17  ;;  %v5766_v8 = vsel %vm3558_vm8, %v14461_v29, %v14511_v0  ;;  %v7265_v56 = vrot.slane %v7263_v41, 4 }
 0x3b0   : > { %v6931_v57 = vadd.f32 %v6841_v62, %v6437_v38  ;;  %11200 = vmatmul.msk.bf16.gmra.mxu2 %vm538_vm4, %v5766_v8  ;;  %v7262_v62 = vrot.slane %v7260_v19, 3  ;;  %v6196_v8 = vsel %vm4128_vm9, %v6193_v60, %v6195_v31  ;;  %v6702_v33 = vsel %vm6604_vm15, %v14509_v25, %v14557_v3  ;;  %v6011_v60 = vld [vmem:[#allocation3 + $0x30] sm:$0xff] }
 0x3b1   : > { %4941 = vst.msk [vmem:[#allocation2 + $0x94] sm:$0xf] %vm4867_vm10, %v4905_v48  ;;  %11284 = vmatmul.msk.bf16.gmra.mxu3 %vm538_vm4, %v6194_v28 }
 0x3b2   : > { %6967 = vst.msk [vmem:[#allocation3] sm:$0xff] %vm538_vm4, %v6931_v57  ;;  %11372 = vmatmul.msk.bf16.gmra.mxu0 %vm538_vm4, %v6693_v15  ;;  %v5511_v29 = vld [vmem:[#allocation2 + $0x90] sm:$0x7] }
 0x3b3   : > { %v4682_v63 = vld [vmem:[#allocation3 + $0x118] sm:$0xff]  ;;  %v5586_v24 = vunpack.c.l.b16 %v5511_v29  ;;  %v5883_v21 = vpop.f32.mrf.mxu2  ;;  %v14576_v29 = vor.u32 %v7265_v56, %v7262_v62  ;;  %v14614_v56 = vld [vmem:[#allocation2 + $0x70] sm:$0xff] }
 0x3b4   : > { %v4722_v10 = vadd.f32 %v14329_v1, %v4682_v63  ;;  %5438 = vst.msk [vmem:[#allocation3 + $0x118] sm:$0xff] %vm538_vm4, %v5400_v32  ;;  %v5949_v7 = vadd.f32 %v5883_v21, %v5455_v59  ;;  %v6285_v58 = vpop.f32.mrf.mxu3  ;;  %v9304_v1 = vsel %vm5830_vm7, %v9118_v40, 0  ;;  %v6439_v32 = vld [vmem:[#allocation3 + $0x10] sm:$0xff] }
 0x3b5   : > { %v5605_v30 = vpack.c.b16 %v5586_v24, %v5586_v24  ;;  %v6369_v13 = vadd.f32 %v6285_v58, %v6009_v9  ;;  %9313 = vmatpush.bf16.msra.mxu1 %v9304_v1  ;;  %v6704_v24 = vshrl.u32 %v12152_v6, 16  ;;  %v7267_v40 = vsel %vm6604_vm15, %v14534_v12, %v14576_v29  ;;  %v14584_v9 = vld [vmem:[#allocation2 + $0x68] sm:$0xff]  ;;  %v5460_v6 = vld [vmem:[#allocation3 + $0xa8] sm:$0xff] }
 0x3b6   : > { %v4758_v27 = vmax.f32 %v4722_v10, 0.0  ;;  %v7406_v2 = vpop.f32.mrf.mxu1  ;;  %5985 = vst.msk [vmem:[#allocation3 + $0x80] sm:$0xff] %vm538_vm4, %v5949_v7  ;;  %v6440_v10 = vld [vmem:[#allocation3 + $0x18] sm:$0xff] }
 0x3b7   : > { %v6843_v26 = vpop.f32.mrf.mxu0  ;;  %v5768_v5 = vshrl.u32 %v5605_v30, 16  ;;  %v5771_v47 = vshll.u32 %v5605_v30, 16  ;;  %6405 = vst.msk [vmem:[#allocation3 + $0x20] sm:$0xff] %vm538_vm4, %v6369_v13  ;;  %v6706_v58 = vrot.slane %v6704_v24, 3  ;;  %v6709_v30 = vrot.slane %v6707_v51, 4 }
 0x3b8   : > { %v4866_v50 = vsel %vm4646_vm11, %v4758_v27, 0.0  ;;  %v6932_v14 = vadd.f32 %v6843_v26, %v6438_v36  ;;  %v7269_v13 = vshrl.u32 %v12170_v23, 16  ;;  %v6012_v26 = vld [vmem:[#allocation3 + $0x38] sm:$0xff] }
 0x3b9   : > { %v4906_v54 = vpack.c.bf16 %v4866_v50, %v4866_v50  ;;  %v7003_v55 = vld [vmem:[#allocation3] sm:$0xff]  ;;  %11462 = vmatmul.msk.bf16.gmra.mxu1 %vm538_vm4, %v7258_v16  ;;  %v5770_v53 = vrot.slane %v5768_v5, 2  ;;  %v5773_v22 = vrot.slane %v5771_v47, 3  ;;  %v6197_v5 = vrot.slane %v14584_v9, 3 }
 0x3ba   : > { %v7496_v49 = vadd.f32 %v7406_v2, %v7003_v55  ;;  %6968 = vst.msk [vmem:[#allocation3 + $0x8] sm:$0xff] %vm538_vm4, %v6932_v14  ;;  %v7272_v2 = vshll.u32 %v12170_v23, 16  ;;  %v14589_v47 = vor.u32 %v6709_v30, %v6706_v58  ;;  %v7271_v55 = vrot.slane %v7269_v13, 3 }
 0x3bb   : > { %4942 = vst.msk [vmem:[#allocation2 + $0x98] sm:$0xf] %vm4867_vm10, %v4906_v54  ;;  %v5885_v11 = vpop.f32.mrf.mxu2  ;;  %v5774_v34 = vor.u32 %v5773_v22, %v5770_v53  ;;  %v6198_v42 = vsel %vm4128_vm9, %v6195_v31, %v6197_v5 }
 0x3bc   : > { %7532 = vst.msk [vmem:[#allocation3] sm:$0xff] %vm538_vm4, %v7496_v49  ;;  %v5950_v4 = vadd.f32 %v5885_v11, %v5456_v44  ;;  %v6287_v18 = vpop.f32.mrf.mxu3  ;;  %v7274_v53 = vrot.slane %v7272_v2, 4  ;;  %v6711_v49 = vsel %vm6604_vm15, %v14557_v3, %v14589_v47  ;;  %v12153_v44 = vld [vmem:[#allocation2 + $0x60] sm:$0xff] }
 0x3bd   : > { %v6370_v37 = vadd.f32 %v6287_v18, %v6010_v20  ;;  %v5775_v38 = vsel %vm3558_vm8, %v14511_v0, %v5774_v34  ;;  %v5457_v0 = vld [vmem:[#allocation3 + $0x90] sm:$0xff]  ;;  %v5459_v34 = vld [vmem:[#allocation3 + $0xa0] sm:$0xff]  ;;  %v6713_v18 = vshrl.u32 %v12153_v44, 16  ;;  %v6716_v31 = vshll.u32 %v12153_v44, 16  ;;  %v5462_v44 = vld [vmem:[#allocation3 + $0xb8] sm:$0xff] }
 0x3be   : > { %v7408_v17 = vpop.f32.mrf.mxu1  ;;  %5986 = vst.msk [vmem:[#allocation3 + $0x88] sm:$0xff] %vm538_vm4, %v5950_v4  ;;  %v6441_v16 = vld [vmem:[#allocation3 + $0x20] sm:$0xff]  ;;  %v14606_v19 = vor.u32 %v7274_v53, %v7271_v55  ;;  %v14644_v53 = vld [vmem:[#allocation2 + $0x78] sm:$0xff] }
 0x3bf   : > { %v6846_v48 = vpop.f32.mrf.mxu0  ;;  %6406 = vst.msk [vmem:[#allocation3 + $0x28] sm:$0xff] %vm538_vm4, %v6370_v37  ;;  %v6013_v4 = vld [vmem:[#allocation3 + $0x40] sm:$0xff] }
 0x3c0   : > { %v6933_v43 = vadd.f32 %v6846_v48, %v6439_v32  ;;  %11201 = vmatmul.msk.bf16.gmra.mxu2 %vm538_vm4, %v5775_v38  ;;  %v12171_v38 = vld [vmem:[#allocation2 + $0x68] sm:$0xff] }
 0x3c1   : > { %v7004_v57 = vld [vmem:[#allocation3 + $0x8] sm:$0xff]  ;;  %11285 = vmatmul.msk.bf16.gmra.mxu3 %vm538_vm4, %v6196_v8  ;;  %v6718_v8 = vrot.slane %v6716_v31, 4 }
 0x3c2   : > { %v7497_v28 = vadd.f32 %v7408_v17, %v7004_v57  ;;  %6969 = vst.msk [vmem:[#allocation3 + $0x10] sm:$0xff] %vm538_vm4, %v6933_v43  ;;  %11373 = vmatmul.msk.bf16.gmra.mxu0 %vm538_vm4, %v6702_v33  ;;  %v7276_v43 = vsel %vm6604_vm15, %v14576_v29, %v14606_v19  ;;  %v6715_v57 = vrot.slane %v6713_v18, 3 }
 0x3c3   : > { %v5888_v15 = vpop.f32.mrf.mxu2 }
 0x3c4   : > { %7533 = vst.msk [vmem:[#allocation3 + $0x8] sm:$0xff] %vm538_vm4, %v7497_v28  ;;  %v5951_v52 = vadd.f32 %v5888_v15, %v5457_v0  ;;  %v6290_v63 = vpop.f32.mrf.mxu3  ;;  %v7278_v0 = vshrl.u32 %v12171_v38, 16  ;;  %v7281_v15 = vshll.u32 %v12171_v38, 16  ;;  %v14619_v24 = vor.u32 %v6718_v8, %v6715_v57 }
 0x3c5   : > { %v6371_v25 = vadd.f32 %v6290_v63, %v6011_v60  ;;  %v6014_v60 = vld [vmem:[#allocation3 + $0x48] sm:$0xff]  ;;  %v6199_v63 = vrot.slane %v14614_v56, 3 }
 0x3c6   : > { %v7411_v35 = vpop.f32.mrf.mxu1  ;;  %5987 = vst.msk [vmem:[#allocation3 + $0x90] sm:$0xff] %vm538_vm4, %v5951_v52  ;;  %v6442_v17 = vld [vmem:[#allocation3 + $0x28] sm:$0xff]  ;;  %v7283_v23 = vrot.slane %v7281_v15, 4  ;;  %v6720_v30 = vsel %vm6604_vm15, %v14589_v47, %v14619_v24 }
 0x3c7   : > { %v6848_v59 = vpop.f32.mrf.mxu0  ;;  %6407 = vst.msk [vmem:[#allocation3 + $0x30] sm:$0xff] %vm538_vm4, %v6371_v25  ;;  %v6200_v58 = vsel %vm4128_vm9, %v6197_v5, %v6199_v63 }
 0x3c8   : > { %v6934_v21 = vadd.f32 %v6848_v59, %v6440_v10  ;;  %v12178_v59 = vld [vmem:[#allocation2 + $0x14] sm:$0xff] }
 0x3c9   : > { %v7005_v7 = vld [vmem:[#allocation3 + $0x10] sm:$0xff]  ;;  %11463 = vmatmul.msk.bf16.gmra.mxu1 %vm538_vm4, %v7267_v40  ;;  %v7280_v40 = vrot.slane %v7278_v0, 3 }
 0x3ca   : > { %v7498_v1 = vadd.f32 %v7411_v35, %v7005_v7  ;;  %6970 = vst.msk [vmem:[#allocation3 + $0x18] sm:$0xff] %vm538_vm4, %v6934_v21 }
 0x3cb   : > { %v5890_v27 = vpop.f32.mrf.mxu2  ;;  %v14636_v13 = vor.u32 %v7283_v23, %v7280_v40  ;;  %v14674_v23 = vld [vmem:[#allocation2 + $0x80] sm:$0xff] }
 0x3cc   : > { %7534 = vst.msk [vmem:[#allocation3 + $0x10] sm:$0xff] %vm538_vm4, %v7498_v1  ;;  %v5952_v36 = vadd.f32 %v5890_v27, %v5458_v46  ;;  %v6292_v12 = vpop.f32.mrf.mxu3  ;;  %v12154_v1 = vld [vmem:[#allocation2 + $0x68] sm:$0xff]  ;;  %v5461_v27 = vld [vmem:[#allocation3 + $0xb0] sm:$0xff] }
 0x3cd   : > { %v6372_v50 = vadd.f32 %v6292_v12, %v6012_v26  ;;  %v6722_v12 = vshrl.u32 %v12154_v1, 16  ;;  %v6725_v5 = vshll.u32 %v12154_v1, 16  ;;  %v5464_v1 = vld [vmem:[#allocation3 + $0xc8] sm:$0xff] }
 0x3ce   : > { %v7413_v14 = vpop.f32.mrf.mxu1  ;;  %5988 = vst.msk [vmem:[#allocation3 + $0x98] sm:$0xff] %vm538_vm4, %v5952_v36  ;;  %v6443_v35 = vld [vmem:[#allocation3 + $0x30] sm:$0xff] }
 0x3cf   : > { %v6851_v45 = vpop.f32.mrf.mxu0  ;;  %6408 = vst.msk [vmem:[#allocation3 + $0x38] sm:$0xff] %vm538_vm4, %v6372_v50  ;;  %v6015_v36 = vld [vmem:[#allocation3 + $0x50] sm:$0xff] }
 0x3d0   : > { %v6935_v54 = vadd.f32 %v6851_v45, %v6441_v16  ;;  %11544 = vmatmul.msk.bf16.vlgmr.msrb.gmra.mxu2 %vm538_vm4, %v12177_v61  ;;  %v7285_v61 = vsel %vm6604_vm15, %v14606_v19, %v14636_v13 }
 0x3d1   : > { %v7006_v22 = vld [vmem:[#allocation3 + $0x18] sm:$0xff]  ;;  %11286 = vmatmul.msk.bf16.gmra.mxu3 %vm538_vm4, %v6198_v42  ;;  %v6727_v42 = vrot.slane %v6725_v5, 4 }
 0x3d2   : > { %v7499_v11 = vadd.f32 %v7413_v14, %v7006_v22  ;;  %6971 = vst.msk [vmem:[#allocation3 + $0x20] sm:$0xff] %vm538_vm4, %v6935_v54  ;;  %11374 = vmatmul.msk.bf16.gmra.mxu0 %vm538_vm4, %v6711_v49  ;;  %v12172_v54 = vld [vmem:[#allocation2 + $0x70] sm:$0xff]  ;;  %v6724_v22 = vrot.slane %v6722_v12, 3 }
 0x3d3   : > { %v5893_v39 = vpop.f32.mrf.mxu2 }
 0x3d4   : > { %7535 = vst.msk [vmem:[#allocation3 + $0x18] sm:$0xff] %vm538_vm4, %v7499_v11  ;;  %v5953_v41 = vadd.f32 %v5893_v39, %v5459_v34  ;;  %v6295_v20 = vpop.f32.mrf.mxu3  ;;  %v7287_v34 = vshrl.u32 %v12172_v54, 16  ;;  %v7290_v39 = vshll.u32 %v12172_v54, 16  ;;  %v14649_v18 = vor.u32 %v6727_v42, %v6724_v22 }
 0x3d5   : > { %v6373_v3 = vadd.f32 %v6295_v20, %v6013_v4  ;;  %v6016_v4 = vld [vmem:[#allocation3 + $0x58] sm:$0xff]  ;;  %v6201_v20 = vrot.slane %v14644_v53, 3 }
 0x3d6   : > { %v7416_v37 = vpop.f32.mrf.mxu1  ;;  %5989 = vst.msk [vmem:[#allocation3 + $0xa0] sm:$0xff] %vm538_vm4, %v5953_v41  ;;  %v6444_v14 = vld [vmem:[#allocation3 + $0x38] sm:$0xff]  ;;  %v7292_v38 = vrot.slane %v7290_v39, 4  ;;  %v6729_v8 = vsel %vm6604_vm15, %v14619_v24, %v14649_v18 }
 0x3d7   : > { %v6853_v32 = vpop.f32.mrf.mxu0  ;;  %6409 = vst.msk [vmem:[#allocation3 + $0x40] sm:$0xff] %vm538_vm4, %v6373_v3  ;;  %v6202_v57 = vsel %vm4128_vm9, %v6199_v63, %v6201_v20 }
 0x3d8   : > { %v6936_v48 = vadd.f32 %v6853_v32, %v6442_v17  ;;  %v12179_v32 = vld [vmem:[#allocation2 + $0x1c] sm:$0xff] }
 0x3d9   : > { %v7007_v62 = vld [vmem:[#allocation3 + $0x20] sm:$0xff]  ;;  %11464 = vmatmul.msk.bf16.gmra.mxu1 %vm538_vm4, %v7276_v43  ;;  %v7289_v43 = vrot.slane %v7287_v34, 3 }
 0x3da   : > { %v7500_v33 = vadd.f32 %v7416_v37, %v7007_v62  ;;  %6972 = vst.msk [vmem:[#allocation3 + $0x28] sm:$0xff] %vm538_vm4, %v6936_v48 }
 0x3db   : > { %v5895_v28 = vpop.f32.mrf.mxu2  ;;  %v14666_v0 = vor.u32 %v7292_v38, %v7289_v43  ;;  %v14704_v38 = vld [vmem:[#allocation2 + $0x88] sm:$0xff] }
 0x3dc   : > { %7536 = vst.msk [vmem:[#allocation3 + $0x20] sm:$0xff] %vm538_vm4, %v7500_v33  ;;  %v5954_v52 = vadd.f32 %v5895_v28, %v5460_v6  ;;  %v6297_v29 = vpop.f32.mrf.mxu3  ;;  %v12155_v33 = vld [vmem:[#allocation2 + $0x70] sm:$0xff]  ;;  %v5463_v28 = vld [vmem:[#allocation3 + $0xc0] sm:$0xff] }
 0x3dd   : > { %v6374_v51 = vadd.f32 %v6297_v29, %v6014_v60  ;;  %v6731_v29 = vshrl.u32 %v12155_v33, 16  ;;  %v6734_v63 = vshll.u32 %v12155_v33, 16  ;;  %v5466_v33 = vld [vmem:[#allocation3 + $0xd8] sm:$0xff] }
 0x3de   : > { %v7418_v25 = vpop.f32.mrf.mxu1  ;;  %5990 = vst.msk [vmem:[#allocation3 + $0xa8] sm:$0xff] %vm538_vm4, %v5954_v52  ;;  %v6445_v37 = vld [vmem:[#allocation3 + $0x40] sm:$0xff] }
 0x3df   : > { %v6856_v10 = vpop.f32.mrf.mxu0  ;;  %6410 = vst.msk [vmem:[#allocation3 + $0x48] sm:$0xff] %vm538_vm4, %v6374_v51  ;;  %v6017_v52 = vld [vmem:[#allocation3 + $0x60] sm:$0xff] }
 0x3e0   : > { %v6937_v21 = vadd.f32 %v6856_v10, %v6443_v35  ;;  %11545 = vmatmul.msk.bf16.gmra.mxu2 %vm538_vm4, %v12178_v59  ;;  %v7294_v59 = vsel %vm6604_vm15, %v14636_v13, %v14666_v0 }
 0x3e1   : > { %v7008_v7 = vld [vmem:[#allocation3 + $0x28] sm:$0xff]  ;;  %11287 = vmatmul.msk.bf16.gmra.mxu3 %vm538_vm4, %v6200_v58  ;;  %v6736_v58 = vrot.slane %v6734_v63, 4 }
 0x3e2   : > { %v7501_v46 = vadd.f32 %v7418_v25, %v7008_v7  ;;  %6973 = vst.msk [vmem:[#allocation3 + $0x30] sm:$0xff] %vm538_vm4, %v6937_v21  ;;  %11375 = vmatmul.msk.bf16.gmra.mxu0 %vm538_vm4, %v6720_v30  ;;  %v12173_v21 = vld [vmem:[#allocation2 + $0x78] sm:$0xff]  ;;  %v6733_v7 = vrot.slane %v6731_v29, 3 }
 0x3e3   : > { %v5898_v9 = vpop.f32.mrf.mxu2 }
 0x3e4   : > { %7537 = vst.msk [vmem:[#allocation3 + $0x28] sm:$0xff] %vm538_vm4, %v7501_v46  ;;  %v5955_v2 = vadd.f32 %v5898_v9, %v5461_v27  ;;  %v6300_v26 = vpop.f32.mrf.mxu3  ;;  %v7296_v27 = vshrl.u32 %v12173_v21, 16  ;;  %v7299_v9 = vshll.u32 %v12173_v21, 16  ;;  %v14679_v12 = vor.u32 %v6736_v58, %v6733_v7 }
 0x3e5   : > { %v6375_v47 = vadd.f32 %v6300_v26, %v6015_v36  ;;  %v6018_v36 = vld [vmem:[#allocation3 + $0x68] sm:$0xff]  ;;  %v6203_v26 = vrot.slane %v14674_v23, 3  ;;  %v5467_v23 = vld [vmem:[#allocation3 + $0xe0] sm:$0xff] }
 0x3e6   : > { %v7421_v50 = vpop.f32.mrf.mxu1  ;;  %5991 = vst.msk [vmem:[#allocation3 + $0xb0] sm:$0xff] %vm538_vm4, %v5955_v2  ;;  %v6446_v25 = vld [vmem:[#allocation3 + $0x48] sm:$0xff]  ;;  %v7301_v54 = vrot.slane %v7299_v9, 4  ;;  %v6738_v42 = vsel %vm6604_vm15, %v14649_v18, %v14679_v12 }
 0x3e7   : > { %v6858_v16 = vpop.f32.mrf.mxu0  ;;  %6411 = vst.msk [vmem:[#allocation3 + $0x50] sm:$0xff] %vm538_vm4, %v6375_v47  ;;  %v6204_v22 = vsel %vm4128_vm9, %v6201_v20, %v6203_v26 }
 0x3e8   : > { %v6938_v45 = vadd.f32 %v6858_v16, %v6444_v14  ;;  %v12180_v16 = vld [vmem:[#allocation2 + $0x24] sm:$0xff] }
 0x3e9   : > { %v7009_v55 = vld [vmem:[#allocation3 + $0x30] sm:$0xff]  ;;  %11465 = vmatmul.msk.bf16.gmra.mxu1 %vm538_vm4, %v7285_v61  ;;  %v7298_v61 = vrot.slane %v7296_v27, 3 }
 0x3ea   : > { %v7502_v49 = vadd.f32 %v7421_v50, %v7009_v55  ;;  %6974 = vst.msk [vmem:[#allocation3 + $0x38] sm:$0xff] %vm538_vm4, %v6938_v45 }
 0x3eb   : > { %v5900_v11 = vpop.f32.mrf.mxu2  ;;  %v14696_v34 = vor.u32 %v7301_v54, %v7298_v61  ;;  %v12175_v54 = vld [vmem:[#allocation2 + $0x88] sm:$0xff] }
 0x3ec   : > { %7538 = vst.msk [vmem:[#allocation3 + $0x30] sm:$0xff] %vm538_vm4, %v7502_v49  ;;  %v5956_v41 = vadd.f32 %v5900_v11, %v5462_v44  ;;  %v6302_v19 = vpop.f32.mrf.mxu3  ;;  %v12156_v49 = vld [vmem:[#allocation2 + $0x78] sm:$0xff] }
 0x3ed   : > { %v6376_v31 = vadd.f32 %v6302_v19, %v6016_v4  ;;  %v5465_v11 = vld [vmem:[#allocation3 + $0xd0] sm:$0xff]  ;;  %v6740_v19 = vshrl.u32 %v12156_v49, 16  ;;  %v6743_v20 = vshll.u32 %v12156_v49, 16 }
 0x3ee   : > { %v7423_v3 = vpop.f32.mrf.mxu1  ;;  %5992 = vst.msk [vmem:[#allocation3 + $0xb8] sm:$0xff] %vm538_vm4, %v5956_v41  ;;  %v6447_v50 = vld [vmem:[#allocation3 + $0x50] sm:$0xff] }
 0x3ef   : > { %v6861_v17 = vpop.f32.mrf.mxu0  ;;  %6412 = vst.msk [vmem:[#allocation3 + $0x58] sm:$0xff] %vm538_vm4, %v6376_v31  ;;  %v6019_v41 = vld [vmem:[#allocation3 + $0x70] sm:$0xff] }
 0x3f0   : > { %v6939_v48 = vadd.f32 %v6861_v17, %v6445_v37  ;;  %11546 = vmatmul.msk.bf16.gmra.mxu2 %vm538_vm4, %v12179_v32  ;;  %v7303_v32 = vsel %vm6604_vm15, %v14666_v0, %v14696_v34 }
 0x3f1   : > { %v7010_v62 = vld [vmem:[#allocation3 + $0x38] sm:$0xff]  ;;  %11288 = vmatmul.msk.bf16.gmra.mxu3 %vm538_vm4, %v6202_v57  ;;  %v6745_v57 = vrot.slane %v6743_v20, 4 }
 0x3f2   : > { %v7503_v6 = vadd.f32 %v7423_v3, %v7010_v62  ;;  %6975 = vst.msk [vmem:[#allocation3 + $0x40] sm:$0xff] %vm538_vm4, %v6939_v48  ;;  %11376 = vmatmul.msk.bf16.gmra.mxu0 %vm538_vm4, %v6729_v8  ;;  %v12174_v48 = vld [vmem:[#allocation2 + $0x80] sm:$0xff]  ;;  %v6742_v62 = vrot.slane %v6740_v19, 3  ;;  %v6022_v19 = vld [vmem:[#allocation3 + $0x88] sm:$0xff] }
 0x3f3   : > { %v5903_v56 = vpop.f32.mrf.mxu2 }
 0x3f4   : > { %7539 = vst.msk [vmem:[#allocation3 + $0x38] sm:$0xff] %vm538_vm4, %v7503_v6  ;;  %v5957_v15 = vadd.f32 %v5903_v56, %v5463_v28  ;;  %v6305_v60 = vpop.f32.mrf.mxu3  ;;  %v7305_v28 = vshrl.u32 %v12174_v48, 16  ;;  %v7308_v56 = vshll.u32 %v12174_v48, 16  ;;  %v14709_v29 = vor.u32 %v6745_v57, %v6742_v62 }
 0x3f5   : > { %v6377_v24 = vadd.f32 %v6305_v60, %v6017_v52  ;;  %v6020_v52 = vld [vmem:[#allocation3 + $0x78] sm:$0xff]  ;;  %v6205_v60 = vrot.slane %v14704_v38, 3  ;;  %v5469_v38 = vld [vmem:[#allocation3 + $0xf0] sm:$0xff] }
 0x3f6   : > { %v7426_v51 = vpop.f32.mrf.mxu1  ;;  %5993 = vst.msk [vmem:[#allocation3 + $0xc0] sm:$0xff] %vm538_vm4, %v5957_v15  ;;  %v6448_v3 = vld [vmem:[#allocation3 + $0x58] sm:$0xff]  ;;  %v7310_v21 = vrot.slane %v7308_v56, 4  ;;  %v6747_v58 = vsel %vm6604_vm15, %v14679_v12, %v14709_v29  ;;  %v12195_v56 = vld [vmem:[#allocation2 + $0xc] sm:$0xff] }
 0x3f7   : > { %v6863_v35 = vpop.f32.mrf.mxu0  ;;  %6413 = vst.msk [vmem:[#allocation3 + $0x60] sm:$0xff] %vm538_vm4, %v6377_v24  ;;  %v6206_v7 = vsel %vm4128_vm9, %v6203_v26, %v6205_v60 }
 0x3f8   : > { %v6940_v10 = vadd.f32 %v6863_v35, %v6446_v25  ;;  %v12181_v35 = vld [vmem:[#allocation2 + $0x2c] sm:$0xff] }
 0x3f9   : > { %v7011_v40 = vld [vmem:[#allocation3 + $0x40] sm:$0xff]  ;;  %11466 = vmatmul.msk.bf16.gmra.mxu1 %vm538_vm4, %v7294_v59  ;;  %v7307_v59 = vrot.slane %v7305_v28, 3 }
 0x3fa   : > { %v7504_v30 = vadd.f32 %v7426_v51, %v7011_v40  ;;  %6976 = vst.msk [vmem:[#allocation3 + $0x48] sm:$0xff] %vm538_vm4, %v6940_v10 }
 0x3fb   : > { %v5905_v46 = vpop.f32.mrf.mxu2  ;;  %v14726_v9 = vor.u32 %v7310_v21, %v7307_v59  ;;  %v8129_v21 = vshll.u32 %v12195_v56, 16 }
 0x3fc   : > { %7540 = vst.msk [vmem:[#allocation3 + $0x40] sm:$0xff] %vm538_vm4, %v7504_v30  ;;  %v5958_v2 = vadd.f32 %v5905_v46, %v5464_v1  ;;  %v6307_v13 = vpop.f32.mrf.mxu3  ;;  %v12157_v30 = vld [vmem:[#allocation2 + $0x80] sm:$0xff]  ;;  %v6077_v46 = vld [vmem:[#allocation2 + $0x90] sm:$0x7] }
 0x3fd   : > { %v6378_v5 = vadd.f32 %v6307_v13, %v6018_v36  ;;  %v6021_v36 = vld [vmem:[#allocation3 + $0x80] sm:$0xff]  ;;  %v6152_v26 = vunpack.c.l.b16 %v6077_v46  ;;  %v6749_v12 = vshrl.u32 %v12157_v30, 16  ;;  %v7312_v61 = vsel %vm6604_vm15, %v14696_v34, %v14726_v9 }
 0x3fe   : > { %v7428_v47 = vpop.f32.mrf.mxu1  ;;  %5994 = vst.msk [vmem:[#allocation3 + $0xc8] sm:$0xff] %vm538_vm4, %v5958_v2  ;;  %v6449_v51 = vld [vmem:[#allocation3 + $0x60] sm:$0xff] }
 0x3ff   : > { %v6866_v14 = vpop.f32.mrf.mxu0  ;;  %6414 = vst.msk [vmem:[#allocation3 + $0x68] sm:$0xff] %vm538_vm4, %v6378_v5  ;;  %v6752_v5 = vshll.u32 %v12157_v30, 16 }
 0x400   : > { %v6941_v45 = vadd.f32 %v6866_v14, %v6447_v50  ;;  %11547 = vmatmul.msk.bf16.gmra.mxu2 %vm538_vm4, %v12180_v16 }
 0x401   : > { %v7012_v55 = vld [vmem:[#allocation3 + $0x48] sm:$0xff]  ;;  %11289 = vmatmul.msk.bf16.gmra.mxu3 %vm538_vm4, %v6204_v22  ;;  %v6171_v22 = vpack.c.b16 %v6152_v26, %v6152_v26  ;;  %v6754_v49 = vrot.slane %v6752_v5, 4 }
 0x402   : > { %v7505_v44 = vadd.f32 %v7428_v47, %v7012_v55  ;;  %6977 = vst.msk [vmem:[#allocation3 + $0x50] sm:$0xff] %vm538_vm4, %v6941_v45  ;;  %11377 = vmatmul.msk.bf16.gmra.mxu0 %vm538_vm4, %v6738_v42  ;;  %v6751_v42 = vrot.slane %v6749_v12, 3  ;;  %v8127_v12 = vshrl.u32 %v12195_v56, 16 }
 0x403   : > { %v5908_v53 = vpop.f32.mrf.mxu2  ;;  %v6207_v34 = vrot.slane %v6171_v22, 3 }
 0x404   : > { %7541 = vst.msk [vmem:[#allocation3 + $0x48] sm:$0xff] %vm538_vm4, %v7505_v44  ;;  %v5959_v39 = vadd.f32 %v5908_v53, %v5465_v11  ;;  %v6310_v4 = vpop.f32.mrf.mxu3  ;;  %v5468_v11 = vld [vmem:[#allocation3 + $0xe8] sm:$0xff] }
 0x405   : > { %v6379_v18 = vadd.f32 %v6310_v4, %v6019_v41  ;;  %v7317_v41 = vshll.u32 %v12175_v54, 16 }
 0x406   : > { %v7431_v31 = vpop.f32.mrf.mxu1  ;;  %5995 = vst.msk [vmem:[#allocation3 + $0xd0] sm:$0xff] %vm538_vm4, %v5959_v39  ;;  %v6450_v14 = vld [vmem:[#allocation3 + $0x68] sm:$0xff]  ;;  %v7314_v39 = vshrl.u32 %v12175_v54, 16 }
 0x407   : > { %v6868_v37 = vpop.f32.mrf.mxu0  ;;  %6415 = vst.msk [vmem:[#allocation3 + $0x70] sm:$0xff] %vm538_vm4, %v6379_v18  ;;  %v14736_v18 = vor.u32 %v6754_v49, %v6751_v42  ;;  %v7319_v62 = vrot.slane %v7317_v41, 4  ;;  %v12183_v49 = vld [vmem:[#allocation2 + $0x3c] sm:$0xff] }
 0x408   : > { %v6942_v17 = vadd.f32 %v6868_v37, %v6448_v3 }
 0x409   : > { %v7013_v43 = vld [vmem:[#allocation3 + $0x50] sm:$0xff]  ;;  %11467 = vmatmul.msk.bf16.gmra.mxu1 %vm538_vm4, %v7303_v32 }
 0x40a   : > { %v7506_v8 = vadd.f32 %v7431_v31, %v7013_v43  ;;  %6978 = vst.msk [vmem:[#allocation3 + $0x58] sm:$0xff] %vm538_vm4, %v6942_v17  ;;  %v12182_v32 = vld [vmem:[#allocation2 + $0x34] sm:$0xff]  ;;  %v7316_v43 = vrot.slane %v7314_v39, 3 }
 0x40b   : > { %v5910_v6 = vpop.f32.mrf.mxu2 }
 0x40c   : > { %7542 = vst.msk [vmem:[#allocation3 + $0x50] sm:$0xff] %vm538_vm4, %v7506_v8  ;;  %v5960_v15 = vadd.f32 %v5910_v6, %v5466_v33  ;;  %v6312_v0 = vpop.f32.mrf.mxu3  ;;  %v6208_v8 = vsel %vm4128_vm9, %v6205_v60, %v6207_v34  ;;  %v6756_v33 = vsel %vm6604_vm15, %v14709_v29, %v14736_v18  ;;  %v12158_v6 = vld [vmem:[#allocation2 + $0x88] sm:$0xff]  ;;  %v6023_v60 = vld [vmem:[#allocation3 + $0x90] sm:$0xff] }
 0x40d   : > { %v6380_v63 = vadd.f32 %v6312_v0, %v6020_v52  ;;  %v14751_v52 = vor.u32 %v7319_v62, %v7316_v43  ;;  %v7075_v34 = vld [vmem:[#allocation2 + $0x98] sm:$0xf] }
 0x40e   : > { %v7433_v24 = vpop.f32.mrf.mxu1  ;;  %5996 = vst.msk [vmem:[#allocation3 + $0xd8] sm:$0xff] %vm538_vm4, %v5960_v15  ;;  %v6451_v37 = vld [vmem:[#allocation3 + $0x70] sm:$0xff] }
 0x40f   : > { %v6871_v25 = vpop.f32.mrf.mxu0  ;;  %6416 = vst.msk [vmem:[#allocation3 + $0x78] sm:$0xff] %vm538_vm4, %v6380_v63  ;;  %v6758_v63 = vshrl.u32 %v12158_v6, 16 }
 0x410   : > { %v6943_v10 = vadd.f32 %v6871_v25, %v6449_v51  ;;  %11548 = vmatmul.msk.bf16.gmra.mxu2 %vm538_vm4, %v12181_v35  ;;  %v14753_v51 = vld [vmem:[#allocation2 + $0x14] sm:$0xff] }
 0x411   : > { %v7014_v40 = vld [vmem:[#allocation3 + $0x58] sm:$0xff]  ;;  %11290 = vmatmul.msk.bf16.gmra.mxu3 %vm538_vm4, %v6206_v7  ;;  %v7321_v7 = vsel %vm6604_vm15, %v14726_v9, %v14751_v52 }
 0x412   : > { %v7507_v1 = vadd.f32 %v7433_v24, %v7014_v40  ;;  %6979 = vst.msk [vmem:[#allocation3 + $0x60] sm:$0xff] %vm538_vm4, %v6943_v10  ;;  %11378 = vmatmul.msk.bf16.gmra.mxu0 %vm538_vm4, %v6747_v58  ;;  %v6761_v24 = vshll.u32 %v12158_v6, 16  ;;  %v12176_v58 = vld [vmem:[#allocation2 + $0x90] sm:$0xff] }
 0x413   : > { %v5913_v27 = vpop.f32.mrf.mxu2  ;;  %v7323_v5 = vshrl.u32 %v12176_v58, 16  ;;  %v7326_v9 = vshll.u32 %v12176_v58, 16 }
 0x414   : > { %7543 = vst.msk [vmem:[#allocation3 + $0x58] sm:$0xff] %vm538_vm4, %v7507_v1  ;;  %v5961_v2 = vadd.f32 %v5913_v27, %v5467_v23  ;;  %v6315_v13 = vpop.f32.mrf.mxu3  ;;  %v6760_v1 = vrot.slane %v6758_v63, 3  ;;  %v6763_v46 = vrot.slane %v6761_v24, 4  ;;  %v8134_v23 = vshll.u32 %v14753_v51, 16 }
 0x415   : > { %v6381_v47 = vadd.f32 %v6315_v13, %v6021_v36  ;;  %v8131_v36 = vrot.slane %v8129_v21, 1  ;;  %v5470_v13 = vld [vmem:[#allocation3 + $0xf8] sm:$0xff]  ;;  %v7328_v39 = vrot.slane %v7326_v9, 4 }
 0x416   : > { %v7436_v50 = vpop.f32.mrf.mxu1  ;;  %5997 = vst.msk [vmem:[#allocation3 + $0xe0] sm:$0xff] %vm538_vm4, %v5961_v2  ;;  %v6452_v10 = vld [vmem:[#allocation3 + $0x78] sm:$0xff]  ;;  %v6509_v2 = vld [vmem:[#allocation2 + $0x90] sm:$0xf] }
 0x417   : > { %v6873_v16 = vpop.f32.mrf.mxu0  ;;  %6417 = vst.msk [vmem:[#allocation3 + $0x80] sm:$0xff] %vm538_vm4, %v6381_v47 }
 0x418   : > { %v6944_v45 = vadd.f32 %v6873_v16, %v6450_v14  ;;  %v14764_v16 = vor.u32 %v6763_v46, %v6760_v1 }
 0x419   : > { %v7015_v55 = vld [vmem:[#allocation3 + $0x60] sm:$0xff]  ;;  %11468 = vmatmul.msk.bf16.gmra.mxu1 %vm538_vm4, %v7312_v61  ;;  %v6584_v61 = vunpack.c.l.b16 %v6509_v2 }
 0x41a   : > { %v7508_v44 = vadd.f32 %v7436_v50, %v7015_v55  ;;  %6980 = vst.msk [vmem:[#allocation3 + $0x68] sm:$0xff] %vm538_vm4, %v6944_v45  ;;  %v6024_v50 = vld [vmem:[#allocation3 + $0x98] sm:$0xff]  ;;  %v14766_v45 = vrot.slane %v8134_v23, 1 }
 0x41b   : > { %v5915_v53 = vpop.f32.mrf.mxu2 }
 0x41c   : > { %7544 = vst.msk [vmem:[#allocation3 + $0x60] sm:$0xff] %vm538_vm4, %v7508_v44  ;;  %v5962_v4 = vadd.f32 %v5915_v53, %v5468_v11  ;;  %v6317_v20 = vpop.f32.mrf.mxu3  ;;  %v8132_v44 = vor.u32 %v8131_v36, %v8127_v12  ;;  %v7325_v53 = vrot.slane %v7323_v5, 3  ;;  %v12184_v36 = vld [vmem:[#allocation2 + $0x44] sm:$0xff] }
 0x41d   : > { %v6382_v31 = vadd.f32 %v6317_v20, %v6022_v19  ;;  %v6603_v20 = vpack.c.b16 %v6584_v61, %v6584_v61 }
 0x41e   : > { %v7438_v3 = vpop.f32.mrf.mxu1  ;;  %5998 = vst.msk [vmem:[#allocation3 + $0xe8] sm:$0xff] %vm538_vm4, %v5962_v4  ;;  %v6453_v22 = vld [vmem:[#allocation3 + $0x80] sm:$0xff]  ;;  %v6765_v4 = vsel %vm6604_vm15, %v14736_v18, %v14764_v16  ;;  %v8137_v19 = vsel %vm706_vm3, %v8132_v44, %v14766_v45  ;;  %v7150_v18 = vunpack.c.l.b16 %v7075_v34 }
 0x41f   : > { %v6876_v17 = vpop.f32.mrf.mxu0  ;;  %6418 = vst.msk [vmem:[#allocation3 + $0x88] sm:$0xff] %vm538_vm4, %v6382_v31  ;;  %v6767_v62 = vshrl.u32 %v6603_v20, 16 }
 0x420   : > { %v6945_v48 = vadd.f32 %v6876_v17, %v6451_v37  ;;  %11549 = vmatmul.msk.bf16.gmra.mxu2 %vm538_vm4, %v12182_v32  ;;  %v14780_v17 = vor.u32 %v7328_v39, %v7325_v53 }
 0x421   : > { %v7016_v57 = vld [vmem:[#allocation3 + $0x68] sm:$0xff]  ;;  %11291 = vmatmul.msk.bf16.gmra.mxu3 %vm538_vm4, %v6208_v8  ;;  %v14782_v8 = vld [vmem:[#allocation2 + $0x1c] sm:$0xff] }
 0x422   : > { %v7509_v28 = vadd.f32 %v7438_v3, %v7016_v57  ;;  %6981 = vst.msk [vmem:[#allocation3 + $0x70] sm:$0xff] %vm538_vm4, %v6945_v48  ;;  %11379 = vmatmul.msk.bf16.gmra.mxu0 %vm538_vm4, %v6756_v33  ;;  %v5471_v3 = vld [vmem:[#allocation3 + $0x100] sm:$0xff]  ;;  %v6770_v57 = vshll.u32 %v6603_v20, 16  ;;  %v8142_v24 = vshll.u32 %v14782_v8, 16 }
 0x423   : > { %v5918_v15 = vpop.f32.mrf.mxu2  ;;  %v6025_v48 = vld [vmem:[#allocation3 + $0xa0] sm:$0xff] }
 0x424   : > { %7545 = vst.msk [vmem:[#allocation3 + $0x68] sm:$0xff] %vm538_vm4, %v7509_v28  ;;  %v5963_v0 = vadd.f32 %v5918_v15, %v5469_v38  ;;  %v6320_v29 = vpop.f32.mrf.mxu3  ;;  %v7330_v15 = vsel %vm6604_vm15, %v14751_v52, %v14780_v17  ;;  %v6772_v63 = vrot.slane %v6770_v57, 4  ;;  %v8144_v1 = vrot.slane %v8142_v24, 1  ;;  %v14825_v24 = vld [vmem:[#allocation2 + $0x1c] sm:$0xff] }
 0x425   : > { %v6383_v25 = vadd.f32 %v6320_v29, %v6023_v60  ;;  %v6769_v29 = vrot.slane %v6767_v62, 3  ;;  %v6028_v62 = vld [vmem:[#allocation3 + $0xb8] sm:$0xff] }
 0x426   : > { %v7441_v35 = vpop.f32.mrf.mxu1  ;;  %5999 = vst.msk [vmem:[#allocation3 + $0xf0] sm:$0xff] %vm538_vm4, %v5963_v0  ;;  %v6454_v28 = vld [vmem:[#allocation3 + $0x88] sm:$0xff]  ;;  %v7169_v0 = vpack.c.b16 %v7150_v18, %v7150_v18  ;;  %v5474_v18 = vld [vmem:[#allocation3 + $0x118] sm:$0xff] }
 0x427   : > { %v6878_v59 = vpop.f32.mrf.mxu0  ;;  %6419 = vst.msk [vmem:[#allocation3 + $0x90] sm:$0xff] %vm538_vm4, %v6383_v25  ;;  %v6773_v58 = vor.u32 %v6772_v63, %v6769_v29  ;;  %v12231_v63 = vld [vmem:[#allocation2 + $0x14] sm:$0xf0] }
 0x428   : > { %v6946_v40 = vadd.f32 %v6878_v59, %v6452_v10  ;;  %v7332_v59 = vshrl.u32 %v7169_v0, 16  ;;  %v7335_v21 = vshll.u32 %v7169_v0, 16  ;;  %v12185_v0 = vld [vmem:[#allocation2 + $0x4c] sm:$0xff] }
 0x429   : > { %v7017_v30 = vld [vmem:[#allocation3 + $0x70] sm:$0xff]  ;;  %11469 = vmatmul.msk.bf16.gmra.mxu1 %vm538_vm4, %v7321_v7  ;;  %v6026_v7 = vld [vmem:[#allocation3 + $0xa8] sm:$0xff] }
 0x42a   : > { %v7510_v27 = vadd.f32 %v7441_v35, %v7017_v30  ;;  %6982 = vst.msk [vmem:[#allocation3 + $0x78] sm:$0xff] %vm538_vm4, %v6946_v40  ;;  %v5472_v35 = vld [vmem:[#allocation3 + $0x108] sm:$0xff]  ;;  %v8138_v30 = vshrl.u32 %v14753_v51, 16  ;;  %v7334_v12 = vrot.slane %v7332_v59, 3  ;;  %v7337_v5 = vrot.slane %v7335_v21, 4 }
 0x42b   : > { %v5920_v26 = vpop.f32.mrf.mxu2  ;;  %v11744_v59 = vld [vmem:[#allocation2 + $0x14] sm:$0xe] }
 0x42c   : > { %7546 = vst.msk [vmem:[#allocation3 + $0x70] sm:$0xff] %vm538_vm4, %v7510_v27  ;;  %v5964_v47 = vadd.f32 %v5920_v26, %v5470_v13  ;;  %v6322_v14 = vpop.f32.mrf.mxu3  ;;  %v8140_v13 = vor.u32 %v8138_v30, %v14766_v45  ;;  %v5473_v45 = vld [vmem:[#allocation3 + $0x110] sm:$0xff]  ;;  %v6029_v30 = vld [vmem:[#allocation3 + $0xc0] sm:$0xff] }
 0x42d   : > { %v6384_v54 = vadd.f32 %v6322_v14, %v6024_v50  ;;  %v12213_v14 = vld [vmem:[#allocation2 + $0x14] sm:$0xff] }
 0x42e   : > { %v7443_v55 = vpop.f32.mrf.mxu1  ;;  %6000 = vst.msk [vmem:[#allocation3 + $0xf8] sm:$0xff] %vm538_vm4, %v5964_v47  ;;  %v6455_v27 = vld [vmem:[#allocation3 + $0x90] sm:$0xff]  ;;  %v6774_v47 = vsel %vm6604_vm15, %v14764_v16, %v6773_v58  ;;  %v8145_v51 = vsel %vm706_vm3, %v8140_v13, %v8144_v1  ;;  %v9213_v58 = vrot.slane %v14825_v24, 1 }
 0x42f   : > { %v6881_v42 = vpop.f32.mrf.mxu0  ;;  %6420 = vst.msk [vmem:[#allocation3 + $0x98] sm:$0xff] %vm538_vm4, %v6384_v54  ;;  %v7338_v54 = vor.u32 %v7337_v5, %v7334_v12 }
 0x430   : > { %v6947_v11 = vadd.f32 %v6881_v42, %v6453_v22  ;;  %11550 = vmatmul.msk.bf16.gmra.mxu2 %vm538_vm4, %v12183_v49  ;;  %v6027_v22 = vld [vmem:[#allocation3 + $0xb0] sm:$0xff]  ;;  %v14805_v42 = vld [vmem:[#allocation2 + $0x24] sm:$0xff] }
 0x431   : > { %v7018_v41 = vld [vmem:[#allocation3 + $0x78] sm:$0xff]  ;;  %11634 = vmatmul.msk.bf16.vlgmr.msra.gmra.mxu3 %vm538_vm4, %v8137_v19  ;;  %v7339_v19 = vsel %vm6604_vm15, %v14780_v17, %v7338_v54  ;;  %v8150_v34 = vshll.u32 %v14805_v42, 16  ;;  %v8154_v54 = vshrl.u32 %v14805_v42, 16 }
 0x432   : > { %v7511_v31 = vadd.f32 %v7443_v55, %v7018_v41  ;;  %6983 = vst.msk [vmem:[#allocation3 + $0x80] sm:$0xff] %vm538_vm4, %v6947_v11  ;;  %11380 = vmatmul.msk.bf16.gmra.mxu0 %vm538_vm4, %v6765_v4  ;;  %v14807_v49 = vld [vmem:[#allocation2 + $0x1c] sm:$0xff]  ;;  %v8672_v41 = vshll.u32 %v12213_v14, 16 }
 0x433   : > { %v5923_v37 = vpop.f32.mrf.mxu2  ;;  %v14819_v57 = vrot.slane %v8150_v34, 1 }
 0x434   : > { %7547 = vst.msk [vmem:[#allocation3 + $0x78] sm:$0xff] %vm538_vm4, %v7511_v31  ;;  %v5965_v32 = vadd.f32 %v5923_v37, %v5471_v3  ;;  %v6325_v43 = vpop.f32.mrf.mxu3  ;;  %v8677_v31 = vshll.u32 %v14807_v49, 16  ;;  %v8674_v37 = vrot.slane %v8672_v41, 1 }
 0x435   : > { %v6385_v33 = vadd.f32 %v6325_v43, %v6025_v48  ;;  %v8146_v48 = vshrl.u32 %v14782_v8, 16  ;;  %v8156_v34 = vor.u32 %v8154_v54, %v14819_v57 }
 0x436   : > { %v7446_v6 = vpop.f32.mrf.mxu1  ;;  %6001 = vst.msk [vmem:[#allocation3 + $0x100] sm:$0xff] %vm538_vm4, %v5965_v32  ;;  %v6456_v53 = vld [vmem:[#allocation3 + $0x98] sm:$0xff] }
 0x437   : > { %v6883_v56 = vpop.f32.mrf.mxu0  ;;  %6421 = vst.msk [vmem:[#allocation3 + $0xa0] sm:$0xff] %vm538_vm4, %v6385_v33  ;;  %v8670_v33 = vshrl.u32 %v12213_v14, 16 }
 0x438   : > { %v6948_v38 = vadd.f32 %v6883_v56, %v6454_v28 }
 0x439   : > { %v7019_v60 = vld [vmem:[#allocation3 + $0x80] sm:$0xff]  ;;  %11470 = vmatmul.msk.bf16.gmra.mxu1 %vm538_vm4, %v7330_v15  ;;  %v8675_v29 = vor.u32 %v8674_v37, %v8670_v33 }
 0x43a   : > { %v7512_v25 = vadd.f32 %v7446_v6, %v7019_v60  ;;  %6984 = vst.msk [vmem:[#allocation3 + $0x88] sm:$0xff] %vm538_vm4, %v6948_v38  ;;  %v14821_v6 = vrot.slane %v8677_v31, 1  ;;  %v8148_v60 = vor.u32 %v8146_v48, %v8144_v1  ;;  %v7570_v48 = vld [vmem:[#allocation3 + $0x10] sm:$0xff] }
 0x43b   : > { %v5925_v10 = vpop.f32.mrf.mxu2 }
 0x43c   : > { %7548 = vst.msk [vmem:[#allocation3 + $0x80] sm:$0xff] %vm538_vm4, %v7512_v25  ;;  %v5966_v40 = vadd.f32 %v5925_v10, %v5472_v35  ;;  %v6327_v52 = vpop.f32.mrf.mxu3  ;;  %v8153_v35 = vsel %vm706_vm3, %v8148_v60, %v14819_v57  ;;  %v8680_v10 = vsel %vm706_vm3, %v8675_v29, %v14821_v6 }
 0x43d   : > { %v6386_v46 = vadd.f32 %v6327_v52, %v6026_v7  ;;  %v7568_v7 = vld [vmem:[#allocation3] sm:$0xff] }
 0x43e   : > { %v7448_v23 = vpop.f32.mrf.mxu1  ;;  %6002 = vst.msk [vmem:[#allocation3 + $0x108] sm:$0xff] %vm538_vm4, %v5966_v40  ;;  %v6457_v38 = vld [vmem:[#allocation3 + $0xa0] sm:$0xff]  ;;  %v11745_v40 = vor.u32 %v12231_v63, %v11744_v59 }
 0x43f   : > { %v6886_v2 = vpop.f32.mrf.mxu0  ;;  %6422 = vst.msk [vmem:[#allocation3 + $0xa8] sm:$0xff] %vm538_vm4, %v6386_v46 }
 0x440   : > { %v6949_v26 = vadd.f32 %v6886_v2, %v6455_v27  ;;  %11551 = vmatmul.msk.bf16.gmra.mxu2 %vm538_vm4, %v12184_v36  ;;  %v14839_v27 = vld [vmem:[#allocation2 + $0x24] sm:$0xff]  ;;  %v9212_v13 = vrot.slane %v11745_v40, 1 }
 0x441   : > { %v7020_v9 = vld [vmem:[#allocation3 + $0x88] sm:$0xff]  ;;  %11635 = vmatmul.msk.bf16.gmra.mxu3 %vm538_vm4, %v8145_v51  ;;  %v6032_v40 = vld [vmem:[#allocation3 + $0xd8] sm:$0xff] }
 0x442   : > { %v7513_v50 = vadd.f32 %v7448_v23, %v7020_v9  ;;  %6985 = vst.msk [vmem:[#allocation3 + $0x90] sm:$0xff] %vm538_vm4, %v6949_v26  ;;  %11381 = vmatmul.msk.bf16.gmra.mxu0 %vm538_vm4, %v6774_v47  ;;  %v14837_v23 = vld [vmem:[#allocation2 + $0x2c] sm:$0xff]  ;;  %v9214_v9 = vsel %vm1254_vm2, %v9212_v13, %v9213_v58  ;;  %v12187_v13 = vld [vmem:[#allocation2 + $0x5c] sm:$0xff] }
 0x443   : > { %v5928_v61 = vpop.f32.mrf.mxu2  ;;  %v8158_v51 = vshll.u32 %v14837_v23, 16 }
 0x444   : > { %7549 = vst.msk [vmem:[#allocation3 + $0x88] sm:$0xff] %vm538_vm4, %v7513_v50  ;;  %v5967_v55 = vadd.f32 %v5928_v61, %v5473_v45  ;;  %v6330_v16 = vpop.f32.mrf.mxu3  ;;  %v8685_v50 = vshll.u32 %v14839_v27, 16  ;;  %v7569_v45 = vld [vmem:[#allocation3 + $0x8] sm:$0xff] }
 0x445   : > { %v6387_v44 = vadd.f32 %v6330_v16, %v6027_v22 }
 0x446   : > { %v7451_v11 = vpop.f32.mrf.mxu1  ;;  %6003 = vst.msk [vmem:[#allocation3 + $0x110] sm:$0xff] %vm538_vm4, %v5967_v55  ;;  %v6458_v26 = vld [vmem:[#allocation3 + $0xa8] sm:$0xff] }
 0x447   : > { %v6888_v39 = vpop.f32.mrf.mxu0  ;;  %6423 = vst.msk [vmem:[#allocation3 + $0xb0] sm:$0xff] %vm538_vm4, %v6387_v44  ;;  %v6030_v55 = vld [vmem:[#allocation3 + $0xc8] sm:$0xff]  ;;  %v8160_v44 = vrot.slane %v8158_v51, 1 }
 0x448   : > { %v6950_v4 = vadd.f32 %v6888_v39, %v6456_v53  ;;  %v8687_v53 = vrot.slane %v8685_v50, 1  ;;  %v7572_v50 = vld [vmem:[#allocation3 + $0x20] sm:$0xff] }
 0x449   : > { %v7021_v20 = vld [vmem:[#allocation3 + $0x90] sm:$0xff]  ;;  %11471 = vmatmul.msk.bf16.gmra.mxu1 %vm538_vm4, %v7339_v19 }
 0x44a   : > { %v7514_v3 = vadd.f32 %v7451_v11, %v7021_v20  ;;  %6986 = vst.msk [vmem:[#allocation3 + $0x98] sm:$0xff] %vm538_vm4, %v6950_v4  ;;  %v8681_v11 = vshrl.u32 %v14807_v49, 16  ;;  %v12186_v20 = vld [vmem:[#allocation2 + $0x54] sm:$0xff]  ;;  %v8161_v49 = vsel %vm706_vm3, %v8156_v34, %v8160_v44 }
 0x44b   : > { %v5930_v32 = vpop.f32.mrf.mxu2 }
 0x44c   : > { %7550 = vst.msk [vmem:[#allocation3 + $0x90] sm:$0xff] %vm538_vm4, %v7514_v3  ;;  %v5968_v43 = vadd.f32 %v5930_v32, %v5474_v18  ;;  %v6332_v17 = vpop.f32.mrf.mxu3  ;;  %v8683_v31 = vor.u32 %v8681_v11, %v14821_v6  ;;  %v14857_v3 = vld [vmem:[#allocation2 + $0x24] sm:$0xff]  ;;  %v14867_v6 = vld [vmem:[#allocation2 + $0x34] sm:$0xff] }
 0x44d   : > { %v6388_v28 = vadd.f32 %v6332_v17, %v6028_v62  ;;  %v9215_v62 = vrot.slane %v14857_v3, 1  ;;  %v6031_v17 = vld [vmem:[#allocation3 + $0xd0] sm:$0xff] }
 0x44e   : > { %v7453_v56 = vpop.f32.mrf.mxu1  ;;  %6004 = vst.msk [vmem:[#allocation3 + $0x118] sm:$0xff] %vm538_vm4, %v5968_v43  ;;  %v6459_v4 = vld [vmem:[#allocation3 + $0xb0] sm:$0xff]  ;;  %v8688_v18 = vsel %vm706_vm3, %v8683_v31, %v8687_v53 }
 0x44f   : > { %v6891_v15 = vpop.f32.mrf.mxu0  ;;  %6424 = vst.msk [vmem:[#allocation3 + $0xb8] sm:$0xff] %vm538_vm4, %v6388_v28  ;;  %v14869_v28 = vld [vmem:[#allocation2 + $0x2c] sm:$0xff]  ;;  %v9216_v29 = vsel %vm1254_vm2, %v9213_v58, %v9215_v62  ;;  %v8689_v58 = vshrl.u32 %v14839_v27, 16 }
 0x450   : > { %v6951_v8 = vadd.f32 %v6891_v15, %v6457_v38  ;;  %11552 = vmatmul.msk.bf16.gmra.mxu2 %vm538_vm4, %v12185_v0 }
 0x451   : > { %v7022_v25 = vld [vmem:[#allocation3 + $0x98] sm:$0xff]  ;;  %11636 = vmatmul.msk.bf16.gmra.mxu3 %vm538_vm4, %v8153_v35 }
 0x452   : > { %v7515_v21 = vadd.f32 %v7453_v56, %v7022_v25  ;;  %6987 = vst.msk [vmem:[#allocation3 + $0xa0] sm:$0xff] %vm538_vm4, %v6951_v8  ;;  %11724 = vmatmul.msk.bf16.vlgmr.msra.gmra.mxu0 %vm538_vm4, %v8680_v10  ;;  %v8166_v8 = vshll.u32 %v14867_v6, 16  ;;  %v8693_v25 = vshll.u32 %v14869_v28, 16  ;;  %v7571_v10 = vld [vmem:[#allocation3 + $0x18] sm:$0xff] }
 0x453   : > { %v7797_v52 = vpop.f32.mrf.mxu2 }
 0x454   : > { %7551 = vst.msk [vmem:[#allocation3 + $0x98] sm:$0xff] %vm538_vm4, %v7515_v21  ;;  %v6335_v1 = vpop.f32.mrf.mxu3  ;;  %v7887_v46 = vadd.f32 %v7797_v52, %v7568_v7  ;;  %v8162_v21 = vshrl.u32 %v14837_v23, 16  ;;  %v8168_v52 = vrot.slane %v8166_v8, 1  ;;  %v14887_v23 = vld [vmem:[#allocation2 + $0x2c] sm:$0xff] }
 0x455   : > { %v6389_v2 = vadd.f32 %v6335_v1, %v6029_v30  ;;  %v8695_v30 = vrot.slane %v8693_v25, 1  ;;  %v7574_v25 = vld [vmem:[#allocation3 + $0x30] sm:$0xff] }
 0x456   : > { %v7456_v36 = vpop.f32.mrf.mxu1  ;;  %7923 = vst.msk [vmem:[#allocation3] sm:$0xff] %vm538_vm4, %v7887_v46  ;;  %v6460_v15 = vld [vmem:[#allocation3 + $0xb8] sm:$0xff] }
 0x457   : > { %v6893_v12 = vpop.f32.mrf.mxu0  ;;  %6425 = vst.msk [vmem:[#allocation3 + $0xc0] sm:$0xff] %vm538_vm4, %v6389_v2 }
 0x458   : > { %v6952_v5 = vadd.f32 %v6893_v12, %v6458_v26  ;;  %v8164_v26 = vor.u32 %v8162_v21, %v8160_v44  ;;  %v8691_v12 = vor.u32 %v8689_v58, %v8687_v53 }
 0x459   : > { %v7023_v47 = vld [vmem:[#allocation3 + $0xa0] sm:$0xff]  ;;  %11814 = vmatmul.msk.bf16.vlgmr.msra.gmra.mxu1 %vm538_vm4, %v9214_v9 }
 0x45a   : > { %v7516_v14 = vadd.f32 %v7456_v36, %v7023_v47  ;;  %6988 = vst.msk [vmem:[#allocation3 + $0xa8] sm:$0xff] %vm538_vm4, %v6952_v5  ;;  %v8169_v27 = vsel %vm706_vm3, %v8164_v26, %v8168_v52  ;;  %v8696_v47 = vsel %vm706_vm3, %v8691_v12, %v8695_v30 }
 0x45b   : > { %v7799_v61 = vpop.f32.mrf.mxu2 }
 0x45c   : > { %7552 = vst.msk [vmem:[#allocation3 + $0xa0] sm:$0xff] %vm538_vm4, %v7516_v14  ;;  %v6337_v22 = vpop.f32.mrf.mxu3  ;;  %v7888_v16 = vadd.f32 %v7799_v61, %v7569_v45  ;;  %v9217_v45 = vrot.slane %v14887_v23, 1  ;;  %v6033_v61 = vld [vmem:[#allocation3 + $0xe0] sm:$0xff] }
 0x45d   : > { %v6390_v39 = vadd.f32 %v6337_v22, %v6030_v55  ;;  %v14897_v22 = vld [vmem:[#allocation2 + $0x3c] sm:$0xff] }
 0x45e   : > { %v7458_v41 = vpop.f32.mrf.mxu1  ;;  %7924 = vst.msk [vmem:[#allocation3 + $0x8] sm:$0xff] %vm538_vm4, %v7888_v16  ;;  %v6461_v2 = vld [vmem:[#allocation3 + $0xc0] sm:$0xff]  ;;  %v14899_v16 = vld [vmem:[#allocation2 + $0x34] sm:$0xff] }
 0x45f   : > { %v6896_v19 = vpop.f32.mrf.mxu0  ;;  %6426 = vst.msk [vmem:[#allocation3 + $0xc8] sm:$0xff] %vm538_vm4, %v6390_v39  ;;  %v8701_v34 = vshll.u32 %v14899_v16, 16 }
 0x460   : > { %v6953_v42 = vadd.f32 %v6896_v19, %v6459_v4  ;;  %11553 = vmatmul.msk.bf16.gmra.mxu2 %vm538_vm4, %v12186_v20  ;;  %v9218_v4 = vsel %vm1254_vm2, %v9215_v62, %v9217_v45  ;;  %v8174_v20 = vshll.u32 %v14897_v22, 16 }
 0x461   : > { %v7024_v37 = vld [vmem:[#allocation3 + $0xa8] sm:$0xff]  ;;  %11637 = vmatmul.msk.bf16.gmra.mxu3 %vm538_vm4, %v8161_v49  ;;  %v8697_v49 = vshrl.u32 %v14869_v28, 16  ;;  %v8703_v62 = vrot.slane %v8701_v34, 1  ;;  %v7576_v34 = vld [vmem:[#allocation3 + $0x40] sm:$0xff] }
 0x462   : > { %v7517_v32 = vadd.f32 %v7458_v41, %v7024_v37  ;;  %6989 = vst.msk [vmem:[#allocation3 + $0xb0] sm:$0xff] %vm538_vm4, %v6953_v42  ;;  %11725 = vmatmul.msk.bf16.gmra.mxu0 %vm538_vm4, %v8688_v18  ;;  %v7573_v42 = vld [vmem:[#allocation3 + $0x28] sm:$0xff] }
 0x463   : > { %v7802_v43 = vpop.f32.mrf.mxu2  ;;  %v6034_v18 = vld [vmem:[#allocation3 + $0xe8] sm:$0xff] }
 0x464   : > { %7553 = vst.msk [vmem:[#allocation3 + $0xa8] sm:$0xff] %vm538_vm4, %v7517_v32  ;;  %v6340_v57 = vpop.f32.mrf.mxu3  ;;  %v7889_v33 = vadd.f32 %v7802_v43, %v7570_v48  ;;  %v8170_v48 = vshrl.u32 %v14867_v6, 16  ;;  %v8176_v43 = vrot.slane %v8174_v20, 1  ;;  %v14917_v28 = vld [vmem:[#allocation2 + $0x34] sm:$0xff] }
 0x465   : > { %v6391_v56 = vadd.f32 %v6340_v57, %v6031_v17 }
 0x466   : > { %v7461_v38 = vpop.f32.mrf.mxu1  ;;  %7925 = vst.msk [vmem:[#allocation3 + $0x10] sm:$0xff] %vm538_vm4, %v7889_v33  ;;  %v6462_v53 = vld [vmem:[#allocation3 + $0xc8] sm:$0xff] }
 0x467   : > { %v6898_v0 = vpop.f32.mrf.mxu0  ;;  %6427 = vst.msk [vmem:[#allocation3 + $0xd0] sm:$0xff] %vm538_vm4, %v6391_v56 }
 0x468   : > { %v6954_v60 = vadd.f32 %v6898_v0, %v6460_v15  ;;  %v8172_v15 = vor.u32 %v8170_v48, %v8168_v52  ;;  %v8699_v0 = vor.u32 %v8697_v49, %v8695_v30 }
 0x469   : > { %v7025_v63 = vld [vmem:[#allocation3 + $0xb0] sm:$0xff]  ;;  %11815 = vmatmul.msk.bf16.gmra.mxu1 %vm538_vm4, %v9216_v29 }
 0x46a   : > { %v7518_v35 = vadd.f32 %v7461_v38, %v7025_v63  ;;  %6990 = vst.msk [vmem:[#allocation3 + $0xb8] sm:$0xff] %vm538_vm4, %v6954_v60  ;;  %v12188_v38 = vld [vmem:[#allocation2 + $0x64] sm:$0xff]  ;;  %v8177_v6 = vsel %vm706_vm3, %v8172_v15, %v8176_v43  ;;  %v8704_v63 = vsel %vm706_vm3, %v8699_v0, %v8703_v62 }
 0x46b   : > { %v7804_v59 = vpop.f32.mrf.mxu2 }
 0x46c   : > { %7554 = vst.msk [vmem:[#allocation3 + $0xb0] sm:$0xff] %vm538_vm4, %v7518_v35  ;;  %v6342_v24 = vpop.f32.mrf.mxu3  ;;  %v7890_v7 = vadd.f32 %v7804_v59, %v7571_v10  ;;  %v9219_v10 = vrot.slane %v14917_v28, 1  ;;  %v6035_v59 = vld [vmem:[#allocation3 + $0xf0] sm:$0xff] }
 0x46d   : > { %v6392_v1 = vadd.f32 %v6342_v24, %v6032_v40  ;;  %v14927_v24 = vld [vmem:[#allocation2 + $0x44] sm:$0xff] }
 0x46e   : > { %v7463_v46 = vpop.f32.mrf.mxu1  ;;  %7926 = vst.msk [vmem:[#allocation3 + $0x18] sm:$0xff] %vm538_vm4, %v7890_v7  ;;  %v6463_v33 = vld [vmem:[#allocation3 + $0xd0] sm:$0xff] }
 0x46f   : > { %v6901_v36 = vpop.f32.mrf.mxu0  ;;  %6428 = vst.msk [vmem:[#allocation3 + $0xd8] sm:$0xff] %vm538_vm4, %v6392_v1  ;;  %v14929_v7 = vld [vmem:[#allocation2 + $0x3c] sm:$0xff] }
 0x470   : > { %v6955_v5 = vadd.f32 %v6901_v36, %v6461_v2  ;;  %11554 = vmatmul.msk.bf16.gmra.mxu2 %vm538_vm4, %v12187_v13  ;;  %v9220_v2 = vsel %vm1254_vm2, %v9217_v45, %v9219_v10  ;;  %v8182_v13 = vshll.u32 %v14927_v24, 16  ;;  %v8709_v26 = vshll.u32 %v14929_v7, 16 }
 0x471   : > { %v7026_v9 = vld [vmem:[#allocation3 + $0xb8] sm:$0xff]  ;;  %11638 = vmatmul.msk.bf16.gmra.mxu3 %vm538_vm4, %v8169_v27  ;;  %v8705_v27 = vshrl.u32 %v14899_v16, 16 }
 0x472   : > { %v7519_v51 = vadd.f32 %v7463_v46, %v7026_v9  ;;  %6991 = vst.msk [vmem:[#allocation3 + $0xc0] sm:$0xff] %vm538_vm4, %v6955_v5  ;;  %11726 = vmatmul.msk.bf16.gmra.mxu0 %vm538_vm4, %v8696_v47  ;;  %v7575_v5 = vld [vmem:[#allocation3 + $0x38] sm:$0xff]  ;;  %v8711_v45 = vrot.slane %v8709_v26, 1  ;;  %v7578_v26 = vld [vmem:[#allocation3 + $0x50] sm:$0xff] }
 0x473   : > { %v7807_v14 = vpop.f32.mrf.mxu2  ;;  %v6036_v47 = vld [vmem:[#allocation3 + $0xf8] sm:$0xff] }
 0x474   : > { %7555 = vst.msk [vmem:[#allocation3 + $0xb8] sm:$0xff] %vm538_vm4, %v7519_v51  ;;  %v6345_v54 = vpop.f32.mrf.mxu3  ;;  %v7891_v55 = vadd.f32 %v7807_v14, %v7572_v50  ;;  %v8178_v50 = vshrl.u32 %v14897_v22, 16  ;;  %v8184_v14 = vrot.slane %v8182_v13, 1  ;;  %v14947_v16 = vld [vmem:[#allocation2 + $0x3c] sm:$0xff] }
 0x475   : > { %v6393_v44 = vadd.f32 %v6345_v54, %v6033_v61 }
 0x476   : > { %v7466_v11 = vpop.f32.mrf.mxu1  ;;  %7927 = vst.msk [vmem:[#allocation3 + $0x20] sm:$0xff] %vm538_vm4, %v7891_v55  ;;  %v6464_v30 = vld [vmem:[#allocation3 + $0xd8] sm:$0xff] }
 0x477   : > { %v6903_v39 = vpop.f32.mrf.mxu0  ;;  %6429 = vst.msk [vmem:[#allocation3 + $0xe0] sm:$0xff] %vm538_vm4, %v6393_v44 }
 0x478   : > { %v6956_v41 = vadd.f32 %v6903_v39, %v6462_v53  ;;  %v8180_v53 = vor.u32 %v8178_v50, %v8176_v43  ;;  %v8707_v39 = vor.u32 %v8705_v27, %v8703_v62 }
 0x479   : > { %v7027_v19 = vld [vmem:[#allocation3 + $0xc0] sm:$0xff]  ;;  %11816 = vmatmul.msk.bf16.gmra.mxu1 %vm538_vm4, %v9218_v4 }
 0x47a   : > { %v7520_v31 = vadd.f32 %v7466_v11, %v7027_v19  ;;  %6992 = vst.msk [vmem:[#allocation3 + $0xc8] sm:$0xff] %vm538_vm4, %v6956_v41  ;;  %v12189_v11 = vld [vmem:[#allocation2 + $0x6c] sm:$0xff]  ;;  %v8185_v22 = vsel %vm706_vm3, %v8180_v53, %v8184_v14  ;;  %v8712_v19 = vsel %vm706_vm3, %v8707_v39, %v8711_v45 }
 0x47b   : > { %v7809_v37 = vpop.f32.mrf.mxu2 }
 0x47c   : > { %7556 = vst.msk [vmem:[#allocation3 + $0xc0] sm:$0xff] %vm538_vm4, %v7520_v31  ;;  %v6347_v3 = vpop.f32.mrf.mxu3  ;;  %v7892_v32 = vadd.f32 %v7809_v37, %v7573_v42  ;;  %v9221_v42 = vrot.slane %v14947_v16, 1  ;;  %v6037_v37 = vld [vmem:[#allocation3 + $0x100] sm:$0xff] }
 0x47d   : > { %v6394_v17 = vadd.f32 %v6347_v3, %v6034_v18  ;;  %v14957_v3 = vld [vmem:[#allocation2 + $0x4c] sm:$0xff] }
 0x47e   : > { %v7468_v57 = vpop.f32.mrf.mxu1  ;;  %7928 = vst.msk [vmem:[#allocation3 + $0x28] sm:$0xff] %vm538_vm4, %v7892_v32  ;;  %v6465_v55 = vld [vmem:[#allocation3 + $0xe0] sm:$0xff] }
 0x47f   : > { %v6906_v56 = vpop.f32.mrf.mxu0  ;;  %6430 = vst.msk [vmem:[#allocation3 + $0xe8] sm:$0xff] %vm538_vm4, %v6394_v17  ;;  %v14959_v32 = vld [vmem:[#allocation2 + $0x44] sm:$0xff] }
 0x480   : > { %v6957_v60 = vadd.f32 %v6906_v56, %v6463_v33  ;;  %11555 = vmatmul.msk.bf16.gmra.mxu2 %vm538_vm4, %v12188_v38  ;;  %v9222_v33 = vsel %vm1254_vm2, %v9219_v10, %v9221_v42  ;;  %v8190_v38 = vshll.u32 %v14957_v3, 16  ;;  %v8717_v15 = vshll.u32 %v14959_v32, 16 }
 0x481   : > { %v7028_v29 = vld [vmem:[#allocation3 + $0xc8] sm:$0xff]  ;;  %11639 = vmatmul.msk.bf16.gmra.mxu3 %vm538_vm4, %v8177_v6  ;;  %v8713_v6 = vshrl.u32 %v14929_v7, 16  ;;  %v14977_v7 = vld [vmem:[#allocation2 + $0x44] sm:$0xff] }
 0x482   : > { %v7521_v8 = vadd.f32 %v7468_v57, %v7028_v29  ;;  %6993 = vst.msk [vmem:[#allocation3 + $0xd0] sm:$0xff] %vm538_vm4, %v6957_v60  ;;  %11727 = vmatmul.msk.bf16.gmra.mxu0 %vm538_vm4, %v8704_v63  ;;  %v7577_v60 = vld [vmem:[#allocation3 + $0x48] sm:$0xff]  ;;  %v8719_v10 = vrot.slane %v8717_v15, 1  ;;  %v7580_v15 = vld [vmem:[#allocation3 + $0x60] sm:$0xff] }
 0x483   : > { %v7812_v35 = vpop.f32.mrf.mxu2  ;;  %v6038_v63 = vld [vmem:[#allocation3 + $0x108] sm:$0xff] }
 0x484   : > { %7557 = vst.msk [vmem:[#allocation3 + $0xc8] sm:$0xff] %vm538_vm4, %v7521_v8  ;;  %v6350_v21 = vpop.f32.mrf.mxu3  ;;  %v7893_v40 = vadd.f32 %v7812_v35, %v7574_v25  ;;  %v8186_v25 = vshrl.u32 %v14927_v24, 16  ;;  %v8192_v35 = vrot.slane %v8190_v38, 1 }
 0x485   : > { %v6395_v52 = vadd.f32 %v6350_v21, %v6035_v59 }
 0x486   : > { %v7471_v58 = vpop.f32.mrf.mxu1  ;;  %7929 = vst.msk [vmem:[#allocation3 + $0x30] sm:$0xff] %vm538_vm4, %v7893_v40  ;;  %v6466_v62 = vld [vmem:[#allocation3 + $0xe8] sm:$0xff] }
 0x487   : > { %v6908_v1 = vpop.f32.mrf.mxu0  ;;  %6431 = vst.msk [vmem:[#allocation3 + $0xf0] sm:$0xff] %vm538_vm4, %v6395_v52 }
 0x488   : > { %v6958_v46 = vadd.f32 %v6908_v1, %v6464_v30  ;;  %v8188_v30 = vor.u32 %v8186_v25, %v8184_v14  ;;  %v8715_v1 = vor.u32 %v8713_v6, %v8711_v45  ;;  %v7959_v6 = vld [vmem:[#allocation3] sm:$0xff] }
 0x489   : > { %v7029_v36 = vld [vmem:[#allocation3 + $0xd0] sm:$0xff]  ;;  %11817 = vmatmul.msk.bf16.gmra.mxu1 %vm538_vm4, %v9220_v2 }
 0x48a   : > { %v7522_v12 = vadd.f32 %v7471_v58, %v7029_v36  ;;  %6994 = vst.msk [vmem:[#allocation3 + $0xd8] sm:$0xff] %vm538_vm4, %v6958_v46  ;;  %v12190_v58 = vld [vmem:[#allocation2 + $0x74] sm:$0xff]  ;;  %v8193_v24 = vsel %vm706_vm3, %v8188_v30, %v8192_v35  ;;  %v8720_v36 = vsel %vm706_vm3, %v8715_v1, %v8719_v10 }
 0x48b   : > { %v7814_v9 = vpop.f32.mrf.mxu2 }
 0x48c   : > { %7558 = vst.msk [vmem:[#allocation3 + $0xd0] sm:$0xff] %vm538_vm4, %v7522_v12  ;;  %v6352_v23 = vpop.f32.mrf.mxu3  ;;  %v7894_v51 = vadd.f32 %v7814_v9, %v7575_v5  ;;  %v9223_v5 = vrot.slane %v14977_v7, 1  ;;  %v6039_v9 = vld [vmem:[#allocation3 + $0x110] sm:$0xff]  ;;  %v7960_v7 = vld [vmem:[#allocation3 + $0x8] sm:$0xff] }
 0x48d   : > { %v6396_v61 = vadd.f32 %v6352_v23, %v6036_v47  ;;  %v14987_v23 = vld [vmem:[#allocation2 + $0x54] sm:$0xff] }
 0x48e   : > { %v7473_v54 = vpop.f32.mrf.mxu1  ;;  %7930 = vst.msk [vmem:[#allocation3 + $0x38] sm:$0xff] %vm538_vm4, %v7894_v51  ;;  %v6467_v40 = vld [vmem:[#allocation3 + $0xf0] sm:$0xff]  ;;  %v14989_v51 = vld [vmem:[#allocation2 + $0x4c] sm:$0xff] }
 0x48f   : > { %v6911_v44 = vpop.f32.mrf.mxu0  ;;  %6432 = vst.msk [vmem:[#allocation3 + $0xf8] sm:$0xff] %vm538_vm4, %v6396_v61  ;;  %v8725_v53 = vshll.u32 %v14989_v51, 16 }
 0x490   : > { %v6959_v41 = vadd.f32 %v6911_v44, %v6465_v55  ;;  %11556 = vmatmul.msk.bf16.gmra.mxu2 %vm538_vm4, %v12189_v11  ;;  %v9224_v55 = vsel %vm1254_vm2, %v9221_v42, %v9223_v5  ;;  %v8198_v11 = vshll.u32 %v14987_v23, 16 }
 0x491   : > { %v7030_v4 = vld [vmem:[#allocation3 + $0xd8] sm:$0xff]  ;;  %11640 = vmatmul.msk.bf16.gmra.mxu3 %vm538_vm4, %v8185_v22  ;;  %v8721_v22 = vshrl.u32 %v14959_v32, 16  ;;  %v8727_v42 = vrot.slane %v8725_v53, 1  ;;  %v15007_v32 = vld [vmem:[#allocation2 + $0x4c] sm:$0xff]  ;;  %v7582_v53 = vld [vmem:[#allocation3 + $0x70] sm:$0xff] }
 0x492   : > { %v7523_v20 = vadd.f32 %v7473_v54, %v7030_v4  ;;  %6995 = vst.msk [vmem:[#allocation3 + $0xe0] sm:$0xff] %vm538_vm4, %v6959_v41  ;;  %11728 = vmatmul.msk.bf16.gmra.mxu0 %vm538_vm4, %v8712_v19  ;;  %v7579_v41 = vld [vmem:[#allocation3 + $0x58] sm:$0xff] }
 0x493   : > { %v7817_v31 = vpop.f32.mrf.mxu2  ;;  %v6040_v19 = vld [vmem:[#allocation3 + $0x118] sm:$0xff] }
 0x494   : > { %7559 = vst.msk [vmem:[#allocation3 + $0xd8] sm:$0xff] %vm538_vm4, %v7523_v20  ;;  %v6355_v49 = vpop.f32.mrf.mxu3  ;;  %v7895_v18 = vadd.f32 %v7817_v31, %v7576_v34  ;;  %v8194_v34 = vshrl.u32 %v14957_v3, 16  ;;  %v8200_v31 = vrot.slane %v8198_v11, 1 }
 0x495   : > { %v6397_v48 = vadd.f32 %v6355_v49, %v6037_v37 }
 0x496   : > { %v7476_v43 = vpop.f32.mrf.mxu1  ;;  %7931 = vst.msk [vmem:[#allocation3 + $0x40] sm:$0xff] %vm538_vm4, %v7895_v18  ;;  %v6468_v45 = vld [vmem:[#allocation3 + $0xf8] sm:$0xff] }
 0x497   : > { %v6913_v17 = vpop.f32.mrf.mxu0  ;;  %6433 = vst.msk [vmem:[#allocation3 + $0x100] sm:$0xff] %vm538_vm4, %v6397_v48 }
 0x498   : > { %v6960_v57 = vadd.f32 %v6913_v17, %v6466_v62  ;;  %v8196_v62 = vor.u32 %v8194_v34, %v8192_v35  ;;  %v8723_v17 = vor.u32 %v8721_v22, %v8719_v10  ;;  %v7961_v22 = vld [vmem:[#allocation3 + $0x10] sm:$0xff] }
 0x499   : > { %v7031_v56 = vld [vmem:[#allocation3 + $0xe0] sm:$0xff]  ;;  %11818 = vmatmul.msk.bf16.gmra.mxu1 %vm538_vm4, %v9222_v33 }
 0x49a   : > { %v7524_v0 = vadd.f32 %v7476_v43, %v7031_v56  ;;  %6996 = vst.msk [vmem:[#allocation3 + $0xe8] sm:$0xff] %vm538_vm4, %v6960_v57  ;;  %v12191_v43 = vld [vmem:[#allocation2 + $0x7c] sm:$0xff]  ;;  %v8201_v3 = vsel %vm706_vm3, %v8196_v62, %v8200_v31  ;;  %v8728_v56 = vsel %vm706_vm3, %v8723_v17, %v8727_v42 }
 0x49b   : > { %v7819_v29 = vpop.f32.mrf.mxu2 }
 0x49c   : > { %7560 = vst.msk [vmem:[#allocation3 + $0xe0] sm:$0xff] %vm538_vm4, %v7524_v0  ;;  %v6357_v28 = vpop.f32.mrf.mxu3  ;;  %v7896_v8 = vadd.f32 %v7819_v29, %v7577_v60  ;;  %v9225_v60 = vrot.slane %v15007_v32, 1  ;;  %v7962_v32 = vld [vmem:[#allocation3 + $0x18] sm:$0xff] }
 0x49d   : > { %v6398_v59 = vadd.f32 %v6357_v28, %v6038_v63  ;;  %v15017_v28 = vld [vmem:[#allocation2 + $0x5c] sm:$0xff] }
 0x49e   : > { %v7478_v21 = vpop.f32.mrf.mxu1  ;;  %7932 = vst.msk [vmem:[#allocation3 + $0x48] sm:$0xff] %vm538_vm4, %v7896_v8  ;;  %v6469_v18 = vld [vmem:[#allocation3 + $0x100] sm:$0xff]  ;;  %v15019_v8 = vld [vmem:[#allocation2 + $0x54] sm:$0xff] }
 0x49f   : > { %v6916_v52 = vpop.f32.mrf.mxu0  ;;  %6434 = vst.msk [vmem:[#allocation3 + $0x108] sm:$0xff] %vm538_vm4, %v6398_v59  ;;  %v8733_v30 = vshll.u32 %v15019_v8, 16 }
 0x4a0   : > { %v6961_v46 = vadd.f32 %v6916_v52, %v6467_v40  ;;  %11557 = vmatmul.msk.bf16.gmra.mxu2 %vm538_vm4, %v12190_v58  ;;  %v9226_v40 = vsel %vm1254_vm2, %v9223_v5, %v9225_v60  ;;  %v8206_v58 = vshll.u32 %v15017_v28, 16 }
 0x4a1   : > { %v7032_v2 = vld [vmem:[#allocation3 + $0xe8] sm:$0xff]  ;;  %11641 = vmatmul.msk.bf16.gmra.mxu3 %vm538_vm4, %v8193_v24  ;;  %v8729_v24 = vshrl.u32 %v14989_v51, 16  ;;  %v8735_v5 = vrot.slane %v8733_v30, 1  ;;  %v7584_v30 = vld [vmem:[#allocation3 + $0x80] sm:$0xff] }
 0x4a2   : > { %v7525_v13 = vadd.f32 %v7478_v21, %v7032_v2  ;;  %6997 = vst.msk [vmem:[#allocation3 + $0xf0] sm:$0xff] %vm538_vm4, %v6961_v46  ;;  %11729 = vmatmul.msk.bf16.gmra.mxu0 %vm538_vm4, %v8720_v36  ;;  %v7581_v46 = vld [vmem:[#allocation3 + $0x68] sm:$0xff] }
 0x4a3   : > { %v7822_v12 = vpop.f32.mrf.mxu2  ;;  %v15037_v51 = vld [vmem:[#allocation2 + $0x54] sm:$0xff] }
 0x4a4   : > { %7561 = vst.msk [vmem:[#allocation3 + $0xe8] sm:$0xff] %vm538_vm4, %v7525_v13  ;;  %v6360_v27 = vpop.f32.mrf.mxu3  ;;  %v7897_v47 = vadd.f32 %v7822_v12, %v7578_v26  ;;  %v8202_v26 = vshrl.u32 %v14987_v23, 16  ;;  %v8208_v12 = vrot.slane %v8206_v58, 1 }
 0x4a5   : > { %v6399_v50 = vadd.f32 %v6360_v27, %v6039_v9 }
 0x4a6   : > { %v7481_v14 = vpop.f32.mrf.mxu1  ;;  %7933 = vst.msk [vmem:[#allocation3 + $0x50] sm:$0xff] %vm538_vm4, %v7897_v47  ;;  %v6470_v10 = vld [vmem:[#allocation3 + $0x108] sm:$0xff] }
 0x4a7   : > { %v6918_v61 = vpop.f32.mrf.mxu0  ;;  %6435 = vst.msk [vmem:[#allocation3 + $0x110] sm:$0xff] %vm538_vm4, %v6399_v50 }
 0x4a8   : > { %v6962_v54 = vadd.f32 %v6918_v61, %v6468_v45  ;;  %v8204_v45 = vor.u32 %v8202_v26, %v8200_v31  ;;  %v8731_v61 = vor.u32 %v8729_v24, %v8727_v42  ;;  %v7963_v24 = vld [vmem:[#allocation3 + $0x20] sm:$0xff] }
 0x4a9   : > { %v7033_v44 = vld [vmem:[#allocation3 + $0xf0] sm:$0xff]  ;;  %11819 = vmatmul.msk.bf16.gmra.mxu1 %vm538_vm4, %v9224_v55 }
 0x4aa   : > { %v7526_v39 = vadd.f32 %v7481_v14, %v7033_v44  ;;  %6998 = vst.msk [vmem:[#allocation3 + $0xf8] sm:$0xff] %vm538_vm4, %v6962_v54  ;;  %v12192_v14 = vld [vmem:[#allocation2 + $0x84] sm:$0xff]  ;;  %v8209_v23 = vsel %vm706_vm3, %v8204_v45, %v8208_v12  ;;  %v8736_v44 = vsel %vm706_vm3, %v8731_v61, %v8735_v5 }
 0x4ab   : > { %v7824_v4 = vpop.f32.mrf.mxu2 }
 0x4ac   : > { %7562 = vst.msk [vmem:[#allocation3 + $0xf0] sm:$0xff] %vm538_vm4, %v7526_v39  ;;  %v6362_v16 = vpop.f32.mrf.mxu3  ;;  %v7898_v20 = vadd.f32 %v7824_v4, %v7579_v41  ;;  %v9227_v41 = vrot.slane %v15037_v51, 1  ;;  %v7964_v51 = vld [vmem:[#allocation3 + $0x28] sm:$0xff] }
 0x4ad   : > { %v6400_v37 = vadd.f32 %v6362_v16, %v6040_v19  ;;  %v15047_v16 = vld [vmem:[#allocation2 + $0x64] sm:$0xff] }
 0x4ae   : > { %v7483_v49 = vpop.f32.mrf.mxu1  ;;  %7934 = vst.msk [vmem:[#allocation3 + $0x58] sm:$0xff] %vm538_vm4, %v7898_v20  ;;  %v6471_v47 = vld [vmem:[#allocation3 + $0x110] sm:$0xff] }
 0x4af   : > { %v6921_v48 = vpop.f32.mrf.mxu0  ;;  %6436 = vst.msk [vmem:[#allocation3 + $0x118] sm:$0xff] %vm538_vm4, %v6400_v37  ;;  %v15049_v20 = vld [vmem:[#allocation2 + $0x5c] sm:$0xff] }
 0x4b0   : > { %v6963_v57 = vadd.f32 %v6921_v48, %v6469_v18  ;;  %11558 = vmatmul.msk.bf16.gmra.mxu2 %vm538_vm4, %v12191_v43  ;;  %v9228_v18 = vsel %vm1254_vm2, %v9225_v60, %v9227_v41  ;;  %v8214_v43 = vshll.u32 %v15047_v16, 16  ;;  %v8741_v62 = vshll.u32 %v15049_v20, 16 }
 0x4b1   : > { %v7034_v33 = vld [vmem:[#allocation3 + $0xf8] sm:$0xff]  ;;  %11642 = vmatmul.msk.bf16.gmra.mxu3 %vm538_vm4, %v8201_v3  ;;  %v8737_v3 = vshrl.u32 %v15019_v8, 16 }
 0x4b2   : > { %v7527_v38 = vadd.f32 %v7483_v49, %v7034_v33  ;;  %6999 = vst.msk [vmem:[#allocation3 + $0x100] sm:$0xff] %vm538_vm4, %v6963_v57  ;;  %11730 = vmatmul.msk.bf16.gmra.mxu0 %vm538_vm4, %v8728_v56  ;;  %v7583_v57 = vld [vmem:[#allocation3 + $0x78] sm:$0xff]  ;;  %v8743_v60 = vrot.slane %v8741_v62, 1 }
 0x4b3   : > { %v7827_v0 = vpop.f32.mrf.mxu2  ;;  %v15067_v8 = vld [vmem:[#allocation2 + $0x5c] sm:$0xff] }
 0x4b4   : > { %7563 = vst.msk [vmem:[#allocation3 + $0xf8] sm:$0xff] %vm538_vm4, %v7527_v38  ;;  %v7899_v29 = vadd.f32 %v7827_v0, %v7580_v15  ;;  %v8340_v63 = vpop.f32.mrf.mxu3  ;;  %v8210_v15 = vshrl.u32 %v15017_v28, 16  ;;  %v8216_v0 = vrot.slane %v8214_v43, 1 }
 0x4b5   : > { %v8430_v25 = vadd.f32 %v8340_v63, %v7959_v6 }
 0x4b6   : > { %v7486_v35 = vpop.f32.mrf.mxu1  ;;  %7935 = vst.msk [vmem:[#allocation3 + $0x60] sm:$0xff] %vm538_vm4, %v7899_v29  ;;  %v6472_v42 = vld [vmem:[#allocation3 + $0x118] sm:$0xff] }
 0x4b7   : > { %v6923_v59 = vpop.f32.mrf.mxu0  ;;  %8466 = vst.msk [vmem:[#allocation3] sm:$0xff] %vm538_vm4, %v8430_v25 }
 0x4b8   : > { %v6964_v21 = vadd.f32 %v6923_v59, %v6470_v10  ;;  %v8212_v10 = vor.u32 %v8210_v15, %v8208_v12  ;;  %v8739_v59 = vor.u32 %v8737_v3, %v8735_v5  ;;  %v7586_v3 = vld [vmem:[#allocation3 + $0x90] sm:$0xff] }
 0x4b9   : > { %v7035_v52 = vld [vmem:[#allocation3 + $0x100] sm:$0xff]  ;;  %11820 = vmatmul.msk.bf16.gmra.mxu1 %vm538_vm4, %v9226_v40 }
 0x4ba   : > { %v7528_v1 = vadd.f32 %v7486_v35, %v7035_v52  ;;  %7000 = vst.msk [vmem:[#allocation3 + $0x108] sm:$0xff] %vm538_vm4, %v6964_v21  ;;  %v12193_v35 = vld [vmem:[#allocation2 + $0x8c] sm:$0xff]  ;;  %v8217_v28 = vsel %vm706_vm3, %v8212_v10, %v8216_v0  ;;  %v8744_v52 = vsel %vm706_vm3, %v8739_v59, %v8743_v60 }
 0x4bb   : > { %v7829_v2 = vpop.f32.mrf.mxu2 }
 0x4bc   : > { %7564 = vst.msk [vmem:[#allocation3 + $0x100] sm:$0xff] %vm538_vm4, %v7528_v1  ;;  %v7900_v36 = vadd.f32 %v7829_v2, %v7581_v46  ;;  %v8342_v13 = vpop.f32.mrf.mxu3  ;;  %v9229_v46 = vrot.slane %v15067_v8, 1 }
 0x4bd   : > { %v8431_v9 = vadd.f32 %v8342_v13, %v7960_v7  ;;  %v15077_v7 = vld [vmem:[#allocation2 + $0x6c] sm:$0xff]  ;;  %v15079_v13 = vld [vmem:[#allocation2 + $0x64] sm:$0xff] }
 0x4be   : > { %v7488_v27 = vpop.f32.mrf.mxu1  ;;  %7936 = vst.msk [vmem:[#allocation3 + $0x68] sm:$0xff] %vm538_vm4, %v7900_v36  ;;  %v8502_v63 = vld [vmem:[#allocation3] sm:$0xff]  ;;  %v8749_v45 = vshll.u32 %v15079_v13, 16 }
 0x4bf   : > { %v6926_v50 = vpop.f32.mrf.mxu0  ;;  %8467 = vst.msk [vmem:[#allocation3 + $0x8] sm:$0xff] %vm538_vm4, %v8431_v9 }
 0x4c0   : > { %v6965_v54 = vadd.f32 %v6926_v50, %v6471_v47  ;;  %11559 = vmatmul.msk.bf16.gmra.mxu2 %vm538_vm4, %v12192_v14  ;;  %v9230_v47 = vsel %vm1254_vm2, %v9227_v41, %v9229_v46  ;;  %v8222_v14 = vshll.u32 %v15077_v7, 16  ;;  %v15097_v41 = vrot.slane %v8749_v45, 1 }
 0x4c1   : > { %v7036_v55 = vld [vmem:[#allocation3 + $0x108] sm:$0xff]  ;;  %11643 = vmatmul.msk.bf16.gmra.mxu3 %vm538_vm4, %v8209_v23  ;;  %v8745_v23 = vshrl.u32 %v15049_v20, 16 }
 0x4c2   : > { %v7529_v11 = vadd.f32 %v7488_v27, %v7036_v55  ;;  %7001 = vst.msk [vmem:[#allocation3 + $0x110] sm:$0xff] %vm538_vm4, %v6965_v54  ;;  %11731 = vmatmul.msk.bf16.gmra.mxu0 %vm538_vm4, %v8736_v44  ;;  %v7585_v54 = vld [vmem:[#allocation3 + $0x88] sm:$0xff] }
 0x4c3   : > { %v7832_v39 = vpop.f32.mrf.mxu2 }
 0x4c4   : > { %7565 = vst.msk [vmem:[#allocation3 + $0x108] sm:$0xff] %vm538_vm4, %v7529_v11  ;;  %v7901_v4 = vadd.f32 %v7832_v39, %v7582_v53  ;;  %v8345_v19 = vpop.f32.mrf.mxu3  ;;  %v8218_v53 = vshrl.u32 %v15047_v16, 16  ;;  %v15095_v39 = vrot.slane %v8222_v14, 1  ;;  %v12250_v16 = vld [vmem:[#allocation2 + $0x1c] sm:$0xff]  ;;  %v8226_v14 = vshrl.u32 %v15077_v7, 16 }
 0x4c5   : > { %v8432_v34 = vadd.f32 %v8345_v19, %v7961_v22  ;;  %v9656_v15 = vshll.u32 %v12250_v16, 16 }
 0x4c6   : > { %v7491_v31 = vpop.f32.mrf.mxu1  ;;  %7937 = vst.msk [vmem:[#allocation3 + $0x70] sm:$0xff] %vm538_vm4, %v7901_v4  ;;  %v8503_v5 = vld [vmem:[#allocation3 + $0x8] sm:$0xff] }
 0x4c7   : > { %v6928_v37 = vpop.f32.mrf.mxu0  ;;  %8468 = vst.msk [vmem:[#allocation3 + $0x10] sm:$0xff] %vm538_vm4, %v8432_v34 }
 0x4c8   : > { %v6966_v49 = vadd.f32 %v6928_v37, %v6472_v42  ;;  %v8220_v42 = vor.u32 %v8218_v53, %v8216_v0  ;;  %v8747_v37 = vor.u32 %v8745_v23, %v8743_v60  ;;  %v7965_v60 = vld [vmem:[#allocation3 + $0x30] sm:$0xff] }
 0x4c9   : > { %v7037_v48 = vld [vmem:[#allocation3 + $0x110] sm:$0xff]  ;;  %11821 = vmatmul.msk.bf16.gmra.mxu1 %vm538_vm4, %v9228_v18  ;;  %v15101_v18 = vld [vmem:[#allocation2 + $0x64] sm:$0xff] }
 0x4ca   : > { %v7530_v17 = vadd.f32 %v7491_v31, %v7037_v48  ;;  %7002 = vst.msk [vmem:[#allocation3 + $0x118] sm:$0xff] %vm538_vm4, %v6966_v49  ;;  %v12194_v31 = vld [vmem:[#allocation2 + $0x94] sm:$0xff]  ;;  %v8225_v43 = vsel %vm706_vm3, %v8220_v42, %v15095_v39  ;;  %v8752_v62 = vsel %vm706_vm3, %v8747_v37, %v15097_v41 }
 0x4cb   : > { %v7834_v33 = vpop.f32.mrf.mxu2  ;;  %v12249_v49 = vld [vmem:[#allocation2 + $0x14] sm:$0xf0] }
 0x4cc   : > { %7566 = vst.msk [vmem:[#allocation3 + $0x110] sm:$0xff] %vm538_vm4, %v7530_v17  ;;  %v7902_v56 = vadd.f32 %v7834_v33, %v7583_v57  ;;  %v8347_v38 = vpop.f32.mrf.mxu3  ;;  %v11834_v17 = vld [vmem:[#allocation2 + $0x14] sm:$0xe] }
 0x4cd   : > { %v8433_v29 = vadd.f32 %v8347_v38, %v7962_v32  ;;  %v11835_v33 = vor.u32 %v12249_v49, %v11834_v17  ;;  %v9231_v32 = vrot.slane %v15101_v18, 1  ;;  %v9653_v38 = vshrl.u32 %v12250_v16, 16  ;;  %v15157_v17 = vld [vmem:[#allocation2 + $0x74] sm:$0xff] }
 0x4ce   : > { %v7493_v6 = vpop.f32.mrf.mxu1  ;;  %7938 = vst.msk [vmem:[#allocation3 + $0x78] sm:$0xff] %vm538_vm4, %v7902_v56  ;;  %v8504_v19 = vld [vmem:[#allocation3 + $0x10] sm:$0xff] }
 0x4cf   : > { %v8883_v25 = vpop.f32.mrf.mxu0  ;;  %8469 = vst.msk [vmem:[#allocation3 + $0x18] sm:$0xff] %vm538_vm4, %v8433_v29  ;;  %v9645_v10 = vshrl.u32 %v11835_v33, 16  ;;  %v9648_v59 = vshll.u32 %v11835_v33, 16 }
 0x4d0   : > { %v8973_v21 = vadd.f32 %v8883_v25, %v8502_v63  ;;  %11560 = vmatmul.msk.bf16.gmra.mxu2 %vm538_vm4, %v12193_v35  ;;  %v15115_v63 = vld [vmem:[#allocation2 + $0x6c] sm:$0xff] }
 0x4d1   : > { %v7038_v40 = vld [vmem:[#allocation3 + $0x118] sm:$0xff]  ;;  %11644 = vmatmul.msk.bf16.gmra.mxu3 %vm538_vm4, %v8217_v28  ;;  %v8761_v18 = vshrl.u32 %v15115_v63, 16 }
 0x4d2   : > { %v7531_v58 = vadd.f32 %v7493_v6, %v7038_v40  ;;  %9009 = vst.msk [vmem:[#allocation3] sm:$0xff] %vm538_vm4, %v8973_v21  ;;  %11732 = vmatmul.msk.bf16.gmra.mxu0 %vm538_vm4, %v8744_v52  ;;  %v15113_v6 = vld [vmem:[#allocation2 + $0x74] sm:$0xff]  ;;  %v9232_v52 = vsel %vm1254_vm2, %v9229_v46, %v9231_v32  ;;  %v8753_v46 = vshrl.u32 %v15079_v13, 16  ;;  %v8228_v13 = vor.u32 %v8226_v14, %v15095_v39 }
 0x4d3   : > { %v7837_v1 = vpop.f32.mrf.mxu2 }
 0x4d4   : > { %7567 = vst.msk [vmem:[#allocation3 + $0x118] sm:$0xff] %vm538_vm4, %v7531_v58  ;;  %v7903_v2 = vadd.f32 %v7837_v1, %v7584_v30  ;;  %v8350_v36 = vpop.f32.mrf.mxu3  ;;  %v9655_v58 = vrot.slane %v9653_v38, 1  ;;  %v9658_v30 = vrot.slane %v9656_v15, 2 }
 0x4d5   : > { %v8434_v26 = vadd.f32 %v8350_v36, %v7963_v24  ;;  %v8757_v24 = vshll.u32 %v15115_v63, 16 }
 0x4d6   : > { %v9315_v12 = vpop.f32.mrf.mxu1  ;;  %7939 = vst.msk [vmem:[#allocation3 + $0x80] sm:$0xff] %vm538_vm4, %v7903_v2  ;;  %v8505_v21 = vld [vmem:[#allocation3 + $0x18] sm:$0xff]  ;;  %v8230_v2 = vshll.u32 %v15113_v6, 16 }
 0x4d7   : > { %v8885_v9 = vpop.f32.mrf.mxu0  ;;  %8470 = vst.msk [vmem:[#allocation3 + $0x20] sm:$0xff] %vm538_vm4, %v8434_v26  ;;  %v9647_v26 = vrot.slane %v9645_v10, 1 }
 0x4d8   : > { %v8974_v27 = vadd.f32 %v8885_v9, %v8503_v5  ;;  %v7587_v5 = vld [vmem:[#allocation3 + $0x98] sm:$0xff]  ;;  %v15130_v9 = vor.u32 %v9658_v30, %v9655_v58  ;;  %v15133_v45 = vrot.slane %v8230_v2, 1  ;;  %v8234_v58 = vshrl.u32 %v15113_v6, 16 }
 0x4d9   : > { %v9045_v50 = vld [vmem:[#allocation3] sm:$0xff]  ;;  %11822 = vmatmul.msk.bf16.gmra.mxu1 %vm538_vm4, %v9230_v47  ;;  %v7966_v47 = vld [vmem:[#allocation3 + $0x38] sm:$0xff] }
 0x4da   : > { %v9405_v61 = vadd.f32 %v9315_v12, %v9045_v50  ;;  %9010 = vst.msk [vmem:[#allocation3 + $0x8] sm:$0xff] %vm538_vm4, %v8974_v27  ;;  %v9650_v12 = vrot.slane %v9648_v59, 2  ;;  %v7589_v59 = vld [vmem:[#allocation3 + $0xa8] sm:$0xff] }
 0x4db   : > { %v7839_v55 = vpop.f32.mrf.mxu2 }
 0x4dc   : > { %9441 = vst.msk [vmem:[#allocation3] sm:$0xff] %vm538_vm4, %v9405_v61  ;;  %v7904_v44 = vadd.f32 %v7839_v55, %v7585_v54  ;;  %v8352_v11 = vpop.f32.mrf.mxu3  ;;  %v15135_v61 = vrot.slane %v8757_v24, 1  ;;  %v9651_v23 = vor.u32 %v9650_v12, %v9647_v26  ;;  %v8236_v12 = vor.u32 %v8234_v58, %v15133_v45 }
 0x4dd   : > { %v8435_v4 = vadd.f32 %v8352_v11, %v7964_v51  ;;  %v8755_v11 = vor.u32 %v8753_v46, %v15097_v41  ;;  %v7588_v41 = vld [vmem:[#allocation3 + $0xa0] sm:$0xff] }
 0x4de   : > { %v9317_v22 = vpop.f32.mrf.mxu1  ;;  %7940 = vst.msk [vmem:[#allocation3 + $0x88] sm:$0xff] %vm538_vm4, %v7904_v44  ;;  %v8506_v44 = vld [vmem:[#allocation3 + $0x20] sm:$0xff]  ;;  %v9660_v7 = vsel %vm2123_vm5, %v9651_v23, %v15130_v9  ;;  %v8763_v63 = vor.u32 %v8761_v18, %v15135_v61 }
 0x4df   : > { %v8888_v34 = vpop.f32.mrf.mxu0  ;;  %8471 = vst.msk [vmem:[#allocation3 + $0x28] sm:$0xff] %vm538_vm4, %v8435_v4  ;;  %v15143_v4 = vld [vmem:[#allocation2 + $0x6c] sm:$0xff] }
 0x4e0   : > { %v8975_v20 = vadd.f32 %v8888_v34, %v8504_v19  ;;  %11561 = vmatmul.msk.bf16.gmra.mxu2 %vm538_vm4, %v12194_v31  ;;  %v8233_v34 = vsel %vm706_vm3, %v8228_v13, %v15133_v45  ;;  %v8760_v31 = vsel %vm706_vm3, %v8755_v11, %v15135_v61  ;;  %v9233_v37 = vrot.slane %v15143_v4, 1  ;;  %v12252_v46 = vld [vmem:[#allocation2 + $0x2c] sm:$0xff]  ;;  %v15198_v13 = vld [vmem:[#allocation2 + $0x84] sm:$0xff]  ;;  %v15200_v11 = vld [vmem:[#allocation2 + $0x7c] sm:$0xff] }
 0x4e1   : > { %v9046_v48 = vld [vmem:[#allocation3 + $0x8] sm:$0xff]  ;;  %11645 = vmatmul.msk.bf16.gmra.mxu3 %vm538_vm4, %v8225_v43  ;;  %v8769_v4 = vshrl.u32 %v15157_v17, 16 }
 0x4e2   : > { %v9406_v57 = vadd.f32 %v9317_v22, %v9046_v48  ;;  %9011 = vst.msk [vmem:[#allocation3 + $0x10] sm:$0xff] %vm538_vm4, %v8975_v20  ;;  %11733 = vmatmul.msk.bf16.gmra.mxu0 %vm538_vm4, %v8752_v62  ;;  %v12251_v22 = vld [vmem:[#allocation2 + $0x24] sm:$0xff]  ;;  %v15155_v62 = vld [vmem:[#allocation2 + $0x7c] sm:$0xff]  ;;  %v9234_v15 = vsel %vm1254_vm2, %v9231_v32, %v9233_v37 }
 0x4e3   : > { %v7842_v56 = vpop.f32.mrf.mxu2  ;;  %v9662_v49 = vshrl.u32 %v12251_v22, 16  ;;  %v9665_v20 = vshll.u32 %v12251_v22, 16  ;;  %v7967_v48 = vld [vmem:[#allocation3 + $0x40] sm:$0xff] }
 0x4e4   : > { %9442 = vst.msk [vmem:[#allocation3 + $0x8] sm:$0xff] %vm538_vm4, %v9406_v57  ;;  %v7905_v0 = vadd.f32 %v7842_v56, %v7586_v3  ;;  %v8355_v29 = vpop.f32.mrf.mxu3 }
 0x4e5   : > { %v8436_v25 = vadd.f32 %v8355_v29, %v7965_v60  ;;  %v9667_v60 = vrot.slane %v9665_v20, 2  ;;  %v8773_v20 = vshll.u32 %v15200_v11, 16 }
 0x4e6   : > { %v9320_v35 = vpop.f32.mrf.mxu1  ;;  %7941 = vst.msk [vmem:[#allocation3 + $0x90] sm:$0xff] %vm538_vm4, %v7905_v0  ;;  %v8507_v3 = vld [vmem:[#allocation3 + $0x28] sm:$0xff]  ;;  %v9664_v0 = vrot.slane %v9662_v49, 1  ;;  %v8246_v49 = vshll.u32 %v15198_v13, 16 }
 0x4e7   : > { %v8890_v40 = vpop.f32.mrf.mxu0  ;;  %8472 = vst.msk [vmem:[#allocation3 + $0x30] sm:$0xff] %vm538_vm4, %v8436_v25  ;;  %v8238_v25 = vshll.u32 %v15155_v62, 16 }
 0x4e8   : > { %v8976_v28 = vadd.f32 %v8890_v40, %v8505_v21  ;;  %v15172_v40 = vor.u32 %v9667_v60, %v9664_v0 }
 0x4e9   : > { %v9047_v1 = vld [vmem:[#allocation3 + $0x10] sm:$0xff]  ;;  %11823 = vmatmul.msk.bf16.gmra.mxu1 %vm538_vm4, %v9232_v52  ;;  %v15175_v30 = vrot.slane %v8238_v25, 1 }
 0x4ea   : > { %v9407_v36 = vadd.f32 %v9320_v35, %v9047_v1  ;;  %9012 = vst.msk [vmem:[#allocation3 + $0x18] sm:$0xff] %vm538_vm4, %v8976_v28  ;;  %v8765_v35 = vshll.u32 %v15157_v17, 16  ;;  %v7968_v28 = vld [vmem:[#allocation3 + $0x48] sm:$0xff]  ;;  %v9669_v6 = vsel %vm2123_vm5, %v15130_v9, %v15172_v40  ;;  %v7590_v9 = vld [vmem:[#allocation3 + $0xb0] sm:$0xff] }
 0x4eb   : > { %v7844_v8 = vpop.f32.mrf.mxu2 }
 0x4ec   : > { %9443 = vst.msk [vmem:[#allocation3 + $0x10] sm:$0xff] %vm538_vm4, %v9407_v36  ;;  %v7906_v27 = vadd.f32 %v7844_v8, %v7587_v5  ;;  %v8357_v50 = vpop.f32.mrf.mxu3  ;;  %v15177_v1 = vrot.slane %v8765_v35, 1  ;;  %v15186_v8 = vld [vmem:[#allocation2 + $0x74] sm:$0xff] }
 0x4ed   : > { %v8437_v54 = vadd.f32 %v8357_v50, %v7966_v47  ;;  %v8241_v47 = vsel %vm706_vm3, %v8236_v12, %v15175_v30  ;;  %v9235_v61 = vrot.slane %v15186_v8, 1  ;;  %v15241_v12 = vld [vmem:[#allocation2 + $0x8c] sm:$0xff]  ;;  %v8777_v8 = vshrl.u32 %v15200_v11, 16 }
 0x4ee   : > { %v9322_v55 = vpop.f32.mrf.mxu1  ;;  %7942 = vst.msk [vmem:[#allocation3 + $0x98] sm:$0xff] %vm538_vm4, %v7906_v27  ;;  %v8508_v36 = vld [vmem:[#allocation3 + $0x30] sm:$0xff]  ;;  %v8768_v50 = vsel %vm706_vm3, %v8763_v63, %v15177_v1  ;;  %v8771_v17 = vor.u32 %v8769_v4, %v15177_v1  ;;  %v15243_v63 = vld [vmem:[#allocation2 + $0x84] sm:$0xff] }
 0x4ef   : > { %v8893_v51 = vpop.f32.mrf.mxu0  ;;  %8473 = vst.msk [vmem:[#allocation3 + $0x38] sm:$0xff] %vm538_vm4, %v8437_v54  ;;  %v9671_v54 = vshrl.u32 %v12252_v46, 16 }
 0x4f0   : > { %v8977_v53 = vadd.f32 %v8893_v51, %v8506_v44  ;;  %11904 = vmatmul.msk.bf16.vlgmr.msra.gmra.mxu2 %vm538_vm4, %v9660_v7  ;;  %v7969_v44 = vld [vmem:[#allocation3 + $0x50] sm:$0xff] }
 0x4f1   : > { %v9048_v19 = vld [vmem:[#allocation3 + $0x18] sm:$0xff]  ;;  %11646 = vmatmul.msk.bf16.gmra.mxu3 %vm538_vm4, %v8233_v34 }
 0x4f2   : > { %v9408_v39 = vadd.f32 %v9322_v55, %v9048_v19  ;;  %9013 = vst.msk [vmem:[#allocation3 + $0x20] sm:$0xff] %vm538_vm4, %v8977_v53  ;;  %11734 = vmatmul.msk.bf16.gmra.mxu0 %vm538_vm4, %v8760_v31  ;;  %v9674_v55 = vshll.u32 %v12252_v46, 16  ;;  %v9236_v31 = vsel %vm1254_vm2, %v9233_v37, %v9235_v61 }
 0x4f3   : > { %v7847_v42 = vpop.f32.mrf.mxu2 }
 0x4f4   : > { %9444 = vst.msk [vmem:[#allocation3 + $0x18] sm:$0xff] %vm538_vm4, %v9408_v39  ;;  %v7907_v16 = vadd.f32 %v7847_v42, %v7588_v41  ;;  %v8360_v43 = vpop.f32.mrf.mxu3  ;;  %v9673_v39 = vrot.slane %v9671_v54, 1  ;;  %v9676_v41 = vrot.slane %v9674_v55, 2  ;;  %v8254_v54 = vshll.u32 %v15241_v12, 16 }
 0x4f5   : > { %v8438_v57 = vadd.f32 %v8360_v43, %v7967_v48  ;;  %v7591_v48 = vld [vmem:[#allocation3 + $0xb8] sm:$0xff]  ;;  %v8781_v55 = vshll.u32 %v15243_v63, 16 }
 0x4f6   : > { %v9325_v33 = vpop.f32.mrf.mxu1  ;;  %7943 = vst.msk [vmem:[#allocation3 + $0xa0] sm:$0xff] %vm538_vm4, %v7907_v16  ;;  %v8509_v22 = vld [vmem:[#allocation3 + $0x38] sm:$0xff] }
 0x4f7   : > { %v8895_v56 = vpop.f32.mrf.mxu0  ;;  %8474 = vst.msk [vmem:[#allocation3 + $0x40] sm:$0xff] %vm538_vm4, %v8438_v57  ;;  %v15215_v57 = vor.u32 %v9676_v41, %v9673_v39 }
 0x4f8   : > { %v8978_v38 = vadd.f32 %v8895_v56, %v8507_v3  ;;  %v8242_v56 = vshrl.u32 %v15155_v62, 16 }
 0x4f9   : > { %v9049_v29 = vld [vmem:[#allocation3 + $0x20] sm:$0xff]  ;;  %11824 = vmatmul.msk.bf16.gmra.mxu1 %vm538_vm4, %v9234_v15  ;;  %v15220_v15 = vrot.slane %v8773_v20, 1  ;;  %v9678_v62 = vsel %vm2123_vm5, %v15172_v40, %v15215_v57 }
 0x4fa   : > { %v9409_v10 = vadd.f32 %v9325_v33, %v9049_v29  ;;  %9014 = vst.msk [vmem:[#allocation3 + $0x28] sm:$0xff] %vm538_vm4, %v8978_v38  ;;  %v7970_v33 = vld [vmem:[#allocation3 + $0x58] sm:$0xff]  ;;  %v15218_v38 = vrot.slane %v8246_v49, 1  ;;  %v8244_v35 = vor.u32 %v8242_v56, %v15175_v30  ;;  %v7592_v40 = vld [vmem:[#allocation3 + $0xc0] sm:$0xff] }
 0x4fb   : > { %v7849_v21 = vpop.f32.mrf.mxu2  ;;  %v8779_v11 = vor.u32 %v8777_v8, %v15220_v15  ;;  %v12255_v8 = vld [vmem:[#allocation2 + $0x44] sm:$0xff] }
 0x4fc   : > { %9445 = vst.msk [vmem:[#allocation3 + $0x20] sm:$0xff] %vm538_vm4, %v9409_v10  ;;  %v7908_v32 = vadd.f32 %v7849_v21, %v7589_v59  ;;  %v8362_v52 = vpop.f32.mrf.mxu3  ;;  %v15229_v59 = vld [vmem:[#allocation2 + $0x7c] sm:$0xff]  ;;  %v12253_v21 = vld [vmem:[#allocation2 + $0x34] sm:$0xff] }
 0x4fd   : > { %v8439_v2 = vadd.f32 %v8362_v52, %v7968_v28  ;;  %v8776_v28 = vsel %vm706_vm3, %v8771_v17, %v15220_v15  ;;  %v9237_v30 = vrot.slane %v15229_v59, 1  ;;  %v9680_v1 = vshrl.u32 %v12253_v21, 16  ;;  %v15286_v17 = vld [vmem:[#allocation2 + $0x8c] sm:$0xff] }
 0x4fe   : > { %v9327_v24 = vpop.f32.mrf.mxu1  ;;  %7944 = vst.msk [vmem:[#allocation3 + $0xa8] sm:$0xff] %vm538_vm4, %v7908_v32  ;;  %v8510_v29 = vld [vmem:[#allocation3 + $0x40] sm:$0xff]  ;;  %v8249_v32 = vsel %vm706_vm3, %v8244_v35, %v15218_v38  ;;  %v15284_v35 = vld [vmem:[#allocation2 + $0x94] sm:$0xff]  ;;  %v8785_v59 = vshrl.u32 %v15243_v63, 16 }
 0x4ff   : > { %v8898_v26 = vpop.f32.mrf.mxu0  ;;  %8475 = vst.msk [vmem:[#allocation3 + $0x48] sm:$0xff] %vm538_vm4, %v8439_v2  ;;  %v9683_v2 = vshll.u32 %v12253_v21, 16 }
 0x500   : > { %v8979_v5 = vadd.f32 %v8898_v26, %v8508_v36  ;;  %11905 = vmatmul.msk.bf16.gmra.mxu2 %vm538_vm4, %v9669_v6  ;;  %v7971_v36 = vld [vmem:[#allocation3 + $0x60] sm:$0xff] }
 0x501   : > { %v9050_v27 = vld [vmem:[#allocation3 + $0x28] sm:$0xff]  ;;  %11647 = vmatmul.msk.bf16.gmra.mxu3 %vm538_vm4, %v8241_v47 }
 0x502   : > { %v9410_v14 = vadd.f32 %v9327_v24, %v9050_v27  ;;  %9015 = vst.msk [vmem:[#allocation3 + $0x30] sm:$0xff] %vm538_vm4, %v8979_v5  ;;  %11735 = vmatmul.msk.bf16.gmra.mxu0 %vm538_vm4, %v8768_v50  ;;  %v9238_v50 = vsel %vm1254_vm2, %v9235_v61, %v9237_v30 }
 0x503   : > { %v7852_v45 = vpop.f32.mrf.mxu2 }
 0x504   : > { %9446 = vst.msk [vmem:[#allocation3 + $0x28] sm:$0xff] %vm538_vm4, %v9410_v14  ;;  %v7909_v23 = vadd.f32 %v7852_v45, %v7590_v9  ;;  %v8365_v51 = vpop.f32.mrf.mxu3  ;;  %v9682_v14 = vrot.slane %v9680_v1, 1  ;;  %v9685_v9 = vrot.slane %v9683_v2, 2  ;;  %v8262_v1 = vshll.u32 %v15284_v35, 16 }
 0x505   : > { %v8440_v53 = vadd.f32 %v8365_v51, %v7969_v44  ;;  %v7593_v44 = vld [vmem:[#allocation3 + $0xc8] sm:$0xff]  ;;  %v8789_v2 = vshll.u32 %v15286_v17, 16 }
 0x506   : > { %v9330_v7 = vpop.f32.mrf.mxu1  ;;  %7945 = vst.msk [vmem:[#allocation3 + $0xb0] sm:$0xff] %vm538_vm4, %v7909_v23  ;;  %v8511_v46 = vld [vmem:[#allocation3 + $0x48] sm:$0xff] }
 0x507   : > { %v8900_v19 = vpop.f32.mrf.mxu0  ;;  %8476 = vst.msk [vmem:[#allocation3 + $0x50] sm:$0xff] %vm538_vm4, %v8440_v53  ;;  %v15258_v53 = vor.u32 %v9685_v9, %v9682_v14 }
 0x508   : > { %v8980_v34 = vadd.f32 %v8900_v19, %v8509_v22  ;;  %v8250_v19 = vshrl.u32 %v15198_v13, 16 }
 0x509   : > { %v9051_v42 = vld [vmem:[#allocation3 + $0x30] sm:$0xff]  ;;  %11825 = vmatmul.msk.bf16.gmra.mxu1 %vm538_vm4, %v9236_v31  ;;  %v15263_v31 = vrot.slane %v8781_v55, 1  ;;  %v9687_v13 = vsel %vm2123_vm5, %v15215_v57, %v15258_v53 }
 0x50a   : > { %v9411_v16 = vadd.f32 %v9330_v7, %v9051_v42  ;;  %9016 = vst.msk [vmem:[#allocation3 + $0x38] sm:$0xff] %vm538_vm4, %v8980_v34  ;;  %v7972_v7 = vld [vmem:[#allocation3 + $0x68] sm:$0xff]  ;;  %v15261_v34 = vrot.slane %v8254_v54, 1  ;;  %v8252_v20 = vor.u32 %v8250_v19, %v15218_v38  ;;  %v7594_v57 = vld [vmem:[#allocation3 + $0xd0] sm:$0xff] }
 0x50b   : > { %v7854_v43 = vpop.f32.mrf.mxu2  ;;  %v8787_v63 = vor.u32 %v8785_v59, %v15263_v31  ;;  %v15347_v59 = vld [vmem:[#allocation2 + $0x94] sm:$0xff] }
 0x50c   : > { %9447 = vst.msk [vmem:[#allocation3 + $0x30] sm:$0xff] %vm538_vm4, %v9411_v16  ;;  %v7910_v37 = vadd.f32 %v7854_v43, %v7591_v48  ;;  %v8367_v3 = vpop.f32.mrf.mxu3  ;;  %v15272_v48 = vld [vmem:[#allocation2 + $0x84] sm:$0xff]  ;;  %v12254_v43 = vld [vmem:[#allocation2 + $0x3c] sm:$0xff] }
 0x50d   : > { %v8441_v0 = vadd.f32 %v8367_v3, %v7970_v33  ;;  %v8784_v33 = vsel %vm706_vm3, %v8779_v11, %v15263_v31  ;;  %v9239_v38 = vrot.slane %v15272_v48, 1  ;;  %v9689_v15 = vshrl.u32 %v12254_v43, 16 }
 0x50e   : > { %v9332_v60 = vpop.f32.mrf.mxu1  ;;  %7946 = vst.msk [vmem:[#allocation3 + $0xb8] sm:$0xff] %vm538_vm4, %v7910_v37  ;;  %v8512_v42 = vld [vmem:[#allocation3 + $0x50] sm:$0xff]  ;;  %v8257_v37 = vsel %vm706_vm3, %v8252_v20, %v15261_v34  ;;  %v7975_v20 = vld [vmem:[#allocation3 + $0x80] sm:$0xff]  ;;  %v8793_v48 = vshrl.u32 %v15286_v17, 16 }
 0x50f   : > { %v8903_v25 = vpop.f32.mrf.mxu0  ;;  %8477 = vst.msk [vmem:[#allocation3 + $0x58] sm:$0xff] %vm538_vm4, %v8441_v0  ;;  %v9692_v0 = vshll.u32 %v12254_v43, 16 }
 0x510   : > { %v8981_v10 = vadd.f32 %v8903_v25, %v8510_v29  ;;  %11906 = vmatmul.msk.bf16.gmra.mxu2 %vm538_vm4, %v9678_v62  ;;  %v7973_v29 = vld [vmem:[#allocation3 + $0x70] sm:$0xff] }
 0x511   : > { %v9052_v18 = vld [vmem:[#allocation3 + $0x38] sm:$0xff]  ;;  %11648 = vmatmul.msk.bf16.gmra.mxu3 %vm538_vm4, %v8249_v32 }
 0x512   : > { %v9412_v52 = vadd.f32 %v9332_v60, %v9052_v18  ;;  %9017 = vst.msk [vmem:[#allocation3 + $0x40] sm:$0xff] %vm538_vm4, %v8981_v10  ;;  %11736 = vmatmul.msk.bf16.gmra.mxu0 %vm538_vm4, %v8776_v28  ;;  %v9240_v28 = vsel %vm1254_vm2, %v9237_v30, %v9239_v38 }
 0x513   : > { %v7857_v58 = vpop.f32.mrf.mxu2 }
 0x514   : > { %9448 = vst.msk [vmem:[#allocation3 + $0x38] sm:$0xff] %vm538_vm4, %v9412_v52  ;;  %v7911_v24 = vadd.f32 %v7857_v58, %v7592_v40  ;;  %v8370_v26 = vpop.f32.mrf.mxu3  ;;  %v9691_v52 = vrot.slane %v9689_v15, 1  ;;  %v9694_v40 = vrot.slane %v9692_v0, 2 }
 0x515   : > { %v8442_v5 = vadd.f32 %v8370_v26, %v7971_v36  ;;  %v7595_v36 = vld [vmem:[#allocation3 + $0xd8] sm:$0xff] }
 0x516   : > { %v9335_v6 = vpop.f32.mrf.mxu1  ;;  %7947 = vst.msk [vmem:[#allocation3 + $0xc0] sm:$0xff] %vm538_vm4, %v7911_v24  ;;  %v8513_v21 = vld [vmem:[#allocation3 + $0x58] sm:$0xff] }
 0x517   : > { %v8905_v27 = vpop.f32.mrf.mxu0  ;;  %8478 = vst.msk [vmem:[#allocation3 + $0x60] sm:$0xff] %vm538_vm4, %v8442_v5  ;;  %v15301_v5 = vor.u32 %v9694_v40, %v9691_v52 }
 0x518   : > { %v8982_v47 = vadd.f32 %v8905_v27, %v8511_v46  ;;  %v8258_v27 = vshrl.u32 %v15241_v12, 16 }
 0x519   : > { %v9053_v45 = vld [vmem:[#allocation3 + $0x40] sm:$0xff]  ;;  %11826 = vmatmul.msk.bf16.gmra.mxu1 %vm538_vm4, %v9238_v50  ;;  %v15304_v50 = vrot.slane %v8789_v2, 1  ;;  %v9696_v12 = vsel %vm2123_vm5, %v15258_v53, %v15301_v5 }
 0x51a   : > { %v9413_v23 = vadd.f32 %v9335_v6, %v9053_v45  ;;  %9018 = vst.msk [vmem:[#allocation3 + $0x48] sm:$0xff] %vm538_vm4, %v8982_v47  ;;  %v7974_v6 = vld [vmem:[#allocation3 + $0x78] sm:$0xff]  ;;  %v8264_v47 = vrot.slane %v8262_v1, 1  ;;  %v8031_v45 = vld [vmem:[#allocation2 + $0x9c] sm:$0x1]  ;;  %v7596_v53 = vld [vmem:[#allocation3 + $0xe0] sm:$0xff] }
 0x51b   : > { %v7859_v51 = vpop.f32.mrf.mxu2  ;;  %v8106_v19 = vunpack.c.l.b16 %v8031_v45 }
 0x51c   : > { %9449 = vst.msk [vmem:[#allocation3 + $0x40] sm:$0xff] %vm538_vm4, %v9413_v23  ;;  %v7912_v61 = vadd.f32 %v7859_v51, %v7593_v44  ;;  %v8372_v22 = vpop.f32.mrf.mxu3  ;;  %v8260_v23 = vor.u32 %v8258_v27, %v15261_v34  ;;  %v15313_v51 = vld [vmem:[#allocation2 + $0x8c] sm:$0xff] }
 0x51d   : > { %v8443_v39 = vadd.f32 %v8372_v22, %v7972_v7  ;;  %v8792_v22 = vsel %vm706_vm3, %v8787_v63, %v15304_v50  ;;  %v15357_v63 = vld [vmem:[#allocation2 + $0x9c] sm:$0xff] }
 0x51e   : > { %v9337_v41 = vpop.f32.mrf.mxu1  ;;  %7948 = vst.msk [vmem:[#allocation3 + $0xc8] sm:$0xff] %vm538_vm4, %v7912_v61  ;;  %v8514_v54 = vld [vmem:[#allocation3 + $0x60] sm:$0xff]  ;;  %v8265_v7 = vsel %vm706_vm3, %v8260_v23, %v8264_v47 }
 0x51f   : > { %v8908_v49 = vpop.f32.mrf.mxu0  ;;  %8479 = vst.msk [vmem:[#allocation3 + $0x68] sm:$0xff] %vm538_vm4, %v8443_v39  ;;  %v9241_v39 = vrot.slane %v15313_v51, 1  ;;  %v8574_v51 = vld [vmem:[#allocation2 + $0xa4] sm:$0x1] }
 0x520   : > { %v8983_v16 = vadd.f32 %v8908_v49, %v8512_v42  ;;  %11907 = vmatmul.msk.bf16.gmra.mxu2 %vm538_vm4, %v9687_v13  ;;  %v9701_v42 = vshll.u32 %v12255_v8, 16  ;;  %v15324_v13 = vld [vmem:[#allocation2 + $0x94] sm:$0xff] }
 0x521   : > { %v9054_v4 = vld [vmem:[#allocation3 + $0x48] sm:$0xff]  ;;  %11649 = vmatmul.msk.bf16.gmra.mxu3 %vm538_vm4, %v8257_v37 }
 0x522   : > { %v9414_v3 = vadd.f32 %v9337_v41, %v9054_v4  ;;  %9019 = vst.msk [vmem:[#allocation3 + $0x50] sm:$0xff] %vm538_vm4, %v8983_v16  ;;  %11737 = vmatmul.msk.bf16.gmra.mxu0 %vm538_vm4, %v8784_v33  ;;  %v9698_v41 = vshrl.u32 %v12255_v8, 16  ;;  %v8125_v16 = vpack.c.b16 %v8106_v19, %v8106_v19  ;;  %v9703_v15 = vrot.slane %v9701_v42, 2 }
 0x523   : > { %v7862_v56 = vpop.f32.mrf.mxu2  ;;  %v8801_v42 = vshrl.u32 %v15324_v13, 16 }
 0x524   : > { %9450 = vst.msk [vmem:[#allocation3 + $0x48] sm:$0xff] %vm538_vm4, %v9414_v3  ;;  %v7913_v60 = vadd.f32 %v7862_v56, %v7594_v57  ;;  %v8375_v25 = vpop.f32.mrf.mxu3  ;;  %v9242_v57 = vsel %vm1254_vm2, %v9239_v38, %v9241_v39  ;;  %v9700_v56 = vrot.slane %v9698_v41, 1 }
 0x525   : > { %v8444_v10 = vadd.f32 %v8375_v25, %v7973_v29  ;;  %v8797_v29 = vshll.u32 %v15324_v13, 16 }
 0x526   : > { %v9340_v62 = vpop.f32.mrf.mxu1  ;;  %7949 = vst.msk [vmem:[#allocation3 + $0xd0] sm:$0xff] %vm538_vm4, %v7913_v60  ;;  %v8515_v37 = vld [vmem:[#allocation3 + $0x68] sm:$0xff]  ;;  %v8270_v60 = vshll.u32 %v8125_v16, 16  ;;  %v15339_v38 = vor.u32 %v9703_v15, %v9700_v56  ;;  %v7978_v16 = vld [vmem:[#allocation3 + $0x98] sm:$0xff]  ;;  %v8649_v15 = vunpack.c.l.b16 %v8574_v51 }
 0x527   : > { %v8910_v18 = vpop.f32.mrf.mxu0  ;;  %8480 = vst.msk [vmem:[#allocation3 + $0x70] sm:$0xff] %vm538_vm4, %v8444_v10  ;;  %v8266_v10 = vshrl.u32 %v15284_v35, 16 }
 0x528   : > { %v8984_v32 = vadd.f32 %v8910_v18, %v8513_v21  ;;  %v8272_v40 = vrot.slane %v8270_v60, 1  ;;  %v9705_v17 = vsel %vm2123_vm5, %v15301_v5, %v15339_v38  ;;  %v7598_v5 = vld [vmem:[#allocation3 + $0xf0] sm:$0xff] }
 0x529   : > { %v9055_v58 = vld [vmem:[#allocation3 + $0x50] sm:$0xff]  ;;  %11827 = vmatmul.msk.bf16.gmra.mxu1 %vm538_vm4, %v9240_v28  ;;  %v8268_v52 = vor.u32 %v8266_v10, %v8264_v47 }
 0x52a   : > { %v9415_v24 = vadd.f32 %v9340_v62, %v9055_v58  ;;  %9020 = vst.msk [vmem:[#allocation3 + $0x58] sm:$0xff] %vm538_vm4, %v8984_v32  ;;  %v7597_v62 = vld [vmem:[#allocation3 + $0xe8] sm:$0xff]  ;;  %v8799_v58 = vrot.slane %v8797_v29, 1  ;;  %v15378_v60 = vld [vmem:[#allocation2 + $0x9c] sm:$0xff] }
 0x52b   : > { %v7864_v26 = vpop.f32.mrf.mxu2  ;;  %v7976_v32 = vld [vmem:[#allocation3 + $0x88] sm:$0xff] }
 0x52c   : > { %9451 = vst.msk [vmem:[#allocation3 + $0x50] sm:$0xff] %vm538_vm4, %v9415_v24  ;;  %v7914_v30 = vadd.f32 %v7864_v26, %v7595_v36  ;;  %v8377_v46 = vpop.f32.mrf.mxu3  ;;  %v8795_v36 = vor.u32 %v8793_v48, %v15304_v50  ;;  %v12257_v29 = vld [vmem:[#allocation2 + $0x54] sm:$0xff]  ;;  %v7600_v48 = vld [vmem:[#allocation3 + $0x100] sm:$0xff] }
 0x52d   : > { %v8445_v14 = vadd.f32 %v8377_v46, %v7974_v6  ;;  %v8273_v46 = vsel %vm706_vm3, %v8268_v52, %v8272_v40  ;;  %v7979_v40 = vld [vmem:[#allocation3 + $0xa0] sm:$0xff] }
 0x52e   : > { %v9342_v9 = vpop.f32.mrf.mxu1  ;;  %7950 = vst.msk [vmem:[#allocation3 + $0xd8] sm:$0xff] %vm538_vm4, %v7914_v30  ;;  %v8516_v24 = vld [vmem:[#allocation3 + $0x70] sm:$0xff]  ;;  %v12256_v30 = vld [vmem:[#allocation2 + $0x4c] sm:$0xff]  ;;  %v8800_v27 = vsel %vm706_vm3, %v8795_v36, %v8799_v58  ;;  %v8809_v36 = vshrl.u32 %v15357_v63, 16 }
 0x52f   : > { %v8913_v55 = vpop.f32.mrf.mxu0  ;;  %8481 = vst.msk [vmem:[#allocation3 + $0x78] sm:$0xff] %vm538_vm4, %v8445_v14  ;;  %v9243_v14 = vrot.slane %v15347_v59, 1  ;;  %v9710_v45 = vshll.u32 %v12256_v30, 16  ;;  %v7980_v59 = vld [vmem:[#allocation3 + $0xa8] sm:$0xff] }
 0x530   : > { %v8985_v44 = vadd.f32 %v8913_v55, %v8514_v54  ;;  %11908 = vmatmul.msk.bf16.gmra.mxu2 %vm538_vm4, %v9696_v12  ;;  %v7977_v55 = vld [vmem:[#allocation3 + $0x90] sm:$0xff] }
 0x531   : > { %v9056_v61 = vld [vmem:[#allocation3 + $0x58] sm:$0xff]  ;;  %11650 = vmatmul.msk.bf16.gmra.mxu3 %vm538_vm4, %v8265_v7 }
 0x532   : > { %v9416_v34 = vadd.f32 %v9342_v9, %v9056_v61  ;;  %9021 = vst.msk [vmem:[#allocation3 + $0x60] sm:$0xff] %vm538_vm4, %v8985_v44  ;;  %11738 = vmatmul.msk.bf16.gmra.mxu0 %vm538_vm4, %v8792_v22  ;;  %v9707_v9 = vshrl.u32 %v12256_v30, 16  ;;  %v9244_v22 = vsel %vm1254_vm2, %v9241_v39, %v9243_v14 }
 0x533   : > { %v7867_v31 = vpop.f32.mrf.mxu2 }
 0x534   : > { %9452 = vst.msk [vmem:[#allocation3 + $0x58] sm:$0xff] %vm538_vm4, %v9416_v34  ;;  %v7915_v49 = vadd.f32 %v7867_v31, %v7596_v53  ;;  %v8380_v11 = vpop.f32.mrf.mxu3  ;;  %v9709_v19 = vrot.slane %v9707_v9, 1  ;;  %v9712_v34 = vrot.slane %v9710_v45, 2  ;;  %v8805_v31 = vshll.u32 %v15357_v63, 16 }
 0x535   : > { %v8446_v43 = vadd.f32 %v8380_v11, %v7975_v20 }
 0x536   : > { %v9345_v4 = vpop.f32.mrf.mxu1  ;;  %7951 = vst.msk [vmem:[#allocation3 + $0xe0] sm:$0xff] %vm538_vm4, %v7915_v49  ;;  %v8517_v8 = vld [vmem:[#allocation3 + $0x78] sm:$0xff]  ;;  %v15371_v11 = vor.u32 %v9712_v34, %v9709_v19 }
 0x537   : > { %v8915_v33 = vpop.f32.mrf.mxu0  ;;  %8482 = vst.msk [vmem:[#allocation3 + $0x80] sm:$0xff] %vm538_vm4, %v8446_v43  ;;  %v7599_v49 = vld [vmem:[#allocation3 + $0xf8] sm:$0xff] }
 0x538   : > { %v8986_v3 = vadd.f32 %v8915_v33, %v8515_v37  ;;  %v8807_v37 = vrot.slane %v8805_v31, 1 }
 0x539   : > { %v9057_v0 = vld [vmem:[#allocation3 + $0x60] sm:$0xff]  ;;  %11828 = vmatmul.msk.bf16.gmra.mxu1 %vm538_vm4, %v9242_v57 }
 0x53a   : > { %v9417_v25 = vadd.f32 %v9345_v4, %v9057_v0  ;;  %9022 = vst.msk [vmem:[#allocation3 + $0x68] sm:$0xff] %vm538_vm4, %v8986_v3  ;;  %v8803_v4 = vor.u32 %v8801_v42, %v8799_v58  ;;  %v9714_v0 = vsel %vm2123_vm5, %v15339_v38, %v15371_v11  ;;  %v9245_v38 = vrot.slane %v15378_v60, 1 }
 0x53b   : > { %v7869_v21 = vpop.f32.mrf.mxu2  ;;  %v8811_v9 = vor.u32 %v8809_v36, %v8807_v37 }
 0x53c   : > { %9453 = vst.msk [vmem:[#allocation3 + $0x60] sm:$0xff] %vm538_vm4, %v9417_v25  ;;  %v7916_v18 = vadd.f32 %v7869_v21, %v7597_v62  ;;  %v8382_v28 = vpop.f32.mrf.mxu3  ;;  %v8808_v10 = vsel %vm706_vm3, %v8803_v4, %v8807_v37  ;;  %v8668_v21 = vpack.c.b16 %v8649_v15, %v8649_v15 }
 0x53d   : > { %v8447_v1 = vadd.f32 %v8382_v28, %v7976_v32  ;;  %v9716_v32 = vshrl.u32 %v12257_v29, 16  ;;  %v9719_v28 = vshll.u32 %v12257_v29, 16  ;;  %v7603_v29 = vld [vmem:[#allocation3 + $0x118] sm:$0xff] }
 0x53e   : > { %v9347_v2 = vpop.f32.mrf.mxu1  ;;  %7952 = vst.msk [vmem:[#allocation3 + $0xe8] sm:$0xff] %vm538_vm4, %v7916_v18  ;;  %v8518_v57 = vld [vmem:[#allocation3 + $0x80] sm:$0xff] }
 0x53f   : > { %v8918_v35 = vpop.f32.mrf.mxu0  ;;  %8483 = vst.msk [vmem:[#allocation3 + $0x88] sm:$0xff] %vm538_vm4, %v8447_v1 }
 0x540   : > { %v8987_v26 = vadd.f32 %v8918_v35, %v8516_v24  ;;  %11909 = vmatmul.msk.bf16.gmra.mxu2 %vm538_vm4, %v9705_v17  ;;  %v9117_v17 = vld [vmem:[#allocation2 + $0xa4] sm:$0x1] }
 0x541   : > { %v9058_v6 = vld [vmem:[#allocation3 + $0x68] sm:$0xff]  ;;  %11651 = vmatmul.msk.bf16.gmra.mxu3 %vm538_vm4, %v8273_v46  ;;  %v9718_v46 = vrot.slane %v9716_v32, 1 }
 0x542   : > { %v9418_v47 = vadd.f32 %v9347_v2, %v9058_v6  ;;  %9023 = vst.msk [vmem:[#allocation3 + $0x70] sm:$0xff] %vm538_vm4, %v8987_v26  ;;  %11739 = vmatmul.msk.bf16.gmra.mxu0 %vm538_vm4, %v8800_v27  ;;  %v8813_v26 = vshll.u32 %v8668_v21, 16  ;;  %v9246_v6 = vsel %vm1254_vm2, %v9243_v14, %v9245_v38  ;;  %v9721_v27 = vrot.slane %v9719_v28, 2  ;;  %v7982_v21 = vld [vmem:[#allocation3 + $0xb8] sm:$0xff] }
 0x543   : > { %v7872_v50 = vpop.f32.mrf.mxu2 }
 0x544   : > { %9454 = vst.msk [vmem:[#allocation3 + $0x68] sm:$0xff] %vm538_vm4, %v9418_v47  ;;  %v7917_v54 = vadd.f32 %v7872_v50, %v7598_v5  ;;  %v8385_v23 = vpop.f32.mrf.mxu3  ;;  %v9192_v50 = vunpack.c.l.b16 %v9117_v17  ;;  %v8815_v45 = vrot.slane %v8813_v26, 1  ;;  %v7983_v17 = vld [vmem:[#allocation3 + $0xc0] sm:$0xff] }
 0x545   : > { %v8448_v44 = vadd.f32 %v8385_v23, %v7977_v55  ;;  %v9722_v23 = vor.u32 %v9721_v27, %v9718_v46 }
 0x546   : > { %v9350_v12 = vpop.f32.mrf.mxu1  ;;  %7953 = vst.msk [vmem:[#allocation3 + $0xf0] sm:$0xff] %vm538_vm4, %v7917_v54  ;;  %v8519_v24 = vld [vmem:[#allocation3 + $0x88] sm:$0xff] }
 0x547   : > { %v8920_v61 = vpop.f32.mrf.mxu0  ;;  %8484 = vst.msk [vmem:[#allocation3 + $0x90] sm:$0xff] %vm538_vm4, %v8448_v44  ;;  %v7601_v54 = vld [vmem:[#allocation3 + $0x108] sm:$0xff]  ;;  %v9723_v34 = vsel %vm2123_vm5, %v15371_v11, %v9722_v23 }
 0x548   : > { %v8988_v7 = vadd.f32 %v8920_v61, %v8517_v8  ;;  %v9211_v8 = vpack.c.b16 %v9192_v50, %v9192_v50 }
 0x549   : > { %v9059_v53 = vld [vmem:[#allocation3 + $0x70] sm:$0xff]  ;;  %11829 = vmatmul.msk.bf16.gmra.mxu1 %vm538_vm4, %v9244_v22  ;;  %v8816_v22 = vsel %vm706_vm3, %v8811_v9, %v8815_v45 }
 0x54a   : > { %v9419_v41 = vadd.f32 %v9350_v12, %v9059_v53  ;;  %9024 = vst.msk [vmem:[#allocation3 + $0x78] sm:$0xff] %vm538_vm4, %v8988_v7  ;;  %v12258_v53 = vld [vmem:[#allocation2 + $0x5c] sm:$0xff]  ;;  %v9247_v42 = vrot.slane %v9211_v8, 1 }
 0x54b   : > { %v7874_v20 = vpop.f32.mrf.mxu2  ;;  %v9725_v51 = vshrl.u32 %v12258_v53, 16 }
 0x54c   : > { %9455 = vst.msk [vmem:[#allocation3 + $0x70] sm:$0xff] %vm538_vm4, %v9419_v41  ;;  %v7918_v39 = vadd.f32 %v7874_v20, %v7599_v49  ;;  %v8387_v43 = vpop.f32.mrf.mxu3  ;;  %v7602_v49 = vld [vmem:[#allocation3 + $0x110] sm:$0xff] }
 0x54d   : > { %v8449_v33 = vadd.f32 %v8387_v43, %v7978_v16  ;;  %v7981_v43 = vld [vmem:[#allocation3 + $0xb0] sm:$0xff]  ;;  %v9727_v15 = vrot.slane %v9725_v51, 1 }
 0x54e   : > { %v9352_v3 = vpop.f32.mrf.mxu1  ;;  %7954 = vst.msk [vmem:[#allocation3 + $0xf8] sm:$0xff] %vm538_vm4, %v7918_v39  ;;  %v8520_v61 = vld [vmem:[#allocation3 + $0x90] sm:$0xff]  ;;  %v9728_v39 = vshll.u32 %v12258_v53, 16  ;;  %v12260_v53 = vld [vmem:[#allocation2 + $0x6c] sm:$0xff] }
 0x54f   : > { %v8923_v56 = vpop.f32.mrf.mxu0  ;;  %8485 = vst.msk [vmem:[#allocation3 + $0x98] sm:$0xff] %vm538_vm4, %v8449_v33  ;;  %v9248_v33 = vsel %vm1254_vm2, %v9245_v38, %v9247_v42  ;;  %v9479_v42 = vld [vmem:[#allocation3 + $0x10] sm:$0xff]  ;;  %v9746_v51 = vshll.u32 %v12260_v53, 16 }
 0x550   : > { %v8989_v13 = vadd.f32 %v8923_v56, %v8518_v57  ;;  %11910 = vmatmul.msk.bf16.gmra.mxu2 %vm538_vm4, %v9714_v0 }
 0x551   : > { %v9060_v25 = vld [vmem:[#allocation3 + $0x78] sm:$0xff] }
 0x552   : > { %v9420_v62 = vadd.f32 %v9352_v3, %v9060_v25  ;;  %9025 = vst.msk [vmem:[#allocation3 + $0x80] sm:$0xff] %vm538_vm4, %v8989_v13  ;;  %11740 = vmatmul.msk.bf16.gmra.mxu0 %vm538_vm4, %v8808_v10  ;;  %v9730_v13 = vrot.slane %v9728_v39, 2  ;;  %v7985_v39 = vld [vmem:[#allocation3 + $0xd0] sm:$0xff] }
 0x553   : > { %v7877_v18 = vpop.f32.mrf.mxu2 }
 0x554   : > { %9456 = vst.msk [vmem:[#allocation3 + $0x78] sm:$0xff] %vm538_vm4, %v9420_v62  ;;  %v7919_v52 = vadd.f32 %v7877_v18, %v7600_v48  ;;  %v8390_v58 = vpop.f32.mrf.mxu3  ;;  %v9731_v10 = vor.u32 %v9730_v13, %v9727_v15 }
 0x555   : > { %v8450_v1 = vadd.f32 %v8390_v58, %v7979_v40  ;;  %v12259_v58 = vld [vmem:[#allocation2 + $0x64] sm:$0xff] }
 0x556   : > { %v9355_v2 = vpop.f32.mrf.mxu1  ;;  %7955 = vst.msk [vmem:[#allocation3 + $0x100] sm:$0xff] %vm538_vm4, %v7919_v52  ;;  %v8521_v3 = vld [vmem:[#allocation3 + $0x98] sm:$0xff]  ;;  %v9732_v40 = vsel %vm2123_vm5, %v9722_v23, %v9731_v10  ;;  %v9734_v36 = vshrl.u32 %v12259_v58, 16  ;;  %v9737_v26 = vshll.u32 %v12259_v58, 16  ;;  %v9478_v23 = vld [vmem:[#allocation3 + $0x8] sm:$0xff] }
 0x557   : > { %v8925_v35 = vpop.f32.mrf.mxu0  ;;  %8486 = vst.msk [vmem:[#allocation3 + $0xa0] sm:$0xff] %vm538_vm4, %v8450_v1 }
 0x558   : > { %v8990_v30 = vadd.f32 %v8925_v35, %v8519_v24  ;;  %v9477_v24 = vld [vmem:[#allocation3] sm:$0xff]  ;;  %v9736_v9 = vrot.slane %v9734_v36, 1  ;;  %v9739_v45 = vrot.slane %v9737_v26, 2 }
 0x559   : > { %v9061_v47 = vld [vmem:[#allocation3 + $0x80] sm:$0xff]  ;;  %11830 = vmatmul.msk.bf16.gmra.mxu1 %vm538_vm4, %v9246_v6 }
 0x55a   : > { %v9421_v5 = vadd.f32 %v9355_v2, %v9061_v47  ;;  %9026 = vst.msk [vmem:[#allocation3 + $0x88] sm:$0xff] %vm538_vm4, %v8990_v30  ;;  %v7987_v36 = vld [vmem:[#allocation3 + $0xe0] sm:$0xff] }
 0x55b   : > { %v7879_v55 = vpop.f32.mrf.mxu2 }
 0x55c   : > { %9457 = vst.msk [vmem:[#allocation3 + $0x80] sm:$0xff] %vm538_vm4, %v9421_v5  ;;  %v7920_v63 = vadd.f32 %v7879_v55, %v7601_v54  ;;  %v8392_v44 = vpop.f32.mrf.mxu3 }
 0x55d   : > { %v8451_v14 = vadd.f32 %v8392_v44, %v7980_v59  ;;  %v9740_v59 = vor.u32 %v9739_v45, %v9736_v9  ;;  %v7984_v44 = vld [vmem:[#allocation3 + $0xc8] sm:$0xff] }
 0x55e   : > { %v9357_v12 = vpop.f32.mrf.mxu1  ;;  %7956 = vst.msk [vmem:[#allocation3 + $0x108] sm:$0xff] %vm538_vm4, %v7920_v63  ;;  %v8522_v32 = vld [vmem:[#allocation3 + $0xa0] sm:$0xff] }
 0x55f   : > { %v8928_v7 = vpop.f32.mrf.mxu0  ;;  %8487 = vst.msk [vmem:[#allocation3 + $0xa8] sm:$0xff] %vm538_vm4, %v8451_v14 }
 0x560   : > { %v8991_v19 = vadd.f32 %v8928_v7, %v8520_v61  ;;  %11911 = vmatmul.msk.bf16.gmra.mxu2 %vm538_vm4, %v9723_v34  ;;  %v9741_v34 = vsel %vm2123_vm5, %v9731_v10, %v9740_v59 }
 0x561   : > { %v9062_v31 = vld [vmem:[#allocation3 + $0x88] sm:$0xff] }
 0x562   : > { %v9422_v41 = vadd.f32 %v9357_v12, %v9062_v31  ;;  %9027 = vst.msk [vmem:[#allocation3 + $0x90] sm:$0xff] %vm538_vm4, %v8991_v19  ;;  %11741 = vmatmul.msk.bf16.gmra.mxu0 %vm538_vm4, %v8816_v22 }
 0x563   : > { %v7882_v20 = vpop.f32.mrf.mxu2 }
 0x564   : > { %9458 = vst.msk [vmem:[#allocation3 + $0x88] sm:$0xff] %vm538_vm4, %v9422_v41  ;;  %v7921_v16 = vadd.f32 %v7882_v20, %v7602_v49  ;;  %v8395_v4 = vpop.f32.mrf.mxu3  ;;  %v9743_v20 = vshrl.u32 %v12260_v53, 16 }
 0x565   : > { %v8452_v11 = vadd.f32 %v8395_v4, %v7981_v43 }
 0x566   : > { %v9360_v37 = vpop.f32.mrf.mxu1  ;;  %7957 = vst.msk [vmem:[#allocation3 + $0x110] sm:$0xff] %vm538_vm4, %v7921_v16  ;;  %v8523_v47 = vld [vmem:[#allocation3 + $0xa8] sm:$0xff] }
 0x567   : > { %v8930_v57 = vpop.f32.mrf.mxu0  ;;  %8488 = vst.msk [vmem:[#allocation3 + $0xb0] sm:$0xff] %vm538_vm4, %v8452_v11 }
 0x568   : > { %v8992_v56 = vadd.f32 %v8930_v57, %v8521_v3  ;;  %v9745_v57 = vrot.slane %v9743_v20, 1  ;;  %v12262_v20 = vld [vmem:[#allocation2 + $0x7c] sm:$0xff] }
 0x569   : > { %v9063_v0 = vld [vmem:[#allocation3 + $0x90] sm:$0xff]  ;;  %11831 = vmatmul.msk.bf16.gmra.mxu1 %vm538_vm4, %v9248_v33 }
 0x56a   : > { %v9423_v60 = vadd.f32 %v9360_v37, %v9063_v0  ;;  %9028 = vst.msk [vmem:[#allocation3 + $0x98] sm:$0xff] %vm538_vm4, %v8992_v56  ;;  %v9748_v56 = vrot.slane %v9746_v51, 2  ;;  %v9480_v0 = vld [vmem:[#allocation3 + $0x18] sm:$0xff] }
 0x56b   : > { %v7884_v25 = vpop.f32.mrf.mxu2 }
 0x56c   : > { %9459 = vst.msk [vmem:[#allocation3 + $0x90] sm:$0xff] %vm538_vm4, %v9423_v60  ;;  %v7922_v62 = vadd.f32 %v7884_v25, %v7603_v29  ;;  %v8397_v48 = vpop.f32.mrf.mxu3  ;;  %v9749_v29 = vor.u32 %v9748_v56, %v9745_v57  ;;  %v7986_v25 = vld [vmem:[#allocation3 + $0xd8] sm:$0xff] }
 0x56d   : > { %v8453_v18 = vadd.f32 %v8397_v48, %v7982_v21 }
 0x56e   : > { %v9362_v38 = vpop.f32.mrf.mxu1  ;;  %7958 = vst.msk [vmem:[#allocation3 + $0x118] sm:$0xff] %vm538_vm4, %v7922_v62  ;;  %v8524_v7 = vld [vmem:[#allocation3 + $0xb0] sm:$0xff] }
 0x56f   : > { %v8933_v28 = vpop.f32.mrf.mxu0  ;;  %8489 = vst.msk [vmem:[#allocation3 + $0xb8] sm:$0xff] %vm538_vm4, %v8453_v18 }
 0x570   : > { %v8993_v52 = vadd.f32 %v8933_v28, %v8522_v32  ;;  %11912 = vmatmul.msk.bf16.gmra.mxu2 %vm538_vm4, %v9732_v40  ;;  %v9750_v28 = vsel %vm2123_vm5, %v9740_v59, %v9749_v29 }
 0x571   : > { %v9064_v1 = vld [vmem:[#allocation3 + $0x98] sm:$0xff] }
 0x572   : > { %v9424_v2 = vadd.f32 %v9362_v38, %v9064_v1  ;;  %9029 = vst.msk [vmem:[#allocation3 + $0xa0] sm:$0xff] %vm538_vm4, %v8993_v52  ;;  %v12261_v52 = vld [vmem:[#allocation2 + $0x74] sm:$0xff]  ;;  %v9481_v1 = vld [vmem:[#allocation3 + $0x20] sm:$0xff] }
 0x573   : > { %v9880_v35 = vpop.f32.mrf.mxu2 }
 0x574   : > { %9460 = vst.msk [vmem:[#allocation3 + $0x98] sm:$0xff] %vm538_vm4, %v9424_v2  ;;  %v8400_v30 = vpop.f32.mrf.mxu3  ;;  %v9970_v6 = vadd.f32 %v9880_v35, %v9477_v24  ;;  %v9752_v24 = vshrl.u32 %v12261_v52, 16  ;;  %v9755_v35 = vshll.u32 %v12261_v52, 16 }
 0x575   : > { %v8454_v46 = vadd.f32 %v8400_v30, %v7983_v17 }
 0x576   : > { %v9365_v27 = vpop.f32.mrf.mxu1  ;;  %10006 = vst.msk [vmem:[#allocation3] sm:$0xff] %vm538_vm4, %v9970_v6  ;;  %v8525_v37 = vld [vmem:[#allocation3 + $0xb8] sm:$0xff] }
 0x577   : > { %v8935_v5 = vpop.f32.mrf.mxu0  ;;  %8490 = vst.msk [vmem:[#allocation3 + $0xc0] sm:$0xff] %vm538_vm4, %v8454_v46 }
 0x578   : > { %v8994_v50 = vadd.f32 %v8935_v5, %v8523_v47  ;;  %v9754_v5 = vrot.slane %v9752_v24, 1 }
 0x579   : > { %v9065_v54 = vld [vmem:[#allocation3 + $0xa0] sm:$0xff] }
 0x57a   : > { %v9425_v55 = vadd.f32 %v9365_v27, %v9065_v54  ;;  %9030 = vst.msk [vmem:[#allocation3 + $0xa8] sm:$0xff] %vm538_vm4, %v8994_v50  ;;  %v9757_v50 = vrot.slane %v9755_v35, 2 }
 0x57b   : > { %v9882_v63 = vpop.f32.mrf.mxu2 }
 0x57c   : > { %9461 = vst.msk [vmem:[#allocation3 + $0xa0] sm:$0xff] %vm538_vm4, %v9425_v55  ;;  %v8402_v14 = vpop.f32.mrf.mxu3  ;;  %v9971_v12 = vadd.f32 %v9882_v63, %v9478_v23  ;;  %v9482_v23 = vld [vmem:[#allocation3 + $0x28] sm:$0xff]  ;;  %v9758_v59 = vor.u32 %v9757_v50, %v9754_v5 }
 0x57d   : > { %v8455_v8 = vadd.f32 %v8402_v14, %v7984_v44  ;;  %v7988_v14 = vld [vmem:[#allocation3 + $0xe8] sm:$0xff] }
 0x57e   : > { %v9367_v61 = vpop.f32.mrf.mxu1  ;;  %10007 = vst.msk [vmem:[#allocation3 + $0x8] sm:$0xff] %vm538_vm4, %v9971_v12  ;;  %v8526_v18 = vld [vmem:[#allocation3 + $0xc0] sm:$0xff] }
 0x57f   : > { %v8938_v22 = vpop.f32.mrf.mxu0  ;;  %8491 = vst.msk [vmem:[#allocation3 + $0xc8] sm:$0xff] %vm538_vm4, %v8455_v8 }
 0x580   : > { %v8995_v19 = vadd.f32 %v8938_v22, %v8524_v7  ;;  %11913 = vmatmul.msk.bf16.gmra.mxu2 %vm538_vm4, %v9741_v34  ;;  %v15444_v34 = vld [vmem:[%s15556_s5] ss:$0 sm:$0xff] }
 0x581   : > { %v9066_v31 = vld [vmem:[#allocation3 + $0xa8] sm:$0xff] }
 0x582   : > { %v9426_v41 = vadd.f32 %v9367_v61, %v9066_v31  ;;  %9031 = vst.msk [vmem:[#allocation3 + $0xb0] sm:$0xff] %vm538_vm4, %v8995_v19 }
 0x583   : > { %v9885_v49 = vpop.f32.mrf.mxu2 }
 0x584   : > { %9462 = vst.msk [vmem:[#allocation3 + $0xa8] sm:$0xff] %vm538_vm4, %v9426_v41  ;;  %v8405_v16 = vpop.f32.mrf.mxu3  ;;  %v9972_v43 = vadd.f32 %v9885_v49, %v9479_v42  ;;  %v9759_v49 = vsel %vm2123_vm5, %v9749_v29, %v9758_v59 }
 0x585   : > { %v8456_v4 = vadd.f32 %v8405_v16, %v7985_v39  ;;  %v10042_v45 = vld [vmem:[#allocation3] ss:$2 sm:$0xff]  ;;  %v10044_v54 = vld [vmem:[#allocation3 + $0x1] ss:$2 sm:$0xff] }
 0x586   : > { %v9370_v11 = vpop.f32.mrf.mxu1  ;;  %10008 = vst.msk [vmem:[#allocation3 + $0x10] sm:$0xff] %vm538_vm4, %v9972_v43  ;;  %v8527_v46 = vld [vmem:[#allocation3 + $0xc8] sm:$0xff]  ;;  %v10045_v44 = vadd.f32 %v10044_v54, %v10042_v45 }
 0x587   : > { %v8940_v33 = vpop.f32.mrf.mxu0  ;;  %8492 = vst.msk [vmem:[#allocation3 + $0xd0] sm:$0xff] %vm538_vm4, %v8456_v4  ;;  %v9483_v4 = vld [vmem:[#allocation3 + $0x30] sm:$0xff] }
 0x588   : > { %v8996_v3 = vadd.f32 %v8940_v33, %v8525_v37  ;;  %v9761_v37 = vshrl.u32 %v12262_v20, 16  ;;  %v9764_v33 = vshll.u32 %v12262_v20, 16 }
 0x589   : > { %v9067_v15 = vld [vmem:[#allocation3 + $0xb0] sm:$0xff] }
 0x58a   : > { %v9427_v13 = vadd.f32 %v9370_v11, %v9067_v15  ;;  %9032 = vst.msk [vmem:[#allocation3 + $0xb8] sm:$0xff] %vm538_vm4, %v8996_v3  ;;  %v7989_v3 = vld [vmem:[#allocation3 + $0xf0] sm:$0xff] }
 0x58b   : > { %v9887_v60 = vpop.f32.mrf.mxu2 }
 0x58c   : > { %9463 = vst.msk [vmem:[#allocation3 + $0xb0] sm:$0xff] %vm538_vm4, %v9427_v13  ;;  %v8407_v10 = vpop.f32.mrf.mxu3  ;;  %v9973_v62 = vadd.f32 %v9887_v60, %v9480_v0 }
 0x58d   : > { %v8457_v21 = vadd.f32 %v8407_v10, %v7986_v25  ;;  %v9763_v25 = vrot.slane %v9761_v37, 1  ;;  %v9766_v10 = vrot.slane %v9764_v33, 2  ;;  %v12264_v37 = vld [vmem:[#allocation2 + $0x8c] sm:$0xff] }
 0x58e   : > { %v9372_v48 = vpop.f32.mrf.mxu1  ;;  %10009 = vst.msk [vmem:[#allocation3 + $0x18] sm:$0xff] %vm538_vm4, %v9973_v62  ;;  %v8528_v53 = vld [vmem:[#allocation3 + $0xd0] sm:$0xff] }
 0x58f   : > { %v8943_v38 = vpop.f32.mrf.mxu0  ;;  %8493 = vst.msk [vmem:[#allocation3 + $0xd8] sm:$0xff] %vm538_vm4, %v8457_v21 }
 0x590   : > { %v8997_v32 = vadd.f32 %v8943_v38, %v8526_v18  ;;  %11914 = vmatmul.msk.bf16.gmra.mxu2 %vm538_vm4, %v9750_v28  ;;  %v9767_v38 = vor.u32 %v9766_v10, %v9763_v25 }
 0x591   : > { %v9068_v40 = vld [vmem:[#allocation3 + $0xb8] sm:$0xff] }
 0x592   : > { %v9428_v58 = vadd.f32 %v9372_v48, %v9068_v40  ;;  %9033 = vst.msk [vmem:[#allocation3 + $0xc0] sm:$0xff] %vm538_vm4, %v8997_v32  ;;  %v9484_v48 = vld [vmem:[#allocation3 + $0x38] sm:$0xff]  ;;  %v9768_v35 = vsel %vm2123_vm5, %v9758_v59, %v9767_v38 }
 0x593   : > { %v9890_v2 = vpop.f32.mrf.mxu2  ;;  %v7990_v32 = vld [vmem:[#allocation3 + $0xf8] sm:$0xff] }
 0x594   : > { %9464 = vst.msk [vmem:[#allocation3 + $0xb8] sm:$0xff] %vm538_vm4, %v9428_v58  ;;  %v8410_v26 = vpop.f32.mrf.mxu3  ;;  %v9974_v17 = vadd.f32 %v9890_v2, %v9481_v1 }
 0x595   : > { %v8458_v30 = vadd.f32 %v8410_v26, %v7987_v36  ;;  %v12263_v36 = vld [vmem:[#allocation2 + $0x84] sm:$0xff] }
 0x596   : > { %v9375_v6 = vpop.f32.mrf.mxu1  ;;  %10010 = vst.msk [vmem:[#allocation3 + $0x20] sm:$0xff] %vm538_vm4, %v9974_v17  ;;  %v8529_v0 = vld [vmem:[#allocation3 + $0xd8] sm:$0xff] }
 0x597   : > { %v8945_v27 = vpop.f32.mrf.mxu0  ;;  %8494 = vst.msk [vmem:[#allocation3 + $0xe0] sm:$0xff] %vm538_vm4, %v8458_v30  ;;  %v9485_v30 = vld [vmem:[#allocation3 + $0x40] sm:$0xff] }
 0x598   : > { %v8998_v47 = vadd.f32 %v8945_v27, %v8527_v46  ;;  %v9770_v46 = vshrl.u32 %v12263_v36, 16  ;;  %v9773_v27 = vshll.u32 %v12263_v36, 16 }
 0x599   : > { %v9069_v9 = vld [vmem:[#allocation3 + $0xc0] sm:$0xff] }
 0x59a   : > { %v9429_v55 = vadd.f32 %v9375_v6, %v9069_v9  ;;  %9034 = vst.msk [vmem:[#allocation3 + $0xc8] sm:$0xff] %vm538_vm4, %v8998_v47  ;;  %v7991_v47 = vld [vmem:[#allocation3 + $0x100] sm:$0xff]  ;;  %v9775_v59 = vrot.slane %v9773_v27, 2 }
 0x59b   : > { %v9892_v63 = vpop.f32.mrf.mxu2 }
 0x59c   : > { %9465 = vst.msk [vmem:[#allocation3 + $0xc0] sm:$0xff] %vm538_vm4, %v9429_v55  ;;  %v8412_v12 = vpop.f32.mrf.mxu3  ;;  %v9975_v8 = vadd.f32 %v9892_v63, %v9482_v23  ;;  %v9772_v63 = vrot.slane %v9770_v46, 1 }
 0x59d   : > { %v10047_v61 = vld [vmem:[#allocation3 + $0x12] ss:$2 sm:$0xff]  ;;  %v8459_v7 = vadd.f32 %v8412_v12, %v7988_v14  ;;  %v10050_v41 = vld [vmem:[#allocation3 + $0x13] ss:$2 sm:$0xff] }
 0x59e   : > { %v9377_v22 = vpop.f32.mrf.mxu1  ;;  %v10048_v19 = vadd.f32 %v10047_v61, %v10045_v44  ;;  %10011 = vst.msk [vmem:[#allocation3 + $0x28] sm:$0xff] %vm538_vm4, %v9975_v8  ;;  %v8530_v1 = vld [vmem:[#allocation3 + $0xe0] sm:$0xff]  ;;  %v9486_v61 = vld [vmem:[#allocation3 + $0x48] sm:$0xff] }
 0x59f   : > { %v8948_v31 = vpop.f32.mrf.mxu0  ;;  %8495 = vst.msk [vmem:[#allocation3 + $0xe8] sm:$0xff] %vm538_vm4, %v8459_v7 }
 0x5a0   : > { %v8999_v42 = vadd.f32 %v8948_v31, %v8528_v53  ;;  %v10051_v51 = vadd.f32 %v10050_v41, %v10048_v19  ;;  %11915 = vmatmul.msk.bf16.gmra.mxu2 %vm538_vm4, %v9759_v49  ;;  %v7992_v53 = vld [vmem:[#allocation3 + $0x108] sm:$0xff] }
 0x5a1   : > { %v9070_v39 = vld [vmem:[#allocation3 + $0xc8] sm:$0xff] }
 0x5a2   : > { %v9430_v16 = vadd.f32 %v9377_v22, %v9070_v39  ;;  %9035 = vst.msk [vmem:[#allocation3 + $0xd0] sm:$0xff] %vm538_vm4, %v8999_v42  ;;  %v10133_v43 = vadd.f32 %v15444_v34, %v10051_v51  ;;  %v9776_v22 = vor.u32 %v9775_v59, %v9772_v63 }
 0x5a3   : > { %v9895_v11 = vpop.f32.mrf.mxu2 }
 0x5a4   : > { %9466 = vst.msk [vmem:[#allocation3 + $0xc8] sm:$0xff] %vm538_vm4, %v9430_v16  ;;  %v8415_v57 = vpop.f32.mrf.mxu3  ;;  %v9976_v56 = vadd.f32 %v9895_v11, %v9483_v4  ;;  %v9777_v11 = vsel %vm2123_vm5, %v9767_v38, %v9776_v22 }
 0x5a5   : > { %10141 = vst.msk [vmem:[%s15453_s7] sm:$0xff] %vm538_vm4, %v10133_v43  ;;  %v8460_v15 = vadd.f32 %v8415_v57, %v7989_v3 }
 0x5a6   : > { %v9380_v13 = vpop.f32.mrf.mxu1  ;;  %10012 = vst.msk [vmem:[#allocation3 + $0x30] sm:$0xff] %vm538_vm4, %v9976_v56  ;;  %v8531_v54 = vld [vmem:[#allocation3 + $0xe8] sm:$0xff] }
 0x5a7   : > { %v8950_v60 = vpop.f32.mrf.mxu0  ;;  %8496 = vst.msk [vmem:[#allocation3 + $0xf0] sm:$0xff] %vm538_vm4, %v8460_v15  ;;  %v9487_v15 = vld [vmem:[#allocation3 + $0x50] sm:$0xff] }
 0x5a8   : > { %v9000_v29 = vadd.f32 %v8950_v60, %v8529_v0  ;;  %v9779_v0 = vshrl.u32 %v12264_v37, 16  ;;  %v9782_v60 = vshll.u32 %v12264_v37, 16  ;;  %v9491_v37 = vld [vmem:[#allocation3 + $0x70] sm:$0xff] }
 0x5a9   : > { %v9071_v62 = vld [vmem:[#allocation3 + $0xd0] sm:$0xff] }
 0x5aa   : > { %v9431_v21 = vadd.f32 %v9380_v13, %v9071_v62  ;;  %9036 = vst.msk [vmem:[#allocation3 + $0xd8] sm:$0xff] %vm538_vm4, %v9000_v29  ;;  %v7993_v29 = vld [vmem:[#allocation3 + $0x110] sm:$0xff] }
 0x5ab   : > { %v9897_v18 = vpop.f32.mrf.mxu2 }
 0x5ac   : > { %9467 = vst.msk [vmem:[#allocation3 + $0xd0] sm:$0xff] %vm538_vm4, %v9431_v21  ;;  %v8417_v28 = vpop.f32.mrf.mxu3  ;;  %v9977_v52 = vadd.f32 %v9897_v18, %v9484_v48 }
 0x5ad   : > { %v8461_v40 = vadd.f32 %v8417_v28, %v7990_v32  ;;  %v10053_v14 = vld [vmem:[#allocation3 + $0x24] ss:$2 sm:$0xff]  ;;  %v10055_v12 = vld [vmem:[#allocation3 + $0x25] ss:$2 sm:$0xff]  ;;  %v9781_v32 = vrot.slane %v9779_v0, 1  ;;  %v9784_v28 = vrot.slane %v9782_v60, 2 }
 0x5ae   : > { %v9382_v58 = vpop.f32.mrf.mxu1  ;;  %10013 = vst.msk [vmem:[#allocation3 + $0x38] sm:$0xff] %vm538_vm4, %v9977_v52  ;;  %v10056_v19 = vadd.f32 %v10055_v12, %v10053_v14  ;;  %v8532_v39 = vld [vmem:[#allocation3 + $0xf0] sm:$0xff] }
 0x5af   : > { %v8953_v2 = vpop.f32.mrf.mxu0  ;;  %8497 = vst.msk [vmem:[#allocation3 + $0xf8] sm:$0xff] %vm538_vm4, %v8461_v40 }
 0x5b0   : > { %v9001_v24 = vadd.f32 %v8953_v2, %v8530_v1  ;;  %11916 = vmatmul.msk.bf16.gmra.mxu2 %vm538_vm4, %v9768_v35  ;;  %v9785_v2 = vor.u32 %v9784_v28, %v9781_v32 }
 0x5b1   : > { %v9072_v26 = vld [vmem:[#allocation3 + $0xd8] sm:$0xff] }
 0x5b2   : > { %v9432_v17 = vadd.f32 %v9382_v58, %v9072_v26  ;;  %9037 = vst.msk [vmem:[#allocation3 + $0xe0] sm:$0xff] %vm538_vm4, %v9001_v24  ;;  %v9488_v58 = vld [vmem:[#allocation3 + $0x58] sm:$0xff]  ;;  %v9786_v27 = vsel %vm2123_vm5, %v9776_v22, %v9785_v2  ;;  %v9490_v22 = vld [vmem:[#allocation3 + $0x68] sm:$0xff] }
 0x5b3   : > { %v9900_v6 = vpop.f32.mrf.mxu2  ;;  %v7994_v24 = vld [vmem:[#allocation3 + $0x118] sm:$0xff] }
 0x5b4   : > { %9468 = vst.msk [vmem:[#allocation3 + $0xd8] sm:$0xff] %vm538_vm4, %v9432_v17  ;;  %v8420_v5 = vpop.f32.mrf.mxu3  ;;  %v9978_v50 = vadd.f32 %v9900_v6, %v9485_v30 }
 0x5b5   : > { %v8462_v9 = vadd.f32 %v8420_v5, %v7991_v47  ;;  %v12265_v47 = vld [vmem:[#allocation2 + $0x94] sm:$0xff] }
 0x5b6   : > { %v9385_v45 = vpop.f32.mrf.mxu1  ;;  %10014 = vst.msk [vmem:[#allocation3 + $0x40] sm:$0xff] %vm538_vm4, %v9978_v50  ;;  %v8533_v48 = vld [vmem:[#allocation3 + $0xf8] sm:$0xff] }
 0x5b7   : > { %v8955_v55 = vpop.f32.mrf.mxu0  ;;  %8498 = vst.msk [vmem:[#allocation3 + $0x100] sm:$0xff] %vm538_vm4, %v8462_v9  ;;  %v9489_v9 = vld [vmem:[#allocation3 + $0x60] sm:$0xff] }
 0x5b8   : > { %v9002_v23 = vadd.f32 %v8955_v55, %v8531_v54  ;;  %v9788_v54 = vshrl.u32 %v12265_v47, 16  ;;  %v9791_v55 = vshll.u32 %v12265_v47, 16 }
 0x5b9   : > { %v9073_v44 = vld [vmem:[#allocation3 + $0xe0] sm:$0xff] }
 0x5ba   : > { %v9433_v8 = vadd.f32 %v9385_v45, %v9073_v44  ;;  %9038 = vst.msk [vmem:[#allocation3 + $0xe8] sm:$0xff] %vm538_vm4, %v9002_v23  ;;  %v9790_v12 = vrot.slane %v9788_v54, 1  ;;  %v9494_v54 = vld [vmem:[#allocation3 + $0x88] sm:$0xff] }
 0x5bb   : > { %v9902_v7 = vpop.f32.mrf.mxu2 }
 0x5bc   : > { %9469 = vst.msk [vmem:[#allocation3 + $0xe0] sm:$0xff] %vm538_vm4, %v9433_v8  ;;  %v8422_v31 = vpop.f32.mrf.mxu3  ;;  %v9979_v41 = vadd.f32 %v9902_v7, %v9486_v61  ;;  %v9793_v8 = vrot.slane %v9791_v55, 2 }
 0x5bd   : > { %v10058_v42 = vld [vmem:[#allocation3 + $0x36] ss:$2 sm:$0xff]  ;;  %v8463_v49 = vadd.f32 %v8422_v31, %v7992_v53  ;;  %v10061_v43 = vld [vmem:[#allocation3 + $0x37] ss:$2 sm:$0xff] }
 0x5be   : > { %v9387_v20 = vpop.f32.mrf.mxu1  ;;  %v10059_v51 = vadd.f32 %v10058_v42, %v10056_v19  ;;  %10015 = vst.msk [vmem:[#allocation3 + $0x48] sm:$0xff] %vm538_vm4, %v9979_v41  ;;  %v8534_v30 = vld [vmem:[#allocation3 + $0x100] sm:$0xff]  ;;  %v9794_v53 = vor.u32 %v9793_v8, %v9790_v12 }
 0x5bf   : > { %v8958_v16 = vpop.f32.mrf.mxu0  ;;  %8499 = vst.msk [vmem:[#allocation3 + $0x108] sm:$0xff] %vm538_vm4, %v8463_v49 }
 0x5c0   : > { %v9003_v4 = vadd.f32 %v8958_v16, %v8532_v39  ;;  %v10062_v33 = vadd.f32 %v10061_v43, %v10059_v51  ;;  %11917 = vmatmul.msk.bf16.gmra.mxu2 %vm538_vm4, %v9777_v11  ;;  %v9795_v51 = vsel %vm2123_vm5, %v9785_v2, %v9794_v53  ;;  %v12266_v39 = vld [vmem:[#allocation2 + $0x9c] sm:$0xff]  ;;  %v9549_v2 = vld [vmem:[#allocation2 + $0xa4] sm:$0x3] }
 0x5c1   : > { %v9074_v3 = vld [vmem:[#allocation3 + $0xe8] sm:$0xff] }
 0x5c2   : > { %v9434_v57 = vadd.f32 %v9387_v20, %v9074_v3  ;;  %9039 = vst.msk [vmem:[#allocation3 + $0xf0] sm:$0xff] %vm538_vm4, %v9003_v4  ;;  %v10134_v56 = vadd.f32 %v15444_v34, %v10062_v33  ;;  %v9797_v3 = vshrl.u32 %v12266_v39, 16 }
 0x5c3   : > { %v9905_v13 = vpop.f32.mrf.mxu2 }
 0x5c4   : > { %9470 = vst.msk [vmem:[#allocation3 + $0xe8] sm:$0xff] %vm538_vm4, %v9434_v57  ;;  %v8425_v25 = vpop.f32.mrf.mxu3  ;;  %v9980_v10 = vadd.f32 %v9905_v13, %v9487_v15  ;;  %v9800_v57 = vshll.u32 %v12266_v39, 16 }
 0x5c5   : > { %10142 = vst.msk [vmem:[%s15453_s7 + $0x8] sm:$0xff] %vm538_vm4, %v10134_v56  ;;  %v8464_v62 = vadd.f32 %v8425_v25, %v7993_v29 }
 0x5c6   : > { %v9390_v21 = vpop.f32.mrf.mxu1  ;;  %10016 = vst.msk [vmem:[#allocation3 + $0x50] sm:$0xff] %vm538_vm4, %v9980_v10  ;;  %v8535_v59 = vld [vmem:[#allocation3 + $0x108] sm:$0xff] }
 0x5c7   : > { %v8960_v18 = vpop.f32.mrf.mxu0  ;;  %8500 = vst.msk [vmem:[#allocation3 + $0x110] sm:$0xff] %vm538_vm4, %v8464_v62 }
 0x5c8   : > { %v9004_v38 = vadd.f32 %v8960_v18, %v8533_v48  ;;  %v9802_v48 = vrot.slane %v9800_v57, 2 }
 0x5c9   : > { %v9075_v52 = vld [vmem:[#allocation3 + $0xf0] sm:$0xff] }
 0x5ca   : > { %v9435_v40 = vadd.f32 %v9390_v21, %v9075_v52  ;;  %9040 = vst.msk [vmem:[#allocation3 + $0xf8] sm:$0xff] %vm538_vm4, %v9004_v38  ;;  %v9799_v21 = vrot.slane %v9797_v3, 1  ;;  %v9492_v52 = vld [vmem:[#allocation3 + $0x78] sm:$0xff] }
 0x5cb   : > { %v9907_v1 = vpop.f32.mrf.mxu2 }
 0x5cc   : > { %9471 = vst.msk [vmem:[#allocation3 + $0xf0] sm:$0xff] %vm538_vm4, %v9435_v40  ;;  %v8427_v35 = vpop.f32.mrf.mxu3  ;;  %v9981_v36 = vadd.f32 %v9907_v1, %v9488_v58  ;;  %v9803_v58 = vor.u32 %v9802_v48, %v9799_v21  ;;  %v9501_v21 = vld [vmem:[#allocation3 + $0xc0] sm:$0xff] }
 0x5cd   : > { %v8465_v26 = vadd.f32 %v8427_v35, %v7994_v24  ;;  %v10064_v43 = vld [vmem:[#allocation3 + $0x48] ss:$2 sm:$0xff]  ;;  %v10066_v4 = vld [vmem:[#allocation3 + $0x49] ss:$2 sm:$0xff]  ;;  %v9624_v24 = vunpack.c.l.b16 %v9549_v2 }
 0x5ce   : > { %v9392_v17 = vpop.f32.mrf.mxu1  ;;  %10017 = vst.msk [vmem:[#allocation3 + $0x58] sm:$0xff] %vm538_vm4, %v9981_v36  ;;  %v8536_v42 = vld [vmem:[#allocation3 + $0x110] sm:$0xff]  ;;  %v10067_v56 = vadd.f32 %v10066_v4, %v10064_v43  ;;  %v9804_v36 = vsel %vm2123_vm5, %v9794_v53, %v9803_v58 }
 0x5cf   : > { %v8963_v6 = vpop.f32.mrf.mxu0  ;;  %8501 = vst.msk [vmem:[#allocation3 + $0x118] sm:$0xff] %vm538_vm4, %v8465_v26  ;;  %v9643_v26 = vpack.c.b16 %v9624_v24, %v9624_v24  ;;  %v9504_v24 = vld [vmem:[#allocation3 + $0xd8] sm:$0xff] }
 0x5d0   : > { %v9005_v46 = vadd.f32 %v8963_v6, %v8534_v30  ;;  %11918 = vmatmul.msk.bf16.gmra.mxu2 %vm538_vm4, %v9786_v27  ;;  %v9493_v27 = vld [vmem:[#allocation3 + $0x80] sm:$0xff] }
 0x5d1   : > { %v9076_v5 = vld [vmem:[#allocation3 + $0xf8] sm:$0xff]  ;;  %v9806_v6 = vshrl.u32 %v9643_v26, 16 }
 0x5d2   : > { %v9436_v50 = vadd.f32 %v9392_v17, %v9076_v5  ;;  %9041 = vst.msk [vmem:[#allocation3 + $0x100] sm:$0xff] %vm538_vm4, %v9005_v46  ;;  %v9809_v46 = vshll.u32 %v9643_v26, 16 }
 0x5d3   : > { %v9910_v45 = vpop.f32.mrf.mxu2 }
 0x5d4   : > { %9472 = vst.msk [vmem:[#allocation3 + $0xf8] sm:$0xff] %vm538_vm4, %v9436_v50  ;;  %v9982_v23 = vadd.f32 %v9910_v45, %v9489_v9  ;;  %v9808_v50 = vrot.slane %v9806_v6, 1  ;;  %v9811_v9 = vrot.slane %v9809_v46, 2 }
 0x5d6   : > { %v9395_v63 = vpop.f32.mrf.mxu1  ;;  %10018 = vst.msk [vmem:[#allocation3 + $0x60] sm:$0xff] %vm538_vm4, %v9982_v23  ;;  %v8537_v29 = vld [vmem:[#allocation3 + $0x118] sm:$0xff]  ;;  %v9812_v45 = vor.u32 %v9811_v9, %v9808_v50  ;;  %v9506_v9 = vld [vmem:[#allocation3 + $0xe8] sm:$0xff] }
 0x5d7   : > { %v8965_v44 = vpop.f32.mrf.mxu0 }
 0x5d8   : > { %v9006_v14 = vadd.f32 %v8965_v44, %v8535_v59 }
 0x5d9   : > { %v9077_v61 = vld [vmem:[#allocation3 + $0x100] sm:$0xff] }
 0x5da   : > { %v9437_v7 = vadd.f32 %v9395_v63, %v9077_v61  ;;  %9042 = vst.msk [vmem:[#allocation3 + $0x108] sm:$0xff] %vm538_vm4, %v9006_v14  ;;  %v9813_v63 = vsel %vm2123_vm5, %v9803_v58, %v9812_v45  ;;  %v9495_v14 = vld [vmem:[#allocation3 + $0x90] sm:$0xff] }
 0x5db   : > { %v9912_v19 = vpop.f32.mrf.mxu2 }
 0x5dc   : > { %9473 = vst.msk [vmem:[#allocation3 + $0x100] sm:$0xff] %vm538_vm4, %v9437_v7  ;;  %v9983_v31 = vadd.f32 %v9912_v19, %v9490_v22 }
 0x5de   : > { %v9397_v41 = vpop.f32.mrf.mxu1  ;;  %10019 = vst.msk [vmem:[#allocation3 + $0x68] sm:$0xff] %vm538_vm4, %v9983_v31 }
 0x5df   : > { %v8968_v49 = vpop.f32.mrf.mxu0 }
 0x5e0   : > { %v9007_v20 = vadd.f32 %v8968_v49, %v8536_v42  ;;  %11919 = vmatmul.msk.bf16.gmra.mxu2 %vm538_vm4, %v9795_v51 }
 0x5e1   : > { %v9078_v16 = vld [vmem:[#allocation3 + $0x108] sm:$0xff] }
 0x5e2   : > { %v9438_v11 = vadd.f32 %v9397_v41, %v9078_v16  ;;  %9043 = vst.msk [vmem:[#allocation3 + $0x110] sm:$0xff] %vm538_vm4, %v9007_v20  ;;  %v9496_v41 = vld [vmem:[#allocation3 + $0x98] sm:$0xff]  ;;  %v9497_v20 = vld [vmem:[#allocation3 + $0xa0] sm:$0xff]  ;;  %v9498_v16 = vld [vmem:[#allocation3 + $0xa8] sm:$0xff] }
 0x5e3   : > { %v9915_v33 = vpop.f32.mrf.mxu2 }
 0x5e4   : > { %9474 = vst.msk [vmem:[#allocation3 + $0x108] sm:$0xff] %vm538_vm4, %v9438_v11  ;;  %v9984_v15 = vadd.f32 %v9915_v33, %v9491_v37  ;;  %v9499_v11 = vld [vmem:[#allocation3 + $0xb0] sm:$0xff] }
 0x5e5   : > { %v10069_v13 = vld [vmem:[#allocation3 + $0x5a] ss:$2 sm:$0xff]  ;;  %v10072_v10 = vld [vmem:[#allocation3 + $0x5b] ss:$2 sm:$0xff] }
 0x5e6   : > { %v9400_v0 = vpop.f32.mrf.mxu1  ;;  %v10070_v60 = vadd.f32 %v10069_v13, %v10067_v56  ;;  %10020 = vst.msk [vmem:[#allocation3 + $0x70] sm:$0xff] %vm538_vm4, %v9984_v15  ;;  %v9500_v56 = vld [vmem:[#allocation3 + $0xb8] sm:$0xff] }
 0x5e7   : > { %v8970_v25 = vpop.f32.mrf.mxu0 }
 0x5e8   : > { %v9008_v62 = vadd.f32 %v8970_v25, %v8537_v29  ;;  %v10073_v18 = vadd.f32 %v10072_v10, %v10070_v60 }
 0x5e9   : > { %v9079_v38 = vld [vmem:[#allocation3 + $0x110] sm:$0xff] }
 0x5ea   : > { %9044 = vst.msk [vmem:[#allocation3 + $0x118] sm:$0xff] %vm538_vm4, %v9008_v62  ;;  %v9439_v32 = vadd.f32 %v9400_v0, %v9079_v38  ;;  %v10135_v28 = vadd.f32 %v15444_v34, %v10073_v18  ;;  %v9502_v38 = vld [vmem:[#allocation3 + $0xc8] sm:$0xff] }
 0x5eb   : > { %v9917_v40 = vpop.f32.mrf.mxu2 }
 0x5ec   : > { %9475 = vst.msk [vmem:[#allocation3 + $0x110] sm:$0xff] %vm538_vm4, %v9439_v32  ;;  %v9985_v1 = vadd.f32 %v9917_v40, %v9492_v52  ;;  %v9503_v52 = vld [vmem:[#allocation3 + $0xd0] sm:$0xff] }
 0x5ed   : > { %10143 = vst.msk [vmem:[%s15453_s7 + $0x10] sm:$0xff] %vm538_vm4, %v10135_v28 }
 0x5ee   : > { %10021 = vst.msk [vmem:[#allocation3 + $0x78] sm:$0xff] %vm538_vm4, %v9985_v1  ;;  %v9402_v35 = vpop.f32.mrf.mxu1 }
 0x5f0   : > { %11920 = vmatmul.msk.bf16.gmra.mxu2 %vm538_vm4, %v9804_v36 }
 0x5f1   : > { %v9080_v17 = vld [vmem:[#allocation3 + $0x118] sm:$0xff] }
 0x5f2   : > { %v9440_v30 = vadd.f32 %v9402_v35, %v9080_v17 }
 0x5f3   : > { %v9920_v47 = vpop.f32.mrf.mxu2 }
 0x5f4   : > { %9476 = vst.msk [vmem:[#allocation3 + $0x118] sm:$0xff] %vm538_vm4, %v9440_v30  ;;  %v9986_v5 = vadd.f32 %v9920_v47, %v9493_v27  ;;  %v9505_v47 = vld [vmem:[#allocation3 + $0xe0] sm:$0xff] }
 0x5f5   : > { %v10075_v59 = vld [vmem:[#allocation3 + $0x6c] ss:$2 sm:$0xff]  ;;  %v10077_v44 = vld [vmem:[#allocation3 + $0x6d] ss:$2 sm:$0xff] }
 0x5f6   : > { %10022 = vst.msk [vmem:[#allocation3 + $0x80] sm:$0xff] %vm538_vm4, %v9986_v5  ;;  %v10078_v8 = vadd.f32 %v10077_v44, %v10075_v59  ;;  %v9508_v59 = vld [vmem:[#allocation3 + $0xf8] sm:$0xff] }
 0x5fb   : > { %v9922_v55 = vpop.f32.mrf.mxu2 }
 0x5fc   : > { %v9987_v23 = vadd.f32 %v9922_v55, %v9494_v54  ;;  %v9507_v55 = vld [vmem:[#allocation3 + $0xf0] sm:$0xff] }
 0x5fe   : > { %10023 = vst.msk [vmem:[#allocation3 + $0x88] sm:$0xff] %vm538_vm4, %v9987_v23 }
 0x600   : > { %11921 = vmatmul.msk.bf16.gmra.mxu2 %vm538_vm4, %v9813_v63 }
 0x603   : > { %v9925_v12 = vpop.f32.mrf.mxu2 }
 0x604   : > { %v9988_v61 = vadd.f32 %v9925_v12, %v9495_v14 }
 0x605   : > { %v10080_v7 = vld [vmem:[#allocation3 + $0x7e] ss:$2 sm:$0xff]  ;;  %v10083_v19 = vld [vmem:[#allocation3 + $0x7f] ss:$2 sm:$0xff] }
 0x606   : > { %v10081_v22 = vadd.f32 %v10080_v7, %v10078_v8  ;;  %10024 = vst.msk [vmem:[#allocation3 + $0x90] sm:$0xff] %vm538_vm4, %v9988_v61  ;;  %v9509_v61 = vld [vmem:[#allocation3 + $0x100] sm:$0xff] }
 0x608   : > { %v10084_v53 = vadd.f32 %v10083_v19, %v10081_v22 }
 0x60a   : > { %v10136_v31 = vadd.f32 %v15444_v34, %v10084_v53 }
 0x60b   : > { %v9927_v42 = vpop.f32.mrf.mxu2 }
 0x60c   : > { %10144 = vst.msk [vmem:[%s15453_s7 + $0x18] sm:$0xff] %vm538_vm4, %v10136_v31  ;;  %v9989_v49 = vadd.f32 %v9927_v42, %v9496_v41 }
 0x60e   : > { %10025 = vst.msk [vmem:[#allocation3 + $0x98] sm:$0xff] %vm538_vm4, %v9989_v49 }
 0x613   : > { %v9930_v51 = vpop.f32.mrf.mxu2 }
 0x614   : > { %v9990_v39 = vadd.f32 %v9930_v51, %v9497_v20  ;;  %v9510_v20 = vld [vmem:[#allocation3 + $0x108] sm:$0xff] }
 0x615   : > { %v10086_v3 = vld [vmem:[#allocation3 + $0x90] ss:$2 sm:$0xff]  ;;  %v10088_v57 = vld [vmem:[#allocation3 + $0x91] ss:$2 sm:$0xff] }
 0x616   : > { %10026 = vst.msk [vmem:[#allocation3 + $0xa0] sm:$0xff] %vm538_vm4, %v9990_v39  ;;  %v10089_v13 = vadd.f32 %v10088_v57, %v10086_v3 }
 0x61b   : > { %v9932_v43 = vpop.f32.mrf.mxu2 }
 0x61c   : > { %v9991_v4 = vadd.f32 %v9932_v43, %v9498_v16  ;;  %v9511_v16 = vld [vmem:[#allocation3 + $0x110] sm:$0xff] }
 0x61e   : > { %10027 = vst.msk [vmem:[#allocation3 + $0xa8] sm:$0xff] %vm538_vm4, %v9991_v4 }
 0x623   : > { %v9935_v37 = vpop.f32.mrf.mxu2 }
 0x624   : > { %v9992_v33 = vadd.f32 %v9935_v37, %v9499_v11  ;;  %v9512_v11 = vld [vmem:[#allocation3 + $0x118] sm:$0xff] }
 0x626   : > { %10028 = vst.msk [vmem:[#allocation3 + $0xb0] sm:$0xff] %vm538_vm4, %v9992_v33 }
 0x62b   : > { %v9937_v15 = vpop.f32.mrf.mxu2 }
 0x62c   : > { %v9993_v0 = vadd.f32 %v9937_v15, %v9500_v56 }
 0x62d   : > { %v10091_v60 = vld [vmem:[#allocation3 + $0xa2] ss:$2 sm:$0xff]  ;;  %v10094_v25 = vld [vmem:[#allocation3 + $0xa3] ss:$2 sm:$0xff] }
 0x62e   : > { %v10092_v29 = vadd.f32 %v10091_v60, %v10089_v13  ;;  %10029 = vst.msk [vmem:[#allocation3 + $0xb8] sm:$0xff] %vm538_vm4, %v9993_v0 }
 0x630   : > { %v10095_v10 = vadd.f32 %v10094_v25, %v10092_v29 }
 0x632   : > { %v10137_v62 = vadd.f32 %v15444_v34, %v10095_v10 }
 0x633   : > { %v9940_v48 = vpop.f32.mrf.mxu2 }
 0x634   : > { %10145 = vst.msk [vmem:[%s15453_s7 + $0x20] sm:$0xff] %vm538_vm4, %v10137_v62  ;;  %v9994_v18 = vadd.f32 %v9940_v48, %v9501_v21 }
 0x636   : > { %10030 = vst.msk [vmem:[#allocation3 + $0xc0] sm:$0xff] %vm538_vm4, %v9994_v18 }
 0x63b   : > { %v9942_v32 = vpop.f32.mrf.mxu2 }
 0x63c   : > { %v9995_v28 = vadd.f32 %v9942_v32, %v9502_v38 }
 0x63d   : > { %v10097_v1 = vld [vmem:[#allocation3 + $0xb4] ss:$2 sm:$0xff]  ;;  %v10099_v2 = vld [vmem:[#allocation3 + $0xb5] ss:$2 sm:$0xff] }
 0x63e   : > { %10031 = vst.msk [vmem:[#allocation3 + $0xc8] sm:$0xff] %vm538_vm4, %v9995_v28  ;;  %v10100_v36 = vadd.f32 %v10099_v2, %v10097_v1 }
 0x643   : > { %v9945_v40 = vpop.f32.mrf.mxu2 }
 0x644   : > { %v9996_v58 = vadd.f32 %v9945_v40, %v9503_v52 }
 0x646   : > { %10032 = vst.msk [vmem:[#allocation3 + $0xd0] sm:$0xff] %vm538_vm4, %v9996_v58 }
 0x64b   : > { %v9947_v35 = vpop.f32.mrf.mxu2 }
 0x64c   : > { %v9997_v26 = vadd.f32 %v9947_v35, %v9504_v24 }
 0x64d   : > { %v10102_v17 = vld [vmem:[#allocation3 + $0xc6] ss:$2 sm:$0xff]  ;;  %v10105_v6 = vld [vmem:[#allocation3 + $0xc7] ss:$2 sm:$0xff] }
 0x64e   : > { %v10103_v30 = vadd.f32 %v10102_v17, %v10100_v36  ;;  %10033 = vst.msk [vmem:[#allocation3 + $0xd8] sm:$0xff] %vm538_vm4, %v9997_v26 }
 0x650   : > { %v10106_v46 = vadd.f32 %v10105_v6, %v10103_v30 }
 0x652   : > { %v10138_v27 = vadd.f32 %v15444_v34, %v10106_v46 }
 0x653   : > { %v9950_v5 = vpop.f32.mrf.mxu2 }
 0x654   : > { %10146 = vst.msk [vmem:[%s15453_s7 + $0x28] sm:$0xff] %vm538_vm4, %v10138_v27  ;;  %v9998_v50 = vadd.f32 %v9950_v5, %v9505_v47 }
 0x656   : > { %10034 = vst.msk [vmem:[#allocation3 + $0xe0] sm:$0xff] %vm538_vm4, %v9998_v50 }
 0x65b   : > { %v9952_v45 = vpop.f32.mrf.mxu2 }
 0x65c   : > { %v9999_v54 = vadd.f32 %v9952_v45, %v9506_v9 }
 0x65d   : > { %v10108_v12 = vld [vmem:[#allocation3 + $0xd8] ss:$2 sm:$0xff]  ;;  %v10110_v8 = vld [vmem:[#allocation3 + $0xd9] ss:$2 sm:$0xff] }
 0x65e   : > { %10035 = vst.msk [vmem:[#allocation3 + $0xe8] sm:$0xff] %vm538_vm4, %v9999_v54  ;;  %v10111_v22 = vadd.f32 %v10110_v8, %v10108_v12 }
 0x663   : > { %v9955_v23 = vpop.f32.mrf.mxu2 }
 0x664   : > { %v10000_v63 = vadd.f32 %v9955_v23, %v9507_v55 }
 0x666   : > { %10036 = vst.msk [vmem:[#allocation3 + $0xf0] sm:$0xff] %vm538_vm4, %v10000_v63 }
 0x66b   : > { %v9957_v44 = vpop.f32.mrf.mxu2 }
 0x66c   : > { %v10001_v14 = vadd.f32 %v9957_v44, %v9508_v59 }
 0x66e   : > { %10037 = vst.msk [vmem:[#allocation3 + $0xf8] sm:$0xff] %vm538_vm4, %v10001_v14 }
 0x673   : > { %v9960_v7 = vpop.f32.mrf.mxu2 }
 0x674   : > { %v10002_v19 = vadd.f32 %v9960_v7, %v9509_v61 }
 0x675   : > { %v10113_v53 = vld [vmem:[#allocation3 + $0xea] ss:$2 sm:$0xff]  ;;  %v10116_v41 = vld [vmem:[#allocation3 + $0xeb] ss:$2 sm:$0xff] }
 0x676   : > { %v10114_v31 = vadd.f32 %v10113_v53, %v10111_v22  ;;  %10038 = vst.msk [vmem:[#allocation3 + $0x100] sm:$0xff] %vm538_vm4, %v10002_v19 }
 0x678   : > { %v10117_v42 = vadd.f32 %v10116_v41, %v10114_v31 }
 0x67a   : > { %v10139_v49 = vadd.f32 %v15444_v34, %v10117_v42 }
 0x67b   : > { %v9962_v51 = vpop.f32.mrf.mxu2 }
 0x67c   : > { %10147 = vst.msk [vmem:[%s15453_s7 + $0x30] sm:$0xff] %vm538_vm4, %v10139_v49  ;;  %v10003_v39 = vadd.f32 %v9962_v51, %v9510_v20 }
 0x67e   : > { %10039 = vst.msk [vmem:[#allocation3 + $0x108] sm:$0xff] %vm538_vm4, %v10003_v39 }
 0x683   : > { %v9965_v43 = vpop.f32.mrf.mxu2 }
 0x684   : > { %v10004_v4 = vadd.f32 %v9965_v43, %v9511_v16 }
 0x685   : > { %v10119_v3 = vld [vmem:[#allocation3 + $0xfc] ss:$2 sm:$0xff]  ;;  %v10121_v57 = vld [vmem:[#allocation3 + $0xfd] ss:$2 sm:$0xff] }
 0x686   : > { %10040 = vst.msk [vmem:[#allocation3 + $0x110] sm:$0xff] %vm538_vm4, %v10004_v4  ;;  %v10122_v56 = vadd.f32 %v10121_v57, %v10119_v3 }
 0x68b   : > { %v9967_v37 = vpop.f32.mrf.mxu2 }
 0x68c   : > { %v10005_v33 = vadd.f32 %v9967_v37, %v9512_v11 }
 0x68e   : > { %10041 = vst.msk [vmem:[#allocation3 + $0x118] sm:$0xff] %vm538_vm4, %v10005_v33 }
 0x695   : > { %v10124_v15 = vld [vmem:[#allocation3 + $0x10e] ss:$2 sm:$0xff]  ;;  %v10127_v0 = vld [vmem:[#allocation3 + $0x10f] ss:$2 sm:$0xff] }
 0x696   : > { %v10125_v13 = vadd.f32 %v10124_v15, %v10122_v56 }
 0x698   : > { %v10128_v60 = vadd.f32 %v10127_v0, %v10125_v13 }
 0x69a   : > { %v10140_v29 = vadd.f32 %v15444_v34, %v10128_v60 }
 0x69c   : > { %10148 = vst.msk [vmem:[%s15453_s7 + $0x38] sm:$0xff] %vm538_vm4, %v10140_v29 }
 0x69d PF: > { %s16_s21 = sadd.s32 1, %s12290_s21  }
 0x69e   : > { %p13_p4 = scmp.ge.s32.totalorder %s16_s21, 4  }
 0x6a0   :  { %15 = sbr.rel (!%p13_p4) target bundleno = 1 (0x1), region = 105 }

</bundles_post_ra>
